<compile_context>
chip_gen: v7x
topology: tpu7x:2x2x1
jax: 0.10.0
libtpu: 0.0.40
codegen_flags: <defaults>
</compile_context>

<pallas_src>
import functools

import jax
import jax.numpy as jnp
from jax.experimental import pallas as pl
from jax.experimental.pallas import tpu as pltpu

EPS = 1e-5


def _layer_norm(x, w, b):
    mu = jnp.mean(x, axis=-1, keepdims=True)
    var = jnp.mean(jnp.square(x - mu), axis=-1, keepdims=True)
    return (x - mu) * jax.lax.rsqrt(var + EPS) * w + b


def perceiver_attn_kernel(ctx_ref, lat_ref,
                          lnc_w_ref, lnc_b_ref, lnl_w_ref, lnl_b_ref,
                          wq_t_ref, wkv_t_ref, wo_t_ref,
                          qln_w_ref, qln_b_ref, kln_w_ref, kln_b_ref,
                          out_ref,
                          q_scr, k_scr, v_scr,
                          *, n_heads, head_dim, qk_layer_norms):
    bblk, S, D = ctx_ref.shape
    _, L, _ = lat_ref.shape
    T = S + L
    inner = n_heads * head_dim
    scale = head_dim ** (-0.5)

    # ---- layer norms (f32 VPU/XLU math), whole batch block at once ---------
    ctx = _layer_norm(ctx_ref[...].astype(jnp.float32), lnc_w_ref[0], lnc_b_ref[0])
    lat = _layer_norm(lat_ref[...].astype(jnp.float32), lnl_w_ref[0], lnl_b_ref[0])

    # K/V input = concat([context, latents]) along seq (cheap sublane copy,
    # S and L are multiples of 8).  Matches torch.cat([context, latents], -2).
    kv_in = jnp.concatenate([ctx, lat], axis=1)                      # [Bb,T,D]

    # Fold batch into M and cast MXU operands to bf16 (f32 accumulation).
    lat2_bf = lat.reshape(bblk * L, D).astype(jnp.bfloat16)
    kv_in_bf = kv_in.reshape(bblk * T, D).astype(jnp.bfloat16)

    # ---- two wide projections instead of five small ones -------------------
    q2 = jnp.dot(lat2_bf, wq_t_ref[...],
                 preferred_element_type=jnp.float32)                 # [Bb*L, inner]
    kv2 = jnp.dot(kv_in_bf, wkv_t_ref[...],
                  preferred_element_type=jnp.float32)                # [Bb*T, 2*inner]

    # Stage projection outputs in VMEM scratch so the unrolled head loop does
    # not keep all f32 intermediates live in vregs (spill pressure).  Lane
    # slices at multiples of inner / head_dim are free (128-aligned).
    q_scr[...] = q2
    k_scr[...] = kv2[:, :inner]
    v_scr[...] = kv2[:, inner:].astype(jnp.bfloat16)   # V feeds the MXU directly

    # Read the small qk-LN params once (avoid per-unrolled-head broadcasts).
    qln_w = qln_w_ref[0]
    qln_b = qln_b_ref[0]
    kln_w = kln_w_ref[0]
    kln_b = kln_b_ref[0]

    r_heads = []
    for h in range(n_heads):     # small static unroll, 128-lane-aligned slices
        cols = slice(h * head_dim, (h + 1) * head_dim)
        qh = q_scr[:, cols].reshape(bblk, L, head_dim)               # f32
        kh = k_scr[:, cols].reshape(bblk, T, head_dim)               # f32
        vh = v_scr[:, cols].reshape(bblk, T, head_dim)               # bf16

        if qk_layer_norms:
            qh = _layer_norm(qh, qln_w, qln_b)
            kh = _layer_norm(kh, kln_w, kln_b)

        qh_bf = (qh * scale).astype(jnp.bfloat16)
        kh_bf = kh.astype(jnp.bfloat16)

        # One score matmul over the merged (context ++ latents) key axis.
        s = jnp.einsum('bld,btd->blt', qh_bf, kh_bf,
                       preferred_element_type=jnp.float32)           # [Bb,L,T]

        # Stabilized softmax (f32).
        m = jnp.max(s, axis=-1, keepdims=True)
        p = jnp.exp(s - m)
        denom = jnp.sum(p, axis=-1, keepdims=True)
        inv = pl.reciprocal(denom, approx=True)       # EUP slot (nearly free)
        inv = inv * (2.0 - denom * inv)               # one Newton step -> ~f32

        rh = jnp.einsum('blt,btd->bld', p.astype(jnp.bfloat16), vh,
                        preferred_element_type=jnp.float32) * inv    # [Bb,L,hd]
        r_heads.append(rh.reshape(bblk * L, head_dim).astype(jnp.bfloat16))

    # Single output projection with K = inner (fills the MXU contraction depth
    # instead of n_heads K=128 accumulating dots).
    r_all = jnp.concatenate(r_heads, axis=-1)                        # [Bb*L, inner]
    out = jnp.dot(r_all, wo_t_ref[...], preferred_element_type=jnp.float32)
    out_ref[...] = out.reshape(bblk, L, D)        # last dim = D -> lane-dense


def _default_batch_block(batch):
    """grid=1 on single-TC chips (v5e/v6e); even grid on multi-TC parts (v7x)."""
    try:
        kind = jax.devices()[0].device_kind.lower()
    except Exception:
        kind = ""
    multi_tc = "v7" in kind
    if multi_tc and batch >= 2 and batch % 2 == 0:
        return batch // 2
    return batch


def idefics_perceiver_attention(context, latents, params, *,
                                n_heads, head_dim, qk_layer_norms=True,
                                batch_block=None):
    B, S, D = context.shape
    _, L, _ = latents.shape
    inner = n_heads * head_dim

    # Alignment requirements of this kernel (lane/sublane tiling).
    assert D % 128 == 0, "embed_dim must be a multiple of 128"
    assert head_dim % 128 == 0, "head_dim must be a multiple of 128"
    assert S % 8 == 0 and L % 8 == 0, "seq lengths must be multiples of 8"
    # TODO(synk): pad/mask support for non-(8,128)-aligned production shapes.

    if batch_block is None:
        batch_block = _default_batch_block(B)
    assert B % batch_block == 0, "batch must be divisible by batch_block"

    f32, bf16 = jnp.float32, jnp.bfloat16

    # One-time host-side weight prep (PyTorch Linear: y = x @ W.T):
    # transpose once, fuse K/V into one [D, 2*inner] matrix, cast MXU operands
    # to bf16 (halves weight DMA bytes and feeds the bf16 MXU rate).
    wq_t = params["wq"].T.astype(bf16)                                 # [D, inner]
    wkv_t = jnp.concatenate([params["wk"].T, params["wv"].T],
                            axis=1).astype(bf16)                       # [D, 2*inner]
    wo_t = params["wo"].T.astype(bf16)                                 # [inner, D]

    weight_args = (
        params["lnc_w"].astype(f32), params["lnc_b"].astype(f32),
        params["lnl_w"].astype(f32), params["lnl_b"].astype(f32),
        wq_t, wkv_t, wo_t,
        params["qln_w"].astype(f32), params["qln_b"].astype(f32),
        params["kln_w"].astype(f32), params["kln_b"].astype(f32),
    )

    kernel = functools.partial(perceiver_attn_kernel,
                               n_heads=n_heads, head_dim=head_dim,
                               qk_layer_norms=qk_layer_norms)

    in_specs = (
        [pl.BlockSpec((batch_block, S, D), lambda b: (b, 0, 0)),
         pl.BlockSpec((batch_block, L, D), lambda b: (b, 0, 0))]
        + [pl.BlockSpec(w.shape, lambda b: (0, 0)) for w in weight_args]
    )

    out = pl.pallas_call(
        kernel,
        out_shape=jax.ShapeDtypeStruct((B, L, D), jnp.float32),
        grid_spec=pltpu.PrefetchScalarGridSpec(
            num_scalar_prefetch=0,
            grid=(B // batch_block,),
            in_specs=in_specs,
            out_specs=pl.BlockSpec((batch_block, L, D), lambda b: (b, 0, 0)),
            scratch_shapes=[
                pltpu.VMEM((batch_block * L, inner), jnp.float32),         # q
                pltpu.VMEM((batch_block * (S + L), inner), jnp.float32),   # k
                pltpu.VMEM((batch_block * (S + L), inner), jnp.bfloat16),  # v
            ],
        ),
        compiler_params=pltpu.CompilerParams(
            dimension_semantics=("parallel",)),
    )(context, latents, *weight_args)
    return out


def reference_jax(context, latents, params, *, n_heads, head_dim,
                  qk_layer_norms=True):
    """Pure-JAX (f32) mirror of the PyTorch forward, for correctness checking."""
    def ln(x, w, b):
        mu = jnp.mean(x, axis=-1, keepdims=True)
        var = jnp.mean(jnp.square(x - mu), axis=-1, keepdims=True)
        return (x - mu) / jnp.sqrt(var + EPS) * w + b

    ctx = ln(context, params["lnc_w"][0], params["lnc_b"][0])
    lat = ln(latents, params["lnl_w"][0], params["lnl_b"][0])
    B, S, D = ctx.shape
    L = lat.shape[1]

    q = lat @ params["wq"].T
    kv_in = jnp.concatenate([ctx, lat], axis=1)
    k = kv_in @ params["wk"].T
    v = kv_in @ params["wv"].T

    def split_heads(x):
        return x.reshape(B, x.shape[1], n_heads, head_dim).transpose(0, 2, 1, 3)

    q, k, v = map(split_heads, (q, k, v))
    if qk_layer_norms:
        q = ln(q, params["qln_w"][0], params["qln_b"][0])
        k = ln(k, params["kln_w"][0], params["kln_b"][0])

    scale = head_dim ** (-0.5)
    scores = jnp.einsum("bhid,bhjd->bhij", q * scale, k)
    scores = scores - jnp.max(scores, axis=-1, keepdims=True)
    attn = jax.nn.softmax(scores, axis=-1)
    res = jnp.einsum("bhij,bhjd->bhid", attn, v)
    res = res.transpose(0, 2, 1, 3).reshape(B, L, n_heads * head_dim)
    return res @ params["wo"].T


if __name__ == "__main__":
    # Small shapes consistent with the module (lane-aligned for the demo).
    B, S, L = 8, 32, 16
    n_heads, head_dim = 2, 128
    D = 128                        # embed_dim
    inner = n_heads * head_dim     # 256

    key = jax.random.PRNGKey(0)
    keys = jax.random.split(key, 12)

    context = jax.random.normal(keys[0], (B, S, D), dtype=jnp.float32)
    latents = jax.random.normal(keys[1], (B, L, D), dtype=jnp.float32)

    params = {
        "lnc_w": 1.0 + 0.02 * jax.random.normal(keys[2], (1, D), jnp.float32),
        "lnc_b": 0.02 * jax.random.normal(keys[3], (1, D), jnp.float32),
        "lnl_w": 1.0 + 0.02 * jax.random.normal(keys[4], (1, D), jnp.float32),
        "lnl_b": 0.02 * jax.random.normal(keys[5], (1, D), jnp.float32),
        "wq": 0.05 * jax.random.normal(keys[6], (inner, D), jnp.float32),
        "wk": 0.05 * jax.random.normal(keys[7], (inner, D), jnp.float32),
        "wv": 0.05 * jax.random.normal(keys[8], (inner, D), jnp.float32),
        "wo": 0.05 * jax.random.normal(keys[9], (D, inner), jnp.float32),
        "qln_w": 1.0 + 0.02 * jax.random.normal(keys[10], (1, head_dim), jnp.float32),
        "qln_b": jnp.zeros((1, head_dim), jnp.float32),
        "kln_w": 1.0 + 0.02 * jax.random.normal(keys[11], (1, head_dim), jnp.float32),
        "kln_b": jnp.zeros((1, head_dim), jnp.float32),
    }

    ref = reference_jax(context, latents, params,
                        n_heads=n_heads, head_dim=head_dim, qk_layer_norms=True)

    # Default blocking: grid=1 on single-TC chips, even grid on v7x.
    out = idefics_perceiver_attention(context, latents, params,
                                      n_heads=n_heads, head_dim=head_dim,
                                      qk_layer_norms=True)
    out = jax.block_until_ready(out)
    assert out.shape == (B, L, D)
    max_err = float(jnp.max(jnp.abs(out - ref)))
    # bf16 MXU operands -> bf16-level tolerance against the f32 reference.
    assert jnp.allclose(out, ref, atol=2e-2, rtol=2e-2), max_err

    # Also exercise a multi-step grid (what a 2-TensorCore part would use).
    out2 = idefics_perceiver_attention(context, latents, params,
                                       n_heads=n_heads, head_dim=head_dim,
                                       qk_layer_norms=True, batch_block=B // 2)
    out2 = jax.block_until_ready(out2)
    max_err2 = float(jnp.max(jnp.abs(out2 - ref)))
    assert jnp.allclose(out2, ref, atol=2e-2, rtol=2e-2), max_err2

    print("KERNEL_OK")
</pallas_src>

<mosaic_0001>
module attributes {stable_mosaic.version = 11 : i64} {
  func.func @perceiver_attn_kernel(%arg0: i32, %arg1: memref<8x32x128xf32, #tpu.memory_space<vmem>>, %arg2: memref<8x16x128xf32, #tpu.memory_space<vmem>>, %arg3: memref<1x128xf32, #tpu.memory_space<vmem>>, %arg4: memref<1x128xf32, #tpu.memory_space<vmem>>, %arg5: memref<1x128xf32, #tpu.memory_space<vmem>>, %arg6: memref<1x128xf32, #tpu.memory_space<vmem>>, %arg7: memref<128x256xbf16, #tpu.memory_space<vmem>>, %arg8: memref<128x512xbf16, #tpu.memory_space<vmem>>, %arg9: memref<256x128xbf16, #tpu.memory_space<vmem>>, %arg10: memref<1x128xf32, #tpu.memory_space<vmem>>, %arg11: memref<1x128xf32, #tpu.memory_space<vmem>>, %arg12: memref<1x128xf32, #tpu.memory_space<vmem>>, %arg13: memref<1x128xf32, #tpu.memory_space<vmem>>, %arg14: memref<8x16x128xf32, #tpu.memory_space<vmem>>, %arg15: memref<128x256xf32, #tpu.memory_space<vmem>>, %arg16: memref<384x256xf32, #tpu.memory_space<vmem>>, %arg17: memref<384x256xbf16, #tpu.memory_space<vmem>>) attributes {dimension_semantics = [#tpu.dimension_semantics<parallel>], iteration_bounds = array<i64: 1>, scalar_prefetch = 0 : i64, scratch_operands = 3 : i64, tpu.core_type = #tpu.core_type<tc>, window_params = [{transform_indices = @transform_0, window_bounds = array<i64: 8, 32, 128>}, {transform_indices = @transform_1, window_bounds = array<i64: 8, 16, 128>}, {pipeline_mode = #tpu.pipeline_mode<synchronous>, transform_indices = @transform_2, window_bounds = array<i64: 1, 128>}, {pipeline_mode = #tpu.pipeline_mode<synchronous>, transform_indices = @transform_3, window_bounds = array<i64: 1, 128>}, {pipeline_mode = #tpu.pipeline_mode<synchronous>, transform_indices = @transform_4, window_bounds = array<i64: 1, 128>}, {pipeline_mode = #tpu.pipeline_mode<synchronous>, transform_indices = @transform_5, window_bounds = array<i64: 1, 128>}, {pipeline_mode = #tpu.pipeline_mode<synchronous>, transform_indices = @transform_6, window_bounds = array<i64: 128, 256>}, {pipeline_mode = #tpu.pipeline_mode<synchronous>, transform_indices = @transform_7, window_bounds = array<i64: 128, 512>}, {pipeline_mode = #tpu.pipeline_mode<synchronous>, transform_indices = @transform_8, window_bounds = array<i64: 256, 128>}, {pipeline_mode = #tpu.pipeline_mode<synchronous>, transform_indices = @transform_9, window_bounds = array<i64: 1, 128>}, {pipeline_mode = #tpu.pipeline_mode<synchronous>, transform_indices = @transform_10, window_bounds = array<i64: 1, 128>}, {pipeline_mode = #tpu.pipeline_mode<synchronous>, transform_indices = @transform_11, window_bounds = array<i64: 1, 128>}, {pipeline_mode = #tpu.pipeline_mode<synchronous>, transform_indices = @transform_12, window_bounds = array<i64: 1, 128>}, {transform_indices = @transform_13, window_bounds = array<i64: 8, 16, 128>}]} {
    %c0 = arith.constant 0 : index
    %c0_0 = arith.constant 0 : index
    %c0_1 = arith.constant 0 : index
    %0 = vector.load %arg1[%c0, %c0_0, %c0_1] : memref<8x32x128xf32, #tpu.memory_space<vmem>>, vector<8x32x128xf32>
    %c0_2 = arith.constant 0 : index
    %c0_3 = arith.constant 0 : index
    %1 = vector.load %arg3[%c0_2, %c0_3] : memref<1x128xf32, #tpu.memory_space<vmem>>, vector<1x128xf32>
    %2 = vector.shape_cast %1 : vector<1x128xf32> to vector<128xf32>
    %c0_4 = arith.constant 0 : index
    %c0_5 = arith.constant 0 : index
    %3 = vector.load %arg4[%c0_4, %c0_5] : memref<1x128xf32, #tpu.memory_space<vmem>>, vector<1x128xf32>
    %4 = vector.shape_cast %3 : vector<1x128xf32> to vector<128xf32>
    %cst = arith.constant dense<0.000000e+00> : vector<8x32xf32>
    %5 = vector.multi_reduction <add>, %0, %cst [2] : vector<8x32x128xf32> to vector<8x32xf32>
    %6 = vector.shape_cast %5 : vector<8x32xf32> to vector<8x32x1xf32>
    %cst_6 = arith.constant 1.280000e+02 : f32
    %7 = vector.broadcast %cst_6 : f32 to vector<8x32x1xf32>
    %8 = arith.divf %6, %7 : vector<8x32x1xf32>
    %9 = vector.broadcast %8 : vector<8x32x1xf32> to vector<8x32x128xf32>
    %10 = arith.subf %0, %9 : vector<8x32x128xf32>
    %11 = arith.mulf %10, %10 : vector<8x32x128xf32>
    %cst_7 = arith.constant dense<0.000000e+00> : vector<8x32xf32>
    %12 = vector.multi_reduction <add>, %11, %cst_7 [2] : vector<8x32x128xf32> to vector<8x32xf32>
    %13 = vector.shape_cast %12 : vector<8x32xf32> to vector<8x32x1xf32>
    %cst_8 = arith.constant 1.280000e+02 : f32
    %14 = vector.broadcast %cst_8 : f32 to vector<8x32x1xf32>
    %15 = arith.divf %13, %14 : vector<8x32x1xf32>
    %16 = vector.broadcast %8 : vector<8x32x1xf32> to vector<8x32x128xf32>
    %17 = arith.subf %0, %16 : vector<8x32x128xf32>
    %cst_9 = arith.constant 9.99999974E-6 : f32
    %18 = vector.broadcast %cst_9 : f32 to vector<8x32x1xf32>
    %19 = arith.addf %15, %18 : vector<8x32x1xf32>
    %20 = math.rsqrt %19 : vector<8x32x1xf32>
    %21 = vector.broadcast %20 : vector<8x32x1xf32> to vector<8x32x128xf32>
    %22 = arith.mulf %17, %21 : vector<8x32x128xf32>
    %23 = vector.shape_cast %2 : vector<128xf32> to vector<1x1x128xf32>
    %24 = vector.broadcast %23 : vector<1x1x128xf32> to vector<8x32x128xf32>
    %25 = arith.mulf %22, %24 : vector<8x32x128xf32>
    %26 = vector.shape_cast %4 : vector<128xf32> to vector<1x1x128xf32>
    %27 = vector.broadcast %26 : vector<1x1x128xf32> to vector<8x32x128xf32>
    %28 = arith.addf %25, %27 : vector<8x32x128xf32>
    %c0_10 = arith.constant 0 : index
    %c0_11 = arith.constant 0 : index
    %c0_12 = arith.constant 0 : index
    %29 = vector.load %arg2[%c0_10, %c0_11, %c0_12] : memref<8x16x128xf32, #tpu.memory_space<vmem>>, vector<8x16x128xf32>
    %c0_13 = arith.constant 0 : index
    %c0_14 = arith.constant 0 : index
    %30 = vector.load %arg5[%c0_13, %c0_14] : memref<1x128xf32, #tpu.memory_space<vmem>>, vector<1x128xf32>
    %31 = vector.shape_cast %30 : vector<1x128xf32> to vector<128xf32>
    %c0_15 = arith.constant 0 : index
    %c0_16 = arith.constant 0 : index
    %32 = vector.load %arg6[%c0_15, %c0_16] : memref<1x128xf32, #tpu.memory_space<vmem>>, vector<1x128xf32>
    %33 = vector.shape_cast %32 : vector<1x128xf32> to vector<128xf32>
    %cst_17 = arith.constant dense<0.000000e+00> : vector<8x16xf32>
    %34 = vector.multi_reduction <add>, %29, %cst_17 [2] : vector<8x16x128xf32> to vector<8x16xf32>
    %35 = vector.shape_cast %34 : vector<8x16xf32> to vector<8x16x1xf32>
    %cst_18 = arith.constant 1.280000e+02 : f32
    %36 = vector.broadcast %cst_18 : f32 to vector<8x16x1xf32>
    %37 = arith.divf %35, %36 : vector<8x16x1xf32>
    %38 = vector.broadcast %37 : vector<8x16x1xf32> to vector<8x16x128xf32>
    %39 = arith.subf %29, %38 : vector<8x16x128xf32>
    %40 = arith.mulf %39, %39 : vector<8x16x128xf32>
    %cst_19 = arith.constant dense<0.000000e+00> : vector<8x16xf32>
    %41 = vector.multi_reduction <add>, %40, %cst_19 [2] : vector<8x16x128xf32> to vector<8x16xf32>
    %42 = vector.shape_cast %41 : vector<8x16xf32> to vector<8x16x1xf32>
    %cst_20 = arith.constant 1.280000e+02 : f32
    %43 = vector.broadcast %cst_20 : f32 to vector<8x16x1xf32>
    %44 = arith.divf %42, %43 : vector<8x16x1xf32>
    %45 = vector.broadcast %37 : vector<8x16x1xf32> to vector<8x16x128xf32>
    %46 = arith.subf %29, %45 : vector<8x16x128xf32>
    %cst_21 = arith.constant 9.99999974E-6 : f32
    %47 = vector.broadcast %cst_21 : f32 to vector<8x16x1xf32>
    %48 = arith.addf %44, %47 : vector<8x16x1xf32>
    %49 = math.rsqrt %48 : vector<8x16x1xf32>
    %50 = vector.broadcast %49 : vector<8x16x1xf32> to vector<8x16x128xf32>
    %51 = arith.mulf %46, %50 : vector<8x16x128xf32>
    %52 = vector.shape_cast %31 : vector<128xf32> to vector<1x1x128xf32>
    %53 = vector.broadcast %52 : vector<1x1x128xf32> to vector<8x16x128xf32>
    %54 = arith.mulf %51, %53 : vector<8x16x128xf32>
    %55 = vector.shape_cast %33 : vector<128xf32> to vector<1x1x128xf32>
    %56 = vector.broadcast %55 : vector<1x1x128xf32> to vector<8x16x128xf32>
    %57 = arith.addf %54, %56 : vector<8x16x128xf32>
    %58 = tpu.concatenate %28, %57 in 1 : vector<8x32x128xf32>, vector<8x16x128xf32> -> vector<8x48x128xf32>
    %59 = vector.shape_cast %57 : vector<8x16x128xf32> to vector<128x128xf32>
    %60 = arith.truncf %59 : vector<128x128xf32> to vector<128x128xbf16>
    %61 = vector.shape_cast %58 : vector<8x48x128xf32> to vector<384x128xf32>
    %62 = arith.truncf %61 : vector<384x128xf32> to vector<384x128xbf16>
    %c0_22 = arith.constant 0 : index
    %c0_23 = arith.constant 0 : index
    %63 = vector.load %arg7[%c0_22, %c0_23] : memref<128x256xbf16, #tpu.memory_space<vmem>>, vector<128x256xbf16>
    %cst_24 = arith.constant dense<0.000000e+00> : vector<128x256xf32>
    %64 = tpu.matmul %60, %63, %cst_24 {dimension_numbers = #tpu.dot_dimension_numbers<[1], [0], [0], [1], [0, 0, 1, 1], [], []>} : vector<128x128xbf16>, vector<128x256xbf16>, vector<128x256xf32> -> vector<128x256xf32>
    %c0_25 = arith.constant 0 : index
    %c0_26 = arith.constant 0 : index
    %65 = vector.load %arg8[%c0_25, %c0_26] : memref<128x512xbf16, #tpu.memory_space<vmem>>, vector<128x512xbf16>
    %cst_27 = arith.constant dense<0.000000e+00> : vector<384x512xf32>
    %66 = tpu.matmul %62, %65, %cst_27 {dimension_numbers = #tpu.dot_dimension_numbers<[1], [0], [0], [1], [0, 0, 1, 1], [], []>} : vector<384x128xbf16>, vector<128x512xbf16>, vector<384x512xf32> -> vector<384x512xf32>
    %c0_28 = arith.constant 0 : index
    %c0_29 = arith.constant 0 : index
    %67 = vector.load %arg15[%c0_28, %c0_29] : memref<128x256xf32, #tpu.memory_space<vmem>>, vector<128x256xf32>
    tpu.vector_store %arg15[%c0_28, %c0_29], %64 {strides = array<i32>} : memref<128x256xf32, #tpu.memory_space<vmem>>, vector<128x256xf32>,
    %68 = vector.extract_strided_slice %66 {offsets = [0, 0], sizes = [384, 256], strides = [1, 1]} : vector<384x512xf32> to vector<384x256xf32>
    %c0_30 = arith.constant 0 : index
    %c0_31 = arith.constant 0 : index
    %69 = vector.load %arg16[%c0_30, %c0_31] : memref<384x256xf32, #tpu.memory_space<vmem>>, vector<384x256xf32>
    tpu.vector_store %arg16[%c0_30, %c0_31], %68 {strides = array<i32>} : memref<384x256xf32, #tpu.memory_space<vmem>>, vector<384x256xf32>,
    %70 = vector.extract_strided_slice %66 {offsets = [0, 256], sizes = [384, 256], strides = [1, 1]} : vector<384x512xf32> to vector<384x256xf32>
    %71 = arith.truncf %70 : vector<384x256xf32> to vector<384x256xbf16>
    %c0_32 = arith.constant 0 : index
    %c0_33 = arith.constant 0 : index
    %72 = vector.load %arg17[%c0_32, %c0_33] : memref<384x256xbf16, #tpu.memory_space<vmem>>, vector<384x256xbf16>
    tpu.vector_store %arg17[%c0_32, %c0_33], %71 {strides = array<i32>} : memref<384x256xbf16, #tpu.memory_space<vmem>>, vector<384x256xbf16>,
    %c0_34 = arith.constant 0 : index
    %c0_35 = arith.constant 0 : index
    %73 = vector.load %arg10[%c0_34, %c0_35] : memref<1x128xf32, #tpu.memory_space<vmem>>, vector<1x128xf32>
    %74 = vector.shape_cast %73 : vector<1x128xf32> to vector<128xf32>
    %c0_36 = arith.constant 0 : index
    %c0_37 = arith.constant 0 : index
    %75 = vector.load %arg11[%c0_36, %c0_37] : memref<1x128xf32, #tpu.memory_space<vmem>>, vector<1x128xf32>
    %76 = vector.shape_cast %75 : vector<1x128xf32> to vector<128xf32>
    %c0_38 = arith.constant 0 : index
    %c0_39 = arith.constant 0 : index
    %77 = vector.load %arg12[%c0_38, %c0_39] : memref<1x128xf32, #tpu.memory_space<vmem>>, vector<1x128xf32>
    %78 = vector.shape_cast %77 : vector<1x128xf32> to vector<128xf32>
    %c0_40 = arith.constant 0 : index
    %c0_41 = arith.constant 0 : index
    %79 = vector.load %arg13[%c0_40, %c0_41] : memref<1x128xf32, #tpu.memory_space<vmem>>, vector<1x128xf32>
    %80 = vector.shape_cast %79 : vector<1x128xf32> to vector<128xf32>
    %c0_42 = arith.constant 0 : index
    %c0_43 = arith.constant 0 : index
    %81 = vector.load %arg15[%c0_42, %c0_43] : memref<128x256xf32, #tpu.memory_space<vmem>>, vector<128x128xf32>
    %82 = vector.shape_cast %81 : vector<128x128xf32> to vector<8x16x128xf32>
    %c0_44 = arith.constant 0 : index
    %c0_45 = arith.constant 0 : index
    %83 = vector.load %arg16[%c0_44, %c0_45] : memref<384x256xf32, #tpu.memory_space<vmem>>, vector<384x128xf32>
    %84 = vector.shape_cast %83 : vector<384x128xf32> to vector<8x48x128xf32>
    %c0_46 = arith.constant 0 : index
    %c0_47 = arith.constant 0 : index
    %85 = vector.load %arg17[%c0_46, %c0_47] : memref<384x256xbf16, #tpu.memory_space<vmem>>, vector<384x128xbf16>
    %86 = vector.shape_cast %85 : vector<384x128xbf16> to vector<8x48x128xbf16>
    %cst_48 = arith.constant dense<0.000000e+00> : vector<8x16xf32>
    %87 = vector.multi_reduction <add>, %82, %cst_48 [2] : vector<8x16x128xf32> to vector<8x16xf32>
    %88 = vector.shape_cast %87 : vector<8x16xf32> to vector<8x16x1xf32>
    %cst_49 = arith.constant 1.280000e+02 : f32
    %89 = vector.broadcast %cst_49 : f32 to vector<8x16x1xf32>
    %90 = arith.divf %88, %89 : vector<8x16x1xf32>
    %91 = vector.broadcast %90 : vector<8x16x1xf32> to vector<8x16x128xf32>
    %92 = arith.subf %82, %91 : vector<8x16x128xf32>
    %93 = arith.mulf %92, %92 : vector<8x16x128xf32>
    %cst_50 = arith.constant dense<0.000000e+00> : vector<8x16xf32>
    %94 = vector.multi_reduction <add>, %93, %cst_50 [2] : vector<8x16x128xf32> to vector<8x16xf32>
    %95 = vector.shape_cast %94 : vector<8x16xf32> to vector<8x16x1xf32>
    %cst_51 = arith.constant 1.280000e+02 : f32
    %96 = vector.broadcast %cst_51 : f32 to vector<8x16x1xf32>
    %97 = arith.divf %95, %96 : vector<8x16x1xf32>
    %98 = vector.broadcast %90 : vector<8x16x1xf32> to vector<8x16x128xf32>
    %99 = arith.subf %82, %98 : vector<8x16x128xf32>
    %cst_52 = arith.constant 9.99999974E-6 : f32
    %100 = vector.broadcast %cst_52 : f32 to vector<8x16x1xf32>
    %101 = arith.addf %97, %100 : vector<8x16x1xf32>
    %102 = math.rsqrt %101 : vector<8x16x1xf32>
    %103 = vector.broadcast %102 : vector<8x16x1xf32> to vector<8x16x128xf32>
    %104 = arith.mulf %99, %103 : vector<8x16x128xf32>
    %105 = vector.shape_cast %74 : vector<128xf32> to vector<1x1x128xf32>
    %106 = vector.broadcast %105 : vector<1x1x128xf32> to vector<8x16x128xf32>
    %107 = arith.mulf %104, %106 : vector<8x16x128xf32>
    %108 = vector.shape_cast %76 : vector<128xf32> to vector<1x1x128xf32>
    %109 = vector.broadcast %108 : vector<1x1x128xf32> to vector<8x16x128xf32>
    %110 = arith.addf %107, %109 : vector<8x16x128xf32>
    %cst_53 = arith.constant dense<0.000000e+00> : vector<8x48xf32>
    %111 = vector.multi_reduction <add>, %84, %cst_53 [2] : vector<8x48x128xf32> to vector<8x48xf32>
    %112 = vector.shape_cast %111 : vector<8x48xf32> to vector<8x48x1xf32>
    %cst_54 = arith.constant 1.280000e+02 : f32
    %113 = vector.broadcast %cst_54 : f32 to vector<8x48x1xf32>
    %114 = arith.divf %112, %113 : vector<8x48x1xf32>
    %115 = vector.broadcast %114 : vector<8x48x1xf32> to vector<8x48x128xf32>
    %116 = arith.subf %84, %115 : vector<8x48x128xf32>
    %117 = arith.mulf %116, %116 : vector<8x48x128xf32>
    %cst_55 = arith.constant dense<0.000000e+00> : vector<8x48xf32>
    %118 = vector.multi_reduction <add>, %117, %cst_55 [2] : vector<8x48x128xf32> to vector<8x48xf32>
    %119 = vector.shape_cast %118 : vector<8x48xf32> to vector<8x48x1xf32>
    %cst_56 = arith.constant 1.280000e+02 : f32
    %120 = vector.broadcast %cst_56 : f32 to vector<8x48x1xf32>
    %121 = arith.divf %119, %120 : vector<8x48x1xf32>
    %122 = vector.broadcast %114 : vector<8x48x1xf32> to vector<8x48x128xf32>
    %123 = arith.subf %84, %122 : vector<8x48x128xf32>
    %cst_57 = arith.constant 9.99999974E-6 : f32
    %124 = vector.broadcast %cst_57 : f32 to vector<8x48x1xf32>
    %125 = arith.addf %121, %124 : vector<8x48x1xf32>
    %126 = math.rsqrt %125 : vector<8x48x1xf32>
    %127 = vector.broadcast %126 : vector<8x48x1xf32> to vector<8x48x128xf32>
    %128 = arith.mulf %123, %127 : vector<8x48x128xf32>
    %129 = vector.shape_cast %78 : vector<128xf32> to vector<1x1x128xf32>
    %130 = vector.broadcast %129 : vector<1x1x128xf32> to vector<8x48x128xf32>
    %131 = arith.mulf %128, %130 : vector<8x48x128xf32>
    %132 = vector.shape_cast %80 : vector<128xf32> to vector<1x1x128xf32>
    %133 = vector.broadcast %132 : vector<1x1x128xf32> to vector<8x48x128xf32>
    %134 = arith.addf %131, %133 : vector<8x48x128xf32>
    %cst_58 = arith.constant 0.0883883461 : f32
    %135 = vector.broadcast %cst_58 : f32 to vector<8x16x128xf32>
    %136 = arith.mulf %110, %135 : vector<8x16x128xf32>
    %137 = arith.truncf %136 : vector<8x16x128xf32> to vector<8x16x128xbf16>
    %138 = arith.truncf %134 : vector<8x48x128xf32> to vector<8x48x128xbf16>
    "tpu.trace_start"() <{level = 10 : i32, message = "bld,btd->blt"}> : () -> ()
    %cst_59 = arith.constant dense<0.000000e+00> : vector<8x16x48xf32>
    %139 = tpu.matmul %137, %138, %cst_59 {dimension_numbers = #tpu.dot_dimension_numbers<[2], [2], [1], [1], [0, 0, 0, 1, 1, 1], [0], [0]>} : vector<8x16x128xbf16>, vector<8x48x128xbf16>, vector<8x16x48xf32> -> vector<8x16x48xf32>
    "tpu.trace_stop"() : () -> ()
    %cst_60 = arith.constant dense<0xFF800000> : vector<8x16xf32>
    %140 = vector.multi_reduction <maximumf>, %139, %cst_60 [2] : vector<8x16x48xf32> to vector<8x16xf32>
    %141 = vector.shape_cast %140 : vector<8x16xf32> to vector<8x16x1xf32>
    %142 = vector.broadcast %141 : vector<8x16x1xf32> to vector<8x16x48xf32>
    %143 = arith.subf %139, %142 : vector<8x16x48xf32>
    %144 = math.exp %143 : vector<8x16x48xf32>
    %cst_61 = arith.constant dense<0.000000e+00> : vector<8x16xf32>
    %145 = vector.multi_reduction <add>, %144, %cst_61 [2] : vector<8x16x48xf32> to vector<8x16xf32>
    %146 = vector.shape_cast %145 : vector<8x16xf32> to vector<8x16x1xf32>
    %147 = tpu.reciprocal %146 {approx = true} : vector<8x16x1xf32> -> vector<8x16x1xf32>
    %148 = arith.mulf %146, %147 : vector<8x16x1xf32>
    %cst_62 = arith.constant 2.000000e+00 : f32
    %149 = vector.broadcast %cst_62 : f32 to vector<8x16x1xf32>
    %150 = arith.subf %149, %148 : vector<8x16x1xf32>
    %151 = arith.mulf %147, %150 : vector<8x16x1xf32>
    %152 = arith.truncf %144 : vector<8x16x48xf32> to vector<8x16x48xbf16>
    "tpu.trace_start"() <{level = 10 : i32, message = "blt,btd->bld"}> : () -> ()
    %cst_63 = arith.constant dense<0.000000e+00> : vector<8x16x128xf32>
    %153 = tpu.matmul %152, %86, %cst_63 {dimension_numbers = #tpu.dot_dimension_numbers<[2], [1], [1], [2], [0, 0, 0, 1, 1, 2], [0], [0]>} : vector<8x16x48xbf16>, vector<8x48x128xbf16>, vector<8x16x128xf32> -> vector<8x16x128xf32>
    "tpu.trace_stop"() : () -> ()
    %154 = vector.broadcast %151 : vector<8x16x1xf32> to vector<8x16x128xf32>
    %155 = arith.mulf %153, %154 : vector<8x16x128xf32>
    %156 = vector.shape_cast %155 : vector<8x16x128xf32> to vector<128x128xf32>
    %157 = arith.truncf %156 : vector<128x128xf32> to vector<128x128xbf16>
    %c0_64 = arith.constant 0 : index
    %c128 = arith.constant 128 : index
    %158 = vector.load %arg15[%c0_64, %c128] : memref<128x256xf32, #tpu.memory_space<vmem>>, vector<128x128xf32>
    %159 = vector.shape_cast %158 : vector<128x128xf32> to vector<8x16x128xf32>
    %c0_65 = arith.constant 0 : index
    %c128_66 = arith.constant 128 : index
    %160 = vector.load %arg16[%c0_65, %c128_66] : memref<384x256xf32, #tpu.memory_space<vmem>>, vector<384x128xf32>
    %161 = vector.shape_cast %160 : vector<384x128xf32> to vector<8x48x128xf32>
    %c0_67 = arith.constant 0 : index
    %c128_68 = arith.constant 128 : index
    %162 = vector.load %arg17[%c0_67, %c128_68] : memref<384x256xbf16, #tpu.memory_space<vmem>>, vector<384x128xbf16>
    %163 = vector.shape_cast %162 : vector<384x128xbf16> to vector<8x48x128xbf16>
    %cst_69 = arith.constant dense<0.000000e+00> : vector<8x16xf32>
    %164 = vector.multi_reduction <add>, %159, %cst_69 [2] : vector<8x16x128xf32> to vector<8x16xf32>
    %165 = vector.shape_cast %164 : vector<8x16xf32> to vector<8x16x1xf32>
    %cst_70 = arith.constant 1.280000e+02 : f32
    %166 = vector.broadcast %cst_70 : f32 to vector<8x16x1xf32>
    %167 = arith.divf %165, %166 : vector<8x16x1xf32>
    %168 = vector.broadcast %167 : vector<8x16x1xf32> to vector<8x16x128xf32>
    %169 = arith.subf %159, %168 : vector<8x16x128xf32>
    %170 = arith.mulf %169, %169 : vector<8x16x128xf32>
    %cst_71 = arith.constant dense<0.000000e+00> : vector<8x16xf32>
    %171 = vector.multi_reduction <add>, %170, %cst_71 [2] : vector<8x16x128xf32> to vector<8x16xf32>
    %172 = vector.shape_cast %171 : vector<8x16xf32> to vector<8x16x1xf32>
    %cst_72 = arith.constant 1.280000e+02 : f32
    %173 = vector.broadcast %cst_72 : f32 to vector<8x16x1xf32>
    %174 = arith.divf %172, %173 : vector<8x16x1xf32>
    %175 = vector.broadcast %167 : vector<8x16x1xf32> to vector<8x16x128xf32>
    %176 = arith.subf %159, %175 : vector<8x16x128xf32>
    %cst_73 = arith.constant 9.99999974E-6 : f32
    %177 = vector.broadcast %cst_73 : f32 to vector<8x16x1xf32>
    %178 = arith.addf %174, %177 : vector<8x16x1xf32>
    %179 = math.rsqrt %178 : vector<8x16x1xf32>
    %180 = vector.broadcast %179 : vector<8x16x1xf32> to vector<8x16x128xf32>
    %181 = arith.mulf %176, %180 : vector<8x16x128xf32>
    %182 = vector.shape_cast %74 : vector<128xf32> to vector<1x1x128xf32>
    %183 = vector.broadcast %182 : vector<1x1x128xf32> to vector<8x16x128xf32>
    %184 = arith.mulf %181, %183 : vector<8x16x128xf32>
    %185 = vector.shape_cast %76 : vector<128xf32> to vector<1x1x128xf32>
    %186 = vector.broadcast %185 : vector<1x1x128xf32> to vector<8x16x128xf32>
    %187 = arith.addf %184, %186 : vector<8x16x128xf32>
    %cst_74 = arith.constant dense<0.000000e+00> : vector<8x48xf32>
    %188 = vector.multi_reduction <add>, %161, %cst_74 [2] : vector<8x48x128xf32> to vector<8x48xf32>
    %189 = vector.shape_cast %188 : vector<8x48xf32> to vector<8x48x1xf32>
    %cst_75 = arith.constant 1.280000e+02 : f32
    %190 = vector.broadcast %cst_75 : f32 to vector<8x48x1xf32>
    %191 = arith.divf %189, %190 : vector<8x48x1xf32>
    %192 = vector.broadcast %191 : vector<8x48x1xf32> to vector<8x48x128xf32>
    %193 = arith.subf %161, %192 : vector<8x48x128xf32>
    %194 = arith.mulf %193, %193 : vector<8x48x128xf32>
    %cst_76 = arith.constant dense<0.000000e+00> : vector<8x48xf32>
    %195 = vector.multi_reduction <add>, %194, %cst_76 [2] : vector<8x48x128xf32> to vector<8x48xf32>
    %196 = vector.shape_cast %195 : vector<8x48xf32> to vector<8x48x1xf32>
    %cst_77 = arith.constant 1.280000e+02 : f32
    %197 = vector.broadcast %cst_77 : f32 to vector<8x48x1xf32>
    %198 = arith.divf %196, %197 : vector<8x48x1xf32>
    %199 = vector.broadcast %191 : vector<8x48x1xf32> to vector<8x48x128xf32>
    %200 = arith.subf %161, %199 : vector<8x48x128xf32>
    %cst_78 = arith.constant 9.99999974E-6 : f32
    %201 = vector.broadcast %cst_78 : f32 to vector<8x48x1xf32>
    %202 = arith.addf %198, %201 : vector<8x48x1xf32>
    %203 = math.rsqrt %202 : vector<8x48x1xf32>
    %204 = vector.broadcast %203 : vector<8x48x1xf32> to vector<8x48x128xf32>
    %205 = arith.mulf %200, %204 : vector<8x48x128xf32>
    %206 = vector.shape_cast %78 : vector<128xf32> to vector<1x1x128xf32>
    %207 = vector.broadcast %206 : vector<1x1x128xf32> to vector<8x48x128xf32>
    %208 = arith.mulf %205, %207 : vector<8x48x128xf32>
    %209 = vector.shape_cast %80 : vector<128xf32> to vector<1x1x128xf32>
    %210 = vector.broadcast %209 : vector<1x1x128xf32> to vector<8x48x128xf32>
    %211 = arith.addf %208, %210 : vector<8x48x128xf32>
    %cst_79 = arith.constant 0.0883883461 : f32
    %212 = vector.broadcast %cst_79 : f32 to vector<8x16x128xf32>
    %213 = arith.mulf %187, %212 : vector<8x16x128xf32>
    %214 = arith.truncf %213 : vector<8x16x128xf32> to vector<8x16x128xbf16>
    %215 = arith.truncf %211 : vector<8x48x128xf32> to vector<8x48x128xbf16>
    "tpu.trace_start"() <{level = 10 : i32, message = "bld,btd->blt"}> : () -> ()
    %cst_80 = arith.constant dense<0.000000e+00> : vector<8x16x48xf32>
    %216 = tpu.matmul %214, %215, %cst_80 {dimension_numbers = #tpu.dot_dimension_numbers<[2], [2], [1], [1], [0, 0, 0, 1, 1, 1], [0], [0]>} : vector<8x16x128xbf16>, vector<8x48x128xbf16>, vector<8x16x48xf32> -> vector<8x16x48xf32>
    "tpu.trace_stop"() : () -> ()
    %cst_81 = arith.constant dense<0xFF800000> : vector<8x16xf32>
    %217 = vector.multi_reduction <maximumf>, %216, %cst_81 [2] : vector<8x16x48xf32> to vector<8x16xf32>
    %218 = vector.shape_cast %217 : vector<8x16xf32> to vector<8x16x1xf32>
    %219 = vector.broadcast %218 : vector<8x16x1xf32> to vector<8x16x48xf32>
    %220 = arith.subf %216, %219 : vector<8x16x48xf32>
    %221 = math.exp %220 : vector<8x16x48xf32>
    %cst_82 = arith.constant dense<0.000000e+00> : vector<8x16xf32>
    %222 = vector.multi_reduction <add>, %221, %cst_82 [2] : vector<8x16x48xf32> to vector<8x16xf32>
    %223 = vector.shape_cast %222 : vector<8x16xf32> to vector<8x16x1xf32>
    %224 = tpu.reciprocal %223 {approx = true} : vector<8x16x1xf32> -> vector<8x16x1xf32>
    %225 = arith.mulf %223, %224 : vector<8x16x1xf32>
    %cst_83 = arith.constant 2.000000e+00 : f32
    %226 = vector.broadcast %cst_83 : f32 to vector<8x16x1xf32>
    %227 = arith.subf %226, %225 : vector<8x16x1xf32>
    %228 = arith.mulf %224, %227 : vector<8x16x1xf32>
    %229 = arith.truncf %221 : vector<8x16x48xf32> to vector<8x16x48xbf16>
    "tpu.trace_start"() <{level = 10 : i32, message = "blt,btd->bld"}> : () -> ()
    %cst_84 = arith.constant dense<0.000000e+00> : vector<8x16x128xf32>
    %230 = tpu.matmul %229, %163, %cst_84 {dimension_numbers = #tpu.dot_dimension_numbers<[2], [1], [1], [2], [0, 0, 0, 1, 1, 2], [0], [0]>} : vector<8x16x48xbf16>, vector<8x48x128xbf16>, vector<8x16x128xf32> -> vector<8x16x128xf32>
    "tpu.trace_stop"() : () -> ()
    %231 = vector.broadcast %228 : vector<8x16x1xf32> to vector<8x16x128xf32>
    %232 = arith.mulf %230, %231 : vector<8x16x128xf32>
    %233 = vector.shape_cast %232 : vector<8x16x128xf32> to vector<128x128xf32>
    %234 = arith.truncf %233 : vector<128x128xf32> to vector<128x128xbf16>
    %235 = tpu.concatenate %157, %234 in 1 : vector<128x128xbf16>, vector<128x128xbf16> -> vector<128x256xbf16>
    %c0_85 = arith.constant 0 : index
    %c0_86 = arith.constant 0 : index
    %236 = vector.load %arg9[%c0_85, %c0_86] : memref<256x128xbf16, #tpu.memory_space<vmem>>, vector<256x128xbf16>
    %cst_87 = arith.constant dense<0.000000e+00> : vector<128x128xf32>
    %237 = tpu.matmul %235, %236, %cst_87 {dimension_numbers = #tpu.dot_dimension_numbers<[1], [0], [0], [1], [0, 0, 1, 1], [], []>} : vector<128x256xbf16>, vector<256x128xbf16>, vector<128x128xf32> -> vector<128x128xf32>
    %238 = vector.shape_cast %237 : vector<128x128xf32> to vector<8x16x128xf32>
    %c0_88 = arith.constant 0 : index
    %c0_89 = arith.constant 0 : index
    %c0_90 = arith.constant 0 : index
    %239 = vector.load %arg14[%c0_88, %c0_89, %c0_90] : memref<8x16x128xf32, #tpu.memory_space<vmem>>, vector<8x16x128xf32>
    tpu.vector_store %arg14[%c0_88, %c0_89, %c0_90], %238 {strides = array<i32>} : memref<8x16x128xf32, #tpu.memory_space<vmem>>, vector<8x16x128xf32>,
    return
  }
  func.func @transform_0(%arg0: i32) -> (i32, i32, i32) {
    %c0_i32 = arith.constant 0 : i32
    %c0_i32_0 = arith.constant 0 : i32
    %c0_i32_1 = arith.constant 0 : i32
    return %arg0, %c0_i32, %c0_i32_0 : i32, i32, i32
  }
  func.func @transform_1(%arg0: i32) -> (i32, i32, i32) {
    %c0_i32 = arith.constant 0 : i32
    %c0_i32_0 = arith.constant 0 : i32
    %c0_i32_1 = arith.constant 0 : i32
    return %arg0, %c0_i32, %c0_i32_0 : i32, i32, i32
  }
  func.func @transform_2(%arg0: i32) -> (i32, i32) {
    %c0_i32 = arith.constant 0 : i32
    %c0_i32_0 = arith.constant 0 : i32
    %c0_i32_1 = arith.constant 0 : i32
    return %c0_i32, %c0_i32_0 : i32, i32
  }
  func.func @transform_3(%arg0: i32) -> (i32, i32) {
    %c0_i32 = arith.constant 0 : i32
    %c0_i32_0 = arith.constant 0 : i32
    %c0_i32_1 = arith.constant 0 : i32
    return %c0_i32, %c0_i32_0 : i32, i32
  }
  func.func @transform_4(%arg0: i32) -> (i32, i32) {
    %c0_i32 = arith.constant 0 : i32
    %c0_i32_0 = arith.constant 0 : i32
    %c0_i32_1 = arith.constant 0 : i32
    return %c0_i32, %c0_i32_0 : i32, i32
  }
  func.func @transform_5(%arg0: i32) -> (i32, i32) {
    %c0_i32 = arith.constant 0 : i32
    %c0_i32_0 = arith.constant 0 : i32
    %c0_i32_1 = arith.constant 0 : i32
    return %c0_i32, %c0_i32_0 : i32, i32
  }
  func.func @transform_6(%arg0: i32) -> (i32, i32) {
    %c0_i32 = arith.constant 0 : i32
    %c0_i32_0 = arith.constant 0 : i32
    %c0_i32_1 = arith.constant 0 : i32
    return %c0_i32, %c0_i32_0 : i32, i32
  }
  func.func @transform_7(%arg0: i32) -> (i32, i32) {
    %c0_i32 = arith.constant 0 : i32
    %c0_i32_0 = arith.constant 0 : i32
    %c0_i32_1 = arith.constant 0 : i32
    return %c0_i32, %c0_i32_0 : i32, i32
  }
  func.func @transform_8(%arg0: i32) -> (i32, i32) {
    %c0_i32 = arith.constant 0 : i32
    %c0_i32_0 = arith.constant 0 : i32
    %c0_i32_1 = arith.constant 0 : i32
    return %c0_i32, %c0_i32_0 : i32, i32
  }
  func.func @transform_9(%arg0: i32) -> (i32, i32) {
    %c0_i32 = arith.constant 0 : i32
    %c0_i32_0 = arith.constant 0 : i32
    %c0_i32_1 = arith.constant 0 : i32
    return %c0_i32, %c0_i32_0 : i32, i32
  }
  func.func @transform_10(%arg0: i32) -> (i32, i32) {
    %c0_i32 = arith.constant 0 : i32
    %c0_i32_0 = arith.constant 0 : i32
    %c0_i32_1 = arith.constant 0 : i32
    return %c0_i32, %c0_i32_0 : i32, i32
  }
  func.func @transform_11(%arg0: i32) -> (i32, i32) {
    %c0_i32 = arith.constant 0 : i32
    %c0_i32_0 = arith.constant 0 : i32
    %c0_i32_1 = arith.constant 0 : i32
    return %c0_i32, %c0_i32_0 : i32, i32
  }
  func.func @transform_12(%arg0: i32) -> (i32, i32) {
    %c0_i32 = arith.constant 0 : i32
    %c0_i32_0 = arith.constant 0 : i32
    %c0_i32_1 = arith.constant 0 : i32
    return %c0_i32, %c0_i32_0 : i32, i32
  }
  func.func @transform_13(%arg0: i32) -> (i32, i32, i32) {
    %c0_i32 = arith.constant 0 : i32
    %c0_i32_0 = arith.constant 0 : i32
    %c0_i32_1 = arith.constant 0 : i32
    return %arg0, %c0_i32, %c0_i32_0 : i32, i32, i32
  }
}

</mosaic_0001>

<bundles_post_ra>
// kernel: tpu_custom_call.1
= control target key start
LH: loop header
LB: loop body
LE: loop exit
PB: predicated region body
PF: predicated region fallthrough
CT: control target
= control target key end

     0   :  { %18 = vsyncpa [#allocation6], 0  ;;  %s11046_s0 = inlined_call_operand.hbm [shape: f32[8,32,128], index: 0, kind: input, shape index: {}]   ;;  %s11047_s1 = inlined_call_operand.hbm [shape: f32[8,16,128], index: 1, kind: input, shape index: {}]   ;;  %s11048_s2 = inlined_call_operand.vmem [shape: f32[1,128], index: 2, kind: input, shape index: {}]   ;;  %s11049_s3 = inlined_call_operand.vmem [shape: f32[1,128], index: 3, kind: input, shape index: {}]   ;;  %s11050_s4 = inlined_call_operand.vmem [shape: f32[1,128], index: 4, kind: input, shape index: {}]   ;;  %s11051_s5 = inlined_call_operand.vmem [shape: f32[1,128], index: 5, kind: input, shape index: {}]   ;;  %s11052_s6 = inlined_call_operand.hbm [shape: bf16[128,256], index: 6, kind: input, shape index: {}]   ;;  %s11053_s7 = inlined_call_operand.hbm [shape: bf16[128,512], index: 7, kind: input, shape index: {}]   ;;  %s11054_s8 = inlined_call_operand.hbm [shape: bf16[256,128], index: 8, kind: input, shape index: {}]   ;;  %s11055_s9 = inlined_call_operand.vmem [shape: f32[1,128], index: 9, kind: input, shape index: {}]   ;;  %s11056_s10 = inlined_call_operand.vmem [shape: f32[1,128], index: 10, kind: input, shape index: {}]   ;;  %s11057_s11 = inlined_call_operand.vmem [shape: f32[1,128], index: 11, kind: input, shape index: {}]   ;;  %s11058_s12 = inlined_call_operand.vmem [shape: f32[1,128], index: 12, kind: input, shape index: {}]   ;;  %s11059_s13 = inlined_call_operand.hbm [shape: f32[8,16,128], index: 13, kind: output, shape index: {}]  }
   0x1   :  { %19 = vsyncpa [#allocation9], 0 }
   0x2   :  { %20 = vsyncpa [#allocation12], 0 }
   0x3   :  { %21 = vsyncpa [#allocation7], 0  ;;  %s7428_s25 = smov [#allocation8]   ;;  %s7429_s27 = smov [#allocation11]  }
   0x4   :  { %s39_s26 = sshll.u32 %s7428_s25, 4  ;;  %s71_s28 = sshll.u32 %s7429_s27, 4  ;;  %s40_s26 = int_to_ptr.vmem [resolvable:$true] %s39_s26  ;;  %s7513_s28 = int_to_ptr.vmem [resolvable:$true] %s71_s28 }
   0x5   :  { %s7288_s14 = scalar_lea.hbm %s11047_s1, 2048 }
   0x6   :  { %p7289_p0 = scmp.ne.s32.totalorder %s11047_s1, %s7288_s14  ;;  %p7292_p1 = scmp.lt.u32.totalorder %s7288_s14, %s11047_s1 }
   0x8   :  { %p7294_p2 = pnand %p7292_p1, %p7289_p0 }
   0xa   :  { %7297 = shalt.err (!%p7294_p2)
}
   0xb   :  { %s7298_s19 = scalar_lea.vmem %s40_s26, 2048  ;;  %p7303_p4 = scmp.lt.s32.totalorder %s40_s26, %s40_s26 }
   0xc   :  { %p7299_p3 = scmp.ne.s32.totalorder %s40_s26, %s7298_s19  ;;  %p7304_p5 = scmp.lt.s32.totalorder %s7298_s19, %s7298_s19 }
   0xe   :  { %p7305_p6 = por %p7304_p5, %p7303_p4 }
  0x10   :  { %p7306_p7 = pnand %p7305_p6, %p7299_p3 }
  0x12   :  { %7309 = shalt.err (!%p7306_p7)
}
  0x13   :  { %s7430_s20 = smov 128   ;;  %s7431_s21 = smov 8  }
  0x14   :  { %45 = dma.hbm_to_vmem [thread:$0]  %s11047_s1, 2048, %s40_s26, [#allocation9], %s7430_s20, %s7430_s20, %s7431_s21  }
  0x15   :  { %s7310_s27 = scalar_lea.hbm %s11053_s7, 4096 }
  0x16   :  { %p7311_p8 = scmp.ne.s32.totalorder %s11053_s7, %s7310_s27  ;;  %p7314_p9 = scmp.lt.u32.totalorder %s7310_s27, %s11053_s7 }
  0x18   :  { %p7316_p10 = pnand %p7314_p9, %p7311_p8 }
  0x1a   :  { %7319 = shalt.err (!%p7316_p10)
}
  0x1b   :  { %s7320_s16 = scalar_lea.vmem %s7513_s28, 4096  ;;  %p7325_p12 = scmp.lt.s32.totalorder %s7513_s28, %s7513_s28 }
  0x1c   :  { %p7321_p11 = scmp.ne.s32.totalorder %s7513_s28, %s7320_s16  ;;  %p7326_p13 = scmp.lt.s32.totalorder %s7320_s16, %s7320_s16 }
  0x1e   :  { %p7327_p0 = por %p7326_p13, %p7325_p12 }
  0x20   :  { %p7328_p1 = pnand %p7327_p0, %p7321_p11 }
  0x22   :  { %7331 = shalt.err (!%p7328_p1)
}
  0x23   :  { %s7432_s1 = smov 256   ;;  %s7433_s26 = smov 16  }
  0x24   :  { %77 = dma.hbm_to_vmem [thread:$0]  %s11053_s7, 4096, %s7513_s28, [#allocation12], %s7432_s1, %s7432_s1, %s7433_s26  }
  0x25   :  { %s7434_s19 = smov [#allocation5]   ;;  %s7435_s23 = smov [#allocation10]  }
  0x26   :  { %s27_s22 = sshll.u32 %s7434_s19, 4  ;;  %s59_s24 = sshll.u32 %s7435_s23, 4  ;;  %s28_s22 = int_to_ptr.vmem [resolvable:$true] %s27_s22  ;;  %s7547_s24 = int_to_ptr.vmem [resolvable:$true] %s59_s24 }
  0x27   :  { %s7332_s29 = scalar_lea.hbm %s11046_s0, 4096 }
  0x28   :  { %p7333_p2 = scmp.ne.s32.totalorder %s11046_s0, %s7332_s29  ;;  %p7336_p3 = scmp.lt.u32.totalorder %s7332_s29, %s11046_s0 }
  0x2a   :  { %p7338_p4 = pnand %p7336_p3, %p7333_p2 }
  0x2c   :  { %7341 = shalt.err (!%p7338_p4)
}
  0x2d   :  { %s7342_s7 = scalar_lea.vmem %s28_s22, 4096  ;;  %p7347_p6 = scmp.lt.s32.totalorder %s28_s22, %s28_s22 }
  0x2e   :  { %p7343_p5 = scmp.ne.s32.totalorder %s28_s22, %s7342_s7  ;;  %p7348_p7 = scmp.lt.s32.totalorder %s7342_s7, %s7342_s7 }
  0x30   :  { %p7349_p8 = por %p7348_p7, %p7347_p6 }
  0x32   :  { %p7350_p9 = pnand %p7349_p8, %p7343_p5 }
  0x34   :  { %7353 = shalt.err (!%p7350_p9)
}
  0x35   :  { %33 = dma.hbm_to_vmem [thread:$0]  %s11046_s0, 4096, %s28_s22, [#allocation6], %s7430_s20, %s7430_s20, %s7431_s21  }
  0x36   :  { %s7354_s18 = scalar_lea.hbm %s11052_s6, 2048 }
  0x37   :  { %p7355_p10 = scmp.ne.s32.totalorder %s11052_s6, %s7354_s18  ;;  %p7358_p11 = scmp.lt.u32.totalorder %s7354_s18, %s11052_s6 }
  0x39   :  { %p7360_p12 = pnand %p7358_p11, %p7355_p10 }
  0x3b   :  { %7363 = shalt.err (!%p7360_p12)
}
  0x3c   :  { %s7364_s29 = scalar_lea.vmem %s7547_s24, 2048  ;;  %p7369_p0 = scmp.lt.s32.totalorder %s7547_s24, %s7547_s24 }
  0x3d   :  { %p7365_p13 = scmp.ne.s32.totalorder %s7547_s24, %s7364_s29  ;;  %p7370_p1 = scmp.lt.s32.totalorder %s7364_s29, %s7364_s29 }
  0x3f   :  { %p7371_p2 = por %p7370_p1, %p7369_p0 }
  0x41   :  { %p7372_p3 = pnand %p7371_p2, %p7365_p13 }
  0x43   :  { %7375 = shalt.err (!%p7372_p3)
}
  0x44   :  { %65 = dma.hbm_to_vmem [thread:$0]  %s11052_s6, 2048, %s7547_s24, [#allocation9], %s7430_s20, %s7430_s20, %s7431_s21  }
  0x45   :  { %s7436_s30 = smov [#allocation13]   ;;  %s7376_s7 = scalar_lea.hbm %s11054_s8, 2048 }
  0x46   :  { %s83_s14 = sshll.u32 %s7436_s30, 4  ;;  %p7377_p4 = scmp.ne.s32.totalorder %s11054_s8, %s7376_s7  ;;  %s84_s14 = int_to_ptr.vmem [resolvable:$true] %s83_s14 }
  0x47   :  { %p7380_p5 = scmp.lt.u32.totalorder %s7376_s7, %s11054_s8 }
  0x49   :  { %p7382_p6 = pnand %p7380_p5, %p7377_p4 }
  0x4b   :  { %7385 = shalt.err (!%p7382_p6)
}
  0x4c   :  { %s7386_s18 = scalar_lea.vmem %s84_s14, 2048  ;;  %p7391_p8 = scmp.lt.s32.totalorder %s84_s14, %s84_s14 }
  0x4d   :  { %p7387_p7 = scmp.ne.s32.totalorder %s84_s14, %s7386_s18  ;;  %p7392_p9 = scmp.lt.s32.totalorder %s7386_s18, %s7386_s18 }
  0x4f   :  { %p7393_p10 = por %p7392_p9, %p7391_p8 }
  0x51   :  { %p7394_p11 = pnand %p7393_p10, %p7387_p7 }
  0x53   :  { %7397 = shalt.err (!%p7394_p11)
}
  0x54   :  { %s7437_s6 = smov 64   ;;  %s7438_s24 = smov 4  }
  0x55   :  { %89 = dma.hbm_to_vmem [thread:$0]  %s11054_s8, 2048, %s84_s14, [#allocation12], %s7437_s6, %s7437_s6, %s7438_s24  }
  0x56   :  { %7420 = dma.done.wait [#allocation6], 4096  }
  0x57   :  { %7421 = vsyncadd [#allocation6], 4294963200 }
  0x58   :  { %7422 = dma.done.wait [#allocation9], 4096  }
  0x59   :  { %7423 = vsyncadd [#allocation9], 4294963200 }
  0x5a   :  { %7424 = dma.done.wait [#allocation12], 6144  }
  0x5b   :  { %7425 = vsyncadd [#allocation12], 4294961152  ;;  %v114_v0 = vld [vmem:[#allocation5] sm:$0xff]  ;;  %v116_v1 = vld [vmem:[#allocation5 + $0x10] sm:$0xff]  ;;  %vm7441_vm0 = vmmov 0   ;;  %vm3334_vm1 = vcmask 392192  }
  0x5c   :  { %148 = vadd.xlane.f32.xlu0 %v114_v0  ;;  %152 = vadd.xlane.f32.xlu1 %v116_v1  ;;  %v115_v2 = vld [vmem:[#allocation5 + $0x8] sm:$0xff]  ;;  %v117_v3 = vld [vmem:[#allocation5 + $0x18] sm:$0xff]  ;;  %v7596_v4 = vld [vmem:[#allocation8] sm:$0xff] }
  0x5d   :  { %v7598_v5 = vld [vmem:[#allocation8 + $0x8] sm:$0xff]  ;;  %v7600_v6 = vld [vmem:[#allocation5 + $0x20] sm:$0xff]  ;;  %v7606_v8 = vld [vmem:[#allocation5 + $0x30] sm:$0xff] }
  0x5e   :  { %v7602_v7 = vld [vmem:[#allocation5 + $0x28] sm:$0xff]  ;;  %v7608_v9 = vld [vmem:[#allocation5 + $0x38] sm:$0xff]  ;;  %v7612_v10 = vld [vmem:[#allocation8 + $0x10] sm:$0xff] }
  0x5f   :  { %v7614_v11 = vld [vmem:[#allocation8 + $0x18] sm:$0xff]  ;;  %v7618_v12 = vld [vmem:[#allocation5 + $0x40] sm:$0xff]  ;;  %v7622_v13 = vld [vmem:[#allocation5 + $0x48] sm:$0xff] }
  0x60   :  { %150 = vadd.xlane.f32.xlu0 %v115_v2  ;;  %154 = vadd.xlane.f32.xlu1 %v117_v3  ;;  %v7624_v14 = vld [vmem:[#allocation5 + $0x50] sm:$0xff]  ;;  %v7626_v15 = vld [vmem:[#allocation5 + $0x58] sm:$0xff]  ;;  %v7630_v16 = vld [vmem:[#allocation8 + $0x20] sm:$0xff] }
  0x61   :  { %v7634_v17 = vld [vmem:[#allocation8 + $0x28] sm:$0xff]  ;;  %v7638_v18 = vld [vmem:[#allocation5 + $0x60] sm:$0xff]  ;;  %v7652_v35 = vld [vmem:[#allocation5 + $0x70] sm:$0xff] }
  0x62   :  { %v7640_v19 = vld [vmem:[#allocation5 + $0x68] sm:$0xff]  ;;  %v6706_v20 = vld [vmem:[#allocation11 + $0x4] ss:$16 sps:$4 sm:$0xff]   ;;  %v6708_v21 = vld [vmem:[#allocation11] ss:$16 sps:$4 sm:$0xff]  }
  0x63   :  { %v6709_v22 = vld [vmem:[#allocation11 + $0x24] ss:$16 sps:$4 sm:$0xff]   ;;  %1240 = vmatprep.subr.bf16.mxu1 %v6706_v20  ;;  %v7661_v41 = vld [vmem:[#allocation5 + $0x78] sm:$0xff]  ;;  %v6711_v51 = vld [vmem:[#allocation11 + $0x20] ss:$16 sps:$4 sm:$0xff]  }
  0x64   :  { %595 = vadd.xlane.f32.xlu0 %v7596_v4  ;;  %597 = vadd.xlane.f32.xlu1 %v7598_v5  ;;  %v7669_v46 = vld [vmem:[#allocation8 + $0x30] sm:$0xff]  ;;  %v7677_v52 = vld [vmem:[#allocation8 + $0x38] sm:$0xff]  ;;  %v7685_v59 = vld [vmem:[#allocation5 + $0x80] sm:$0xff] }
  0x65   :  { %1241 = vmatpush1.bf16.msra.mxu1 %v6708_v21  ;;  %v6712_v54 = vld [vmem:[#allocation11 + $0x44] ss:$16 sps:$4 sm:$0xff]   ;;  %v6714_v58 = vld [vmem:[#allocation11 + $0x40] ss:$16 sps:$4 sm:$0xff]  }
  0x66   :  { %1242 = vmatprep.subr.bf16.mxu1 %v6709_v22  ;;  %v6715_v61 = vld [vmem:[#allocation11 + $0x64] ss:$16 sps:$4 sm:$0xff]   ;;  %v6723_v22 = vld [vmem:[#allocation11 + $0x80] ss:$16 sps:$4 sm:$0xff]  }
  0x68   :  { %156 = vadd.xlane.f32.xlu0 %v7600_v6  ;;  %158 = vadd.xlane.f32.xlu1 %v7602_v7 }
  0x69   :  { %1243 = vmatpush1.bf16.msra.mxu1 %v6711_v51  ;;  %v6738_v51 = vld [vmem:[#allocation11 + $0xe4] ss:$16 sps:$4 sm:$0xff]  }
  0x6a   :  { %1244 = vmatprep.subr.bf16.mxu1 %v6712_v54 }
  0x6c   :  { %160 = vadd.xlane.f32.xlu0 %v7606_v8  ;;  %162 = vadd.xlane.f32.xlu1 %v7608_v9 }
  0x6d   :  { %1245 = vmatpush1.bf16.msra.mxu1 %v6714_v58  ;;  %v7725_v58 = vld [vmem:[#allocation8 + $0x48] sm:$0xff] }
  0x6e   :  { %1246 = vmatprep.subr.bf16.mxu1 %v6715_v61  ;;  %v6742_v61 = vld [vmem:[#allocation10 + $0x44] ss:$8 sps:$4 sm:$0xff]  }
  0x70   :  { %599 = vadd.xlane.f32.xlu0 %v7612_v10  ;;  %601 = vadd.xlane.f32.xlu1 %v7614_v11 }
  0x74   :  { %164 = vadd.xlane.f32.xlu0 %v7618_v12  ;;  %166 = vadd.xlane.f32.xlu1 %v7622_v13 }
  0x78   :  { %168 = vadd.xlane.f32.xlu0 %v7624_v14  ;;  %170 = vadd.xlane.f32.xlu1 %v7626_v15 }
  0x7c   :  { %603 = vadd.xlane.f32.xlu0 %v7630_v16  ;;  %605 = vadd.xlane.f32.xlu1 %v7634_v17 }
  0x80   :  { %172 = vadd.xlane.f32.xlu0 %v7638_v18  ;;  %174 = vadd.xlane.f32.xlu1 %v7640_v19 }
  0xe9   :  { %v149_v23 = vpop.xlane.xlu0 %148  ;;  %v153_v24 = vpop.xlane.xlu1 %152 }
  0xea   :  { %v213_v25 = vmul.f32 0.0078125, %v149_v23  ;;  %v215_v27 = vmul.f32 0.0078125, %v153_v24  ;;  %v7701_v23 = vld [vmem:[#allocation5 + $0x90] sm:$0xff] }
  0xec   :  { %v7644_v26 = vsub.f32 %v114_v0, %v213_v25  ;;  %v7650_v34 = vsub.f32 %v116_v1, %v215_v27  ;;  %v6717_v1 = vld [vmem:[#allocation11 + $0x60] ss:$16 sps:$4 sm:$0xff]   ;;  %v6724_v25 = vld [vmem:[#allocation10 + $0x14] ss:$8 sps:$4 sm:$0xff]  }
  0xed   :  { %v151_v28 = vpop.xlane.xlu0 %150  ;;  %v155_v29 = vpop.xlane.xlu1 %154  ;;  %1247 = vmatpush1.bf16.msra.mxu1 %v6717_v1  ;;  %v6726_v27 = vld [vmem:[#allocation11 + $0xa4] ss:$16 sps:$4 sm:$0xff]   ;;  %v6744_v1 = vld [vmem:[#allocation10 + $0x40] ss:$8 sps:$4 sm:$0xff]  }
  0xee   :  { %v214_v30 = vmul.f32 0.0078125, %v151_v28  ;;  %v277_v31 = vmul.f32 %v7644_v26, %v7644_v26  ;;  %v216_v33 = vmul.f32 0.0078125, %v155_v29  ;;  %v279_v38 = vmul.f32 %v7650_v34, %v7650_v34 }
  0xf0   :  { %309 = vadd.xlane.f32.xlu0 %v277_v31  ;;  %v7648_v32 = vsub.f32 %v115_v2, %v214_v30  ;;  %v7659_v40 = vsub.f32 %v117_v3, %v216_v33  ;;  %v7693_v2 = vld [vmem:[#allocation5 + $0x88] sm:$0xff]  ;;  %v6728_v30 = vld [vmem:[#allocation10 + $0x10] ss:$8 sps:$4 sm:$0xff]  }
  0xf1   :  { %v596_v36 = vpop.xlane.xlu0 %595  ;;  %v598_v42 = vpop.xlane.xlu1 %597  ;;  %v6729_v31 = vld [vmem:[#allocation11 + $0xa0] ss:$16 sps:$4 sm:$0xff]   ;;  %v7709_v33 = vld [vmem:[#allocation5 + $0x98] sm:$0xff] }
  0xf2   :  { %v278_v37 = vmul.f32 %v7648_v32, %v7648_v32  ;;  %v627_v39 = vmul.f32 0.0078125, %v596_v36  ;;  %v280_v43 = vmul.f32 %v7659_v40, %v7659_v40  ;;  %v628_v44 = vmul.f32 0.0078125, %v598_v42 }
  0xf4   :  { %176 = vadd.xlane.f32.xlu0 %v7652_v35  ;;  %311 = vadd.xlane.f32.xlu1 %v278_v37  ;;  %v7667_v45 = vsub.f32 %v7596_v4, %v627_v39  ;;  %v7675_v50 = vsub.f32 %v7598_v5, %v628_v44  ;;  %v6718_v4 = vld [vmem:[#allocation10 + $0x4] ss:$8 sps:$4 sm:$0xff]   ;;  %v6735_v44 = vld [vmem:[#allocation11 + $0xc0] ss:$16 sps:$4 sm:$0xff]  }
  0xf5   :  { %v157_v47 = vpop.xlane.xlu0 %156  ;;  %v159_v53 = vpop.xlane.xlu1 %158  ;;  %v6720_v5 = vld [vmem:[#allocation11 + $0x84] ss:$16 sps:$4 sm:$0xff]   ;;  %935 = vmatprep.subr.bf16.mxu0 %v6718_v4 }
  0xf6   :  { %v659_v48 = vmul.f32 %v7667_v45, %v7667_v45  ;;  %v217_v49 = vmul.f32 0.0078125, %v157_v47  ;;  %v660_v55 = vmul.f32 %v7675_v50, %v7675_v50  ;;  %v218_v56 = vmul.f32 0.0078125, %v159_v53  ;;  %1248 = vmatprep.subr.bf16.mxu1 %v6720_v5  ;;  %v6730_v37 = vld [vmem:[#allocation10 + $0x24] ss:$8 sps:$4 sm:$0xff]  }
  0xf7   :  { %1249 = vmatpush1.bf16.msra.mxu1 %v6723_v22  ;;  %v7717_v47 = vld [vmem:[#allocation8 + $0x40] sm:$0xff]  ;;  %v11060_v5 = vmov 0   ;;  %v6747_v22 = vld [vmem:[#allocation10 + $0x50] ss:$8 sps:$4 sm:$0xff]  }
  0xf8   :  { %313 = vadd.xlane.f32.xlu0 %v279_v38  ;;  %178 = vadd.xlane.f32.xlu1 %v7661_v41  ;;  %v7683_v57 = vsub.f32 %v7600_v6, %v217_v49  ;;  %v7691_v0 = vsub.f32 %v7602_v7, %v218_v56  ;;  %v6722_v7 = vld [vmem:[#allocation10] ss:$8 sps:$4 sm:$0xff]   ;;  %v6732_v38 = vld [vmem:[#allocation11 + $0xc4] ss:$16 sps:$4 sm:$0xff]  }
  0xf9   :  { %v161_v60 = vpop.xlane.xlu0 %160  ;;  %v163_v3 = vpop.xlane.xlu1 %162  ;;  %936 = vmatpush1.bf16.msra.mxu0 %v6722_v7  ;;  %1250 = vmatprep.subr.bf16.mxu1 %v6726_v27  ;;  %v6736_v49 = vld [vmem:[#allocation10 + $0x34] ss:$8 sps:$4 sm:$0xff]   ;;  %v6741_v56 = vld [vmem:[#allocation11 + $0xe0] ss:$16 sps:$4 sm:$0xff]   ;;  %v6748_v27 = vld [vmem:[#allocation10 + $0x64] ss:$8 sps:$4 sm:$0xff]  }
  0xfa   :  { %v281_v62 = vmul.f32 %v7683_v57, %v7683_v57  ;;  %v219_v63 = vmul.f32 0.0078125, %v161_v60  ;;  %v282_v6 = vmul.f32 %v7691_v0, %v7691_v0  ;;  %v220_v20 = vmul.f32 0.0078125, %v163_v3  ;;  %937 = vmatprep.subr.bf16.mxu0 %v6724_v25  ;;  %v7733_v3 = vld [vmem:[#allocation5 + $0xa0] sm:$0xff]  ;;  %1272 = vmatprep.mubr.bf16.mxu1 %v11060_v5 }
  0xfb   :  { %1251 = vmatpush1.bf16.msra.mxu1 %v6729_v31  ;;  %967 = vmatprep.mubr.bf16.mxu0 %v11060_v5  ;;  %v6750_v31 = vld [vmem:[#allocation10 + $0x60] ss:$8 sps:$4 sm:$0xff]  }
  0xfc   :  { %607 = vadd.xlane.f32.xlu0 %v7669_v46  ;;  %315 = vadd.xlane.f32.xlu1 %v280_v43  ;;  %v7699_v21 = vsub.f32 %v7606_v8, %v219_v63  ;;  %v7707_v8 = vsub.f32 %v7608_v9, %v220_v20  ;;  %v6734_v43 = vld [vmem:[#allocation10 + $0x20] ss:$8 sps:$4 sm:$0xff]  }
  0xfd   :  { %v600_v24 = vpop.xlane.xlu0 %599  ;;  %v602_v36 = vpop.xlane.xlu1 %601  ;;  %938 = vmatpush1.bf16.msra.mxu0 %v6728_v30  ;;  %1252 = vmatprep.subr.bf16.mxu1 %v6732_v38 }
  0xfe   :  { %v283_v28 = vmul.f32 %v7699_v21, %v7699_v21  ;;  %v629_v29 = vmul.f32 0.0078125, %v600_v24  ;;  %v284_v39 = vmul.f32 %v7707_v8, %v7707_v8  ;;  %v630_v42 = vmul.f32 0.0078125, %v602_v36  ;;  %939 = vmatprep.subr.bf16.mxu0 %v6730_v37  ;;  %v7743_v24 = vld [vmem:[#allocation5 + $0xa8] sm:$0xff]  ;;  %v6751_v37 = vld [vmem:[#allocation10 + $0x74] ss:$8 sps:$4 sm:$0xff]  }
  0xff   :  { %1253 = vmatpush1.bf16.msra.mxu1 %v6735_v44 }
 0x100   :  { %609 = vadd.xlane.f32.xlu1 %v7677_v52  ;;  %675 = vadd.xlane.f32.xlu0 %v659_v48  ;;  %v7715_v9 = vsub.f32 %v7612_v10, %v629_v29  ;;  %v7723_v10 = vsub.f32 %v7614_v11, %v630_v42 }
 0x101   :  { %v165_v48 = vpop.xlane.xlu0 %164  ;;  %940 = vmatpush1.bf16.msra.mxu0 %v6734_v43  ;;  %v167_v60 = vpop.xlane.xlu1 %166  ;;  %1254 = vmatprep.subr.bf16.mxu1 %v6738_v51  ;;  %v6753_v43 = vld [vmem:[#allocation10 + $0x70] ss:$8 sps:$4 sm:$0xff]  }
 0x102   :  { %v661_v53 = vmul.f32 %v7715_v9, %v7715_v9  ;;  %v221_v54 = vmul.f32 0.0078125, %v165_v48  ;;  %941 = vmatprep.subr.bf16.mxu0 %v6736_v49  ;;  %v222_v63 = vmul.f32 0.0078125, %v167_v60  ;;  %v7775_v60 = vld [vmem:[#allocation8 + $0x58] sm:$0xff] }
 0x103   :  { %1255 = vmatpush1.bf16.msra.mxu1 %v6741_v56 }
 0x104   :  { %677 = vadd.xlane.f32.xlu1 %v660_v55  ;;  %180 = vadd.xlane.f32.xlu0 %v7685_v59  ;;  %v6740_v55 = vld [vmem:[#allocation10 + $0x30] ss:$8 sps:$4 sm:$0xff]   ;;  %v7731_v11 = vsub.f32 %v7618_v12, %v221_v54  ;;  %v7741_v7 = vsub.f32 %v7622_v13, %v222_v63 }
 0x105   :  { %942 = vmatpush1.bf16.msra.mxu0 %v6740_v55  ;;  %v169_v4 = vpop.xlane.xlu0 %168  ;;  %v171_v25 = vpop.xlane.xlu1 %170  ;;  %v7751_v13 = vld [vmem:[#allocation5 + $0xb0] sm:$0xff] }
 0x106   :  { %943 = vmatprep.subr.bf16.mxu0 %v6742_v61  ;;  %v285_v20 = vmul.f32 %v7731_v11, %v7731_v11  ;;  %v223_v12 = vmul.f32 0.0078125, %v169_v4  ;;  %v224_v29 = vmul.f32 0.0078125, %v171_v25 }
 0x108   :  { %182 = vadd.xlane.f32.xlu1 %v7693_v2  ;;  %317 = vadd.xlane.f32.xlu0 %v281_v62  ;;  %v662_v62 = vmul.f32 %v7723_v10, %v7723_v10  ;;  %v7749_v30 = vsub.f32 %v7624_v14, %v223_v12  ;;  %v7757_v42 = vsub.f32 %v7626_v15, %v224_v29  ;;  %v7759_v14 = vld [vmem:[#allocation5 + $0xb8] sm:$0xff] }
 0x109   :  { %944 = vmatpush1.bf16.msra.mxu0 %v6744_v1  ;;  %v604_v36 = vpop.xlane.xlu0 %603  ;;  %v606_v44 = vpop.xlane.xlu1 %605  ;;  %v7783_v1 = vld [vmem:[#allocation5 + $0xc0] sm:$0xff]  ;;  %v7799_v12 = vld [vmem:[#allocation5 + $0xd8] sm:$0xff] }
 0x10a   :  { %v287_v38 = vmul.f32 %v7749_v30, %v7749_v30  ;;  %v288_v48 = vmul.f32 %v7757_v42, %v7757_v42  ;;  %v632_v49 = vmul.f32 0.0078125, %v606_v44 }
 0x10c   :  { %319 = vadd.xlane.f32.xlu1 %v282_v6  ;;  %184 = vadd.xlane.f32.xlu0 %v7701_v23  ;;  %v6745_v6 = vld [vmem:[#allocation10 + $0x54] ss:$8 sps:$4 sm:$0xff]   ;;  %v7773_v56 = vsub.f32 %v7634_v17, %v632_v49 }
 0x10d   :  { %945 = vmatprep.subr.bf16.mxu0 %v6745_v6  ;;  %v173_v15 = vpop.xlane.xlu0 %172  ;;  %v175_v61 = vpop.xlane.xlu1 %174  ;;  %v7791_v6 = vld [vmem:[#allocation5 + $0xc8] sm:$0xff] }
 0x10e   :  { %946 = vmatpush1.bf16.msra.mxu0 %v6747_v22  ;;  %v225_v55 = vmul.f32 0.0078125, %v173_v15 }
 0x10f   :  { %947 = vmatprep.subr.bf16.mxu0 %v6748_v27 }
 0x110   :  { %186 = vadd.xlane.f32.xlu1 %v7709_v33  ;;  %321 = vadd.xlane.f32.xlu0 %v283_v28  ;;  %v286_v28 = vmul.f32 %v7741_v7, %v7741_v7  ;;  %v7781_v63 = vsub.f32 %v7638_v18, %v225_v55 }
 0x112   :  { %948 = vmatpush1.bf16.msra.mxu0 %v6750_v31  ;;  %v289_v17 = vmul.f32 %v7781_v63, %v7781_v63 }
 0x113   :  { %949 = vmatprep.subr.bf16.mxu0 %v6751_v37 }
 0x114   :  { %323 = vadd.xlane.f32.xlu1 %v284_v39  ;;  %611 = vadd.xlane.f32.xlu0 %v7717_v47  ;;  %v631_v39 = vmul.f32 0.0078125, %v604_v36 }
 0x116   :  { %950 = vmatpush1.bf16.msra.mxu0 %v6753_v43  ;;  %v7765_v51 = vsub.f32 %v7630_v16, %v631_v39  ;;  %v664_v16 = vmul.f32 %v7773_v56, %v7773_v56 }
 0x118   :  { %613 = vadd.xlane.f32.xlu1 %v7725_v58  ;;  %679 = vadd.xlane.f32.xlu0 %v661_v53  ;;  %v7767_v53 = vld [vmem:[#allocation8 + $0x50] sm:$0xff]  ;;  %v663_v54 = vmul.f32 %v7765_v51, %v7765_v51 }
 0x11c   :  { %681 = vadd.xlane.f32.xlu1 %v662_v62  ;;  %188 = vadd.xlane.f32.xlu0 %v7733_v3  ;;  %v226_v62 = vmul.f32 0.0078125, %v175_v61  ;;  %v7810_v61 = vld [vmem:[#allocation8 + $0x60] sm:$0xff] }
 0x11e   :  { %v7789_v4 = vsub.f32 %v7640_v19, %v226_v62 }
 0x120   :  { %190 = vadd.xlane.f32.xlu1 %v7743_v24  ;;  %325 = vadd.xlane.f32.xlu0 %v285_v20  ;;  %v290_v18 = vmul.f32 %v7789_v4, %v7789_v4  ;;  %v7796_v20 = vld [vmem:[#allocation5 + $0xd0] sm:$0xff] }
 0x124   :  { %327 = vadd.xlane.f32.xlu1 %v286_v28  ;;  %192 = vadd.xlane.f32.xlu0 %v7751_v13 }
 0x128   :  { %194 = vadd.xlane.f32.xlu1 %v7759_v14  ;;  %329 = vadd.xlane.f32.xlu0 %v287_v38 }
 0x12c   :  { %331 = vadd.xlane.f32.xlu1 %v288_v48  ;;  %615 = vadd.xlane.f32.xlu0 %v7767_v53 }
 0x130   :  { %617 = vadd.xlane.f32.xlu1 %v7775_v60  ;;  %683 = vadd.xlane.f32.xlu0 %v663_v54 }
 0x134   :  { %685 = vadd.xlane.f32.xlu1 %v664_v16  ;;  %196 = vadd.xlane.f32.xlu0 %v7783_v1 }
 0x138   :  { %198 = vadd.xlane.f32.xlu1 %v7791_v6  ;;  %333 = vadd.xlane.f32.xlu0 %v289_v17 }
 0x13c   :  { %335 = vadd.xlane.f32.xlu1 %v290_v18  ;;  %200 = vadd.xlane.f32.xlu0 %v7796_v20 }
 0x140   :  { %202 = vadd.xlane.f32.xlu1 %v7799_v12 }
 0x17d   :  { %v310_v22 = vpop.xlane.xlu0 %309 }
 0x17e   :  { %v373_v19 = vmul.f32 0.0078125, %v310_v22 }
 0x180   :  { %v405_v25 = vadd.f32 1e-05, %v373_v19 }
 0x181   :  { %v312_v27 = vpop.xlane.xlu1 %311  ;;  %v177_v28 = vpop.xlane.xlu0 %176 }
 0x182   :  { %6794 = vrsqrt.f32 %v405_v25  ;;  %v374_v29 = vmul.f32 0.0078125, %v312_v27  ;;  %v227_v31 = vmul.f32 0.0078125, %v177_v28  ;;  %v7818_v25 = vld [vmem:[#allocation8 + $0x68] sm:$0xff] }
 0x184   :  { %v406_v36 = vadd.f32 1e-05, %v374_v29  ;;  %v7803_v37 = vsub.f32 %v7652_v35, %v227_v31 }
 0x185   :  { %v179_v38 = vpop.xlane.xlu1 %178  ;;  %v314_v39 = vpop.xlane.xlu0 %313 }
 0x186   :  { %6796 = vrsqrt.f32 %v406_v36  ;;  %v228_v43 = vmul.f32 0.0078125, %v179_v38  ;;  %v375_v44 = vmul.f32 0.0078125, %v314_v39  ;;  %v291_v48 = vmul.f32 %v7803_v37, %v7803_v37  ;;  %v7826_v36 = vld [vmem:[%s11048_s2] ss:$0 sm:$0xff] }
 0x188   :  { %v407_v49 = vadd.f32 1e-05, %v375_v44  ;;  %337 = vadd.xlane.f32.xlu0 %v291_v48  ;;  %v7808_v15 = vsub.f32 %v7661_v41, %v228_v43  ;;  %v7832_v44 = vld [vmem:[#allocation5 + $0xe0] sm:$0xff] }
 0x189   :  { %v316_v54 = vpop.xlane.xlu1 %315  ;;  %v608_v55 = vpop.xlane.xlu0 %607 }
 0x18a   :  { %6798 = vrsqrt.f32 %v407_v49  ;;  %v376_v35 = vmul.f32 0.0078125, %v316_v54  ;;  %v633_v16 = vmul.f32 0.0078125, %v608_v55  ;;  %v292_v62 = vmul.f32 %v7808_v15, %v7808_v15 }
 0x18c   :  { %v6795_v17 = vpop.eup %6794  ;;  %v408_v18 = vadd.f32 1e-05, %v376_v35  ;;  %339 = vadd.xlane.f32.xlu1 %v292_v62  ;;  %619 = vadd.xlane.f32.xlu0 %v7810_v61  ;;  %v7816_v22 = vsub.f32 %v7669_v46, %v633_v16  ;;  %v7841_v16 = vld [vmem:[%s11049_s3] ss:$0 sm:$0xff] }
 0x18d   :  { %v610_v41 = vpop.xlane.xlu1 %609  ;;  %v676_v19 = vpop.xlane.xlu0 %675  ;;  %v469_v27 = vmul.f32 %v6795_v17, %v7644_v26 }
 0x18e   :  { %6800 = vrsqrt.f32 %v408_v18  ;;  %v634_v28 = vmul.f32 0.0078125, %v610_v41  ;;  %v707_v29 = vmul.f32 0.0078125, %v676_v19  ;;  %v665_v31 = vmul.f32 %v7816_v22, %v7816_v22  ;;  %v7848_v19 = vld [vmem:[#allocation5 + $0xe8] sm:$0xff] }
 0x18f   :  { %v507_v49 = vmul.f32 %v7826_v36, %v469_v27 }
 0x190   :  { %v6797_v38 = vpop.eup %6796  ;;  %v723_v46 = vadd.f32 1e-05, %v707_v29  ;;  %621 = vadd.xlane.f32.xlu1 %v7818_v25  ;;  %687 = vadd.xlane.f32.xlu0 %v665_v31  ;;  %v7830_v39 = vsub.f32 %v7677_v52, %v634_v28 }
 0x191   :  { %v678_v26 = vpop.xlane.xlu1 %677  ;;  %v181_v43 = vpop.xlane.xlu0 %180  ;;  %v470_v48 = vmul.f32 %v6797_v38, %v7648_v32  ;;  %v545_v27 = vadd.f32 %v7841_v16, %v507_v49 }
 0x192   :  { %6802 = vrsqrt.f32 %v723_v46  ;;  %v708_v54 = vmul.f32 0.0078125, %v678_v26  ;;  %v229_v55 = vmul.f32 0.0078125, %v181_v43  ;;  %v666_v35 = vmul.f32 %v7830_v39, %v7830_v39 }
 0x193   :  { %v508_v52 = vmul.f32 %v7826_v36, %v470_v48 }
 0x194   :  { %v6799_v62 = vpop.eup %6798  ;;  %v724_v17 = vadd.f32 1e-05, %v708_v54  ;;  %689 = vadd.xlane.f32.xlu1 %v666_v35  ;;  %204 = vadd.xlane.f32.xlu0 %v7832_v44  ;;  %v7846_v32 = vsub.f32 %v7685_v59, %v229_v55  ;;  %v7862_v54 = vld [vmem:[#allocation5 + $0xf0] sm:$0xff] }
 0x195   :  { %v183_v18 = vpop.xlane.xlu1 %182  ;;  %v318_v41 = vpop.xlane.xlu0 %317  ;;  %v546_v28 = vadd.f32 %v7841_v16, %v508_v52  ;;  %v471_v29 = vmul.f32 %v6799_v62, %v7650_v34 }
 0x196   :  { %6804 = vrsqrt.f32 %v724_v17  ;;  %v230_v31 = vmul.f32 0.0078125, %v183_v18  ;;  %v377_v38 = vmul.f32 0.0078125, %v318_v41  ;;  %v293_v46 = vmul.f32 %v7846_v32, %v7846_v32 }
 0x197   :  { %v7855_v26 = vpack.c.bf16 %v546_v28, %v545_v27  ;;  %v509_v35 = vmul.f32 %v7826_v36, %v471_v29  ;;  %v7874_v29 = vld [vmem:[#allocation5 + $0xf8] sm:$0xff] }
 0x198   :  { %v6801_v59 = vpop.eup %6800  ;;  %v409_v43 = vadd.f32 1e-05, %v377_v38  ;;  %206 = vadd.xlane.f32.xlu1 %v7848_v19  ;;  %341 = vadd.xlane.f32.xlu0 %v293_v46  ;;  %v7859_v48 = vsub.f32 %v7693_v2, %v230_v31 }
 0x199   :  { %v320_v49 = vpop.xlane.xlu1 %319  ;;  %1273 = vmatmul.mubr.bf16.vlgmr.msra.gmra.mrb[0].mxu1 %v7855_v26  ;;  %v185_v34 = vpop.xlane.xlu0 %184  ;;  %v472_v55 = vmul.f32 %v6801_v59, %v7659_v40  ;;  %v547_v31 = vadd.f32 %v7841_v16, %v509_v35 }
 0x19a   :  { %6806 = vrsqrt.f32 %v409_v43  ;;  %v378_v52 = vmul.f32 0.0078125, %v320_v49  ;;  %v231_v62 = vmul.f32 0.0078125, %v185_v34  ;;  %v294_v17 = vmul.f32 %v7859_v48, %v7859_v48  ;;  %1282 = vmatprep.mubr.bf16.mxu1 %v11060_v5 }
 0x19b   :  { %v510_v2 = vmul.f32 %v7826_v36, %v472_v55 }
 0x19c   :  { %v6803_v18 = vpop.eup %6802  ;;  %v410_v41 = vadd.f32 1e-05, %v378_v52  ;;  %343 = vadd.xlane.f32.xlu1 %v294_v17  ;;  %208 = vadd.xlane.f32.xlu0 %v7862_v54  ;;  %v7872_v27 = vsub.f32 %v7701_v23, %v231_v62  ;;  %v7884_v23 = vld [vmem:[%s11050_s4] ss:$0 sm:$0xff]  ;;  %v7893_v17 = vld [vmem:[#allocation8 + $0x70] sm:$0xff] }
 0x19d   :  { %v187_v40 = vpop.xlane.xlu1 %186  ;;  %v322_v28 = vpop.xlane.xlu0 %321  ;;  %v548_v38 = vadd.f32 %v7841_v16, %v510_v2  ;;  %v755_v46 = vmul.f32 %v6803_v18, %v7667_v45 }
 0x19e   :  { %6808 = vrsqrt.f32 %v410_v41  ;;  %v232_v59 = vmul.f32 0.0078125, %v187_v40  ;;  %v379_v43 = vmul.f32 0.0078125, %v322_v28  ;;  %v295_v49 = vmul.f32 %v7872_v27, %v7872_v27 }
 0x19f   :  { %v7886_v34 = vpack.c.bf16 %v548_v38, %v547_v31  ;;  %v777_v18 = vmul.f32 %v7884_v23, %v755_v46 }
 0x1a0   :  { %v6805_v55 = vpop.eup %6804  ;;  %v411_v52 = vadd.f32 1e-05, %v379_v43  ;;  %210 = vadd.xlane.f32.xlu1 %v7874_v29  ;;  %345 = vadd.xlane.f32.xlu0 %v295_v49  ;;  %v7890_v45 = vsub.f32 %v7709_v33, %v232_v59  ;;  %v7903_v33 = vld [vmem:[%s11051_s5] ss:$0 sm:$0xff]  ;;  %v7910_v49 = vld [vmem:[#allocation8 + $0x78] sm:$0xff] }
 0x1a1   :  { %v324_v35 = vpop.xlane.xlu1 %323  ;;  %1283 = vmatmul.mubr.bf16.gmra.mrb[4].mxu1 %v7886_v34  ;;  %v612_v62 = vpop.xlane.xlu0 %611  ;;  %v756_v2 = vmul.f32 %v6805_v55, %v7675_v50  ;;  %v799_v55 = vadd.f32 %v7903_v33, %v777_v18 }
 0x1a2   :  { %6810 = vrsqrt.f32 %v411_v52  ;;  %v380_v41 = vmul.f32 0.0078125, %v324_v35  ;;  %v635_v40 = vmul.f32 0.0078125, %v612_v62  ;;  %v296_v28 = vmul.f32 %v7890_v45, %v7890_v45  ;;  %1292 = vmatprep.mubr.bf16.mxu1 %v11060_v5 }
 0x1a3   :  { %v778_v31 = vmul.f32 %v7884_v23, %v756_v2 }
 0x1a4   :  { %v6807_v38 = vpop.eup %6806  ;;  %v412_v59 = vadd.f32 1e-05, %v380_v41  ;;  %347 = vadd.xlane.f32.xlu1 %v296_v28  ;;  %623 = vadd.xlane.f32.xlu0 %v7893_v17  ;;  %v7908_v50 = vsub.f32 %v7717_v47, %v635_v40 }
 0x1a5   :  { %v614_v46 = vpop.xlane.xlu1 %613  ;;  %v680_v43 = vpop.xlane.xlu0 %679  ;;  %v800_v52 = vadd.f32 %v7903_v33, %v778_v31  ;;  %v473_v35 = vmul.f32 %v6807_v38, %v7683_v57 }
 0x1a6   :  { %6812 = vrsqrt.f32 %v412_v59  ;;  %v636_v62 = vmul.f32 0.0078125, %v614_v46  ;;  %v709_v2 = vmul.f32 0.0078125, %v680_v43  ;;  %v667_v41 = vmul.f32 %v7908_v50, %v7908_v50 }
 0x1a7   :  { %v7917_v28 = vpack.c.bf16 %v800_v52, %v799_v55  ;;  %v511_v38 = vmul.f32 %v7826_v36, %v473_v35  ;;  %v11336_v55 = vmov 0  }
 0x1a8   :  { %v6809_v47 = vpop.eup %6808  ;;  %v725_v40 = vadd.f32 1e-05, %v709_v2  ;;  %625 = vadd.xlane.f32.xlu1 %v7910_v49  ;;  %691 = vadd.xlane.f32.xlu0 %v667_v41  ;;  %v7921_v5 = vsub.f32 %v7725_v58, %v636_v62 }
 0x1a9   :  { %11335 = vst [vmem:[#allocation19_spill] sm:$0xff] %v7917_v28  ;;  %v682_v18 = vpop.xlane.xlu1 %681  ;;  %968 = vmatmul.mubr.bf16.vlgmr.msra.gmra.mrb[0].mxu0 %v7917_v28  ;;  %1293 = vmatmul.mubr.bf16.gmra.mrb[8].mxu1 %v7917_v28  ;;  %v189_v57 = vpop.xlane.xlu0 %188  ;;  %v474_v31 = vmul.f32 %v6809_v47, %v7691_v0  ;;  %v549_v41 = vadd.f32 %v7841_v16, %v511_v38 }
 0x1aa   :  { %6814 = vrsqrt.f32 %v725_v40  ;;  %v710_v59 = vmul.f32 0.0078125, %v682_v18  ;;  %v233_v46 = vmul.f32 0.0078125, %v189_v57  ;;  %v668_v43 = vmul.f32 %v7921_v5, %v7921_v5  ;;  %1302 = vmatprep.mubr.bf16.mxu1 %v11336_v55  ;;  %977 = vmatprep.mubr.bf16.mxu0 %v11336_v55 }
 0x1ab   :  { %v512_v58 = vmul.f32 %v7826_v36, %v474_v31 }
 0x1ac   :  { %v6811_v52 = vpop.eup %6810  ;;  %v726_v62 = vadd.f32 1e-05, %v710_v59  ;;  %693 = vadd.xlane.f32.xlu1 %v668_v43  ;;  %v7933_v2 = vsub.f32 %v7733_v3, %v233_v46 }
 0x1ad   :  { %v191_v0 = vpop.xlane.xlu1 %190  ;;  %v326_v35 = vpop.xlane.xlu0 %325  ;;  %v550_v47 = vadd.f32 %v7841_v16, %v512_v58  ;;  %v475_v40 = vmul.f32 %v6811_v52, %v7699_v21 }
 0x1ae   :  { %6816 = vrsqrt.f32 %v726_v62  ;;  %v234_v18 = vmul.f32 0.0078125, %v191_v0  ;;  %v381_v57 = vmul.f32 0.0078125, %v326_v35  ;;  %v297_v31 = vmul.f32 %v7933_v2, %v7933_v2 }
 0x1af   :  { %v7940_v28 = vpack.c.bf16 %v550_v47, %v549_v41  ;;  %v513_v58 = vmul.f32 %v7826_v36, %v475_v40 }
 0x1b0   :  { %v6813_v59 = vpop.eup %6812  ;;  %v413_v43 = vadd.f32 1e-05, %v381_v57  ;;  %349 = vadd.xlane.f32.xlu0 %v297_v31  ;;  %v7943_v3 = vsub.f32 %v7743_v24, %v234_v18 }
 0x1b1   :  { %v328_v46 = vpop.xlane.xlu1 %327  ;;  %1303 = vmatmul.mubr.bf16.gmra.mrb[12].mxu1 %v7940_v28  ;;  %v193_v38 = vpop.xlane.xlu0 %192  ;;  %v476_v21 = vmul.f32 %v6813_v59, %v7707_v8  ;;  %v551_v40 = vadd.f32 %v7841_v16, %v513_v58 }
 0x1b2   :  { %6818 = vrsqrt.f32 %v413_v43  ;;  %v382_v52 = vmul.f32 0.0078125, %v328_v46  ;;  %v235_v62 = vmul.f32 0.0078125, %v193_v38  ;;  %v298_v0 = vmul.f32 %v7943_v3, %v7943_v3  ;;  %1312 = vmatprep.mubr.bf16.mxu1 %v11336_v55 }
 0x1b3   :  { %v514_v35 = vmul.f32 %v7826_v36, %v476_v21 }
 0x1b4   :  { %v6815_v24 = vpop.eup %6814  ;;  %v414_v41 = vadd.f32 1e-05, %v382_v52  ;;  %351 = vadd.xlane.f32.xlu1 %v298_v0  ;;  %v7953_v47 = vsub.f32 %v7751_v13, %v235_v62 }
 0x1b5   :  { %v195_v18 = vpop.xlane.xlu1 %194  ;;  %v330_v8 = vpop.xlane.xlu0 %329  ;;  %v552_v57 = vadd.f32 %v7841_v16, %v514_v35  ;;  %v757_v31 = vmul.f32 %v6815_v24, %v7715_v9 }
 0x1b6   :  { %6820 = vrsqrt.f32 %v414_v41  ;;  %v236_v59 = vmul.f32 0.0078125, %v195_v18  ;;  %v383_v43 = vmul.f32 0.0078125, %v330_v8  ;;  %v299_v46 = vmul.f32 %v7953_v47, %v7953_v47 }
 0x1b7   :  { %v7960_v38 = vpack.c.bf16 %v552_v57, %v551_v40  ;;  %v779_v0 = vmul.f32 %v7884_v23, %v757_v31 }
 0x1b8   :  { %v6817_v21 = vpop.eup %6816  ;;  %v415_v52 = vadd.f32 1e-05, %v383_v43  ;;  %353 = vadd.xlane.f32.xlu0 %v299_v46  ;;  %v7963_v13 = vsub.f32 %v7759_v14, %v236_v59 }
 0x1b9   :  { %v332_v62 = vpop.xlane.xlu1 %331  ;;  %1313 = vmatmul.mubr.bf16.gmra.mrb[16].mxu1 %v7960_v38  ;;  %v616_v58 = vpop.xlane.xlu0 %615  ;;  %v758_v9 = vmul.f32 %v6817_v21, %v7723_v10  ;;  %v801_v31 = vadd.f32 %v7903_v33, %v779_v0 }
 0x1ba   :  { %6822 = vrsqrt.f32 %v415_v52  ;;  %v384_v35 = vmul.f32 0.0078125, %v332_v62  ;;  %v637_v24 = vmul.f32 0.0078125, %v616_v58  ;;  %v300_v41 = vmul.f32 %v7963_v13, %v7963_v13  ;;  %1322 = vmatprep.mubr.bf16.mxu1 %v11336_v55 }
 0x1bb   :  { %v780_v18 = vmul.f32 %v7884_v23, %v758_v9 }
 0x1bc   :  { %v6819_v14 = vpop.eup %6818  ;;  %v416_v8 = vadd.f32 1e-05, %v384_v35  ;;  %355 = vadd.xlane.f32.xlu1 %v300_v41  ;;  %v7973_v40 = vsub.f32 %v7767_v53, %v637_v24 }
 0x1bd   :  { %v618_v57 = vpop.xlane.xlu1 %617  ;;  %v684_v10 = vpop.xlane.xlu0 %683  ;;  %v802_v59 = vadd.f32 %v7903_v33, %v780_v18  ;;  %v477_v43 = vmul.f32 %v6819_v14, %v7731_v11 }
 0x1be   :  { %6824 = vrsqrt.f32 %v416_v8  ;;  %v638_v46 = vmul.f32 0.0078125, %v618_v57  ;;  %v711_v21 = vmul.f32 0.0078125, %v684_v10  ;;  %v669_v52 = vmul.f32 %v7973_v40, %v7973_v40 }
 0x1bf   :  { %v7980_v62 = vpack.c.bf16 %v802_v59, %v801_v31  ;;  %v515_v24 = vmul.f32 %v7826_v36, %v477_v43 }
 0x1c0   :  { %v6821_v58 = vpop.eup %6820  ;;  %v727_v9 = vadd.f32 1e-05, %v711_v21  ;;  %695 = vadd.xlane.f32.xlu0 %v669_v52  ;;  %v7983_v53 = vsub.f32 %v7775_v60, %v638_v46 }
 0x1c1   :  { %v686_v35 = vpop.xlane.xlu1 %685  ;;  %978 = vmatmul.mubr.bf16.gmra.mrb[4].mxu0 %v7980_v62  ;;  %1323 = vmatmul.mubr.bf16.gmra.mrb[20].mxu1 %v7980_v62  ;;  %v197_v11 = vpop.xlane.xlu0 %196  ;;  %v478_v0 = vmul.f32 %v6821_v58, %v7741_v7  ;;  %v553_v59 = vadd.f32 %v7841_v16, %v515_v24 }
 0x1c2   :  { %6826 = vrsqrt.f32 %v727_v9  ;;  %v712_v41 = vmul.f32 0.0078125, %v686_v35  ;;  %v237_v18 = vmul.f32 0.0078125, %v197_v11  ;;  %v670_v14 = vmul.f32 %v7983_v53, %v7983_v53  ;;  %1332 = vmatprep.mubr.bf16.mxu1 %v11336_v55  ;;  %987 = vmatprep.mubr.bf16.mxu0 %v11336_v55 }
 0x1c3   :  { %v516_v60 = vmul.f32 %v7826_v36, %v478_v0 }
 0x1c4   :  { %v6823_v8 = vpop.eup %6822  ;;  %v728_v57 = vadd.f32 1e-05, %v712_v41  ;;  %697 = vadd.xlane.f32.xlu1 %v670_v14  ;;  %v7995_v10 = vsub.f32 %v7783_v1, %v237_v18 }
 0x1c5   :  { %v199_v7 = vpop.xlane.xlu1 %198  ;;  %v334_v31 = vpop.xlane.xlu0 %333  ;;  %v554_v43 = vadd.f32 %v7841_v16, %v516_v60  ;;  %v479_v46 = vmul.f32 %v6823_v8, %v7749_v30 }
 0x1c6   :  { %6828 = vrsqrt.f32 %v728_v57  ;;  %v238_v21 = vmul.f32 0.0078125, %v199_v7  ;;  %v385_v52 = vmul.f32 0.0078125, %v334_v31  ;;  %v301_v58 = vmul.f32 %v7995_v10, %v7995_v10 }
 0x1c7   :  { %v8002_v9 = vpack.c.bf16 %v554_v43, %v553_v59  ;;  %v517_v41 = vmul.f32 %v7826_v36, %v479_v46 }
 0x1c8   :  { %v6825_v35 = vpop.eup %6824  ;;  %v417_v11 = vadd.f32 1e-05, %v385_v52  ;;  %357 = vadd.xlane.f32.xlu0 %v301_v58  ;;  %v8005_v1 = vsub.f32 %v7791_v6, %v238_v21 }
 0x1c9   :  { %v336_v0 = vpop.xlane.xlu1 %335  ;;  %1333 = vmatmul.mubr.bf16.gmra.mrb[24].mxu1 %v8002_v9  ;;  %v201_v24 = vpop.xlane.xlu0 %200  ;;  %v480_v30 = vmul.f32 %v6825_v35, %v7757_v42  ;;  %v555_v42 = vadd.f32 %v7841_v16, %v517_v41 }
 0x1ca   :  { %6830 = vrsqrt.f32 %v417_v11  ;;  %v386_v18 = vmul.f32 0.0078125, %v336_v0  ;;  %v239_v14 = vmul.f32 0.0078125, %v201_v24  ;;  %v302_v60 = vmul.f32 %v8005_v1, %v8005_v1  ;;  %1342 = vmatprep.mubr.bf16.mxu1 %v11336_v55 }
 0x1cb   :  { %v518_v8 = vmul.f32 %v7826_v36, %v480_v30 }
 0x1cc   :  { %v6827_v6 = vpop.eup %6826  ;;  %v418_v57 = vadd.f32 1e-05, %v386_v18  ;;  %359 = vadd.xlane.f32.xlu1 %v302_v60  ;;  %v8015_v7 = vsub.f32 %v7796_v20, %v239_v14 }
 0x1cd   :  { %v203_v31 = vpop.xlane.xlu1 %202  ;;  %v556_v59 = vadd.f32 %v7841_v16, %v518_v8  ;;  %v759_v43 = vmul.f32 %v6827_v6, %v7765_v51 }
 0x1ce   :  { %6832 = vrsqrt.f32 %v418_v57  ;;  %v240_v46 = vmul.f32 0.0078125, %v203_v31  ;;  %v303_v21 = vmul.f32 %v8015_v7, %v8015_v7 }
 0x1cf   :  { %v8022_v52 = vpack.c.bf16 %v556_v59, %v555_v42  ;;  %v781_v11 = vmul.f32 %v7884_v23, %v759_v43 }
 0x1d0   :  { %v6829_v58 = vpop.eup %6828  ;;  %361 = vadd.xlane.f32.xlu0 %v303_v21  ;;  %v8025_v35 = vsub.f32 %v7799_v12, %v240_v46 }
 0x1d1   :  { %1343 = vmatmul.mubr.bf16.gmra.mrb[28].mxu1 %v8022_v52  ;;  %v760_v20 = vmul.f32 %v6829_v58, %v7773_v56  ;;  %v803_v30 = vadd.f32 %v7903_v33, %v781_v11 }
 0x1d2   :  { %v304_v51 = vmul.f32 %v8025_v35, %v8025_v35  ;;  %1352 = vmatprep.mubr.bf16.mxu1 %v11336_v55 }
 0x1d3   :  { %v782_v0 = vmul.f32 %v7884_v23, %v760_v20 }
 0x1d4   :  { %v6831_v24 = vpop.eup %6830  ;;  %363 = vadd.xlane.f32.xlu1 %v304_v51 }
 0x1d5   :  { %v804_v12 = vadd.f32 %v7903_v33, %v782_v0  ;;  %v481_v41 = vmul.f32 %v6831_v24, %v7781_v63 }
 0x1d7   :  { %v8037_v18 = vpack.c.bf16 %v804_v12, %v803_v30  ;;  %v519_v60 = vmul.f32 %v7826_v36, %v481_v41 }
 0x1d8   :  { %v6833_v56 = vpop.eup %6832 }
 0x1d9   :  { %988 = vmatmul.mubr.bf16.gmra.mrb[8].mxu0 %v8037_v18  ;;  %1353 = vmatmul.mubr.bf16.gmra.mrb[32].mxu1 %v8037_v18  ;;  %v482_v14 = vmul.f32 %v6833_v56, %v7789_v4  ;;  %v557_v6 = vadd.f32 %v7841_v16, %v519_v60 }
 0x1da   :  { %1362 = vmatprep.mubr.bf16.mxu1 %v11336_v55  ;;  %997 = vmatprep.mubr.bf16.mxu0 %v11336_v55 }
 0x1db   :  { %v520_v8 = vmul.f32 %v7826_v36, %v482_v14 }
 0x1dd   :  { %v558_v63 = vadd.f32 %v7841_v16, %v520_v8 }
 0x1df   :  { %v8048_v57 = vpack.c.bf16 %v558_v63, %v557_v6 }
 0x1e1   :  { %1363 = vmatmul.mubr.bf16.gmra.mrb[36].mxu1 %v8048_v57 }
 0x1e2   :  { %1372 = vmatprep.mubr.bf16.mxu1 %v11336_v55 }
 0x215   :  { %v338_v31 = vpop.xlane.xlu0 %337 }
 0x216   :  { %v387_v4 = vmul.f32 0.0078125, %v338_v31 }
 0x218   :  { %v419_v42 = vadd.f32 1e-05, %v387_v4 }
 0x219   :  { %v340_v59 = vpop.xlane.xlu1 %339  ;;  %v620_v43 = vpop.xlane.xlu0 %619 }
 0x21a   :  { %6834 = vrsqrt.f32 %v419_v42  ;;  %v388_v46 = vmul.f32 0.0078125, %v340_v59  ;;  %v639_v21 = vmul.f32 0.0078125, %v620_v43 }
 0x21c   :  { %v420_v58 = vadd.f32 1e-05, %v388_v46  ;;  %v8053_v20 = vsub.f32 %v7810_v61, %v639_v21 }
 0x21d   :  { %v622_v11 = vpop.xlane.xlu1 %621  ;;  %v688_v51 = vpop.xlane.xlu0 %687 }
 0x21e   :  { %6836 = vrsqrt.f32 %v420_v58  ;;  %v640_v0 = vmul.f32 0.0078125, %v622_v11  ;;  %v713_v24 = vmul.f32 0.0078125, %v688_v51  ;;  %v671_v30 = vmul.f32 %v8053_v20, %v8053_v20 }
 0x220   :  { %v729_v12 = vadd.f32 1e-05, %v713_v24  ;;  %699 = vadd.xlane.f32.xlu0 %v671_v30  ;;  %v8058_v41 = vsub.f32 %v7818_v25, %v640_v0 }
 0x221   :  { %v690_v56 = vpop.xlane.xlu1 %689  ;;  %v205_v14 = vpop.xlane.xlu0 %204 }
 0x222   :  { %6838 = vrsqrt.f32 %v729_v12  ;;  %v714_v60 = vmul.f32 0.0078125, %v690_v56  ;;  %v241_v8 = vmul.f32 0.0078125, %v205_v14  ;;  %v672_v61 = vmul.f32 %v8058_v41, %v8058_v41 }
 0x224   :  { %v6835_v6 = vpop.eup %6834  ;;  %v730_v63 = vadd.f32 1e-05, %v714_v60  ;;  %701 = vadd.xlane.f32.xlu1 %v672_v61  ;;  %v8063_v31 = vsub.f32 %v7832_v44, %v241_v8 }
 0x225   :  { %v207_v4 = vpop.xlane.xlu1 %206  ;;  %v342_v42 = vpop.xlane.xlu0 %341  ;;  %v483_v59 = vmul.f32 %v6835_v6, %v7803_v37 }
 0x226   :  { %6840 = vrsqrt.f32 %v730_v63  ;;  %v242_v25 = vmul.f32 0.0078125, %v207_v4  ;;  %v389_v43 = vmul.f32 0.0078125, %v342_v42  ;;  %v305_v46 = vmul.f32 %v8063_v31, %v8063_v31 }
 0x227   :  { %v521_v24 = vmul.f32 %v7826_v36, %v483_v59 }
 0x228   :  { %v6837_v21 = vpop.eup %6836  ;;  %v421_v58 = vadd.f32 1e-05, %v389_v43  ;;  %365 = vadd.xlane.f32.xlu0 %v305_v46  ;;  %v8069_v11 = vsub.f32 %v7848_v19, %v242_v25 }
 0x229   :  { %v344_v51 = vpop.xlane.xlu1 %343  ;;  %v209_v0 = vpop.xlane.xlu0 %208  ;;  %v484_v44 = vmul.f32 %v6837_v21, %v7808_v15  ;;  %v559_v15 = vadd.f32 %v7841_v16, %v521_v24 }
 0x22a   :  { %6842 = vrsqrt.f32 %v421_v58  ;;  %v390_v37 = vmul.f32 0.0078125, %v344_v51  ;;  %v243_v30 = vmul.f32 0.0078125, %v209_v0  ;;  %v306_v12 = vmul.f32 %v8069_v11, %v8069_v11 }
 0x22b   :  { %v522_v56 = vmul.f32 %v7826_v36, %v484_v44 }
 0x22c   :  { %v6839_v14 = vpop.eup %6838  ;;  %v422_v60 = vadd.f32 1e-05, %v390_v37  ;;  %367 = vadd.xlane.f32.xlu1 %v306_v12  ;;  %v8077_v19 = vsub.f32 %v7862_v54, %v243_v30 }
 0x22d   :  { %v211_v8 = vpop.xlane.xlu1 %210  ;;  %v346_v61 = vpop.xlane.xlu0 %345  ;;  %v560_v6 = vadd.f32 %v7841_v16, %v522_v56  ;;  %v761_v63 = vmul.f32 %v6839_v14, %v7816_v22 }
 0x22e   :  { %6844 = vrsqrt.f32 %v422_v60  ;;  %v244_v4 = vmul.f32 0.0078125, %v211_v8  ;;  %v391_v42 = vmul.f32 0.0078125, %v346_v61  ;;  %v307_v59 = vmul.f32 %v8077_v19, %v8077_v19 }
 0x22f   :  { %v8084_v25 = vpack.c.bf16 %v560_v6, %v559_v15  ;;  %v783_v51 = vmul.f32 %v7884_v23, %v761_v63 }
 0x230   :  { %v6841_v43 = vpop.eup %6840  ;;  %v423_v46 = vadd.f32 1e-05, %v391_v42  ;;  %369 = vadd.xlane.f32.xlu0 %v307_v59  ;;  %v8087_v54 = vsub.f32 %v7874_v29, %v244_v4 }
 0x231   :  { %v348_v21 = vpop.xlane.xlu1 %347  ;;  %1373 = vmatmul.mubr.bf16.gmra.mrb[40].mxu1 %v8084_v25  ;;  %v624_v58 = vpop.xlane.xlu0 %623  ;;  %v762_v22 = vmul.f32 %v6841_v43, %v7830_v39  ;;  %v805_v14 = vadd.f32 %v7903_v33, %v783_v51 }
 0x232   :  { %6846 = vrsqrt.f32 %v423_v46  ;;  %v392_v0 = vmul.f32 0.0078125, %v348_v21  ;;  %v641_v44 = vmul.f32 0.0078125, %v624_v58  ;;  %v308_v24 = vmul.f32 %v8087_v54, %v8087_v54  ;;  %1382 = vmatprep.mubr.bf16.mxu1 %v11336_v55 }
 0x233   :  { %v784_v37 = vmul.f32 %v7884_v23, %v762_v22 }
 0x234   :  { %v6843_v29 = vpop.eup %6842  ;;  %v424_v30 = vadd.f32 1e-05, %v392_v0  ;;  %371 = vadd.xlane.f32.xlu1 %v308_v24  ;;  %v8097_v12 = vsub.f32 %v7893_v17, %v641_v44 }
 0x235   :  { %v626_v56 = vpop.xlane.xlu1 %625  ;;  %v692_v39 = vpop.xlane.xlu0 %691  ;;  %v806_v60 = vadd.f32 %v7903_v33, %v784_v37  ;;  %v485_v8 = vmul.f32 %v6843_v29, %v7846_v32 }
 0x236   :  { %6848 = vrsqrt.f32 %v424_v30  ;;  %v642_v61 = vmul.f32 0.0078125, %v626_v56  ;;  %v715_v15 = vmul.f32 0.0078125, %v692_v39  ;;  %v673_v6 = vmul.f32 %v8097_v12, %v8097_v12 }
 0x237   :  { %v8104_v63 = vpack.c.bf16 %v806_v60, %v805_v14  ;;  %v523_v43 = vmul.f32 %v7826_v36, %v485_v8 }
 0x238   :  { %v6845_v4 = vpop.eup %6844  ;;  %v731_v42 = vadd.f32 1e-05, %v715_v15  ;;  %703 = vadd.xlane.f32.xlu0 %v673_v6  ;;  %v8107_v17 = vsub.f32 %v7910_v49, %v642_v61 }
 0x239   :  { %v694_v59 = vpop.xlane.xlu1 %693  ;;  %998 = vmatmul.mubr.bf16.gmra.mrb[12].mxu0 %v8104_v63  ;;  %1383 = vmatmul.mubr.bf16.gmra.mrb[44].mxu1 %v8104_v63  ;;  %v486_v32 = vmul.f32 %v6845_v4, %v7859_v48  ;;  %v561_v0 = vadd.f32 %v7841_v16, %v523_v43 }
 0x23a   :  { %6850 = vrsqrt.f32 %v731_v42  ;;  %v716_v46 = vmul.f32 0.0078125, %v694_v59  ;;  %v674_v21 = vmul.f32 %v8107_v17, %v8107_v17  ;;  %1392 = vmatprep.mubr.bf16.mxu1 %v11336_v55  ;;  %1007 = vmatprep.mubr.bf16.mxu0 %v11336_v55 }
 0x23b   :  { %v524_v49 = vmul.f32 %v7826_v36, %v486_v32 }
 0x23c   :  { %v6847_v58 = vpop.eup %6846  ;;  %v732_v22 = vadd.f32 1e-05, %v716_v46  ;;  %705 = vadd.xlane.f32.xlu1 %v674_v21  ;;  %v6756_v46 = vld [vmem:[#allocation11 + $0xc] ss:$16 sps:$4 sm:$0xff]  }
 0x23d   :  { %v350_v51 = vpop.xlane.xlu0 %349  ;;  %v562_v48 = vadd.f32 %v7841_v16, %v524_v49  ;;  %v487_v44 = vmul.f32 %v6847_v58, %v7872_v27  ;;  %1513 = vmatprep.subr.bf16.mxu0 %v6756_v46  ;;  %6675 = vmatprep.subr.bf16.mxu1 %v6756_v46  ;;  %v6763_v46 = vld [vmem:[#allocation11 + $0x68] ss:$16 sps:$4 sm:$0xff]  }
 0x23e   :  { %6852 = vrsqrt.f32 %v732_v22  ;;  %v393_v24 = vmul.f32 0.0078125, %v350_v51  ;;  %v6754_v22 = vld [vmem:[#allocation11 + $0x8] ss:$16 sps:$4 sm:$0xff]  }
 0x23f   :  { %v8121_v37 = vpack.c.bf16 %v562_v48, %v561_v0  ;;  %v525_v14 = vmul.f32 %v7826_v36, %v487_v44  ;;  %1514 = vmatpush1.bf16.msra.mxu0 %v6754_v22  ;;  %6683 = vmatpush1.bf16.msra.mxu1 %v6754_v22  ;;  %v6759_v44 = vld [vmem:[#allocation11 + $0x2c] ss:$16 sps:$4 sm:$0xff]  }
 0x240   :  { %v6849_v29 = vpop.eup %6848  ;;  %v425_v30 = vadd.f32 1e-05, %v393_v24  ;;  %1515 = vmatprep.subr.bf16.mxu0 %v6759_v44  ;;  %6676 = vmatprep.subr.bf16.mxu1 %v6759_v44 }
 0x241   :  { %v352_v56 = vpop.xlane.xlu1 %351  ;;  %1393 = vmatmul.mubr.bf16.gmra.mrb[48].mxu1 %v8121_v37  ;;  %v488_v39 = vmul.f32 %v6849_v29, %v7890_v45  ;;  %v563_v6 = vadd.f32 %v7841_v16, %v525_v14 }
 0x242   :  { %6854 = vrsqrt.f32 %v425_v30  ;;  %v394_v60 = vmul.f32 0.0078125, %v352_v56  ;;  %1402 = vmatprep.mubr.bf16.mxu1 %v11336_v55  ;;  %v6757_v56 = vld [vmem:[#allocation11 + $0x28] ss:$16 sps:$4 sm:$0xff]  }
 0x243   :  { %v526_v8 = vmul.f32 %v7826_v36, %v488_v39  ;;  %1516 = vmatpush1.bf16.msra.mxu0 %v6757_v56  ;;  %6684 = vmatpush1.bf16.msra.mxu1 %v6757_v56 }
 0x244   :  { %v6851_v27 = vpop.eup %6850  ;;  %v426_v61 = vadd.f32 1e-05, %v394_v60 }
 0x245   :  { %v354_v15 = vpop.xlane.xlu0 %353  ;;  %v564_v4 = vadd.f32 %v7841_v16, %v526_v8  ;;  %v763_v42 = vmul.f32 %v6851_v27, %v7908_v50  ;;  %v6762_v27 = vld [vmem:[#allocation11 + $0x4c] ss:$16 sps:$4 sm:$0xff]  }
 0x246   :  { %6856 = vrsqrt.f32 %v426_v61  ;;  %v395_v59 = vmul.f32 0.0078125, %v354_v15  ;;  %1517 = vmatprep.subr.bf16.mxu0 %v6762_v27  ;;  %6677 = vmatprep.subr.bf16.mxu1 %v6762_v27 }
 0x247   :  { %v8131_v45 = vpack.c.bf16 %v564_v4, %v563_v6  ;;  %v785_v58 = vmul.f32 %v7884_v23, %v763_v42  ;;  %v6760_v6 = vld [vmem:[#allocation11 + $0x48] ss:$16 sps:$4 sm:$0xff]   ;;  %v6765_v4 = vld [vmem:[#allocation11 + $0x6c] ss:$16 sps:$4 sm:$0xff]  }
 0x248   :  { %v6853_v32 = vpop.eup %6852  ;;  %v427_v43 = vadd.f32 1e-05, %v395_v59  ;;  %1518 = vmatpush1.bf16.msra.mxu0 %v6760_v6  ;;  %6685 = vmatpush1.bf16.msra.mxu1 %v6760_v6 }
 0x249   :  { %v356_v21 = vpop.xlane.xlu1 %355  ;;  %1403 = vmatmul.mubr.bf16.gmra.mrb[52].mxu1 %v8131_v45  ;;  %v764_v49 = vmul.f32 %v6853_v32, %v7921_v5  ;;  %v807_v29 = vadd.f32 %v7903_v33, %v785_v58  ;;  %1519 = vmatprep.subr.bf16.mxu0 %v6765_v4 }
 0x24a   :  { %6858 = vrsqrt.f32 %v427_v43  ;;  %v396_v51 = vmul.f32 0.0078125, %v356_v21  ;;  %1412 = vmatprep.mubr.bf16.mxu1 %v11336_v55  ;;  %6678 = vmatprep.subr.bf16.mxu1 %v6765_v4 }
 0x24b   :  { %v786_v50 = vmul.f32 %v7884_v23, %v764_v49 }
 0x24c   :  { %v6855_v0 = vpop.eup %6854  ;;  %v428_v48 = vadd.f32 1e-05, %v396_v51  ;;  %1520 = vmatpush1.bf16.msra.mxu0 %v6763_v46  ;;  %6686 = vmatpush1.bf16.msra.mxu1 %v6763_v46 }
 0x24d   :  { %v696_v24 = vpop.xlane.xlu0 %695  ;;  %v808_v5 = vadd.f32 %v7903_v33, %v786_v50  ;;  %v489_v30 = vmul.f32 %v6855_v0, %v7933_v2 }
 0x24e   :  { %6860 = vrsqrt.f32 %v428_v48  ;;  %v717_v39 = vmul.f32 0.0078125, %v696_v24  ;;  %v6768_v48 = vld [vmem:[#allocation11 + $0x8c] ss:$16 sps:$4 sm:$0xff]  }
 0x24f   :  { %v8141_v14 = vpack.c.bf16 %v808_v5, %v807_v29  ;;  %v527_v2 = vmul.f32 %v7826_v36, %v489_v30  ;;  %v6766_v5 = vld [vmem:[#allocation11 + $0x88] ss:$16 sps:$4 sm:$0xff]   ;;  %1521 = vmatprep.subr.bf16.mxu0 %v6768_v48  ;;  %6679 = vmatprep.subr.bf16.mxu1 %v6768_v48 }
 0x250   :  { %v6857_v60 = vpop.eup %6856  ;;  %v733_v8 = vadd.f32 1e-05, %v717_v39  ;;  %1522 = vmatpush1.bf16.msra.mxu0 %v6766_v5  ;;  %6687 = vmatpush1.bf16.msra.mxu1 %v6766_v5 }
 0x251   :  { %v698_v61 = vpop.xlane.xlu1 %697  ;;  %1008 = vmatmul.mubr.bf16.gmra.mrb[16].mxu0 %v8141_v14  ;;  %1413 = vmatmul.mubr.bf16.gmra.mrb[56].mxu1 %v8141_v14  ;;  %v490_v15 = vmul.f32 %v6857_v60, %v7943_v3  ;;  %v565_v21 = vadd.f32 %v7841_v16, %v527_v2 }
 0x252   :  { %6862 = vrsqrt.f32 %v733_v8  ;;  %v718_v42 = vmul.f32 0.0078125, %v698_v61  ;;  %1422 = vmatprep.mubr.bf16.mxu1 %v11336_v55  ;;  %1017 = vmatprep.mubr.bf16.mxu0 %v11336_v55  ;;  %v6769_v8 = vld [vmem:[#allocation11 + $0xa8] ss:$16 sps:$4 sm:$0xff]  }
 0x253   :  { %v528_v59 = vmul.f32 %v7826_v36, %v490_v15 }
 0x254   :  { %v6859_v32 = vpop.eup %6858  ;;  %v734_v43 = vadd.f32 1e-05, %v718_v42  ;;  %v6774_v42 = vld [vmem:[#allocation11 + $0xcc] ss:$16 sps:$4 sm:$0xff]  }
 0x255   :  { %v358_v3 = vpop.xlane.xlu0 %357  ;;  %v566_v49 = vadd.f32 %v7841_v16, %v528_v59  ;;  %v491_v58 = vmul.f32 %v6859_v32, %v7953_v47  ;;  %v6771_v47 = vld [vmem:[#allocation11 + $0xac] ss:$16 sps:$4 sm:$0xff]  }
 0x256   :  { %6864 = vrsqrt.f32 %v734_v43  ;;  %v397_v22 = vmul.f32 0.0078125, %v358_v3  ;;  %1523 = vmatprep.subr.bf16.mxu0 %v6771_v47  ;;  %6680 = vmatprep.subr.bf16.mxu1 %v6771_v47  ;;  %v6772_v43 = vld [vmem:[#allocation11 + $0xc8] ss:$16 sps:$4 sm:$0xff]  }
 0x257   :  { %v8153_v51 = vpack.c.bf16 %v566_v49, %v565_v21  ;;  %v529_v29 = vmul.f32 %v7826_v36, %v491_v58  ;;  %1524 = vmatpush1.bf16.msra.mxu0 %v6769_v8  ;;  %6688 = vmatpush1.bf16.msra.mxu1 %v6769_v8  ;;  %v6775_v58 = vld [vmem:[#allocation11 + $0xe8] ss:$16 sps:$4 sm:$0xff]  }
 0x258   :  { %v6861_v50 = vpop.eup %6860  ;;  %v429_v0 = vadd.f32 1e-05, %v397_v22  ;;  %1525 = vmatprep.subr.bf16.mxu0 %v6774_v42  ;;  %6681 = vmatprep.subr.bf16.mxu1 %v6774_v42 }
 0x259   :  { %v360_v44 = vpop.xlane.xlu1 %359  ;;  %1423 = vmatmul.mubr.bf16.gmra.mrb[60].mxu1 %v8153_v51  ;;  %v492_v24 = vmul.f32 %v6861_v50, %v7963_v13  ;;  %v567_v13 = vadd.f32 %v7841_v16, %v529_v29 }
 0x25a   :  { %6866 = vrsqrt.f32 %v429_v0  ;;  %v398_v30 = vmul.f32 0.0078125, %v360_v44  ;;  %1432 = vmatprep.mubr.bf16.mxu1 %v11336_v55 }
 0x25b   :  { %v530_v56 = vmul.f32 %v7826_v36, %v492_v24  ;;  %1526 = vmatpush1.bf16.msra.mxu0 %v6772_v43  ;;  %6689 = vmatpush1.bf16.msra.mxu1 %v6772_v43 }
 0x25c   :  { %v6863_v39 = vpop.eup %6862  ;;  %v430_v60 = vadd.f32 1e-05, %v398_v30 }
 0x25d   :  { %v362_v27 = vpop.xlane.xlu0 %361  ;;  %v568_v61 = vadd.f32 %v7841_v16, %v530_v56  ;;  %v765_v15 = vmul.f32 %v6863_v39, %v7973_v40  ;;  %v6777_v40 = vld [vmem:[#allocation11 + $0xec] ss:$16 sps:$4 sm:$0xff]  }
 0x25e   :  { %6868 = vrsqrt.f32 %v430_v60  ;;  %v399_v2 = vmul.f32 0.0078125, %v362_v27  ;;  %1527 = vmatprep.subr.bf16.mxu0 %v6777_v40  ;;  %6682 = vmatprep.subr.bf16.mxu1 %v6777_v40 }
 0x25f   :  { %v8163_v6 = vpack.c.bf16 %v568_v61, %v567_v13  ;;  %v787_v16 = vmul.f32 %v7884_v23, %v765_v15  ;;  %1528 = vmatpush1.bf16.msra.mxu0 %v6775_v58  ;;  %6690 = vmatpush1.bf16.msra.mxu1 %v6775_v58 }
 0x260   :  { %v6865_v36 = vpop.eup %6864  ;;  %v431_v4 = vadd.f32 1e-05, %v399_v2 }
 0x261   :  { %v364_v59 = vpop.xlane.xlu1 %363  ;;  %1433 = vmatmul.mubr.bf16.gmra.mrb[64].mxu1 %v8163_v6  ;;  %v766_v32 = vmul.f32 %v6865_v36, %v7983_v53  ;;  %v809_v22 = vadd.f32 %v7903_v33, %v787_v16 }
 0x262   :  { %6870 = vrsqrt.f32 %v431_v4  ;;  %v400_v46 = vmul.f32 0.0078125, %v364_v59  ;;  %1442 = vmatprep.mubr.bf16.mxu1 %v11336_v55 }
 0x263   :  { %v788_v3 = vmul.f32 %v7884_v23, %v766_v32 }
 0x264   :  { %v6867_v21 = vpop.eup %6866  ;;  %v432_v49 = vadd.f32 1e-05, %v400_v46 }
 0x265   :  { %v810_v53 = vadd.f32 %v7903_v33, %v788_v3  ;;  %v493_v50 = vmul.f32 %v6867_v21, %v7995_v10  ;;  %v8181_v33 = vld [vmem:[%s11048_s2] ss:$0 sm:$0xff] }
 0x266   :  { %6872 = vrsqrt.f32 %v432_v49 }
 0x267   :  { %v8173_v0 = vpack.c.bf16 %v810_v53, %v809_v22  ;;  %v531_v10 = vmul.f32 %v8181_v33, %v493_v50 }
 0x268   :  { %v6869_v48 = vpop.eup %6868 }
 0x269   :  { %1018 = vmatmul.mubr.bf16.gmra.mrb[20].mxu0 %v8173_v0  ;;  %1443 = vmatmul.mubr.bf16.gmra.mrb[68].mxu1 %v8173_v0  ;;  %v494_v23 = vmul.f32 %v6869_v48, %v8005_v1  ;;  %v8195_v1 = vld [vmem:[%s11049_s3] ss:$0 sm:$0xff] }
 0x26a   :  { %1452 = vmatprep.mubr.bf16.mxu1 %v11336_v55  ;;  %1027 = vmatprep.mubr.bf16.mxu0 %v11336_v55  ;;  %v569_v47 = vadd.f32 %v8195_v1, %v531_v10 }
 0x26b   :  { %v532_v44 = vmul.f32 %v8181_v33, %v494_v23 }
 0x26c   :  { %v6871_v24 = vpop.eup %6870  ;;  %v8187_v29 = vpop.f32.mrb[0].mxu1 }
 0x26d   :  { %v8189_v5 = vpop.f32.mrb[1].mxu1  ;;  %2322 = vadd.xlane.f32.xlu0 %v8187_v29  ;;  %v570_v30 = vadd.f32 %v8195_v1, %v532_v44  ;;  %v495_v56 = vmul.f32 %v6871_v24, %v8015_v7 }
 0x26e   :  { %11337 = vst [vmem:[#allocation20_spill] sm:$0xff] %v8189_v5  ;;  %v8200_v39 = vpop.f32.mrb[2].mxu1 }
 0x26f   :  { %2324 = vadd.xlane.f32.xlu1 %v8200_v39  ;;  %v8203_v60 = vpop.f32.mrb[3].mxu1  ;;  %v8205_v8 = vpack.c.bf16 %v570_v30, %v569_v47  ;;  %v533_v61 = vmul.f32 %v8181_v33, %v495_v56 }
 0x270   :  { %11338 = vst [vmem:[#allocation21_spill] sm:$0xff] %v8203_v60  ;;  %v6873_v27 = vpop.eup %6872 }
 0x271   :  { %1453 = vmatmul.mubr.bf16.gmra.mrb[72].mxu1 %v8205_v8  ;;  %v496_v13 = vmul.f32 %v6873_v27, %v8025_v35  ;;  %v571_v36 = vadd.f32 %v8195_v1, %v533_v61 }
 0x272   :  { %1462 = vmatprep.mubr.bf16.mxu1 %v11336_v55 }
 0x273   :  { %v534_v15 = vmul.f32 %v8181_v33, %v496_v13 }
 0x274   :  { %v8212_v7 = vpop.f32.mrb[4].mxu1 }
 0x275   :  { %v8214_v2 = vpop.f32.mrb[5].mxu1  ;;  %v572_v4 = vadd.f32 %v8195_v1, %v534_v15 }
 0x276   :  { %11339 = vst [vmem:[#allocation22_spill] sm:$0xff] %v8214_v2  ;;  %v8218_v42 = vpop.f32.mrb[6].mxu1 }
 0x277   :  { %11340 = vst [vmem:[#allocation23_spill] sm:$0xff] %v8218_v42  ;;  %v8220_v59 = vpop.f32.mrb[7].mxu1  ;;  %v8222_v32 = vpack.c.bf16 %v572_v4, %v571_v36 }
 0x278   :  { %11341 = vst [vmem:[#allocation24_spill] sm:$0xff] %v8220_v59 }
 0x279   :  { %1463 = vmatmul.mubr.bf16.gmra.mrb[76].mxu1 %v8222_v32 }
 0x27a   :  { %1472 = vmatprep.mubr.bf16.mxu1 %v11336_v55 }
 0x27c   :  { %v8226_v35 = vpop.f32.mrb[0].mxu0  ;;  %v8228_v16 = vpop.f32.mrb[8].mxu1 }
 0x27d   :  { %11342 = vst [vmem:[#allocation25_spill] sm:$0xff] %v8228_v16  ;;  %v8230_v43 = vpop.f32.mrb[1].mxu0  ;;  %v8232_v40 = vpop.f32.mrb[9].mxu1  ;;  %2102 = vadd.xlane.f32.xlu0 %v8226_v35 }
 0x27e   :  { %11343 = vst [vmem:[#allocation26_spill] sm:$0xff] %v8230_v43  ;;  %11344 = vst [vmem:[#allocation27_spill] sm:$0xff] %v8232_v40  ;;  %v8235_v46 = vpop.f32.mrb[2].mxu0  ;;  %v8237_v3 = vpop.f32.mrb[10].mxu1 }
 0x27f   :  { %11345 = vst [vmem:[#allocation28_spill] sm:$0xff] %v8237_v3  ;;  %v8239_v21 = vpop.f32.mrb[11].mxu1  ;;  %2104 = vadd.xlane.f32.xlu1 %v8235_v46  ;;  %v8242_v49 = vpop.f32.mrb[3].mxu0 }
 0x280   :  { %11346 = vst [vmem:[#allocation29_spill] sm:$0xff] %v8239_v21  ;;  %11347 = vst [vmem:[#allocation30_spill] sm:$0xff] %v8242_v49 }
 0x281   :  { %2326 = vadd.xlane.f32.xlu0 %v8212_v7 }
 0x283   :  { %2328 = vadd.xlane.f32.xlu1 %v8218_v42 }
 0x284   :  { %v8246_v58 = vpop.f32.mrb[12].mxu1 }
 0x285   :  { %11348 = vst [vmem:[#allocation31_spill] sm:$0xff] %v8246_v58  ;;  %v8248_v22 = vpop.f32.mrb[13].mxu1 }
 0x286   :  { %11349 = vst [vmem:[#allocation32_spill] sm:$0xff] %v8248_v22  ;;  %v8250_v53 = vpop.f32.mrb[14].mxu1 }
 0x287   :  { %11350 = vst [vmem:[#allocation33_spill] sm:$0xff] %v8250_v53  ;;  %v8252_v50 = vpop.f32.mrb[15].mxu1 }
 0x288   :  { %11351 = vst [vmem:[#allocation34_spill] sm:$0xff] %v8252_v50 }
 0x28c   :  { %v8254_v48 = vpop.f32.mrb[16].mxu1 }
 0x28d   :  { %v8256_v23 = vpop.f32.mrb[17].mxu1 }
 0x28e   :  { %11352 = vst [vmem:[#allocation35_spill] sm:$0xff] %v8256_v23  ;;  %v8258_v10 = vpop.f32.mrb[18].mxu1 }
 0x28f   :  { %v8260_v44 = vpop.f32.mrb[19].mxu1 }
 0x290   :  { %11353 = vst [vmem:[#allocation36_spill] sm:$0xff] %v8260_v44 }
 0x294   :  { %v8262_v24 = vpop.f32.mrb[4].mxu0  ;;  %v8264_v47 = vpop.f32.mrb[20].mxu1 }
 0x295   :  { %11354 = vst [vmem:[#allocation37_spill] sm:$0xff] %v8262_v24  ;;  %v8266_v30 = vpop.f32.mrb[5].mxu0  ;;  %v8268_v56 = vpop.f32.mrb[21].mxu1  ;;  %2106 = vadd.xlane.f32.xlu0 %v8262_v24 }
 0x296   :  { %11355 = vst [vmem:[#allocation38_spill] sm:$0xff] %v8266_v30  ;;  %11356 = vst [vmem:[#allocation39_spill] sm:$0xff] %v8268_v56  ;;  %v8271_v27 = vpop.f32.mrb[6].mxu0  ;;  %v8273_v13 = vpop.f32.mrb[22].mxu1 }
 0x297   :  { %11357 = vst [vmem:[#allocation40_spill] sm:$0xff] %v8271_v27  ;;  %v8275_v61 = vpop.f32.mrb[23].mxu1  ;;  %2108 = vadd.xlane.f32.xlu1 %v8271_v27  ;;  %v8278_v15 = vpop.f32.mrb[7].mxu0 }
 0x298   :  { %11358 = vst [vmem:[#allocation41_spill] sm:$0xff] %v8275_v61  ;;  %11359 = vst [vmem:[#allocation42_spill] sm:$0xff] %v8278_v15 }
 0x299   :  { %2330 = vadd.xlane.f32.xlu0 %v8228_v16 }
 0x29b   :  { %2332 = vadd.xlane.f32.xlu1 %v8237_v3 }
 0x29c   :  { %v8282_v36 = vpop.f32.mrb[24].mxu1 }
 0x29d   :  { %v8284_v4 = vpop.f32.mrb[25].mxu1 }
 0x29e   :  { %11360 = vst [vmem:[#allocation43_spill] sm:$0xff] %v8284_v4  ;;  %v8286_v30 = vpop.f32.mrb[26].mxu1 }
 0x29f   :  { %v8288_v56 = vpop.f32.mrb[27].mxu1 }
 0x2a0   :  { %11361 = vst [vmem:[#allocation44_spill] sm:$0xff] %v8288_v56 }
 0x2a4   :  { %v8290_v49 = vpop.f32.mrb[28].mxu1 }
 0x2a5   :  { %v8292_v43 = vpop.f32.mrb[29].mxu1 }
 0x2a6   :  { %11362 = vst [vmem:[#allocation45_spill] sm:$0xff] %v8292_v43  ;;  %v8294_v61 = vpop.f32.mrb[30].mxu1 }
 0x2a7   :  { %v8296_v44 = vpop.f32.mrb[31].mxu1 }
 0x2a8   :  { %11363 = vst [vmem:[#allocation46_spill] sm:$0xff] %v8296_v44 }
 0x2ac   :  { %v8298_v15 = vpop.f32.mrb[8].mxu0  ;;  %v8300_v23 = vpop.f32.mrb[32].mxu1 }
 0x2ad   :  { %11364 = vst [vmem:[#allocation47_spill] sm:$0xff] %v8298_v15  ;;  %v8302_v21 = vpop.f32.mrb[9].mxu0  ;;  %v8304_v40 = vpop.f32.mrb[33].mxu1  ;;  %2110 = vadd.xlane.f32.xlu0 %v8298_v15 }
 0x2ae   :  { %11365 = vst [vmem:[#allocation48_spill] sm:$0xff] %v8302_v21  ;;  %11366 = vst [vmem:[#allocation49_spill] sm:$0xff] %v8304_v40  ;;  %v700_v4 = vpop.xlane.xlu0 %699  ;;  %v8307_v56 = vpop.f32.mrb[10].mxu0 }
 0x2af   :  { %11367 = vst [vmem:[#allocation50_spill] sm:$0xff] %v8307_v56  ;;  %v719_v50 = vmul.f32 0.0078125, %v700_v4  ;;  %v8309_v22 = vpop.f32.mrb[34].mxu1  ;;  %2112 = vadd.xlane.f32.xlu1 %v8307_v56  ;;  %v8312_v43 = vpop.f32.mrb[11].mxu0 }
 0x2b0   :  { %11368 = vst [vmem:[#allocation51_spill] sm:$0xff] %v8312_v43  ;;  %v8314_v44 = vpop.f32.mrb[35].mxu1 }
 0x2b1   :  { %11369 = vst [vmem:[#allocation52_spill] sm:$0xff] %v8314_v44  ;;  %v735_v59 = vadd.f32 1e-05, %v719_v50  ;;  %v702_v2 = vpop.xlane.xlu1 %701  ;;  %2334 = vadd.xlane.f32.xlu0 %v8246_v58 }
 0x2b2   :  { %v720_v21 = vmul.f32 0.0078125, %v702_v2 }
 0x2b3   :  { %6874 = vrsqrt.f32 %v735_v59  ;;  %2336 = vadd.xlane.f32.xlu1 %v8250_v53 }
 0x2b4   :  { %v736_v40 = vadd.f32 1e-05, %v720_v21  ;;  %v8318_v60 = vpop.f32.mrb[36].mxu1 }
 0x2b5   :  { %v8320_v4 = vpop.f32.mrb[37].mxu1  ;;  %v366_v5 = vpop.xlane.xlu0 %365 }
 0x2b6   :  { %11370 = vst [vmem:[#allocation53_spill] sm:$0xff] %v8320_v4  ;;  %6876 = vrsqrt.f32 %v736_v40  ;;  %v401_v56 = vmul.f32 0.0078125, %v366_v5  ;;  %v8322_v15 = vpop.f32.mrb[38].mxu1  ;;  %v7276_v40 = vld [vmem:[%s11050_s4] ss:$0 sm:$0xff] }
 0x2b7   :  { %v8324_v43 = vpop.f32.mrb[39].mxu1 }
 0x2b8   :  { %11371 = vst [vmem:[#allocation54_spill] sm:$0xff] %v8324_v43  ;;  %v433_v50 = vadd.f32 1e-05, %v401_v56 }
 0x2b9   :  { %v368_v44 = vpop.xlane.xlu1 %367 }
 0x2ba   :  { %6878 = vrsqrt.f32 %v433_v50  ;;  %v402_v58 = vmul.f32 0.0078125, %v368_v44 }
 0x2bc   :  { %v434_v2 = vadd.f32 1e-05, %v402_v58 }
 0x2bd   :  { %v6875_v59 = vpop.eup %6874  ;;  %v370_v3 = vpop.xlane.xlu0 %369 }
 0x2be   :  { %6880 = vrsqrt.f32 %v434_v2  ;;  %v403_v21 = vmul.f32 0.0078125, %v370_v3  ;;  %v767_v53 = vmul.f32 %v6875_v59, %v8053_v20  ;;  %v7277_v20 = vld [vmem:[%s11051_s5] ss:$0 sm:$0xff] }
 0x2c0   :  { %v6877_v16 = vpop.eup %6876  ;;  %v435_v4 = vadd.f32 1e-05, %v403_v21  ;;  %v789_v56 = vmul.f32 %v7276_v40, %v767_v53 }
 0x2c1   :  { %v372_v27 = vpop.xlane.xlu1 %371  ;;  %v768_v5 = vmul.f32 %v6877_v16, %v8058_v41 }
 0x2c2   :  { %6882 = vrsqrt.f32 %v435_v4  ;;  %v404_v50 = vmul.f32 0.0078125, %v372_v27  ;;  %v811_v3 = vadd.f32 %v7277_v20, %v789_v56 }
 0x2c3   :  { %v790_v44 = vmul.f32 %v7276_v40, %v768_v5 }
 0x2c4   :  { %v6879_v58 = vpop.eup %6878  ;;  %v436_v43 = vadd.f32 1e-05, %v404_v50 }
 0x2c5   :  { %v704_v24 = vpop.xlane.xlu0 %703  ;;  %v812_v2 = vadd.f32 %v7277_v20, %v790_v44  ;;  %v497_v59 = vmul.f32 %v6879_v58, %v8063_v31 }
 0x2c6   :  { %6884 = vrsqrt.f32 %v436_v43  ;;  %v721_v41 = vmul.f32 0.0078125, %v704_v24 }
 0x2c7   :  { %v821_v16 = vpack.c.bf16 %v812_v2, %v811_v3  ;;  %v535_v4 = vmul.f32 %v8181_v33, %v497_v59 }
 0x2c8   :  { %v6881_v21 = vpop.eup %6880  ;;  %v737_v42 = vadd.f32 1e-05, %v721_v41 }
 0x2c9   :  { %v706_v53 = vpop.xlane.xlu1 %705  ;;  %1028 = vmatmul.mubr.bf16.gmra.mrb[24].mxu0 %v821_v16  ;;  %1473 = vmatmul.mubr.bf16.gmra.mrb[80].mxu1 %v821_v16  ;;  %v498_v27 = vmul.f32 %v6881_v21, %v8069_v11  ;;  %v573_v56 = vadd.f32 %v8195_v1, %v535_v4 }
 0x2ca   :  { %6886 = vrsqrt.f32 %v737_v42  ;;  %v722_v5 = vmul.f32 0.0078125, %v706_v53  ;;  %1482 = vmatprep.mubr.bf16.mxu1 %v11336_v55  ;;  %1037 = vmatprep.mubr.bf16.mxu0 %v11336_v55 }
 0x2cb   :  { %v536_v31 = vmul.f32 %v8181_v33, %v498_v27 }
 0x2cc   :  { %v6883_v43 = vpop.eup %6882  ;;  %v738_v24 = vadd.f32 1e-05, %v722_v5 }
 0x2cd   :  { %v574_v50 = vadd.f32 %v8195_v1, %v536_v31  ;;  %v499_v44 = vmul.f32 %v6883_v43, %v8077_v19 }
 0x2ce   :  { %6888 = vrsqrt.f32 %v738_v24 }
 0x2cf   :  { %v837_v11 = vpack.c.bf16 %v574_v50, %v573_v56  ;;  %v537_v3 = vmul.f32 %v8181_v33, %v499_v44 }
 0x2d0   :  { %v6885_v58 = vpop.eup %6884 }
 0x2d1   :  { %1483 = vmatmul.mubr.bf16.gmra.mrb[84].mxu1 %v837_v11  ;;  %v500_v42 = vmul.f32 %v6885_v58, %v8087_v54  ;;  %v575_v41 = vadd.f32 %v8195_v1, %v537_v3 }
 0x2d2   :  { %1492 = vmatprep.mubr.bf16.mxu1 %v11336_v55 }
 0x2d3   :  { %v538_v2 = vmul.f32 %v8181_v33, %v500_v42 }
 0x2d4   :  { %v6887_v59 = vpop.eup %6886 }
 0x2d5   :  { %v576_v21 = vadd.f32 %v8195_v1, %v538_v2  ;;  %v769_v53 = vmul.f32 %v6887_v59, %v8097_v12  ;;  %v11372_v12 = vld [vmem:[#allocation19_spill] sm:$0xff] }
 0x2d7   :  { %v838_v19 = vpack.c.bf16 %v576_v21, %v575_v41  ;;  %v791_v5 = vmul.f32 %v7276_v40, %v769_v53 }
 0x2d8   :  { %v6889_v27 = vpop.eup %6888 }
 0x2d9   :  { %1493 = vmatmul.mubr.bf16.gmra.mrb[88].mxu1 %v838_v19  ;;  %v770_v4 = vmul.f32 %v6889_v27, %v8107_v17  ;;  %v813_v31 = vadd.f32 %v7277_v20, %v791_v5 }
 0x2da   :  { %1502 = vmatprep.mubr.bf16.mxu1 %v11336_v55 }
 0x2db   :  { %v792_v54 = vmul.f32 %v7276_v40, %v770_v4 }
 0x2dd   :  { %v814_v43 = vadd.f32 %v7277_v20, %v792_v54 }
 0x2df   :  { %v822_v24 = vpack.c.bf16 %v814_v43, %v813_v31 }
 0x2e1   :  { %1038 = vmatmul.mubr.bf16.gmra.mrb[28].mxu0 %v822_v24  ;;  %1503 = vmatmul.mubr.bf16.gmra.mrb[92].mxu1 %v822_v24 }
 0x2e2   :  { %1545 = vmatprep.mubr.bf16.mxu0 %v11336_v55  ;;  %1735 = vmatprep.mubr.bf16.mxu1 %v11336_v55 }
 0x2e9   :  { %1546 = vmatmul.mubr.bf16.vlgmr.msra.gmra.mrb[32].mxu0 %v7855_v26  ;;  %1736 = vmatmul.mubr.bf16.vlgmr.msra.gmra.mrb[96].mxu1 %v8222_v32 }
 0x2ea   :  { %1555 = vmatprep.mubr.bf16.mxu0 %v11336_v55  ;;  %1745 = vmatprep.mubr.bf16.mxu1 %v11336_v55 }
 0x2f1   :  { %1556 = vmatmul.mubr.bf16.gmra.mrb[36].mxu0 %v7886_v34  ;;  %1746 = vmatmul.mubr.bf16.gmra.mrb[100].mxu1 %v821_v16 }
 0x2f2   :  { %1565 = vmatprep.mubr.bf16.mxu0 %v11336_v55  ;;  %1755 = vmatprep.mubr.bf16.mxu1 %v11336_v55 }
 0x2f9   :  { %1566 = vmatmul.mubr.bf16.gmra.mrb[40].mxu0 %v11372_v12  ;;  %1756 = vmatmul.mubr.bf16.gmra.mrb[104].mxu1 %v837_v11 }
 0x2fa   :  { %1575 = vmatprep.mubr.bf16.mxu0 %v11336_v55  ;;  %1765 = vmatprep.mubr.bf16.mxu1 %v11336_v55 }
 0x301   :  { %1576 = vmatmul.mubr.bf16.gmra.mrb[44].mxu0 %v7940_v28  ;;  %1766 = vmatmul.mubr.bf16.gmra.mrb[108].mxu1 %v838_v19 }
 0x302   :  { %1585 = vmatprep.mubr.bf16.mxu0 %v11336_v55  ;;  %1775 = vmatprep.mubr.bf16.mxu1 %v11336_v55 }
 0x304   :  { %v8367_v26 = vpop.f32.mrb[40].mxu1 }
 0x305   :  { %v8369_v34 = vpop.f32.mrb[41].mxu1 }
 0x306   :  { %11373 = vst [vmem:[#allocation19_spill] sm:$0xff] %v8369_v34  ;;  %v8371_v17 = vpop.f32.mrb[42].mxu1 }
 0x307   :  { %v8373_v33 = vpop.f32.mrb[43].mxu1 }
 0x308   :  { %11374 = vst [vmem:[#allocation55_spill] sm:$0xff] %v8373_v33 }
 0x309   :  { %1586 = vmatmul.mubr.bf16.gmra.mrb[48].mxu0 %v7960_v38  ;;  %1776 = vmatmul.mubr.bf16.gmra.mrb[112].mxu1 %v822_v24 }
 0x30a   :  { %1595 = vmatprep.mubr.bf16.mxu0 %v11336_v55 }
 0x30c   :  { %v8377_v1 = vpop.f32.mrb[12].mxu0  ;;  %v8379_v28 = vpop.f32.mrb[44].mxu1 }
 0x30d   :  { %v8381_v32 = vpop.f32.mrb[13].mxu0  ;;  %2114 = vadd.xlane.f32.xlu0 %v8377_v1  ;;  %v8384_v40 = vpop.f32.mrb[45].mxu1 }
 0x30e   :  { %11375 = vst [vmem:[#allocation56_spill] sm:$0xff] %v8381_v32  ;;  %11376 = vst [vmem:[#allocation57_spill] sm:$0xff] %v8384_v40  ;;  %v8386_v20 = vpop.f32.mrb[14].mxu0  ;;  %v8388_v16 = vpop.f32.mrb[46].mxu1 }
 0x30f   :  { %2116 = vadd.xlane.f32.xlu1 %v8386_v20  ;;  %v8391_v38 = vpop.f32.mrb[47].mxu1  ;;  %v8393_v56 = vpop.f32.mrb[15].mxu0 }
 0x310   :  { %11377 = vst [vmem:[#allocation58_spill] sm:$0xff] %v8391_v38  ;;  %11378 = vst [vmem:[#allocation59_spill] sm:$0xff] %v8393_v56 }
 0x311   :  { %2338 = vadd.xlane.f32.xlu0 %v8254_v48  ;;  %1596 = vmatmul.mubr.bf16.gmra.mrb[52].mxu0 %v7980_v62 }
 0x312   :  { %1605 = vmatprep.mubr.bf16.mxu0 %v11336_v55 }
 0x313   :  { %2340 = vadd.xlane.f32.xlu1 %v8258_v10 }
 0x314   :  { %v8399_v50 = vpop.f32.mrb[48].mxu1 }
 0x315   :  { %v8401_v44 = vpop.f32.mrb[49].mxu1 }
 0x316   :  { %11379 = vst [vmem:[#allocation60_spill] sm:$0xff] %v8401_v44  ;;  %v8403_v11 = vpop.f32.mrb[50].mxu1 }
 0x317   :  { %v8405_v58 = vpop.f32.mrb[51].mxu1 }
 0x318   :  { %11380 = vst [vmem:[#allocation61_spill] sm:$0xff] %v8405_v58 }
 0x319   :  { %1606 = vmatmul.mubr.bf16.gmra.mrb[56].mxu0 %v8002_v9 }
 0x31a   :  { %1615 = vmatprep.mubr.bf16.mxu0 %v11336_v55 }
 0x31c   :  { %v8409_v42 = vpop.f32.mrb[52].mxu1 }
 0x31d   :  { %v8411_v3 = vpop.f32.mrb[53].mxu1 }
 0x31e   :  { %11381 = vst [vmem:[#allocation62_spill] sm:$0xff] %v8411_v3  ;;  %v8413_v62 = vpop.f32.mrb[54].mxu1 }
 0x31f   :  { %v8415_v2 = vpop.f32.mrb[55].mxu1 }
 0x320   :  { %11382 = vst [vmem:[#allocation63_spill] sm:$0xff] %v8415_v2 }
 0x321   :  { %1616 = vmatmul.mubr.bf16.gmra.mrb[60].mxu0 %v8022_v52 }
 0x322   :  { %1625 = vmatprep.mubr.bf16.mxu0 %v11336_v55 }
 0x324   :  { %v8419_v59 = vpop.f32.mrb[16].mxu0  ;;  %v8421_v41 = vpop.f32.mrb[56].mxu1 }
 0x325   :  { %2118 = vadd.xlane.f32.xlu0 %v8419_v59  ;;  %v8424_v9 = vpop.f32.mrb[17].mxu0  ;;  %v8426_v21 = vpop.f32.mrb[57].mxu1 }
 0x326   :  { %11383 = vst [vmem:[#allocation64_spill] sm:$0xff] %v8424_v9  ;;  %11384 = vst [vmem:[#allocation65_spill] sm:$0xff] %v8426_v21  ;;  %v8428_v53 = vpop.f32.mrb[18].mxu0  ;;  %v8430_v19 = vpop.f32.mrb[58].mxu1 }
 0x327   :  { %2120 = vadd.xlane.f32.xlu1 %v8428_v53  ;;  %v8433_v27 = vpop.f32.mrb[59].mxu1  ;;  %v8435_v52 = vpop.f32.mrb[19].mxu0 }
 0x328   :  { %11385 = vst [vmem:[#allocation66_spill] sm:$0xff] %v8433_v27  ;;  %11386 = vst [vmem:[#allocation67_spill] sm:$0xff] %v8435_v52 }
 0x329   :  { %2342 = vadd.xlane.f32.xlu0 %v8264_v47  ;;  %1626 = vmatmul.mubr.bf16.gmra.mrb[64].mxu0 %v8037_v18 }
 0x32a   :  { %1635 = vmatprep.mubr.bf16.mxu0 %v11336_v55 }
 0x32b   :  { %2344 = vadd.xlane.f32.xlu1 %v8273_v13 }
 0x32c   :  { %v8441_v4 = vpop.f32.mrb[60].mxu1 }
 0x32d   :  { %11387 = vst [vmem:[#allocation68_spill] sm:$0xff] %v8441_v4  ;;  %v8443_v5 = vpop.f32.mrb[61].mxu1 }
 0x32e   :  { %11388 = vst [vmem:[#allocation69_spill] sm:$0xff] %v8443_v5  ;;  %v8445_v54 = vpop.f32.mrb[62].mxu1 }
 0x32f   :  { %v8447_v31 = vpop.f32.mrb[63].mxu1 }
 0x330   :  { %11389 = vst [vmem:[#allocation70_spill] sm:$0xff] %v8447_v31 }
 0x331   :  { %1636 = vmatmul.mubr.bf16.gmra.mrb[68].mxu0 %v8048_v57 }
 0x332   :  { %1645 = vmatprep.mubr.bf16.mxu0 %v11336_v55 }
 0x334   :  { %v8451_v43 = vpop.f32.mrb[64].mxu1 }
 0x335   :  { %v8453_v24 = vpop.f32.mrb[65].mxu1 }
 0x336   :  { %11390 = vst [vmem:[#allocation71_spill] sm:$0xff] %v8453_v24  ;;  %v8455_v18 = vpop.f32.mrb[66].mxu1 }
 0x337   :  { %v8457_v12 = vpop.f32.mrb[67].mxu1 }
 0x338   :  { %11391 = vst [vmem:[#allocation72_spill] sm:$0xff] %v8457_v12 }
 0x339   :  { %1646 = vmatmul.mubr.bf16.gmra.mrb[72].mxu0 %v8084_v25 }
 0x33a   :  { %1655 = vmatprep.mubr.bf16.mxu0 %v11336_v55 }
 0x33c   :  { %v8461_v52 = vpop.f32.mrb[20].mxu0  ;;  %v8463_v9 = vpop.f32.mrb[68].mxu1 }
 0x33d   :  { %11392 = vst [vmem:[#allocation73_spill] sm:$0xff] %v8461_v52  ;;  %11393 = vst [vmem:[#allocation74_spill] sm:$0xff] %v8463_v9  ;;  %2122 = vadd.xlane.f32.xlu0 %v8461_v52  ;;  %v8466_v57 = vpop.f32.mrb[21].mxu0  ;;  %v8468_v27 = vpop.f32.mrb[69].mxu1 }
 0x33e   :  { %11394 = vst [vmem:[#allocation75_spill] sm:$0xff] %v8466_v57  ;;  %11395 = vst [vmem:[#allocation76_spill] sm:$0xff] %v8468_v27  ;;  %v8470_v21 = vpop.f32.mrb[22].mxu0  ;;  %v8472_v24 = vpop.f32.mrb[70].mxu1 }
 0x33f   :  { %11396 = vst [vmem:[#allocation77_spill] sm:$0xff] %v8470_v21  ;;  %2124 = vadd.xlane.f32.xlu1 %v8470_v21  ;;  %v8475_v12 = vpop.f32.mrb[71].mxu1  ;;  %v8477_v25 = vpop.f32.mrb[23].mxu0 }
 0x340   :  { %11397 = vst [vmem:[#allocation78_spill] sm:$0xff] %v8475_v12  ;;  %11398 = vst [vmem:[#allocation79_spill] sm:$0xff] %v8477_v25 }
 0x341   :  { %2346 = vadd.xlane.f32.xlu0 %v8282_v36  ;;  %1656 = vmatmul.mubr.bf16.gmra.mrb[76].mxu0 %v8104_v63 }
 0x342   :  { %1665 = vmatprep.mubr.bf16.mxu0 %v11336_v55 }
 0x343   :  { %2348 = vadd.xlane.f32.xlu1 %v8286_v30 }
 0x344   :  { %v8483_v57 = vpop.f32.mrb[72].mxu1 }
 0x345   :  { %v8485_v27 = vpop.f32.mrb[73].mxu1 }
 0x346   :  { %11399 = vst [vmem:[#allocation80_spill] sm:$0xff] %v8485_v27  ;;  %v8487_v31 = vpop.f32.mrb[74].mxu1 }
 0x347   :  { %v8489_v5 = vpop.f32.mrb[75].mxu1 }
 0x348   :  { %11400 = vst [vmem:[#allocation81_spill] sm:$0xff] %v8489_v5 }
 0x349   :  { %1666 = vmatmul.mubr.bf16.gmra.mrb[80].mxu0 %v8121_v37 }
 0x34a   :  { %1675 = vmatprep.mubr.bf16.mxu0 %v11336_v55 }
 0x34c   :  { %v8493_v25 = vpop.f32.mrb[76].mxu1 }
 0x34d   :  { %v8495_v12 = vpop.f32.mrb[77].mxu1 }
 0x34e   :  { %11401 = vst [vmem:[#allocation82_spill] sm:$0xff] %v8495_v12  ;;  %v8497_v63 = vpop.f32.mrb[78].mxu1 }
 0x34f   :  { %v8499_v2 = vpop.f32.mrb[79].mxu1 }
 0x350   :  { %11402 = vst [vmem:[#allocation83_spill] sm:$0xff] %v8499_v2 }
 0x351   :  { %1676 = vmatmul.mubr.bf16.gmra.mrb[84].mxu0 %v8131_v45 }
 0x352   :  { %1685 = vmatprep.mubr.bf16.mxu0 %v11336_v55 }
 0x359   :  { %1686 = vmatmul.mubr.bf16.gmra.mrb[88].mxu0 %v8141_v14 }
 0x35a   :  { %1695 = vmatprep.mubr.bf16.mxu0 %v11336_v55 }
 0x361   :  { %1696 = vmatmul.mubr.bf16.gmra.mrb[92].mxu0 %v8153_v51 }
 0x362   :  { %1705 = vmatprep.mubr.bf16.mxu0 %v11336_v55 }
 0x369   :  { %1706 = vmatmul.mubr.bf16.gmra.mrb[96].mxu0 %v8163_v6 }
 0x36a   :  { %1715 = vmatprep.mubr.bf16.mxu0 %v11336_v55 }
 0x371   :  { %1716 = vmatmul.mubr.bf16.gmra.mrb[100].mxu0 %v8173_v0 }
 0x372   :  { %1725 = vmatprep.mubr.bf16.mxu0 %v11336_v55 }
 0x379   :  { %1726 = vmatmul.mubr.bf16.gmra.mrb[104].mxu0 %v8205_v8 }
 0x39c   :  { %v8512_v37 = vpop.f32.mrb[24].mxu0  ;;  %v8514_v45 = vpop.f32.mrb[80].mxu1 }
 0x39d   :  { %11403 = vst [vmem:[#allocation84_spill] sm:$0xff] %v8512_v37  ;;  %2126 = vadd.xlane.f32.xlu0 %v8512_v37  ;;  %v8517_v14 = vpop.f32.mrb[25].mxu0  ;;  %v8519_v51 = vpop.f32.mrb[81].mxu1 }
 0x39e   :  { %11404 = vst [vmem:[#allocation85_spill] sm:$0xff] %v8517_v14  ;;  %11405 = vst [vmem:[#allocation86_spill] sm:$0xff] %v8519_v51  ;;  %v8521_v2 = vpop.f32.mrb[26].mxu0  ;;  %v8523_v6 = vpop.f32.mrb[82].mxu1 }
 0x39f   :  { %11406 = vst [vmem:[#allocation87_spill] sm:$0xff] %v8521_v2  ;;  %11407 = vst [vmem:[#allocation88_spill] sm:$0xff] %v8523_v6  ;;  %2128 = vadd.xlane.f32.xlu1 %v8521_v2  ;;  %v8526_v0 = vpop.f32.mrb[83].mxu1  ;;  %v8528_v55 = vpop.f32.mrb[27].mxu0 }
 0x3a0   :  { %11408 = vst [vmem:[#allocation89_spill] sm:$0xff] %v8526_v0  ;;  %11409 = vst [vmem:[#allocation90_spill] sm:$0xff] %v8528_v55 }
 0x3a1   :  { %2350 = vadd.xlane.f32.xlu0 %v8290_v49 }
 0x3a3   :  { %2352 = vadd.xlane.f32.xlu1 %v8294_v61 }
 0x3a4   :  { %v8532_v8 = vpop.f32.mrb[84].mxu1 }
 0x3a5   :  { %v8534_v12 = vpop.f32.mrb[85].mxu1 }
 0x3a6   :  { %11410 = vst [vmem:[#allocation91_spill] sm:$0xff] %v8534_v12  ;;  %v8536_v14 = vpop.f32.mrb[86].mxu1 }
 0x3a7   :  { %v8538_v51 = vpop.f32.mrb[87].mxu1 }
 0x3a8   :  { %11411 = vst [vmem:[#allocation92_spill] sm:$0xff] %v8538_v51 }
 0x3ac   :  { %v8540_v5 = vpop.f32.mrb[88].mxu1 }
 0x3ad   :  { %v8542_v27 = vpop.f32.mrb[89].mxu1 }
 0x3ae   :  { %11412 = vst [vmem:[#allocation93_spill] sm:$0xff] %v8542_v27  ;;  %v8544_v3 = vpop.f32.mrb[90].mxu1 }
 0x3af   :  { %v8546_v0 = vpop.f32.mrb[91].mxu1 }
 0x3b0   :  { %11413 = vst [vmem:[#allocation94_spill] sm:$0xff] %v8546_v0 }
 0x3b4   :  { %v8548_v55 = vpop.f32.mrb[28].mxu0  ;;  %v8550_v56 = vpop.f32.mrb[92].mxu1 }
 0x3b5   :  { %11414 = vst [vmem:[#allocation95_spill] sm:$0xff] %v8548_v55  ;;  %2130 = vadd.xlane.f32.xlu0 %v8548_v55  ;;  %v8553_v32 = vpop.f32.mrb[29].mxu0  ;;  %v8555_v12 = vpop.f32.mrb[93].mxu1 }
 0x3b6   :  { %11415 = vst [vmem:[#allocation96_spill] sm:$0xff] %v8553_v32  ;;  %11416 = vst [vmem:[#allocation97_spill] sm:$0xff] %v8555_v12  ;;  %v8557_v58 = vpop.f32.mrb[30].mxu0  ;;  %v8559_v51 = vpop.f32.mrb[94].mxu1 }
 0x3b7   :  { %11417 = vst [vmem:[#allocation98_spill] sm:$0xff] %v8557_v58  ;;  %2132 = vadd.xlane.f32.xlu1 %v8557_v58  ;;  %v8562_v27 = vpop.f32.mrb[95].mxu1  ;;  %v8564_v44 = vpop.f32.mrb[31].mxu0 }
 0x3b8   :  { %11418 = vst [vmem:[#allocation99_spill] sm:$0xff] %v8562_v27  ;;  %11419 = vst [vmem:[#allocation100_spill] sm:$0xff] %v8564_v44 }
 0x3b9   :  { %2354 = vadd.xlane.f32.xlu0 %v8300_v23 }
 0x3bb   :  { %2356 = vadd.xlane.f32.xlu1 %v8309_v22 }
 0x3bc   :  { %v8568_v0 = vpop.f32.mrb[32].mxu0  ;;  %v8570_v38 = vpop.f32.mrb[96].mxu1 }
 0x3bd   :  { %11420 = vst [vmem:[#allocation101_spill] sm:$0xff] %v8568_v0  ;;  %11421 = vst [vmem:[#allocation102_spill] sm:$0xff] %v8570_v38  ;;  %v8572_v32 = vpop.f32.mrb[97].mxu1  ;;  %2358 = vadd.xlane.f32.xlu0 %v8318_v60  ;;  %v8575_v12 = vpop.f32.mrb[33].mxu0 }
 0x3be   :  { %11422 = vst [vmem:[#allocation103_spill] sm:$0xff] %v8572_v32  ;;  %11423 = vst [vmem:[#allocation104_spill] sm:$0xff] %v8575_v12  ;;  %v8577_v40 = vpop.f32.mrb[34].mxu0  ;;  %v8579_v33 = vpop.f32.mrb[98].mxu1 }
 0x3bf   :  { %11424 = vst [vmem:[#allocation105_spill] sm:$0xff] %v8577_v40  ;;  %11425 = vst [vmem:[#allocation106_spill] sm:$0xff] %v8579_v33  ;;  %v8585_v34 = vpop.f32.mrb[99].mxu1  ;;  %2360 = vadd.xlane.f32.xlu1 %v8322_v15  ;;  %v8588_v58 = vpop.f32.mrb[35].mxu0 }
 0x3c0   :  { %11426 = vst [vmem:[#allocation107_spill] sm:$0xff] %v8585_v34  ;;  %11427 = vst [vmem:[#allocation108_spill] sm:$0xff] %v8588_v58  ;;  %v2323_v58 = vpop.xlane.xlu0 %2322 }
 0x3c1   :  { %2362 = vadd.xlane.f32.xlu0 %v8367_v26  ;;  %v2418_v52 = vmul.f32 0.0078125, %v2323_v58 }
 0x3c3   :  { %2364 = vadd.xlane.f32.xlu1 %v8371_v17  ;;  %v8694_v58 = vsub.f32 %v8187_v29, %v2418_v52 }
 0x3c4   :  { %v8596_v44 = vpop.f32.mrb[36].mxu0  ;;  %v8598_v0 = vpop.f32.mrb[100].mxu1 }
 0x3c5   :  { %11428 = vst [vmem:[#allocation109_spill] sm:$0xff] %v8596_v44  ;;  %11429 = vst [vmem:[#allocation110_spill] sm:$0xff] %v8598_v0  ;;  %v8600_v27 = vpop.f32.mrb[101].mxu1  ;;  %2366 = vadd.xlane.f32.xlu0 %v8379_v28  ;;  %v8603_v38 = vpop.f32.mrb[37].mxu0 }
 0x3c6   :  { %11430 = vst [vmem:[#allocation111_spill] sm:$0xff] %v8600_v27  ;;  %11431 = vst [vmem:[#allocation112_spill] sm:$0xff] %v8603_v38  ;;  %v8605_v33 = vpop.f32.mrb[38].mxu0  ;;  %v8607_v55 = vpop.f32.mrb[102].mxu1 }
 0x3c7   :  { %11432 = vst [vmem:[#allocation113_spill] sm:$0xff] %v8605_v33  ;;  %11433 = vst [vmem:[#allocation114_spill] sm:$0xff] %v8607_v55  ;;  %v8613_v34 = vpop.f32.mrb[103].mxu1  ;;  %2368 = vadd.xlane.f32.xlu1 %v8388_v16  ;;  %v8616_v12 = vpop.f32.mrb[39].mxu0 }
 0x3c8   :  { %11434 = vst [vmem:[#allocation115_spill] sm:$0xff] %v8613_v34  ;;  %11435 = vst [vmem:[#allocation116_spill] sm:$0xff] %v8616_v12 }
 0x3c9   :  { %2370 = vadd.xlane.f32.xlu0 %v8399_v50 }
 0x3cb   :  { %2372 = vadd.xlane.f32.xlu1 %v8403_v11 }
 0x3cc   :  { %v8624_v2 = vpop.f32.mrb[40].mxu0  ;;  %v8626_v44 = vpop.f32.mrb[104].mxu1 }
 0x3cd   :  { %11436 = vst [vmem:[#allocation117_spill] sm:$0xff] %v8624_v2  ;;  %11437 = vst [vmem:[#allocation118_spill] sm:$0xff] %v8626_v44  ;;  %2374 = vadd.xlane.f32.xlu0 %v8409_v42  ;;  %v8629_v32 = vpop.f32.mrb[41].mxu0  ;;  %v8631_v0 = vpop.f32.mrb[105].mxu1 }
 0x3ce   :  { %11438 = vst [vmem:[#allocation119_spill] sm:$0xff] %v8629_v32  ;;  %11439 = vst [vmem:[#allocation120_spill] sm:$0xff] %v8631_v0  ;;  %v8633_v55 = vpop.f32.mrb[42].mxu0  ;;  %v8637_v40 = vpop.f32.mrb[106].mxu1 }
 0x3cf   :  { %11440 = vst [vmem:[#allocation121_spill] sm:$0xff] %v8633_v55  ;;  %11441 = vst [vmem:[#allocation122_spill] sm:$0xff] %v8637_v40  ;;  %2376 = vadd.xlane.f32.xlu1 %v8413_v62  ;;  %v8642_v34 = vpop.f32.mrb[107].mxu1  ;;  %v8644_v38 = vpop.f32.mrb[43].mxu0 }
 0x3d0   :  { %11442 = vst [vmem:[#allocation123_spill] sm:$0xff] %v8642_v34  ;;  %11443 = vst [vmem:[#allocation124_spill] sm:$0xff] %v8644_v38  ;;  %v2325_v2 = vpop.xlane.xlu1 %2324 }
 0x3d1   :  { %2378 = vadd.xlane.f32.xlu0 %v8421_v41 }
 0x3d3   :  { %2380 = vadd.xlane.f32.xlu1 %v8430_v19 }
 0x3d4   :  { %v8652_v55 = vpop.f32.mrb[44].mxu0  ;;  %v8654_v37 = vpop.f32.mrb[108].mxu1 }
 0x3d5   :  { %11444 = vst [vmem:[#allocation125_spill] sm:$0xff] %v8652_v55  ;;  %11445 = vst [vmem:[#allocation126_spill] sm:$0xff] %v8654_v37  ;;  %v8656_v27 = vpop.f32.mrb[109].mxu1  ;;  %2382 = vadd.xlane.f32.xlu0 %v8441_v4  ;;  %v8659_v44 = vpop.f32.mrb[45].mxu0 }
 0x3d6   :  { %11446 = vst [vmem:[#allocation127_spill] sm:$0xff] %v8656_v27  ;;  %11447 = vst [vmem:[#allocation128_spill] sm:$0xff] %v8659_v44  ;;  %v8661_v12 = vpop.f32.mrb[46].mxu0  ;;  %v8663_v0 = vpop.f32.mrb[110].mxu1  ;;  %v2514_v44 = vmul.f32 %v8694_v58, %v8694_v58 }
 0x3d7   :  { %11448 = vst [vmem:[#allocation129_spill] sm:$0xff] %v8661_v12  ;;  %11449 = vst [vmem:[#allocation130_spill] sm:$0xff] %v8663_v0  ;;  %v8669_v32 = vpop.f32.mrb[111].mxu1  ;;  %2384 = vadd.xlane.f32.xlu1 %v8445_v54  ;;  %v8672_v38 = vpop.f32.mrb[47].mxu0  ;;  %v2419_v0 = vmul.f32 0.0078125, %v2325_v2 }
 0x3d8   :  { %11450 = vst [vmem:[#allocation131_spill] sm:$0xff] %v8669_v32  ;;  %11451 = vst [vmem:[#allocation132_spill] sm:$0xff] %v8672_v38  ;;  %v2103_v4 = vpop.xlane.xlu0 %2102  ;;  %v2105_v33 = vpop.xlane.xlu1 %2104 }
 0x3d9   :  { %2386 = vadd.xlane.f32.xlu0 %v8451_v43  ;;  %v2134_v32 = vmul.f32 0.0078125, %v2103_v4  ;;  %v8710_v52 = vsub.f32 %v8200_v39, %v2419_v0  ;;  %v2135_v4 = vmul.f32 0.0078125, %v2105_v33 }
 0x3db   :  { %2388 = vadd.xlane.f32.xlu1 %v8455_v18  ;;  %v8714_v2 = vsub.f32 %v8226_v35, %v2134_v32  ;;  %v2515_v39 = vmul.f32 %v8710_v52, %v8710_v52 }
 0x3dc   :  { %v8680_v34 = vpop.f32.mrb[48].mxu0  ;;  %v8682_v37 = vpop.f32.mrb[112].mxu1 }
 0x3dd   :  { %11452 = vst [vmem:[#allocation133_spill] sm:$0xff] %v8680_v34  ;;  %11453 = vst [vmem:[#allocation134_spill] sm:$0xff] %v8682_v37  ;;  %v8684_v55 = vpop.f32.mrb[113].mxu1  ;;  %2390 = vadd.xlane.f32.xlu0 %v8463_v9  ;;  %v8687_v40 = vpop.f32.mrb[49].mxu0  ;;  %v8722_v9 = vsub.f32 %v8235_v46, %v2135_v4  ;;  %v2166_v46 = vmul.f32 %v8714_v2, %v8714_v2 }
 0x3de   :  { %11454 = vst [vmem:[#allocation135_spill] sm:$0xff] %v8684_v55  ;;  %11455 = vst [vmem:[#allocation136_spill] sm:$0xff] %v8687_v40  ;;  %v8689_v27 = vpop.f32.mrb[50].mxu0  ;;  %v8691_v21 = vpop.f32.mrb[114].mxu1 }
 0x3df   :  { %11456 = vst [vmem:[#allocation137_spill] sm:$0xff] %v8689_v27  ;;  %11457 = vst [vmem:[#allocation138_spill] sm:$0xff] %v8691_v21  ;;  %v8700_v38 = vpop.f32.mrb[115].mxu1  ;;  %2392 = vadd.xlane.f32.xlu1 %v8472_v24  ;;  %v8703_v12 = vpop.f32.mrb[51].mxu0  ;;  %v2167_v40 = vmul.f32 %v8722_v9, %v8722_v9 }
 0x3e0   :  { %11458 = vst [vmem:[#allocation139_spill] sm:$0xff] %v8700_v38  ;;  %11459 = vst [vmem:[#allocation140_spill] sm:$0xff] %v8703_v12  ;;  %v2327_v37 = vpop.xlane.xlu0 %2326  ;;  %v2329_v33 = vpop.xlane.xlu1 %2328 }
 0x3e1   :  { %2394 = vadd.xlane.f32.xlu0 %v8483_v57  ;;  %11460 = vst [vmem:[#allocation141_spill] sm:$0xff] %v8714_v2  ;;  %11462 = vst [vmem:[#allocation143_spill] sm:$0xff] %v8722_v9  ;;  %v2420_v32 = vmul.f32 0.0078125, %v2327_v37  ;;  %v2421_v38 = vmul.f32 0.0078125, %v2329_v33 }
 0x3e3   :  { %2396 = vadd.xlane.f32.xlu1 %v8487_v31  ;;  %v8741_v37 = vsub.f32 %v8212_v7, %v2420_v32  ;;  %v11474_v32 = vld [vmem:[#allocation40_spill] sm:$0xff] }
 0x3e4   :  { %v8719_v21 = vpop.f32.mrb[52].mxu0  ;;  %v2107_v4 = vpop.xlane.xlu0 %2106 }
 0x3e5   :  { %11461 = vst [vmem:[#allocation142_spill] sm:$0xff] %v8719_v21  ;;  %v8724_v29 = vpop.f32.mrb[53].mxu0  ;;  %2562 = vadd.xlane.f32.xlu0 %v2514_v44  ;;  %v2109_v12 = vpop.xlane.xlu1 %2108  ;;  %v2136_v0 = vmul.f32 0.0078125, %v2107_v4  ;;  %v11467_v21 = vld [vmem:[#allocation23_spill] sm:$0xff] }
 0x3e6   :  { %11463 = vst [vmem:[#allocation144_spill] sm:$0xff] %v8724_v29  ;;  %v8728_v35 = vpop.f32.mrb[54].mxu0  ;;  %v2137_v34 = vmul.f32 0.0078125, %v2109_v12  ;;  %v11479_v12 = vld [vmem:[#allocation25_spill] sm:$0xff] }
 0x3e7   :  { %11464 = vst [vmem:[#allocation145_spill] sm:$0xff] %v8728_v35  ;;  %2564 = vadd.xlane.f32.xlu1 %v2515_v39  ;;  %v8732_v55 = vpop.f32.mrb[55].mxu0  ;;  %v8746_v35 = vsub.f32 %v11467_v21, %v2421_v38  ;;  %v2516_v38 = vmul.f32 %v8741_v37, %v8741_v37 }
 0x3e8   :  { %11465 = vst [vmem:[#allocation146_spill] sm:$0xff] %v8732_v55  ;;  %v2331_v21 = vpop.xlane.xlu0 %2330  ;;  %v8766_v4 = vsub.f32 %v11474_v32, %v2137_v34 }
 0x3e9   :  { %2182 = vadd.xlane.f32.xlu0 %v2166_v46  ;;  %11468 = vst [vmem:[#allocation23_spill] sm:$0xff] %v8746_v35  ;;  %v11471_v46 = vld [vmem:[#allocation37_spill] sm:$0xff]  ;;  %v2422_v7 = vmul.f32 0.0078125, %v2331_v21 }
 0x3ea   :  { %v8754_v44 = vsub.f32 %v11471_v46, %v2136_v0  ;;  %11475 = vst [vmem:[#allocation40_spill] sm:$0xff] %v8766_v4  ;;  %v2517_v0 = vmul.f32 %v8746_v35, %v8746_v35  ;;  %v2333_v46 = vpop.xlane.xlu1 %2332  ;;  %v2169_v34 = vmul.f32 %v8766_v4, %v8766_v4  ;;  %v11484_v35 = vld [vmem:[#allocation47_spill] sm:$0xff] }
 0x3eb   :  { %2184 = vadd.xlane.f32.xlu1 %v2167_v40 }
 0x3ec   :  { %v8743_v39 = vpop.f32.mrb[56].mxu0  ;;  %11472 = vst [vmem:[#allocation37_spill] sm:$0xff] %v8754_v44  ;;  %v2168_v29 = vmul.f32 %v8754_v44, %v8754_v44  ;;  %v2111_v55 = vpop.xlane.xlu0 %2110 }
 0x3ed   :  { %11466 = vst [vmem:[#allocation147_spill] sm:$0xff] %v8743_v39  ;;  %v8748_v27 = vpop.f32.mrb[57].mxu0  ;;  %2398 = vadd.xlane.f32.xlu0 %v8493_v25  ;;  %v2138_v21 = vmul.f32 0.0078125, %v2111_v55 }
 0x3ee   :  { %11469 = vst [vmem:[#allocation148_spill] sm:$0xff] %v8748_v27  ;;  %v8751_v33 = vpop.f32.mrb[58].mxu0  ;;  %v8781_v27 = vsub.f32 %v11479_v12, %v2422_v7 }
 0x3ef   :  { %11470 = vst [vmem:[#allocation149_spill] sm:$0xff] %v8751_v33  ;;  %2400 = vadd.xlane.f32.xlu1 %v8497_v63  ;;  %v8759_v40 = vpop.f32.mrb[59].mxu0  ;;  %v2423_v33 = vmul.f32 0.0078125, %v2333_v46  ;;  %v8794_v7 = vsub.f32 %v11484_v35, %v2138_v21 }
 0x3f0   :  { %11473 = vst [vmem:[#allocation150_spill] sm:$0xff] %v8759_v40  ;;  %11480 = vst [vmem:[#allocation25_spill] sm:$0xff] %v8781_v27  ;;  %v2335_v9 = vpop.xlane.xlu0 %2334  ;;  %v2518_v55 = vmul.f32 %v8781_v27, %v8781_v27 }
 0x3f1   :  { %2566 = vadd.xlane.f32.xlu0 %v2516_v38  ;;  %v2113_v38 = vpop.xlane.xlu1 %2112  ;;  %11485 = vst [vmem:[#allocation47_spill] sm:$0xff] %v8794_v7  ;;  %v2424_v21 = vmul.f32 0.0078125, %v2335_v9 }
 0x3f2   :  { %v2139_v4 = vmul.f32 0.0078125, %v2113_v38 }
 0x3f3   :  { %2568 = vadd.xlane.f32.xlu1 %v2517_v0  ;;  %v11487_v0 = vld [vmem:[#allocation50_spill] sm:$0xff] }
 0x3f4   :  { %v8772_v39 = vpop.f32.mrb[60].mxu0  ;;  %v8802_v46 = vsub.f32 %v11487_v0, %v2139_v4  ;;  %v2170_v4 = vmul.f32 %v8794_v7, %v8794_v7 }
 0x3f5   :  { %11476 = vst [vmem:[#allocation151_spill] sm:$0xff] %v8772_v39  ;;  %v8774_v2 = vpop.f32.mrb[61].mxu0  ;;  %2186 = vadd.xlane.f32.xlu0 %v2168_v29  ;;  %v11482_v29 = vld [vmem:[#allocation28_spill] sm:$0xff]  ;;  %v2337_v12 = vpop.xlane.xlu1 %2336 }
 0x3f6   :  { %11477 = vst [vmem:[#allocation152_spill] sm:$0xff] %v8774_v2  ;;  %v8778_v32 = vpop.f32.mrb[62].mxu0  ;;  %v8790_v44 = vsub.f32 %v11482_v29, %v2423_v33  ;;  %11488 = vst [vmem:[#allocation50_spill] sm:$0xff] %v8802_v46  ;;  %v2115_v29 = vpop.xlane.xlu0 %2114  ;;  %v2425_v39 = vmul.f32 0.0078125, %v2337_v12 }
 0x3f7   :  { %11478 = vst [vmem:[#allocation153_spill] sm:$0xff] %v8778_v32  ;;  %2188 = vadd.xlane.f32.xlu1 %v2169_v34  ;;  %v8785_v40 = vpop.f32.mrb[63].mxu0  ;;  %v2171_v32 = vmul.f32 %v8802_v46, %v8802_v46  ;;  %v2140_v27 = vmul.f32 0.0078125, %v2115_v29 }
 0x3f8   :  { %11481 = vst [vmem:[#allocation154_spill] sm:$0xff] %v8785_v40  ;;  %11483 = vst [vmem:[#allocation28_spill] sm:$0xff] %v8790_v44  ;;  %v2519_v38 = vmul.f32 %v8790_v44, %v8790_v44  ;;  %v11492_v44 = vld [vmem:[#allocation31_spill] sm:$0xff] }
 0x3f9   :  { %2402 = vadd.xlane.f32.xlu0 %v8514_v45  ;;  %v2117_v0 = vpop.xlane.xlu1 %2116  ;;  %v8821_v9 = vsub.f32 %v11492_v44, %v2424_v21 }
 0x3fa   :  { %v2141_v7 = vmul.f32 0.0078125, %v2117_v0 }
 0x3fb   :  { %2404 = vadd.xlane.f32.xlu1 %v8523_v6 }
 0x3fc   :  { %v8799_v34 = vpop.f32.mrb[64].mxu0  ;;  %v8846_v21 = vsub.f32 %v8386_v20, %v2141_v7 }
 0x3fd   :  { %11486 = vst [vmem:[#allocation155_spill] sm:$0xff] %v8799_v34  ;;  %v8804_v33 = vpop.f32.mrb[65].mxu0  ;;  %2570 = vadd.xlane.f32.xlu0 %v2518_v55  ;;  %v11494_v34 = vld [vmem:[#allocation33_spill] sm:$0xff]  ;;  %v2341_v12 = vpop.xlane.xlu1 %2340  ;;  %v8834_v55 = vsub.f32 %v8377_v1, %v2140_v27 }
 0x3fe   :  { %11489 = vst [vmem:[#allocation156_spill] sm:$0xff] %v8804_v33  ;;  %v8808_v35 = vpop.f32.mrb[66].mxu0  ;;  %11499 = vst [vmem:[#allocation162_spill] sm:$0xff] %v8846_v21  ;;  %v2427_v29 = vmul.f32 0.0078125, %v2341_v12  ;;  %v2173_v7 = vmul.f32 %v8846_v21, %v8846_v21 }
 0x3ff   :  { %11490 = vst [vmem:[#allocation157_spill] sm:$0xff] %v8808_v35  ;;  %2572 = vadd.xlane.f32.xlu1 %v2519_v38  ;;  %v8812_v40 = vpop.f32.mrb[67].mxu0  ;;  %v2339_v38 = vpop.xlane.xlu0 %2338  ;;  %v8826_v35 = vsub.f32 %v11494_v34, %v2425_v39  ;;  %11497 = vst [vmem:[#allocation160_spill] sm:$0xff] %v8834_v55  ;;  %v2520_v39 = vmul.f32 %v8821_v9, %v8821_v9  ;;  %v2172_v44 = vmul.f32 %v8834_v55, %v8834_v55 }
 0x400   :  { %11491 = vst [vmem:[#allocation158_spill] sm:$0xff] %v8812_v40  ;;  %v2426_v0 = vmul.f32 0.0078125, %v2339_v38  ;;  %v11212_v40 = vmov 0.0  }
 0x401   :  { %2190 = vadd.xlane.f32.xlu0 %v2170_v4  ;;  %v2521_v1 = vmul.f32 %v8826_v35, %v8826_v35  ;;  %v2121_v27 = vpop.xlane.xlu1 %2120  ;;  %6355 = vmatprep.subr.bf16.mxu1 %v11212_v40 }
 0x402   :  { %6385 = vmatprep.subr.bf16.mxu0 %v11212_v40  ;;  %v8872_v40 = vsub.f32 %v8258_v10, %v2427_v29 }
 0x403   :  { %2192 = vadd.xlane.f32.xlu1 %v2171_v32  ;;  %v2119_v34 = vpop.xlane.xlu0 %2118 }
 0x404   :  { %v8823_v2 = vpop.f32.mrb[68].mxu0 }
 0x405   :  { %11493 = vst [vmem:[#allocation31_spill] sm:$0xff] %v8823_v2  ;;  %v8828_v6 = vpop.f32.mrb[69].mxu0  ;;  %2406 = vadd.xlane.f32.xlu0 %v8532_v8  ;;  %v2345_v12 = vpop.xlane.xlu1 %2344 }
 0x406   :  { %11495 = vst [vmem:[#allocation33_spill] sm:$0xff] %v8828_v6  ;;  %v8831_v4 = vpop.f32.mrb[70].mxu0  ;;  %v2142_v6 = vmul.f32 0.0078125, %v2119_v34 }
 0x407   :  { %11496 = vst [vmem:[#allocation159_spill] sm:$0xff] %v8831_v4  ;;  %2408 = vadd.xlane.f32.xlu1 %v8536_v14  ;;  %v8839_v32 = vpop.f32.mrb[71].mxu0  ;;  %v2143_v4 = vmul.f32 0.0078125, %v2121_v27  ;;  %v2523_v27 = vmul.f32 %v8872_v40, %v8872_v40 }
 0x408   :  { %11498 = vst [vmem:[#allocation161_spill] sm:$0xff] %v8839_v32 }
 0x409   :  { %2574 = vadd.xlane.f32.xlu0 %v2520_v39  ;;  %v2343_v39 = vpop.xlane.xlu0 %2342  ;;  %v8888_v10 = vsub.f32 %v8428_v53, %v2143_v4 }
 0x40b   :  { %2576 = vadd.xlane.f32.xlu1 %v2521_v1  ;;  %v8863_v1 = vsub.f32 %v8254_v48, %v2426_v0  ;;  %v8878_v48 = vsub.f32 %v8419_v59, %v2142_v6  ;;  %v8883_v0 = vpop.xlane.xlu1 %2124  ;;  %11506 = vst [vmem:[#allocation169_spill] sm:$0xff] %v8888_v10  ;;  %v2428_v6 = vmul.f32 0.0078125, %v2343_v39 }
 0x40c   :  { %v8852_v33 = vpop.f32.mrb[72].mxu0 }
 0x40d   :  { %11500 = vst [vmem:[#allocation163_spill] sm:$0xff] %v8852_v33  ;;  %v8856_v20 = vpop.f32.mrb[73].mxu0  ;;  %2194 = vadd.xlane.f32.xlu0 %v2172_v44  ;;  %v8875_v55 = vpop.xlane.xlu0 %2122  ;;  %11504 = vst [vmem:[#allocation167_spill] sm:$0xff] %v8878_v48  ;;  %v2522_v34 = vmul.f32 %v8863_v1, %v8863_v1  ;;  %v8907_v39 = vsub.f32 %v8264_v47, %v2428_v6  ;;  %v11518_v47 = vmov 0.0  }
 0x40e   :  { %11501 = vst [vmem:[#allocation164_spill] sm:$0xff] %v8856_v20  ;;  %v8860_v38 = vpop.f32.mrb[74].mxu0  ;;  %v2174_v20 = vmul.f32 %v8878_v48, %v8878_v48  ;;  %6361 = vmatprep.mubr.msk.bf16.mxu1 %vm7441_vm0, %v11518_v47  ;;  %6391 = vmatprep.mubr.msk.bf16.mxu0 %vm7441_vm0, %v11518_v47 }
 0x40f   :  { %11502 = vst [vmem:[#allocation165_spill] sm:$0xff] %v8860_v38  ;;  %2196 = vadd.xlane.f32.xlu1 %v2173_v7  ;;  %v8867_v2 = vpop.f32.mrb[75].mxu0  ;;  %v2349_v33 = vpop.xlane.xlu1 %2348 }
 0x410   :  { %11503 = vst [vmem:[#allocation166_spill] sm:$0xff] %v8867_v2  ;;  %v2175_v2 = vmul.f32 %v8888_v10, %v8888_v10 }
 0x411   :  { %2410 = vadd.xlane.f32.xlu0 %v8540_v5  ;;  %v2347_v53 = vpop.xlane.xlu0 %2346 }
 0x412   :  { %v2430_v44 = vmul.f32 0.0078125, %v2347_v53 }
 0x413   :  { %2412 = vadd.xlane.f32.xlu1 %v8544_v3 }
 0x414   :  { %v8885_v7 = vpop.f32.mrb[76].mxu0 }
 0x415   :  { %11505 = vst [vmem:[#allocation168_spill] sm:$0xff] %v8885_v7  ;;  %v8890_v29 = vpop.f32.mrb[77].mxu0  ;;  %2578 = vadd.xlane.f32.xlu0 %v2522_v34  ;;  %v2429_v34 = vmul.f32 0.0078125, %v2345_v12  ;;  %v8920_v12 = vsub.f32 %v8282_v36, %v2430_v44 }
 0x416   :  { %11507 = vst [vmem:[#allocation170_spill] sm:$0xff] %v8890_v29  ;;  %v8894_v59 = vpop.f32.mrb[78].mxu0 }
 0x417   :  { %11508 = vst [vmem:[#allocation171_spill] sm:$0xff] %v8894_v59  ;;  %2580 = vadd.xlane.f32.xlu1 %v2523_v27  ;;  %v8898_v32 = vpop.f32.mrb[79].mxu0  ;;  %v8912_v7 = vsub.f32 %v8273_v13, %v2429_v34  ;;  %v2431_v59 = vmul.f32 0.0078125, %v2349_v33  ;;  %v2524_v13 = vmul.f32 %v8907_v39, %v8907_v39  ;;  %v2526_v44 = vmul.f32 %v8920_v12, %v8920_v12 }
 0x418   :  { %11509 = vst [vmem:[#allocation172_spill] sm:$0xff] %v8898_v32 }
 0x419   :  { %2198 = vadd.xlane.f32.xlu0 %v2174_v20  ;;  %v8932_v6 = vsub.f32 %v8286_v30, %v2431_v59  ;;  %v2525_v36 = vmul.f32 %v8912_v7, %v8912_v7 }
 0x41b   :  { %2200 = vadd.xlane.f32.xlu1 %v2175_v2  ;;  %v2527_v4 = vmul.f32 %v8932_v6, %v8932_v6 }
 0x41c   :  { %v8909_v27 = vpop.f32.mrb[80].mxu0 }
 0x41d   :  { %11510 = vst [vmem:[#allocation173_spill] sm:$0xff] %v8909_v27  ;;  %v8914_v38 = vpop.f32.mrb[81].mxu0  ;;  %2414 = vadd.xlane.f32.xlu0 %v8550_v56 }
 0x41e   :  { %11511 = vst [vmem:[#allocation174_spill] sm:$0xff] %v8914_v38  ;;  %v8917_v20 = vpop.f32.mrb[82].mxu0 }
 0x41f   :  { %11512 = vst [vmem:[#allocation175_spill] sm:$0xff] %v8917_v20  ;;  %2416 = vadd.xlane.f32.xlu1 %v8559_v51  ;;  %v8925_v2 = vpop.f32.mrb[83].mxu0 }
 0x420   :  { %11513 = vst [vmem:[#allocation176_spill] sm:$0xff] %v8925_v2 }
 0x421   :  { %2582 = vadd.xlane.f32.xlu0 %v2524_v13 }
 0x423   :  { %2584 = vadd.xlane.f32.xlu1 %v2525_v36 }
 0x424   :  { %v8938_v53 = vpop.f32.mrb[84].mxu0 }
 0x425   :  { %11514 = vst [vmem:[#allocation177_spill] sm:$0xff] %v8938_v53  ;;  %v8940_v34 = vpop.f32.mrb[85].mxu0  ;;  %2586 = vadd.xlane.f32.xlu0 %v2526_v44 }
 0x426   :  { %11515 = vst [vmem:[#allocation178_spill] sm:$0xff] %v8940_v34  ;;  %v8944_v33 = vpop.f32.mrb[86].mxu0 }
 0x427   :  { %11516 = vst [vmem:[#allocation179_spill] sm:$0xff] %v8944_v33  ;;  %2588 = vadd.xlane.f32.xlu1 %v2527_v4  ;;  %v8948_v59 = vpop.f32.mrb[87].mxu0 }
 0x428   :  { %11517 = vst [vmem:[#allocation180_spill] sm:$0xff] %v8948_v59 }
 0x42a   :  { %v8952_v36 = vpop.xlane.xlu0 %2126 }
 0x42c   :  { %v8958_v44 = vpop.xlane.xlu1 %2128  ;;  %v8960_v38 = vpop.f32.mrb[88].mxu0 }
 0x42d   :  { %11519 = vst [vmem:[#allocation181_spill] sm:$0xff] %v8960_v38  ;;  %v8962_v30 = vpop.f32.mrb[89].mxu0 }
 0x42e   :  { %11520 = vst [vmem:[#allocation182_spill] sm:$0xff] %v8962_v30  ;;  %v8964_v4 = vpop.f32.mrb[90].mxu0  ;;  %v2351_v2 = vpop.xlane.xlu0 %2350 }
 0x42f   :  { %11521 = vst [vmem:[#allocation183_spill] sm:$0xff] %v8964_v4  ;;  %v2432_v34 = vmul.f32 0.0078125, %v2351_v2  ;;  %v8968_v59 = vpop.f32.mrb[91].mxu0 }
 0x430   :  { %11522 = vst [vmem:[#allocation184_spill] sm:$0xff] %v8968_v59  ;;  %v2353_v32 = vpop.xlane.xlu1 %2352 }
 0x431   :  { %v8973_v53 = vsub.f32 %v8290_v49, %v2432_v34  ;;  %v2433_v33 = vmul.f32 0.0078125, %v2353_v32 }
 0x433   :  { %v8976_v27 = vsub.f32 %v8294_v61, %v2433_v33  ;;  %v2528_v20 = vmul.f32 %v8973_v53, %v8973_v53 }
 0x434   :  { %v8980_v48 = vpop.f32.mrb[92].mxu0 }
 0x435   :  { %11523 = vst [vmem:[#allocation185_spill] sm:$0xff] %v8980_v48  ;;  %v8982_v13 = vpop.f32.mrb[93].mxu0  ;;  %2590 = vadd.xlane.f32.xlu0 %v2528_v20  ;;  %v2529_v2 = vmul.f32 %v8976_v27, %v8976_v27 }
 0x436   :  { %11524 = vst [vmem:[#allocation186_spill] sm:$0xff] %v8982_v13  ;;  %v8986_v29 = vpop.f32.mrb[94].mxu0 }
 0x437   :  { %11525 = vst [vmem:[#allocation187_spill] sm:$0xff] %v8986_v29  ;;  %2592 = vadd.xlane.f32.xlu1 %v2529_v2  ;;  %v8990_v32 = vpop.f32.mrb[95].mxu0 }
 0x438   :  { %11526 = vst [vmem:[#allocation188_spill] sm:$0xff] %v8990_v32 }
 0x43c   :  { %v8994_v33 = vpop.f32.mrb[96].mxu0 }
 0x43d   :  { %11527 = vst [vmem:[#allocation189_spill] sm:$0xff] %v8994_v33  ;;  %v8996_v34 = vpop.f32.mrb[97].mxu0 }
 0x43e   :  { %11528 = vst [vmem:[#allocation190_spill] sm:$0xff] %v8996_v34  ;;  %v8998_v30 = vpop.f32.mrb[98].mxu0 }
 0x43f   :  { %11529 = vst [vmem:[#allocation191_spill] sm:$0xff] %v8998_v30  ;;  %v9002_v59 = vpop.f32.mrb[99].mxu0 }
 0x440   :  { %11530 = vst [vmem:[#allocation192_spill] sm:$0xff] %v9002_v59 }
 0x442   :  { %v9006_v2 = vpop.xlane.xlu0 %2130 }
 0x444   :  { %v9008_v48 = vpop.xlane.xlu1 %2132  ;;  %v9010_v29 = vpop.f32.mrb[100].mxu0 }
 0x445   :  { %11531 = vst [vmem:[#allocation193_spill] sm:$0xff] %v9010_v29  ;;  %v9012_v61 = vpop.f32.mrb[101].mxu0 }
 0x446   :  { %11532 = vst [vmem:[#allocation194_spill] sm:$0xff] %v9012_v61  ;;  %v9014_v13 = vpop.f32.mrb[102].mxu0  ;;  %v2355_v32 = vpop.xlane.xlu0 %2354 }
 0x447   :  { %11533 = vst [vmem:[#allocation195_spill] sm:$0xff] %v9014_v13  ;;  %v2434_v20 = vmul.f32 0.0078125, %v2355_v32  ;;  %v9018_v33 = vpop.f32.mrb[103].mxu0 }
 0x448   :  { %11534 = vst [vmem:[#allocation196_spill] sm:$0xff] %v9018_v33  ;;  %v2357_v34 = vpop.xlane.xlu1 %2356 }
 0x449   :  { %v9023_v59 = vsub.f32 %v8300_v23, %v2434_v20  ;;  %v2435_v30 = vmul.f32 0.0078125, %v2357_v34 }
 0x44a   :  { %v2359_v4 = vpop.xlane.xlu0 %2358 }
 0x44b   :  { %v9026_v10 = vsub.f32 %v8309_v22, %v2435_v30  ;;  %v2436_v21 = vmul.f32 0.0078125, %v2359_v4  ;;  %v2530_v46 = vmul.f32 %v9023_v59, %v9023_v59 }
 0x44c   :  { %v2361_v38 = vpop.xlane.xlu1 %2360  ;;  %v9030_v32 = vpop.f32.mrb[104].mxu0 }
 0x44d   :  { %11535 = vst [vmem:[#allocation197_spill] sm:$0xff] %v9030_v32  ;;  %v9033_v29 = vsub.f32 %v8318_v60, %v2436_v21  ;;  %v2437_v49 = vmul.f32 0.0078125, %v2361_v38  ;;  %v9035_v61 = vpop.f32.mrb[105].mxu0  ;;  %2594 = vadd.xlane.f32.xlu0 %v2530_v46  ;;  %v2531_v23 = vmul.f32 %v9026_v10, %v9026_v10 }
 0x44e   :  { %11536 = vst [vmem:[#allocation198_spill] sm:$0xff] %v9035_v61  ;;  %v9039_v34 = vpop.f32.mrb[106].mxu0  ;;  %v2363_v22 = vpop.xlane.xlu0 %2362 }
 0x44f   :  { %11537 = vst [vmem:[#allocation199_spill] sm:$0xff] %v9039_v34  ;;  %v9042_v30 = vsub.f32 %v8322_v15, %v2437_v49  ;;  %v2438_v20 = vmul.f32 0.0078125, %v2363_v22  ;;  %2596 = vadd.xlane.f32.xlu1 %v2531_v23  ;;  %v9046_v60 = vpop.f32.mrb[107].mxu0  ;;  %v2532_v21 = vmul.f32 %v9033_v29, %v9033_v29 }
 0x450   :  { %11538 = vst [vmem:[#allocation200_spill] sm:$0xff] %v9046_v60  ;;  %v2365_v38 = vpop.xlane.xlu1 %2364  ;;  %v11540_v60 = vld [vmem:[#allocation73_spill] sm:$0xff] }
 0x451   :  { %v9053_v33 = vsub.f32 %v8367_v26, %v2438_v20  ;;  %v2439_v13 = vmul.f32 0.0078125, %v2365_v38  ;;  %2598 = vadd.xlane.f32.xlu0 %v2532_v21  ;;  %v2533_v15 = vmul.f32 %v9042_v30, %v9042_v30 }
 0x452   :  { %v2367_v49 = vpop.xlane.xlu0 %2366 }
 0x453   :  { %v9058_v23 = vsub.f32 %v8371_v17, %v2439_v13  ;;  %v2440_v22 = vmul.f32 0.0078125, %v2367_v49  ;;  %2600 = vadd.xlane.f32.xlu1 %v2533_v15  ;;  %v2534_v4 = vmul.f32 %v9053_v33, %v9053_v33 }
 0x454   :  { %v2369_v32 = vpop.xlane.xlu1 %2368 }
 0x455   :  { %v9063_v46 = vsub.f32 %v8379_v28, %v2440_v22  ;;  %v2441_v26 = vmul.f32 0.0078125, %v2369_v32  ;;  %2602 = vadd.xlane.f32.xlu0 %v2534_v4  ;;  %v2535_v20 = vmul.f32 %v9058_v23, %v9058_v23 }
 0x456   :  { %v2371_v21 = vpop.xlane.xlu0 %2370 }
 0x457   :  { %v9068_v38 = vsub.f32 %v8388_v16, %v2441_v26  ;;  %v2442_v17 = vmul.f32 0.0078125, %v2371_v21  ;;  %2604 = vadd.xlane.f32.xlu1 %v2535_v20  ;;  %v2536_v13 = vmul.f32 %v9063_v46, %v9063_v46 }
 0x458   :  { %v2373_v15 = vpop.xlane.xlu1 %2372 }
 0x459   :  { %v9073_v49 = vsub.f32 %v8399_v50, %v2442_v17  ;;  %v2443_v28 = vmul.f32 0.0078125, %v2373_v15  ;;  %2606 = vadd.xlane.f32.xlu0 %v2536_v13  ;;  %v2537_v32 = vmul.f32 %v9068_v38, %v9068_v38 }
 0x45a   :  { %v2375_v4 = vpop.xlane.xlu0 %2374 }
 0x45b   :  { %v9078_v22 = vsub.f32 %v8403_v11, %v2443_v28  ;;  %v2444_v16 = vmul.f32 0.0078125, %v2375_v4  ;;  %2608 = vadd.xlane.f32.xlu1 %v2537_v32  ;;  %v2538_v26 = vmul.f32 %v9073_v49, %v9073_v49 }
 0x45c   :  { %v2377_v20 = vpop.xlane.xlu1 %2376 }
 0x45d   :  { %v9083_v21 = vsub.f32 %v8409_v42, %v2444_v16  ;;  %v2445_v50 = vmul.f32 0.0078125, %v2377_v20  ;;  %2610 = vadd.xlane.f32.xlu0 %v2538_v26  ;;  %v2539_v17 = vmul.f32 %v9078_v22, %v9078_v22  ;;  %v2144_v20 = vmul.f32 0.0078125, %v8875_v55 }
 0x45e   :  { %v2379_v13 = vpop.xlane.xlu0 %2378 }
 0x45f   :  { %v9088_v15 = vsub.f32 %v8413_v62, %v2445_v50  ;;  %v2446_v11 = vmul.f32 0.0078125, %v2379_v13  ;;  %2612 = vadd.xlane.f32.xlu1 %v2539_v17  ;;  %v2540_v28 = vmul.f32 %v9083_v21, %v9083_v21 }
 0x460   :  { %v2381_v32 = vpop.xlane.xlu1 %2380 }
 0x461   :  { %v9093_v4 = vsub.f32 %v8421_v41, %v2446_v11  ;;  %v2447_v42 = vmul.f32 0.0078125, %v2381_v32  ;;  %2614 = vadd.xlane.f32.xlu0 %v2540_v28  ;;  %v2541_v16 = vmul.f32 %v9088_v15, %v9088_v15  ;;  %v2145_v41 = vmul.f32 0.0078125, %v8883_v0  ;;  %v11539_v11 = vld [vmem:[#allocation68_spill] sm:$0xff] }
 0x462   :  { %v2383_v26 = vpop.xlane.xlu0 %2382 }
 0x463   :  { %v9099_v62 = vsub.f32 %v8430_v19, %v2447_v42  ;;  %v2448_v50 = vmul.f32 0.0078125, %v2383_v26  ;;  %2616 = vadd.xlane.f32.xlu1 %v2541_v16  ;;  %v2542_v17 = vmul.f32 %v9093_v4, %v9093_v4  ;;  %v9110_v19 = vsub.f32 %v11540_v60, %v2144_v20 }
 0x464   :  { %v2385_v13 = vpop.xlane.xlu1 %2384 }
 0x465   :  { %v9105_v32 = vsub.f32 %v11539_v11, %v2448_v50  ;;  %v2449_v28 = vmul.f32 0.0078125, %v2385_v13  ;;  %2618 = vadd.xlane.f32.xlu0 %v2542_v17  ;;  %v2543_v61 = vmul.f32 %v9099_v62, %v9099_v62  ;;  %11541 = vst [vmem:[#allocation68_spill] sm:$0xff] %v9110_v19  ;;  %v11542_v50 = vld [vmem:[#allocation77_spill] sm:$0xff] }
 0x466   :  { %v2387_v55 = vpop.xlane.xlu0 %2386  ;;  %v9118_v11 = vsub.f32 %v11542_v50, %v2145_v41 }
 0x467   :  { %v9113_v42 = vsub.f32 %v8445_v54, %v2449_v28  ;;  %v2450_v16 = vmul.f32 0.0078125, %v2387_v55  ;;  %2620 = vadd.xlane.f32.xlu1 %v2543_v61  ;;  %v2544_v0 = vmul.f32 %v9105_v32, %v9105_v32  ;;  %v2176_v61 = vmul.f32 %v9110_v19, %v9110_v19 }
 0x468   :  { %v2389_v26 = vpop.xlane.xlu1 %2388  ;;  %11543 = vst [vmem:[#allocation73_spill] sm:$0xff] %v9118_v11  ;;  %v2177_v55 = vmul.f32 %v9118_v11, %v9118_v11 }
 0x469   :  { %v2451_v17 = vmul.f32 0.0078125, %v2389_v26  ;;  %2622 = vadd.xlane.f32.xlu0 %v2544_v0  ;;  %v2545_v13 = vmul.f32 %v9113_v42, %v9113_v42  ;;  %v9123_v60 = vsub.f32 %v8451_v43, %v2450_v16  ;;  %v11545_v26 = vld [vmem:[#allocation74_spill] sm:$0xff] }
 0x46a   :  { %v2391_v34 = vpop.xlane.xlu0 %2390 }
 0x46b   :  { %v2452_v54 = vmul.f32 0.0078125, %v2391_v34  ;;  %2624 = vadd.xlane.f32.xlu1 %v2545_v13  ;;  %v9128_v28 = vsub.f32 %v8455_v18, %v2451_v17  ;;  %v2546_v34 = vmul.f32 %v9123_v60, %v9123_v60 }
 0x46c   :  { %v2393_v20 = vpop.xlane.xlu1 %2392 }
 0x46d   :  { %11544 = vst [vmem:[#allocation77_spill] sm:$0xff] %v9128_v28  ;;  %v2453_v41 = vmul.f32 0.0078125, %v2393_v20  ;;  %2202 = vadd.xlane.f32.xlu0 %v2176_v61  ;;  %v9133_v50 = vsub.f32 %v11545_v26, %v2452_v54  ;;  %v2547_v17 = vmul.f32 %v9128_v28, %v9128_v28 }
 0x46e   :  { %v2395_v0 = vpop.xlane.xlu0 %2394 }
 0x46f   :  { %11546 = vst [vmem:[#allocation74_spill] sm:$0xff] %v9133_v50  ;;  %v2454_v43 = vmul.f32 0.0078125, %v2395_v0  ;;  %2204 = vadd.xlane.f32.xlu1 %v2177_v55  ;;  %v9138_v13 = vsub.f32 %v8472_v24, %v2453_v41  ;;  %v2548_v55 = vmul.f32 %v9133_v50, %v9133_v50 }
 0x470   :  { %v2397_v16 = vpop.xlane.xlu1 %2396 }
 0x471   :  { %11547 = vst [vmem:[#allocation201_spill] sm:$0xff] %v9138_v13  ;;  %v2455_v18 = vmul.f32 0.0078125, %v2397_v16  ;;  %2626 = vadd.xlane.f32.xlu0 %v2546_v34  ;;  %v9143_v20 = vsub.f32 %v8483_v57, %v2454_v43  ;;  %v2549_v34 = vmul.f32 %v9138_v13, %v9138_v13 }
 0x472   :  { %v2563_v61 = vpop.xlane.xlu0 %2562 }
 0x473   :  { %11548 = vst [vmem:[#allocation202_spill] sm:$0xff] %v9143_v20  ;;  %v2658_v54 = vmul.f32 0.0078125, %v2563_v61  ;;  %2628 = vadd.xlane.f32.xlu1 %v2547_v17  ;;  %v9148_v26 = vsub.f32 %v8487_v31, %v2455_v18  ;;  %v2550_v57 = vmul.f32 %v9143_v20, %v9143_v20 }
 0x474   :  { %v2565_v0 = vpop.xlane.xlu1 %2564 }
 0x475   :  { %11549 = vst [vmem:[#allocation203_spill] sm:$0xff] %v9148_v26  ;;  %v2706_v24 = vadd.f32 1e-05, %v2658_v54  ;;  %v2659_v41 = vmul.f32 0.0078125, %v2565_v0  ;;  %2630 = vadd.xlane.f32.xlu0 %v2548_v55  ;;  %v2551_v31 = vmul.f32 %v9148_v26, %v9148_v26 }
 0x476   :  { %v2183_v16 = vpop.xlane.xlu0 %2182 }
 0x477   :  { %6890 = vrsqrt.f32 %v2706_v24  ;;  %v2707_v19 = vadd.f32 1e-05, %v2659_v41  ;;  %2632 = vadd.xlane.f32.xlu1 %v2549_v34 }
 0x478   :  { %v2185_v43 = vpop.xlane.xlu1 %2184 }
 0x479   :  { %6892 = vrsqrt.f32 %v2707_v19  ;;  %2634 = vadd.xlane.f32.xlu0 %v2550_v57 }
 0x47a   :  { %v2399_v18 = vpop.xlane.xlu0 %2398 }
 0x47b   :  { %v2456_v17 = vmul.f32 0.0078125, %v2399_v18  ;;  %2636 = vadd.xlane.f32.xlu1 %v2551_v31 }
 0x47c   :  { %v2401_v61 = vpop.xlane.xlu1 %2400 }
 0x47d   :  { %v9157_v54 = vsub.f32 %v8493_v25, %v2456_v17  ;;  %v2457_v55 = vmul.f32 0.0078125, %v2401_v61  ;;  %v9169_v25 = vld [vmem:[%s11057_s11] ss:$0 sm:$0xff]  ;;  %v2215_v61 = vmul.f32 0.0078125, %v2185_v43 }
 0x47e   :  { %v2567_v0 = vpop.xlane.xlu0 %2566 }
 0x47f   :  { %11550 = vst [vmem:[#allocation204_spill] sm:$0xff] %v9157_v54  ;;  %v9160_v24 = vsub.f32 %v8497_v63, %v2457_v55  ;;  %v2660_v41 = vmul.f32 0.0078125, %v2567_v0  ;;  %v2552_v19 = vmul.f32 %v9157_v54, %v9157_v54  ;;  %v2231_v43 = vadd.f32 1e-05, %v2215_v61 }
 0x480   :  { %v2569_v34 = vpop.xlane.xlu1 %2568 }
 0x481   :  { %11551 = vst [vmem:[#allocation205_spill] sm:$0xff] %v9160_v24  ;;  %v6891_v57 = vpop.eup %6890  ;;  %v2708_v20 = vadd.f32 1e-05, %v2660_v41  ;;  %v2661_v26 = vmul.f32 0.0078125, %v2569_v34  ;;  %2638 = vadd.xlane.f32.xlu0 %v2552_v19  ;;  %v2553_v31 = vmul.f32 %v9160_v24, %v9160_v24  ;;  %v9181_v34 = vld [vmem:[%s11058_s12] ss:$0 sm:$0xff] }
 0x482   :  { %v9171_v18 = vpop.xlane.xlu0 %2186  ;;  %v2802_v63 = vmul.f32 %v6891_v57, %v8694_v58  ;;  %v2214_v24 = vmul.f32 0.0078125, %v2183_v16 }
 0x483   :  { %v6893_v17 = vpop.eup %6892  ;;  %6894 = vrsqrt.f32 %v2708_v20  ;;  %v2709_v55 = vadd.f32 1e-05, %v2661_v26  ;;  %2640 = vadd.xlane.f32.xlu1 %v2553_v31 }
 0x484   :  { %v9174_v0 = vpop.xlane.xlu1 %2188  ;;  %v2803_v41 = vmul.f32 %v6893_v17, %v8710_v52  ;;  %v2856_v19 = vmul.f32 %v9169_v25, %v2802_v63  ;;  %v2230_v31 = vadd.f32 1e-05, %v2214_v24 }
 0x485   :  { %6896 = vrsqrt.f32 %v2709_v55 }
 0x486   :  { %v2403_v54 = vpop.xlane.xlu0 %2402  ;;  %v2857_v58 = vmul.f32 %v9169_v25, %v2803_v41  ;;  %v2910_v26 = vadd.f32 %v9181_v34, %v2856_v19  ;;  %6898 = vrsqrt.f32 %v2231_v43 }
 0x487   :  { %6900 = vrsqrt.f32 %v2230_v31 }
 0x488   :  { %v2405_v20 = vpop.xlane.xlu1 %2404  ;;  %v2911_v57 = vadd.f32 %v9181_v34, %v2857_v58  ;;  %v11552_v58 = vld [vmem:[#allocation23_spill] sm:$0xff] }
 0x48a   :  { %v2571_v52 = vpop.xlane.xlu0 %2570  ;;  %v2982_v17 = vpack.c.bf16 %v2911_v57, %v2910_v26 }
 0x48b   :  { %v2662_v63 = vmul.f32 0.0078125, %v2571_v52 }
 0x48c   :  { %v2573_v55 = vpop.xlane.xlu1 %2572  ;;  %6356 = vmatpush3.bf16.xpose.msra.mxu1 %v2982_v17  ;;  %v2458_v17 = vmul.f32 0.0078125, %v2403_v54 }
 0x48d   :  { %v6895_v11 = vpop.eup %6894  ;;  %v2710_v13 = vadd.f32 1e-05, %v2662_v63  ;;  %v2663_v50 = vmul.f32 0.0078125, %v2573_v55  ;;  %6357 = vmatprep.subr.bf16.mxu1 %v11518_v47 }
 0x48e   :  { %v9187_v16 = vpop.xlane.xlu0 %2190  ;;  %v2804_v61 = vmul.f32 %v6895_v11, %v8741_v37 }
 0x48f   :  { %v6897_v41 = vpop.eup %6896  ;;  %6902 = vrsqrt.f32 %v2710_v13  ;;  %v2711_v19 = vadd.f32 1e-05, %v2663_v50  ;;  %v2459_v13 = vmul.f32 0.0078125, %v2405_v20 }
 0x490   :  { %v9190_v24 = vpop.xlane.xlu1 %2192  ;;  %v2805_v43 = vmul.f32 %v6897_v41, %v11552_v58  ;;  %v2858_v26 = vmul.f32 %v9169_v25, %v2804_v61  ;;  %v6899_v11 = vpop.eup %6898  ;;  %v9201_v61 = vsub.f32 %v8514_v45, %v2458_v17 }
 0x491   :  { %6904 = vrsqrt.f32 %v2711_v19 }
 0x492   :  { %v2407_v57 = vpop.xlane.xlu0 %2406  ;;  %v2859_v52 = vmul.f32 %v9169_v25, %v2805_v43  ;;  %v2912_v55 = vadd.f32 %v9181_v34, %v2858_v26  ;;  %11554 = vst [vmem:[#allocation206_spill] sm:$0xff] %v9201_v61  ;;  %v6901_v26 = vpop.eup %6900 }
 0x493   :  { %v2460_v63 = vmul.f32 0.0078125, %v2407_v57  ;;  %v11556_v57 = vld [vmem:[#allocation143_spill] sm:$0xff] }
 0x494   :  { %v2409_v31 = vpop.xlane.xlu1 %2408  ;;  %v2913_v37 = vadd.f32 %v9181_v34, %v2859_v52  ;;  %v2263_v52 = vmul.f32 %v6899_v11, %v11556_v57  ;;  %v11560_v11 = vld [vmem:[#allocation141_spill] sm:$0xff] }
 0x495   :  { %v9198_v50 = vsub.f32 %v8532_v8, %v2460_v63  ;;  %v2461_v28 = vmul.f32 0.0078125, %v2409_v31  ;;  %v11557_v63 = vld [vmem:[#allocation88_spill] sm:$0xff]  ;;  %v2262_v57 = vmul.f32 %v6901_v26, %v11560_v11 }
 0x496   :  { %v2575_v41 = vpop.xlane.xlu0 %2574  ;;  %v2983_v58 = vpack.c.bf16 %v2913_v37, %v2912_v55  ;;  %v9210_v31 = vsub.f32 %v11557_v63, %v2459_v13  ;;  %v2554_v13 = vmul.f32 %v9201_v61, %v9201_v61 }
 0x497   :  { %11553 = vst [vmem:[#allocation23_spill] sm:$0xff] %v9198_v50  ;;  %v9204_v19 = vsub.f32 %v8536_v14, %v2461_v28  ;;  %v2664_v54 = vmul.f32 0.0078125, %v2575_v41  ;;  %v2556_v43 = vmul.f32 %v9198_v50, %v9198_v50  ;;  %v11559_v28 = vld [vmem:[#allocation25_spill] sm:$0xff]  ;;  %v11563_v50 = vld [vmem:[#allocation87_spill] sm:$0xff] }
 0x498   :  { %v2577_v20 = vpop.xlane.xlu1 %2576  ;;  %6358 = vmatpush3.bf16.xpose.msra.mxu1 %v2983_v58  ;;  %11558 = vst [vmem:[#allocation143_spill] sm:$0xff] %v9210_v31  ;;  %v2555_v26 = vmul.f32 %v9210_v31, %v9210_v31 }
 0x499   :  { %11555 = vst [vmem:[#allocation207_spill] sm:$0xff] %v9204_v19  ;;  %v6903_v8 = vpop.eup %6902  ;;  %v2712_v55 = vadd.f32 1e-05, %v2664_v54  ;;  %v2665_v37 = vmul.f32 0.0078125, %v2577_v20  ;;  %2646 = vadd.xlane.f32.xlu0 %v2556_v43  ;;  %v2557_v45 = vmul.f32 %v9204_v19, %v9204_v19  ;;  %6359 = vmatprep.subr.bf16.mxu1 %v11518_v47  ;;  %v9224_v54 = vld [vmem:[%s11055_s9] ss:$0 sm:$0xff] }
 0x49a   :  { %v9215_v14 = vpop.xlane.xlu0 %2194  ;;  %v2806_v17 = vmul.f32 %v6903_v8, %v11559_v28  ;;  %v11561_v20 = vld [vmem:[#allocation28_spill] sm:$0xff]  ;;  %v2285_v28 = vmul.f32 %v9224_v54, %v2263_v52  ;;  %v2284_v11 = vmul.f32 %v9224_v54, %v2262_v57 }
 0x49b   :  { %v6905_v41 = vpop.eup %6904  ;;  %6906 = vrsqrt.f32 %v2712_v55  ;;  %v2713_v58 = vadd.f32 1e-05, %v2665_v37  ;;  %2648 = vadd.xlane.f32.xlu1 %v2557_v45  ;;  %v2146_v55 = vmul.f32 0.0078125, %v8952_v36 }
 0x49c   :  { %v9226_v43 = vpop.xlane.xlu1 %2196  ;;  %v2807_v63 = vmul.f32 %v6905_v41, %v11561_v20  ;;  %v2860_v8 = vmul.f32 %v9169_v25, %v2806_v17  ;;  %v2147_v41 = vmul.f32 0.0078125, %v8958_v44 }
 0x49d   :  { %6908 = vrsqrt.f32 %v2713_v58  ;;  %2642 = vadd.xlane.f32.xlu0 %v2554_v13  ;;  %v9242_v58 = vld [vmem:[%s11056_s10] ss:$0 sm:$0xff] }
 0x49e   :  { %v2411_v37 = vpop.xlane.xlu0 %2410  ;;  %v2861_v45 = vmul.f32 %v9169_v25, %v2807_v63  ;;  %v2914_v17 = vadd.f32 %v9181_v34, %v2860_v8  ;;  %v2307_v57 = vadd.f32 %v9242_v58, %v2285_v28  ;;  %v11562_v63 = vld [vmem:[#allocation84_spill] sm:$0xff]  ;;  %v2306_v19 = vadd.f32 %v9242_v58, %v2284_v11 }
 0x49f   :  { %v2462_v61 = vmul.f32 0.0078125, %v2411_v37  ;;  %2644 = vadd.xlane.f32.xlu1 %v2555_v26  ;;  %v9249_v26 = vsub.f32 %v11562_v63, %v2146_v55 }
 0x4a0   :  { %v2413_v20 = vpop.xlane.xlu1 %2412  ;;  %v2915_v52 = vadd.f32 %v9181_v34, %v2861_v45  ;;  %v2958_v63 = vmul.f32 0.088388346, %v2306_v19  ;;  %v2148_v19 = vmul.f32 0.0078125, %v9006_v2 }
 0x4a1   :  { %v9245_v36 = vsub.f32 %v8540_v5, %v2462_v61  ;;  %v2463_v13 = vmul.f32 0.0078125, %v2413_v20  ;;  %v9258_v5 = vsub.f32 %v11563_v50, %v2147_v41  ;;  %v2178_v41 = vmul.f32 %v9249_v26, %v9249_v26 }
 0x4a2   :  { %v2579_v44 = vpop.xlane.xlu0 %2578  ;;  %v2984_v37 = vpack.c.bf16 %v2915_v52, %v2914_v17 }
 0x4a3   :  { %v9252_v8 = vsub.f32 %v8544_v3, %v2463_v13  ;;  %v2666_v45 = vmul.f32 0.0078125, %v2579_v44  ;;  %v2558_v31 = vmul.f32 %v9245_v36, %v9245_v36  ;;  %v2959_v3 = vmul.f32 0.088388346, %v2307_v57 }
 0x4a4   :  { %v2581_v61 = vpop.xlane.xlu1 %2580  ;;  %6360 = vmatpush3.bf16.xpose.msra.mxu1 %v2984_v37 }
 0x4a5   :  { %v6907_v28 = vpop.eup %6906  ;;  %v2714_v20 = vadd.f32 1e-05, %v2666_v45  ;;  %v2667_v55 = vmul.f32 0.0078125, %v2581_v61  ;;  %2650 = vadd.xlane.f32.xlu0 %v2558_v31  ;;  %v2559_v17 = vmul.f32 %v9252_v8, %v9252_v8  ;;  %6365 = vmatprep.subr.bf16.mxu1 %v11518_v47  ;;  %v2217_v31 = vmul.f32 0.0078125, %v9174_v0 }
 0x4a6   :  { %v9263_v52 = vpop.xlane.xlu0 %2198  ;;  %v2808_v13 = vmul.f32 %v6907_v28, %v8821_v9  ;;  %v2179_v9 = vmul.f32 %v9258_v5, %v9258_v5  ;;  %v2974_v45 = vpack.c.bf16 %v2959_v3, %v2958_v63  ;;  %v2216_v61 = vmul.f32 0.0078125, %v9171_v18  ;;  %v11564_v63 = vld [vmem:[#allocation95_spill] sm:$0xff] }
 0x4a7   :  { %v6909_v11 = vpop.eup %6908  ;;  %6910 = vrsqrt.f32 %v2714_v20  ;;  %v2715_v50 = vadd.f32 1e-05, %v2667_v55  ;;  %2652 = vadd.xlane.f32.xlu1 %v2559_v17  ;;  %v2233_v55 = vadd.f32 1e-05, %v2217_v31  ;;  %v2149_v3 = vmul.f32 0.0078125, %v9008_v48 }
 0x4a8   :  { %v9269_v44 = vpop.xlane.xlu1 %2200  ;;  %v2809_v57 = vmul.f32 %v6909_v11, %v8826_v35  ;;  %v2862_v37 = vmul.f32 %v9169_v25, %v2808_v13 }
 0x4a9   :  { %6912 = vrsqrt.f32 %v2715_v50  ;;  %2206 = vadd.xlane.f32.xlu0 %v2178_v41  ;;  %v2232_v50 = vadd.f32 1e-05, %v2216_v61 }
 0x4aa   :  { %v2415_v28 = vpop.xlane.xlu0 %2414  ;;  %v2863_v20 = vmul.f32 %v9169_v25, %v2809_v57  ;;  %v2916_v17 = vadd.f32 %v9181_v34, %v2862_v37  ;;  %v9287_v57 = vsub.f32 %v11564_v63, %v2148_v19  ;;  %6914 = vrsqrt.f32 %v2233_v55 }
 0x4ab   :  { %v2464_v0 = vmul.f32 0.0078125, %v2415_v28  ;;  %2208 = vadd.xlane.f32.xlu1 %v2179_v9  ;;  %6362 = vmatmul.mubr.bf16.vlgmr.msra.gmra.mrb[116].mxu1 %v2974_v45  ;;  %6916 = vrsqrt.f32 %v2232_v50 }
 0x4ac   :  { %v2417_v35 = vpop.xlane.xlu1 %2416  ;;  %v2917_v13 = vadd.f32 %v9181_v34, %v2863_v20  ;;  %6371 = vmatprep.mubr.msk.bf16.mxu1 %vm7441_vm0, %v11518_v47 }
 0x4ad   :  { %v9284_v18 = vsub.f32 %v8550_v56, %v2464_v0  ;;  %v2465_v11 = vmul.f32 0.0078125, %v2417_v35  ;;  %v11565_v56 = vld [vmem:[#allocation98_spill] sm:$0xff] }
 0x4ae   :  { %v2583_v2 = vpop.xlane.xlu0 %2582  ;;  %v2985_v41 = vpack.c.bf16 %v2917_v13, %v2916_v17  ;;  %v9295_v28 = vsub.f32 %v11565_v56, %v2149_v3  ;;  %v2180_v13 = vmul.f32 %v9287_v57, %v9287_v57 }
 0x4af   :  { %v9290_v31 = vsub.f32 %v8559_v51, %v2465_v11  ;;  %v2668_v37 = vmul.f32 0.0078125, %v2583_v2  ;;  %v2560_v9 = vmul.f32 %v9284_v18, %v9284_v18 }
 0x4b0   :  { %v2585_v45 = vpop.xlane.xlu1 %2584  ;;  %6366 = vmatpush3.bf16.xpose.msra.mxu1 %v2985_v41 }
 0x4b1   :  { %v6911_v48 = vpop.eup %6910  ;;  %v2716_v61 = vadd.f32 1e-05, %v2668_v37  ;;  %v2669_v20 = vmul.f32 0.0078125, %v2585_v45  ;;  %2654 = vadd.xlane.f32.xlu0 %v2560_v9  ;;  %v2561_v19 = vmul.f32 %v9290_v31, %v9290_v31  ;;  %6367 = vmatprep.subr.bf16.mxu1 %v11518_v47 }
 0x4b2   :  { %v2587_v51 = vpop.xlane.xlu0 %2586  ;;  %v2810_v0 = vmul.f32 %v6911_v48, %v8863_v1  ;;  %v2181_v1 = vmul.f32 %v9295_v28, %v9295_v28 }
 0x4b3   :  { %v6913_v35 = vpop.eup %6912  ;;  %6918 = vrsqrt.f32 %v2716_v61  ;;  %v2717_v55 = vadd.f32 1e-05, %v2669_v20  ;;  %v2670_v17 = vmul.f32 0.0078125, %v2587_v51  ;;  %2656 = vadd.xlane.f32.xlu1 %v2561_v19  ;;  %v11567_v61 = vld [vmem:[#allocation21_spill] sm:$0xff]  ;;  %v11568_v51 = vld [vmem:[#allocation40_spill] sm:$0xff] }
 0x4b4   :  { %v2589_v3 = vpop.xlane.xlu1 %2588  ;;  %v2811_v11 = vmul.f32 %v6913_v35, %v8872_v40  ;;  %v2864_v2 = vmul.f32 %v9169_v25, %v2810_v0  ;;  %v11566_v40 = vld [vmem:[#allocation20_spill] sm:$0xff]  ;;  %v6915_v48 = vpop.eup %6914  ;;  %v11569_v35 = vld [vmem:[#allocation22_spill] sm:$0xff] }
 0x4b5   :  { %6920 = vrsqrt.f32 %v2717_v55  ;;  %v2718_v41 = vadd.f32 1e-05, %v2670_v17  ;;  %v2671_v63 = vmul.f32 0.0078125, %v2589_v3  ;;  %2210 = vadd.xlane.f32.xlu0 %v2180_v13  ;;  %v6917_v20 = vpop.eup %6916  ;;  %v2265_v0 = vmul.f32 %v6915_v48, %v11568_v51  ;;  %v11570_v13 = vld [vmem:[#allocation37_spill] sm:$0xff] }
 0x4b6   :  { %v2865_v50 = vmul.f32 %v9169_v25, %v2811_v11  ;;  %v2918_v9 = vadd.f32 %v9181_v34, %v2864_v2  ;;  %v2264_v3 = vmul.f32 %v6917_v20, %v11570_v13  ;;  %v11571_v11 = vld [vmem:[#allocation24_spill] sm:$0xff]  ;;  %v11574_v13 = vld [vmem:[#allocation27_spill] sm:$0xff] }
 0x4b7   :  { %6922 = vrsqrt.f32 %v2718_v41  ;;  %v2719_v37 = vadd.f32 1e-05, %v2671_v63  ;;  %2212 = vadd.xlane.f32.xlu1 %v2181_v1  ;;  %v11572_v1 = vld [vmem:[#allocation32_spill] sm:$0xff] }
 0x4b8   :  { %v2919_v45 = vadd.f32 %v9181_v34, %v2865_v50  ;;  %v2287_v50 = vmul.f32 %v9224_v54, %v2265_v0 }
 0x4b9   :  { %6924 = vrsqrt.f32 %v2719_v37  ;;  %4223 = vadd.xlane.f32.xlu0 %v11566_v40 }
 0x4ba   :  { %v2986_v56 = vpack.c.bf16 %v2919_v45, %v2918_v9 }
 0x4bb   :  { %4225 = vadd.xlane.f32.xlu1 %v11567_v61 }
 0x4bc   :  { %6368 = vmatpush3.bf16.xpose.msra.mxu1 %v2986_v56  ;;  %v2286_v56 = vmul.f32 %v9224_v54, %v2264_v3 }
 0x4bd   :  { %v6919_v19 = vpop.eup %6918  ;;  %4227 = vadd.xlane.f32.xlu0 %v11569_v35  ;;  %6369 = vmatprep.subr.bf16.mxu1 %v11518_v47 }
 0x4be   :  { %v2812_v55 = vmul.f32 %v6919_v19, %v8907_v39  ;;  %v11573_v39 = vld [vmem:[#allocation34_spill] sm:$0xff] }
 0x4bf   :  { %v6921_v17 = vpop.eup %6920  ;;  %4229 = vadd.xlane.f32.xlu1 %v11571_v11 }
 0x4c0   :  { %v2813_v2 = vmul.f32 %v6921_v17, %v8912_v7  ;;  %v2866_v41 = vmul.f32 %v9169_v25, %v2812_v55 }
 0x4c1   :  { %v6923_v63 = vpop.eup %6922  ;;  %4235 = vadd.xlane.f32.xlu0 %v11572_v1  ;;  %v11575_v1 = vld [vmem:[#allocation29_spill] sm:$0xff] }
 0x4c2   :  { %v2591_v37 = vpop.xlane.xlu0 %2590  ;;  %v2867_v9 = vmul.f32 %v9169_v25, %v2813_v2  ;;  %v2920_v19 = vadd.f32 %v9181_v34, %v2866_v41  ;;  %v2814_v51 = vmul.f32 %v6923_v63, %v8920_v12  ;;  %v2309_v2 = vadd.f32 %v9242_v58, %v2287_v50 }
 0x4c3   :  { %v6925_v45 = vpop.eup %6924  ;;  %v2672_v48 = vmul.f32 0.0078125, %v2591_v37  ;;  %4237 = vadd.xlane.f32.xlu1 %v11573_v39  ;;  %v2308_v41 = vadd.f32 %v9242_v58, %v2286_v56 }
 0x4c4   :  { %v2593_v20 = vpop.xlane.xlu1 %2592  ;;  %v2921_v7 = vadd.f32 %v9181_v34, %v2867_v9  ;;  %v2815_v55 = vmul.f32 %v6925_v45, %v8932_v6  ;;  %v2868_v12 = vmul.f32 %v9169_v25, %v2814_v51  ;;  %v11576_v6 = vld [vmem:[#allocation35_spill] sm:$0xff]  ;;  %v2961_v63 = vmul.f32 0.088388346, %v2309_v2  ;;  %v11577_v9 = vld [vmem:[#allocation36_spill] sm:$0xff] }
 0x4c5   :  { %v2720_v17 = vadd.f32 1e-05, %v2672_v48  ;;  %v2673_v0 = vmul.f32 0.0078125, %v2593_v20  ;;  %4231 = vadd.xlane.f32.xlu0 %v11574_v13  ;;  %v2960_v45 = vmul.f32 0.088388346, %v2308_v41  ;;  %v11578_v20 = vld [vmem:[#allocation26_spill] sm:$0xff] }
 0x4c6   :  { %v2987_v37 = vpack.c.bf16 %v2921_v7, %v2920_v19  ;;  %v2869_v39 = vmul.f32 %v9169_v25, %v2815_v55  ;;  %v2922_v48 = vadd.f32 %v9181_v34, %v2868_v12  ;;  %v11579_v7 = vld [vmem:[#allocation30_spill] sm:$0xff]  ;;  %v2219_v51 = vmul.f32 0.0078125, %v9190_v24  ;;  %v11582_v12 = vld [vmem:[#allocation43_spill] sm:$0xff] }
 0x4c7   :  { %6926 = vrsqrt.f32 %v2720_v17  ;;  %v2721_v3 = vadd.f32 1e-05, %v2673_v0  ;;  %4233 = vadd.xlane.f32.xlu1 %v11575_v1  ;;  %v2975_v19 = vpack.c.bf16 %v2961_v63, %v2960_v45  ;;  %v2218_v2 = vmul.f32 0.0078125, %v9187_v16  ;;  %v11583_v45 = vld [vmem:[#allocation44_spill] sm:$0xff]  ;;  %v11584_v16 = vld [vmem:[#allocation38_spill] sm:$0xff] }
 0x4c8   :  { %6370 = vmatpush3.bf16.xpose.msra.mxu1 %v2987_v37  ;;  %v2923_v50 = vadd.f32 %v9181_v34, %v2869_v39  ;;  %v11580_v39 = vld [vmem:[#allocation39_spill] sm:$0xff]  ;;  %v11581_v37 = vld [vmem:[#allocation41_spill] sm:$0xff] }
 0x4c9   :  { %6928 = vrsqrt.f32 %v2721_v3  ;;  %4239 = vadd.xlane.f32.xlu0 %v11576_v6  ;;  %6375 = vmatprep.subr.bf16.mxu1 %v11518_v47  ;;  %v2235_v3 = vadd.f32 1e-05, %v2219_v51  ;;  %v11585_v51 = vld [vmem:[#allocation42_spill] sm:$0xff] }
 0x4ca   :  { %v2988_v56 = vpack.c.bf16 %v2923_v50, %v2922_v48  ;;  %v2234_v50 = vadd.f32 1e-05, %v2218_v2  ;;  %v11586_v2 = vld [vmem:[#allocation45_spill] sm:$0xff] }
 0x4cb   :  { %4241 = vadd.xlane.f32.xlu1 %v11577_v9  ;;  %6930 = vrsqrt.f32 %v2235_v3 }
 0x4cc   :  { %6932 = vrsqrt.f32 %v2234_v50 }
 0x4cd   :  { %4015 = vadd.xlane.f32.xlu0 %v11578_v20 }
 0x4cf   :  { %4017 = vadd.xlane.f32.xlu1 %v11579_v7  ;;  %6372 = vmatmul.mubr.bf16.vlgmr.msra.gmra.mrb[120].mxu1 %v2975_v19 }
 0x4d0   :  { %6376 = vmatpush3.bf16.xpose.msra.mxu1 %v2988_v56  ;;  %6381 = vmatprep.mubr.msk.bf16.mxu1 %vm7441_vm0, %v11518_v47 }
 0x4d1   :  { %v6927_v55 = vpop.eup %6926  ;;  %4243 = vadd.xlane.f32.xlu0 %v11580_v39  ;;  %6377 = vmatprep.subr.bf16.mxu1 %v11518_v47 }
 0x4d2   :  { %v2816_v17 = vmul.f32 %v6927_v55, %v8973_v53 }
 0x4d3   :  { %v6929_v0 = vpop.eup %6928  ;;  %4245 = vadd.xlane.f32.xlu1 %v11581_v37 }
 0x4d4   :  { %v2817_v41 = vmul.f32 %v6929_v0, %v8976_v27  ;;  %v2870_v24 = vmul.f32 %v9169_v25, %v2816_v17 }
 0x4d5   :  { %4247 = vadd.xlane.f32.xlu0 %v11582_v12 }
 0x4d6   :  { %v2871_v63 = vmul.f32 %v9169_v25, %v2817_v41  ;;  %v2924_v53 = vadd.f32 %v9181_v34, %v2870_v24 }
 0x4d7   :  { %4249 = vadd.xlane.f32.xlu1 %v11583_v45 }
 0x4d8   :  { %v2925_v48 = vadd.f32 %v9181_v34, %v2871_v63  ;;  %v11587_v63 = vld [vmem:[#allocation46_spill] sm:$0xff] }
 0x4d9   :  { %4019 = vadd.xlane.f32.xlu0 %v11584_v16 }
 0x4da   :  { %v2595_v19 = vpop.xlane.xlu0 %2594  ;;  %v2989_v56 = vpack.c.bf16 %v2925_v48, %v2924_v53  ;;  %v11588_v48 = vld [vmem:[#allocation53_spill] sm:$0xff] }
 0x4db   :  { %v2674_v27 = vmul.f32 0.0078125, %v2595_v19  ;;  %4021 = vadd.xlane.f32.xlu1 %v11585_v51  ;;  %v6931_v19 = vpop.eup %6930  ;;  %v11589_v51 = vld [vmem:[#allocation54_spill] sm:$0xff] }
 0x4dc   :  { %v2597_v55 = vpop.xlane.xlu1 %2596  ;;  %6378 = vmatpush3.bf16.xpose.msra.mxu1 %v2989_v56 }
 0x4dd   :  { %v2722_v17 = vadd.f32 1e-05, %v2674_v27  ;;  %v2675_v0 = vmul.f32 0.0078125, %v2597_v55  ;;  %4251 = vadd.xlane.f32.xlu0 %v11586_v2  ;;  %6379 = vmatprep.subr.bf16.mxu1 %v11518_v47  ;;  %v2220_v27 = vmul.f32 0.0078125, %v9215_v14 }
 0x4de   :  { %v2599_v3 = vpop.xlane.xlu0 %2598 }
 0x4df   :  { %6934 = vrsqrt.f32 %v2722_v17  ;;  %v2723_v41 = vadd.f32 1e-05, %v2675_v0  ;;  %v2676_v24 = vmul.f32 0.0078125, %v2599_v3  ;;  %4253 = vadd.xlane.f32.xlu1 %v11587_v63  ;;  %v2221_v17 = vmul.f32 0.0078125, %v9226_v43  ;;  %v6933_v3 = vpop.eup %6932  ;;  %v11590_v63 = vld [vmem:[#allocation50_spill] sm:$0xff] }
 0x4e0   :  { %v2601_v16 = vpop.xlane.xlu1 %2600  ;;  %v2267_v45 = vmul.f32 %v6931_v19, %v11590_v63  ;;  %v2236_v12 = vadd.f32 1e-05, %v2220_v27  ;;  %v11594_v63 = vld [vmem:[#allocation19_spill] sm:$0xff] }
 0x4e1   :  { %6936 = vrsqrt.f32 %v2723_v41  ;;  %v2724_v50 = vadd.f32 1e-05, %v2676_v24  ;;  %v2677_v53 = vmul.f32 0.0078125, %v2601_v16  ;;  %4259 = vadd.xlane.f32.xlu0 %v11588_v48  ;;  %v11591_v24 = vld [vmem:[#allocation49_spill] sm:$0xff]  ;;  %v2237_v37 = vadd.f32 1e-05, %v2221_v17 }
 0x4e2   :  { %v2603_v56 = vpop.xlane.xlu0 %2602 }
 0x4e3   :  { %6938 = vrsqrt.f32 %v2724_v50  ;;  %v2725_v55 = vadd.f32 1e-05, %v2677_v53  ;;  %v2678_v2 = vmul.f32 0.0078125, %v2603_v56  ;;  %4261 = vadd.xlane.f32.xlu1 %v11589_v51  ;;  %v11592_v53 = vld [vmem:[#allocation52_spill] sm:$0xff]  ;;  %v11593_v56 = vld [vmem:[#allocation47_spill] sm:$0xff] }
 0x4e4   :  { %v2605_v0 = vpop.xlane.xlu1 %2604  ;;  %v2266_v51 = vmul.f32 %v6933_v3, %v11593_v56 }
 0x4e5   :  { %6940 = vrsqrt.f32 %v2725_v55  ;;  %v2726_v41 = vadd.f32 1e-05, %v2678_v2  ;;  %v2679_v16 = vmul.f32 0.0078125, %v2605_v0  ;;  %4255 = vadd.xlane.f32.xlu0 %v11591_v24  ;;  %v2289_v2 = vmul.f32 %v9224_v54, %v2267_v45 }
 0x4e6   :  { %v2607_v48 = vpop.xlane.xlu0 %2606  ;;  %v2288_v56 = vmul.f32 %v9224_v54, %v2266_v51 }
 0x4e7   :  { %6942 = vrsqrt.f32 %v2726_v41  ;;  %v2727_v14 = vadd.f32 1e-05, %v2679_v16  ;;  %v2680_v50 = vmul.f32 0.0078125, %v2607_v48  ;;  %4257 = vadd.xlane.f32.xlu1 %v11592_v53  ;;  %v11595_v16 = vld [vmem:[#allocation55_spill] sm:$0xff] }
 0x4e8   :  { %v2609_v43 = vpop.xlane.xlu1 %2608 }
 0x4e9   :  { %v6935_v39 = vpop.eup %6934  ;;  %6944 = vrsqrt.f32 %v2727_v14  ;;  %v2681_v7 = vmul.f32 0.0078125, %v2609_v43  ;;  %4263 = vadd.xlane.f32.xlu0 %v11594_v63  ;;  %v2728_v19 = vadd.f32 1e-05, %v2680_v50  ;;  %v11596_v63 = vld [vmem:[#allocation48_spill] sm:$0xff] }
 0x4ea   :  { %v2611_v55 = vpop.xlane.xlu0 %2610  ;;  %v2818_v27 = vmul.f32 %v6935_v39, %v9023_v59  ;;  %6946 = vrsqrt.f32 %v2236_v12  ;;  %v2311_v59 = vadd.f32 %v9242_v58, %v2289_v2 }
 0x4eb   :  { %v6937_v0 = vpop.eup %6936  ;;  %v2729_v48 = vadd.f32 1e-05, %v2681_v7  ;;  %v2682_v41 = vmul.f32 0.0078125, %v2611_v55  ;;  %4265 = vadd.xlane.f32.xlu1 %v11595_v16  ;;  %6948 = vrsqrt.f32 %v2237_v37  ;;  %v2222_v7 = vmul.f32 0.0078125, %v9263_v52 }
 0x4ec   :  { %v2613_v17 = vpop.xlane.xlu1 %2612  ;;  %v2819_v3 = vmul.f32 %v6937_v0, %v9026_v10  ;;  %v2872_v14 = vmul.f32 %v9169_v25, %v2818_v27  ;;  %v11597_v27 = vld [vmem:[#allocation51_spill] sm:$0xff] }
 0x4ed   :  { %v6939_v43 = vpop.eup %6938  ;;  %6950 = vrsqrt.f32 %v2729_v48  ;;  %v2730_v45 = vadd.f32 1e-05, %v2682_v41  ;;  %v2683_v50 = vmul.f32 0.0078125, %v2613_v17  ;;  %4023 = vadd.xlane.f32.xlu0 %v11596_v63 }
 0x4ee   :  { %6952 = vrsqrt.f32 %v2728_v19  ;;  %v2615_v39 = vpop.xlane.xlu0 %2614  ;;  %v2873_v37 = vmul.f32 %v9169_v25, %v2819_v3  ;;  %v2820_v10 = vmul.f32 %v6939_v43, %v9033_v29  ;;  %v2926_v48 = vadd.f32 %v9181_v34, %v2872_v14  ;;  %v11598_v29 = vld [vmem:[#allocation57_spill] sm:$0xff] }
 0x4ef   :  { %v6941_v12 = vpop.eup %6940  ;;  %6954 = vrsqrt.f32 %v2730_v45  ;;  %v2731_v55 = vadd.f32 1e-05, %v2683_v50  ;;  %v2684_v51 = vmul.f32 0.0078125, %v2615_v39  ;;  %4025 = vadd.xlane.f32.xlu1 %v11597_v27  ;;  %v2310_v43 = vadd.f32 %v9242_v58, %v2288_v56 }
 0x4f0   :  { %v2617_v0 = vpop.xlane.xlu1 %2616  ;;  %v2927_v41 = vadd.f32 %v9181_v34, %v2873_v37  ;;  %v2821_v2 = vmul.f32 %v6941_v12, %v9042_v30  ;;  %v2874_v52 = vmul.f32 %v9169_v25, %v2820_v10  ;;  %v2238_v45 = vadd.f32 1e-05, %v2222_v7  ;;  %v11599_v12 = vld [vmem:[#allocation58_spill] sm:$0xff] }
 0x4f1   :  { %v6943_v19 = vpop.eup %6942  ;;  %6956 = vrsqrt.f32 %v2731_v55  ;;  %v2732_v17 = vadd.f32 1e-05, %v2684_v51  ;;  %v2685_v3 = vmul.f32 0.0078125, %v2617_v0  ;;  %4267 = vadd.xlane.f32.xlu0 %v11598_v29  ;;  %v2963_v14 = vmul.f32 0.088388346, %v2311_v59 }
 0x4f2   :  { %v2619_v50 = vpop.xlane.xlu0 %2618  ;;  %v2990_v39 = vpack.c.bf16 %v2927_v41, %v2926_v48  ;;  %v2875_v27 = vmul.f32 %v9169_v25, %v2821_v2  ;;  %v2223_v37 = vmul.f32 0.0078125, %v9269_v44  ;;  %v2928_v51 = vadd.f32 %v9181_v34, %v2874_v52  ;;  %v11600_v41 = vld [vmem:[#allocation60_spill] sm:$0xff] }
 0x4f3   :  { %v6945_v63 = vpop.eup %6944  ;;  %6958 = vrsqrt.f32 %v2732_v17  ;;  %v2733_v30 = vadd.f32 1e-05, %v2685_v3  ;;  %v2686_v10 = vmul.f32 0.0078125, %v2619_v50  ;;  %4269 = vadd.xlane.f32.xlu1 %v11599_v12  ;;  %v2822_v7 = vmul.f32 %v6943_v19, %v9053_v33  ;;  %v11601_v33 = vld [vmem:[#allocation61_spill] sm:$0xff] }
 0x4f4   :  { %v2621_v55 = vpop.xlane.xlu1 %2620  ;;  %6380 = vmatpush3.bf16.xpose.msra.mxu1 %v2990_v39  ;;  %v2929_v56 = vadd.f32 %v9181_v34, %v2875_v27  ;;  %v2823_v0 = vmul.f32 %v6945_v63, %v9058_v23  ;;  %v6947_v48 = vpop.eup %6946  ;;  %v2962_v50 = vmul.f32 0.088388346, %v2310_v43  ;;  %v2239_v63 = vadd.f32 1e-05, %v2223_v37  ;;  %v11602_v43 = vld [vmem:[#allocation56_spill] sm:$0xff] }
 0x4f5   :  { %6960 = vrsqrt.f32 %v2733_v30  ;;  %v2687_v59 = vmul.f32 0.0078125, %v2621_v55  ;;  %4271 = vadd.xlane.f32.xlu0 %v11600_v41  ;;  %6395 = vmatprep.subr.bf16.mxu1 %v11518_v47  ;;  %v6949_v44 = vpop.eup %6948  ;;  %v2734_v2 = vadd.f32 1e-05, %v2686_v10  ;;  %v2876_v55 = vmul.f32 %v9169_v25, %v2822_v7  ;;  %v11604_v7 = vld [vmem:[#allocation160_spill] sm:$0xff] }
 0x4f6   :  { %v2623_v17 = vpop.xlane.xlu0 %2622  ;;  %v2991_v3 = vpack.c.bf16 %v2929_v56, %v2928_v51  ;;  %v2877_v52 = vmul.f32 %v9169_v25, %v2823_v0  ;;  %6962 = vrsqrt.f32 %v2238_v45  ;;  %v2976_v30 = vpack.c.bf16 %v2963_v14, %v2962_v50  ;;  %v11603_v0 = vld [vmem:[#allocation162_spill] sm:$0xff]  ;;  %v11605_v50 = vld [vmem:[#allocation59_spill] sm:$0xff] }
 0x4f7   :  { %v6951_v39 = vpop.eup %6950  ;;  %v2735_v27 = vadd.f32 1e-05, %v2687_v59  ;;  %v2688_v12 = vmul.f32 0.0078125, %v2623_v17  ;;  %4273 = vadd.xlane.f32.xlu1 %v11601_v33  ;;  %v2269_v59 = vmul.f32 %v6949_v44, %v11603_v0  ;;  %v2930_v44 = vadd.f32 %v9181_v34, %v2876_v55 }
 0x4f8   :  { %v6953_v23 = vpop.eup %6952  ;;  %v2625_v19 = vpop.xlane.xlu1 %2624  ;;  %6386 = vmatpush3.bf16.xpose.msra.mxu0 %v2991_v3  ;;  %v2825_v56 = vmul.f32 %v6951_v39, %v9068_v38  ;;  %v2931_v37 = vadd.f32 %v9181_v34, %v2877_v52  ;;  %v2268_v3 = vmul.f32 %v6947_v48, %v11604_v7  ;;  %v11606_v48 = vld [vmem:[#allocation62_spill] sm:$0xff] }
 0x4f9   :  { %v6955_v41 = vpop.eup %6954  ;;  %6964 = vrsqrt.f32 %v2735_v27  ;;  %v2736_v10 = vadd.f32 1e-05, %v2688_v12  ;;  %v2689_v51 = vmul.f32 0.0078125, %v2625_v19  ;;  %4027 = vadd.xlane.f32.xlu0 %v11602_v43  ;;  %6387 = vmatprep.subr.bf16.mxu0 %v11518_v47  ;;  %v2824_v27 = vmul.f32 %v6953_v23, %v9063_v46 }
 0x4fa   :  { %6966 = vrsqrt.f32 %v2734_v2  ;;  %v2203_v45 = vpop.xlane.xlu0 %2202  ;;  %v2826_v14 = vmul.f32 %v6955_v41, %v9073_v49  ;;  %v2879_v41 = vmul.f32 %v9169_v25, %v2825_v56  ;;  %v2291_v39 = vmul.f32 %v9224_v54, %v2269_v59 }
 0x4fb   :  { %v6957_v17 = vpop.eup %6956  ;;  %6968 = vrsqrt.f32 %v2736_v10  ;;  %v2737_v12 = vadd.f32 1e-05, %v2689_v51  ;;  %4029 = vadd.xlane.f32.xlu1 %v11605_v50  ;;  %6382 = vmatmul.mubr.bf16.vlgmr.msra.gmra.mrb[124].mxu1 %v2976_v30  ;;  %v2224_v55 = vmul.f32 0.0078125, %v2203_v45  ;;  %v11607_v51 = vld [vmem:[#allocation63_spill] sm:$0xff]  ;;  %v2878_v0 = vmul.f32 %v9169_v25, %v2824_v27 }
 0x4fc   :  { %6970 = vrsqrt.f32 %v2239_v63  ;;  %v2205_v38 = vpop.xlane.xlu1 %2204  ;;  %v2827_v2 = vmul.f32 %v6957_v17, %v9078_v22  ;;  %v2880_v52 = vmul.f32 %v9169_v25, %v2826_v14  ;;  %6401 = vmatprep.mubr.msk.bf16.mxu1 %vm7441_vm0, %v11518_v47  ;;  %v2992_v63 = vpack.c.bf16 %v2931_v37, %v2930_v44 }
 0x4fd   :  { %v6959_v49 = vpop.eup %6958  ;;  %6972 = vrsqrt.f32 %v2737_v12  ;;  %4275 = vadd.xlane.f32.xlu0 %v11606_v48  ;;  %v2225_v46 = vmul.f32 0.0078125, %v2205_v38  ;;  %v2290_v22 = vmul.f32 %v9224_v54, %v2268_v3  ;;  %v11608_v38 = vld [vmem:[#allocation69_spill] sm:$0xff]  ;;  %v2933_v45 = vadd.f32 %v9181_v34, %v2879_v41 }
 0x4fe   :  { %v2627_v23 = vpop.xlane.xlu0 %2626  ;;  %v2881_v19 = vmul.f32 %v9169_v25, %v2827_v2  ;;  %v2934_v56 = vadd.f32 %v9181_v34, %v2880_v52  ;;  %v2828_v17 = vmul.f32 %v6959_v49, %v9083_v21  ;;  %v11609_v49 = vld [vmem:[#allocation70_spill] sm:$0xff] }
 0x4ff   :  { %v6961_v30 = vpop.eup %6960  ;;  %v2690_v10 = vmul.f32 0.0078125, %v2627_v23  ;;  %4277 = vadd.xlane.f32.xlu1 %v11607_v51  ;;  %v2241_v27 = vadd.f32 1e-05, %v2225_v46  ;;  %v2313_v23 = vadd.f32 %v9242_v58, %v2291_v39  ;;  %v2312_v46 = vadd.f32 %v9242_v58, %v2290_v22 }
 0x500   :  { %v2629_v14 = vpop.xlane.xlu1 %2628  ;;  %6388 = vmatpush3.bf16.xpose.msra.mxu0 %v2992_v63  ;;  %v2935_v59 = vadd.f32 %v9181_v34, %v2881_v19  ;;  %v2829_v37 = vmul.f32 %v6961_v30, %v9088_v15  ;;  %v6963_v3 = vpop.eup %6962  ;;  %v2932_v19 = vadd.f32 %v9181_v34, %v2878_v0  ;;  %v2882_v41 = vmul.f32 %v9169_v25, %v2828_v17 }
 0x501   :  { %v2738_v7 = vadd.f32 1e-05, %v2690_v10  ;;  %v2691_v12 = vmul.f32 0.0078125, %v2629_v14  ;;  %4283 = vadd.xlane.f32.xlu0 %v11608_v38  ;;  %6389 = vmatprep.subr.bf16.mxu0 %v11518_v47  ;;  %v2240_v10 = vadd.f32 1e-05, %v2224_v55 }
 0x502   :  { %v2631_v44 = vpop.xlane.xlu0 %2630  ;;  %v2994_v2 = vpack.c.bf16 %v2935_v59, %v2934_v56  ;;  %v2883_v52 = vmul.f32 %v9169_v25, %v2829_v37  ;;  %v11610_v37 = vld [vmem:[#allocation65_spill] sm:$0xff] }
 0x503   :  { %v6965_v63 = vpop.eup %6964  ;;  %6974 = vrsqrt.f32 %v2738_v7  ;;  %v2739_v21 = vadd.f32 1e-05, %v2691_v12  ;;  %v2692_v15 = vmul.f32 0.0078125, %v2631_v44  ;;  %4285 = vadd.xlane.f32.xlu1 %v11609_v49  ;;  %v2993_v7 = vpack.c.bf16 %v2933_v45, %v2932_v19 }
 0x504   :  { %v6967_v30 = vpop.eup %6966  ;;  %v2633_v14 = vpop.xlane.xlu1 %2632  ;;  %6396 = vmatpush3.bf16.xpose.msra.mxu1 %v2994_v2  ;;  %v2937_v55 = vadd.f32 %v9181_v34, %v2883_v52  ;;  %v2831_v17 = vmul.f32 %v6965_v63, %v9099_v62  ;;  %v2936_v45 = vadd.f32 %v9181_v34, %v2882_v41 }
 0x505   :  { %v6969_v56 = vpop.eup %6968  ;;  %6976 = vrsqrt.f32 %v2739_v21  ;;  %v2740_v59 = vadd.f32 1e-05, %v2692_v15  ;;  %v2693_v39 = vmul.f32 0.0078125, %v2633_v14  ;;  %4279 = vadd.xlane.f32.xlu0 %v11610_v37  ;;  %6397 = vmatprep.subr.bf16.mxu1 %v11518_v47  ;;  %v11611_v15 = vld [vmem:[#allocation66_spill] sm:$0xff]  ;;  %v2965_v14 = vmul.f32 0.088388346, %v2313_v23 }
 0x506   :  { %v6971_v12 = vpop.eup %6970  ;;  %6978 = vrsqrt.f32 %v2241_v27  ;;  %v2635_v0 = vpop.xlane.xlu0 %2634  ;;  %v2832_v44 = vmul.f32 %v6969_v56, %v9105_v32  ;;  %v2830_v52 = vmul.f32 %v6967_v30, %v9093_v4  ;;  %v11612_v32 = vld [vmem:[#allocation169_spill] sm:$0xff]  ;;  %v2995_v23 = vpack.c.bf16 %v2937_v55, %v2936_v45  ;;  %v11615_v4 = vld [vmem:[#allocation72_spill] sm:$0xff] }
 0x507   :  { %v6973_v2 = vpop.eup %6972  ;;  %6980 = vrsqrt.f32 %v2740_v59  ;;  %v2741_v22 = vadd.f32 1e-05, %v2693_v39  ;;  %v2694_v21 = vmul.f32 0.0078125, %v2635_v0  ;;  %4281 = vadd.xlane.f32.xlu1 %v11611_v15  ;;  %v2271_v56 = vmul.f32 %v6971_v12, %v11612_v32  ;;  %v11613_v59 = vld [vmem:[#allocation71_spill] sm:$0xff]  ;;  %v11616_v55 = vld [vmem:[#allocation64_spill] sm:$0xff] }
 0x508   :  { %v2637_v37 = vpop.xlane.xlu1 %2636  ;;  %6390 = vmatpush3.bf16.xpose.msra.mxu0 %v2993_v7  ;;  %v2833_v27 = vmul.f32 %v6973_v2, %v9113_v42  ;;  %v2886_v19 = vmul.f32 %v9169_v25, %v2832_v44  ;;  %v2885_v41 = vmul.f32 %v9169_v25, %v2831_v17  ;;  %v11614_v42 = vld [vmem:[#allocation167_spill] sm:$0xff]  ;;  %v2964_v30 = vmul.f32 0.088388346, %v2312_v46 }
 0x509   :  { %6982 = vrsqrt.f32 %v2741_v22  ;;  %v2742_v62 = vadd.f32 1e-05, %v2694_v21  ;;  %v2695_v63 = vmul.f32 0.0078125, %v2637_v37  ;;  %4287 = vadd.xlane.f32.xlu0 %v11613_v59  ;;  %6405 = vmatprep.subr.bf16.mxu0 %v11518_v47  ;;  %v2270_v7 = vmul.f32 %v6963_v3, %v11614_v42  ;;  %v11619_v42 = vld [vmem:[#allocation76_spill] sm:$0xff] }
 0x50a   :  { %6984 = vrsqrt.f32 %v2240_v10  ;;  %v2887_v39 = vmul.f32 %v9169_v25, %v2833_v27  ;;  %v2940_v37 = vadd.f32 %v9181_v34, %v2886_v19  ;;  %v2884_v44 = vmul.f32 %v9169_v25, %v2830_v52  ;;  %v11617_v19 = vld [vmem:[#allocation67_spill] sm:$0xff] }
 0x50b   :  { %6986 = vrsqrt.f32 %v2742_v62  ;;  %v2743_v0 = vadd.f32 1e-05, %v2695_v63  ;;  %4289 = vadd.xlane.f32.xlu1 %v11615_v4  ;;  %v2977_v2 = vpack.c.bf16 %v2965_v14, %v2964_v30  ;;  %v2293_v3 = vmul.f32 %v9224_v54, %v2271_v56  ;;  %v9465_v14 = vld [vmem:[%s11058_s12] ss:$0 sm:$0xff] }
 0x50c   :  { %6398 = vmatpush3.bf16.xpose.msra.mxu1 %v2995_v23  ;;  %v2941_v12 = vadd.f32 %v9181_v34, %v2887_v39  ;;  %v2939_v46 = vadd.f32 %v9181_v34, %v2885_v41  ;;  %v2292_v25 = vmul.f32 %v9224_v54, %v2270_v7  ;;  %v2938_v56 = vadd.f32 %v9465_v14, %v2884_v44  ;;  %v11618_v34 = vld [vmem:[#allocation77_spill] sm:$0xff]  ;;  %v11620_v44 = vld [vmem:[#allocation78_spill] sm:$0xff] }
 0x50d   :  { %v6975_v10 = vpop.eup %6974  ;;  %6988 = vrsqrt.f32 %v2743_v0  ;;  %4031 = vadd.xlane.f32.xlu0 %v11616_v55  ;;  %6399 = vmatprep.subr.bf16.mxu1 %v11518_v47  ;;  %v2315_v7 = vadd.f32 %v9242_v58, %v2293_v3 }
 0x50e   :  { %v2639_v17 = vpop.xlane.xlu0 %2638  ;;  %v2997_v22 = vpack.c.bf16 %v2941_v12, %v2940_v37  ;;  %v2834_v21 = vmul.f32 %v6975_v10, %v9123_v60  ;;  %v9472_v60 = vld [vmem:[%s11057_s11] ss:$0 sm:$0xff]  ;;  %v2996_v0 = vpack.c.bf16 %v2939_v46, %v2938_v56  ;;  %v2314_v10 = vadd.f32 %v9242_v58, %v2292_v25 }
 0x50f   :  { %v6977_v45 = vpop.eup %6976  ;;  %v2696_v27 = vmul.f32 0.0078125, %v2639_v17  ;;  %4033 = vadd.xlane.f32.xlu1 %v11617_v19  ;;  %6392 = vmatmul.mubr.bf16.vlgmr.msra.gmra.mrb[108].mxu0 %v2977_v2 }
 0x510   :  { %v6979_v52 = vpop.eup %6978  ;;  %v2641_v32 = vpop.xlane.xlu1 %2640  ;;  %6406 = vmatpush3.bf16.xpose.msra.mxu0 %v2997_v22  ;;  %v2835_v62 = vmul.f32 %v6977_v45, %v11618_v34  ;;  %v2888_v63 = vmul.f32 %v9472_v60, %v2834_v21  ;;  %6411 = vmatprep.mubr.msk.bf16.mxu0 %vm7441_vm0, %v11518_v47  ;;  %v11621_v21 = vld [vmem:[#allocation74_spill] sm:$0xff]  ;;  %v11624_v34 = vld [vmem:[#allocation80_spill] sm:$0xff] }
 0x511   :  { %v6981_v23 = vpop.eup %6980  ;;  %v2744_v39 = vadd.f32 1e-05, %v2696_v27  ;;  %v2697_v41 = vmul.f32 0.0078125, %v2641_v32  ;;  %4291 = vadd.xlane.f32.xlu0 %v11619_v42  ;;  %6407 = vmatprep.subr.bf16.mxu0 %v11518_v47  ;;  %v11622_v27 = vld [vmem:[#allocation201_spill] sm:$0xff] }
 0x512   :  { %v2889_v30 = vmul.f32 %v9472_v60, %v2835_v62  ;;  %v2942_v17 = vadd.f32 %v9465_v14, %v2888_v63  ;;  %v2836_v45 = vmul.f32 %v6981_v23, %v11621_v21  ;;  %v11623_v32 = vld [vmem:[#allocation73_spill] sm:$0xff]  ;;  %v2967_v62 = vmul.f32 0.088388346, %v2315_v7 }
 0x513   :  { %v6983_v37 = vpop.eup %6982  ;;  %6990 = vrsqrt.f32 %v2744_v39  ;;  %v2745_v12 = vadd.f32 1e-05, %v2697_v41  ;;  %4293 = vadd.xlane.f32.xlu1 %v11620_v44  ;;  %v2273_v56 = vmul.f32 %v6979_v52, %v11623_v32  ;;  %v11625_v41 = vld [vmem:[#allocation202_spill] sm:$0xff]  ;;  %v11627_v23 = vld [vmem:[#allocation81_spill] sm:$0xff] }
 0x514   :  { %v6985_v2 = vpop.eup %6984  ;;  %6400 = vmatpush3.bf16.xpose.msra.mxu1 %v2996_v0  ;;  %v2943_v22 = vadd.f32 %v9465_v14, %v2889_v30  ;;  %v2837_v3 = vmul.f32 %v6983_v37, %v11622_v27  ;;  %v11626_v30 = vld [vmem:[#allocation68_spill] sm:$0xff]  ;;  %v2966_v37 = vmul.f32 0.088388346, %v2314_v10  ;;  %v2890_v52 = vmul.f32 %v9472_v60, %v2836_v45  ;;  %v11629_v27 = vld [vmem:[#allocation75_spill] sm:$0xff] }
 0x515   :  { %v6987_v46 = vpop.eup %6986  ;;  %6992 = vrsqrt.f32 %v2745_v12  ;;  %4295 = vadd.xlane.f32.xlu0 %v11624_v34  ;;  %6415 = vmatprep.subr.bf16.mxu1 %v11518_v47  ;;  %v2272_v44 = vmul.f32 %v6985_v2, %v11626_v30  ;;  %v11628_v12 = vld [vmem:[#allocation203_spill] sm:$0xff]  ;;  %v11687_v34 = vld [vmem:[#allocation41_spill] sm:$0xff] }
 0x516   :  { %v2998_v25 = vpack.c.bf16 %v2943_v22, %v2942_v17  ;;  %v2891_v39 = vmul.f32 %v9472_v60, %v2837_v3  ;;  %v2838_v63 = vmul.f32 %v6987_v46, %v11625_v41  ;;  %v2978_v17 = vpack.c.bf16 %v2967_v62, %v2966_v37  ;;  %v11630_v46 = vld [vmem:[#allocation79_spill] sm:$0xff] }
 0x517   :  { %v6989_v0 = vpop.eup %6988  ;;  %4297 = vadd.xlane.f32.xlu1 %v11627_v23  ;;  %v2295_v22 = vmul.f32 %v9224_v54, %v2273_v56  ;;  %v2294_v10 = vmul.f32 %v9224_v54, %v2272_v44  ;;  %v2944_v45 = vadd.f32 %v9465_v14, %v2890_v52  ;;  %v11632_v54 = vld [vmem:[#allocation205_spill] sm:$0xff] }
 0x518   :  { %6408 = vmatpush3.bf16.xpose.msra.mxu0 %v2998_v25  ;;  %v2839_v21 = vmul.f32 %v6989_v0, %v11628_v12  ;;  %v2892_v7 = vmul.f32 %v9472_v60, %v2838_v63  ;;  %v2945_v3 = vadd.f32 %v9465_v14, %v2891_v39  ;;  %v11631_v63 = vld [vmem:[#allocation204_spill] sm:$0xff] }
 0x519   :  { %4035 = vadd.xlane.f32.xlu0 %v11629_v27  ;;  %6409 = vmatprep.subr.bf16.mxu0 %v11518_v47  ;;  %v2317_v56 = vadd.f32 %v9242_v58, %v2295_v22  ;;  %v2316_v37 = vadd.f32 %v9242_v58, %v2294_v10 }
 0x51a   :  { %v2893_v2 = vmul.f32 %v9472_v60, %v2839_v21  ;;  %v2946_v32 = vadd.f32 %v9465_v14, %v2892_v7  ;;  %v2999_v39 = vpack.c.bf16 %v2945_v3, %v2944_v45 }
 0x51b   :  { %4037 = vadd.xlane.f32.xlu1 %v11630_v46  ;;  %6402 = vmatmul.mubr.bf16.vlgmr.msra.gmra.mrb[128].mxu1 %v2978_v17  ;;  %v2969_v12 = vmul.f32 0.088388346, %v2317_v56  ;;  %v2968_v7 = vmul.f32 0.088388346, %v2316_v37 }
 0x51c   :  { %v2947_v25 = vadd.f32 %v9465_v14, %v2893_v2  ;;  %6421 = vmatprep.mubr.msk.bf16.mxu1 %vm7441_vm0, %v11518_v47 }
 0x51d   :  { %v6991_v62 = vpop.eup %6990  ;;  %v2979_v3 = vpack.c.bf16 %v2969_v12, %v2968_v7 }
 0x51e   :  { %v3000_v41 = vpack.c.bf16 %v2947_v25, %v2946_v32  ;;  %v2840_v0 = vmul.f32 %v6991_v62, %v11631_v63 }
 0x51f   :  { %v6993_v30 = vpop.eup %6992 }
 0x520   :  { %6410 = vmatpush3.bf16.xpose.msra.mxu0 %v2999_v39  ;;  %6416 = vmatpush3.bf16.xpose.msra.mxu1 %v3000_v41  ;;  %v2841_v44 = vmul.f32 %v6993_v30, %v11632_v54  ;;  %v2894_v52 = vmul.f32 %v9472_v60, %v2840_v0 }
 0x521   :  { %6417 = vmatprep.subr.bf16.mxu1 %v11518_v47  ;;  %6425 = vmatprep.subr.bf16.mxu0 %v11518_v47 }
 0x522   :  { %v2895_v21 = vmul.f32 %v9472_v60, %v2841_v44  ;;  %v2948_v17 = vadd.f32 %v9465_v14, %v2894_v52 }
 0x524   :  { %v2949_v22 = vadd.f32 %v9465_v14, %v2895_v21 }
 0x526   :  { %v2647_v58 = vpop.xlane.xlu0 %2646  ;;  %v3001_v2 = vpack.c.bf16 %v2949_v22, %v2948_v17  ;;  %v11633_v17 = vld [vmem:[#allocation23_spill] sm:$0xff] }
 0x527   :  { %v2700_v10 = vmul.f32 0.0078125, %v2647_v58  ;;  %6412 = vmatmul.mubr.bf16.vlgmr.msra.gmra.mrb[112].mxu0 %v2979_v3 }
 0x528   :  { %v2649_v45 = vpop.xlane.xlu1 %2648  ;;  %6418 = vmatpush3.bf16.xpose.msra.mxu1 %v3001_v2  ;;  %6431 = vmatprep.mubr.msk.bf16.mxu0 %vm7441_vm0, %v11518_v47 }
 0x529   :  { %v2748_v32 = vadd.f32 1e-05, %v2700_v10  ;;  %v2701_v25 = vmul.f32 0.0078125, %v2649_v45  ;;  %6419 = vmatprep.subr.bf16.mxu1 %v11518_v47  ;;  %v11634_v45 = vld [vmem:[#allocation207_spill] sm:$0xff] }
 0x52a   :  { %v2643_v62 = vpop.xlane.xlu0 %2642 }
 0x52b   :  { %6994 = vrsqrt.f32 %v2748_v32  ;;  %v2749_v56 = vadd.f32 1e-05, %v2701_v25  ;;  %v2698_v39 = vmul.f32 0.0078125, %v2643_v62 }
 0x52c   :  { %v2645_v41 = vpop.xlane.xlu1 %2644 }
 0x52d   :  { %6996 = vrsqrt.f32 %v2749_v56  ;;  %v2746_v63 = vadd.f32 1e-05, %v2698_v39  ;;  %v2699_v0 = vmul.f32 0.0078125, %v2645_v41 }
 0x52f   :  { %6998 = vrsqrt.f32 %v2746_v63  ;;  %v2747_v30 = vadd.f32 1e-05, %v2699_v0  ;;  %v11635_v63 = vld [vmem:[#allocation206_spill] sm:$0xff] }
 0x531   :  { %7000 = vrsqrt.f32 %v2747_v30 }
 0x532   :  { %v2651_v37 = vpop.xlane.xlu0 %2650 }
 0x533   :  { %v2702_v54 = vmul.f32 0.0078125, %v2651_v37 }
 0x534   :  { %v2653_v44 = vpop.xlane.xlu1 %2652 }
 0x535   :  { %v6995_v52 = vpop.eup %6994  ;;  %v2750_v12 = vadd.f32 1e-05, %v2702_v54  ;;  %v2703_v21 = vmul.f32 0.0078125, %v2653_v44 }
 0x536   :  { %v2207_v7 = vpop.xlane.xlu0 %2206  ;;  %v2844_v22 = vmul.f32 %v6995_v52, %v11633_v17  ;;  %v11636_v52 = vld [vmem:[#allocation143_spill] sm:$0xff] }
 0x537   :  { %v6997_v3 = vpop.eup %6996  ;;  %7002 = vrsqrt.f32 %v2750_v12  ;;  %v2751_v58 = vadd.f32 1e-05, %v2703_v21  ;;  %v2226_v2 = vmul.f32 0.0078125, %v2207_v7 }
 0x538   :  { %v2209_v10 = vpop.xlane.xlu1 %2208  ;;  %v2845_v32 = vmul.f32 %v6997_v3, %v11634_v45  ;;  %v2898_v25 = vmul.f32 %v9472_v60, %v2844_v22 }
 0x539   :  { %v6999_v62 = vpop.eup %6998  ;;  %7004 = vrsqrt.f32 %v2751_v58  ;;  %v2242_v56 = vadd.f32 1e-05, %v2226_v2  ;;  %v2227_v39 = vmul.f32 0.0078125, %v2209_v10 }
 0x53a   :  { %v2899_v41 = vmul.f32 %v9472_v60, %v2845_v32  ;;  %v2842_v0 = vmul.f32 %v6999_v62, %v11635_v63  ;;  %v2952_v54 = vadd.f32 %v9465_v14, %v2898_v25 }
 0x53b   :  { %v7001_v30 = vpop.eup %7000  ;;  %7006 = vrsqrt.f32 %v2242_v56  ;;  %v2243_v37 = vadd.f32 1e-05, %v2227_v39 }
 0x53c   :  { %v2953_v44 = vadd.f32 %v9465_v14, %v2899_v41  ;;  %v2843_v12 = vmul.f32 %v7001_v30, %v11636_v52  ;;  %v2896_v21 = vmul.f32 %v9472_v60, %v2842_v0 }
 0x53d   :  { %7008 = vrsqrt.f32 %v2243_v37 }
 0x53e   :  { %v2655_v7 = vpop.xlane.xlu0 %2654  ;;  %v3003_v17 = vpack.c.bf16 %v2953_v44, %v2952_v54  ;;  %v2897_v22 = vmul.f32 %v9472_v60, %v2843_v12  ;;  %v2950_v2 = vadd.f32 %v9465_v14, %v2896_v21 }
 0x53f   :  { %v2704_v3 = vmul.f32 0.0078125, %v2655_v7 }
 0x540   :  { %v2657_v58 = vpop.xlane.xlu1 %2656  ;;  %6426 = vmatpush3.bf16.xpose.msra.mxu0 %v3003_v17  ;;  %v2951_v10 = vadd.f32 %v9465_v14, %v2897_v22 }
 0x541   :  { %v7003_v45 = vpop.eup %7002  ;;  %v2752_v32 = vadd.f32 1e-05, %v2704_v3  ;;  %v2705_v25 = vmul.f32 0.0078125, %v2657_v58  ;;  %6427 = vmatprep.subr.bf16.mxu0 %v11518_v47 }
 0x542   :  { %v2211_v62 = vpop.xlane.xlu0 %2210  ;;  %v3002_v56 = vpack.c.bf16 %v2951_v10, %v2950_v2  ;;  %v2846_v39 = vmul.f32 %v7003_v45, %v9245_v36  ;;  %v7280_v45 = vld [vmem:[%s11055_s9] ss:$0 sm:$0xff] }
 0x543   :  { %v7005_v41 = vpop.eup %7004  ;;  %7010 = vrsqrt.f32 %v2752_v32  ;;  %v2753_v63 = vadd.f32 1e-05, %v2705_v25  ;;  %v2228_v0 = vmul.f32 0.0078125, %v2211_v62 }
 0x544   :  { %v2213_v30 = vpop.xlane.xlu1 %2212  ;;  %6420 = vmatpush3.bf16.xpose.msra.mxu1 %v3002_v56  ;;  %v2847_v37 = vmul.f32 %v7005_v41, %v9252_v8  ;;  %v2900_v54 = vmul.f32 %v9472_v60, %v2846_v39 }
 0x545   :  { %v7007_v44 = vpop.eup %7006  ;;  %7012 = vrsqrt.f32 %v2753_v63  ;;  %v2244_v52 = vadd.f32 1e-05, %v2228_v0  ;;  %v2229_v12 = vmul.f32 0.0078125, %v2213_v30  ;;  %6435 = vmatprep.subr.bf16.mxu1 %v11518_v47 }
 0x546   :  { %v2274_v21 = vmul.f32 %v7007_v44, %v9249_v26  ;;  %v4224_v7 = vpop.xlane.xlu0 %4223  ;;  %v2901_v36 = vmul.f32 %v9472_v60, %v2847_v37  ;;  %v2954_v2 = vadd.f32 %v9465_v14, %v2900_v54 }
 0x547   :  { %v7009_v17 = vpop.eup %7008  ;;  %7014 = vrsqrt.f32 %v2244_v52  ;;  %v2245_v22 = vadd.f32 1e-05, %v2229_v12  ;;  %v4319_v3 = vmul.f32 0.0078125, %v4224_v7 }
 0x548   :  { %v2275_v58 = vmul.f32 %v7009_v17, %v9258_v5  ;;  %v4226_v8 = vpop.xlane.xlu1 %4225  ;;  %v2955_v10 = vadd.f32 %v9465_v14, %v2901_v36  ;;  %v2296_v32 = vmul.f32 %v7280_v45, %v2274_v21  ;;  %v7281_v5 = vld [vmem:[%s11056_s10] ss:$0 sm:$0xff] }
 0x549   :  { %7016 = vrsqrt.f32 %v2245_v22  ;;  %v9548_v26 = vsub.f32 %v11566_v40, %v4319_v3  ;;  %v4320_v25 = vmul.f32 0.0078125, %v4226_v8  ;;  %v11639_v8 = vld [vmem:[#allocation82_spill] sm:$0xff] }
 0x54a   :  { %v4228_v62 = vpop.xlane.xlu0 %4227  ;;  %v3004_v56 = vpack.c.bf16 %v2955_v10, %v2954_v2  ;;  %v2297_v39 = vmul.f32 %v7280_v45, %v2275_v58  ;;  %v2318_v41 = vadd.f32 %v7281_v5, %v2296_v32 }
 0x54b   :  { %11637 = vst [vmem:[#allocation88_spill] sm:$0xff] %v9548_v26  ;;  %v9554_v63 = vsub.f32 %v11567_v61, %v4320_v25  ;;  %v4415_v0 = vmul.f32 %v9548_v26, %v9548_v26  ;;  %v4321_v61 = vmul.f32 0.0078125, %v4228_v62 }
 0x54c   :  { %v4230_v30 = vpop.xlane.xlu1 %4229  ;;  %6428 = vmatpush3.bf16.xpose.msra.mxu0 %v3004_v56  ;;  %v2319_v37 = vadd.f32 %v7281_v5, %v2297_v39  ;;  %v2970_v44 = vmul.f32 0.088388346, %v2318_v41  ;;  %v11641_v56 = vld [vmem:[#allocation105_spill] sm:$0xff]  ;;  %v11644_v41 = vld [vmem:[#allocation83_spill] sm:$0xff] }
 0x54d   :  { %11638 = vst [vmem:[#allocation25_spill] sm:$0xff] %v9554_v63  ;;  %v7011_v40 = vpop.eup %7010  ;;  %4463 = vadd.xlane.f32.xlu0 %v4415_v0  ;;  %v4416_v54 = vmul.f32 %v9554_v63, %v9554_v63  ;;  %6429 = vmatprep.subr.bf16.mxu0 %v11518_v47  ;;  %v4322_v58 = vmul.f32 0.0078125, %v4230_v30  ;;  %v9568_v25 = vsub.f32 %v11569_v35, %v4321_v61  ;;  %v11642_v39 = vld [vmem:[#allocation101_spill] sm:$0xff] }
 0x54e   :  { %v2971_v52 = vmul.f32 0.088388346, %v2319_v37  ;;  %v2848_v12 = vmul.f32 %v7011_v40, %v9284_v18  ;;  %v4236_v7 = vpop.xlane.xlu0 %4235  ;;  %v11646_v40 = vld [vmem:[#allocation91_spill] sm:$0xff]  ;;  %v11650_v61 = vld [vmem:[#allocation109_spill] sm:$0xff] }
 0x54f   :  { %v7013_v21 = vpop.eup %7012  ;;  %4465 = vadd.xlane.f32.xlu1 %v4416_v54  ;;  %11640 = vst [vmem:[#allocation141_spill] sm:$0xff] %v9568_v25  ;;  %v4325_v62 = vmul.f32 0.0078125, %v4236_v7  ;;  %v9581_v35 = vsub.f32 %v11571_v11, %v4322_v58 }
 0x550   :  { %v2980_v36 = vpack.c.bf16 %v2971_v52, %v2970_v44  ;;  %v2849_v17 = vmul.f32 %v7013_v21, %v9290_v31  ;;  %v2902_v22 = vmul.f32 %v9472_v60, %v2848_v12  ;;  %v4238_v10 = vpop.xlane.xlu1 %4237  ;;  %v11643_v31 = vpack.c.bf16 %v11641_v56, %v11642_v39  ;;  %v11647_v12 = vld [vmem:[#allocation32_spill] sm:$0xff] }
 0x551   :  { %v7015_v3 = vpop.eup %7014  ;;  %4299 = vadd.xlane.f32.xlu0 %v11639_v8  ;;  %11645 = vst [vmem:[#allocation28_spill] sm:$0xff] %v9581_v35  ;;  %v4326_v37 = vmul.f32 0.0078125, %v4238_v10  ;;  %v9585_v21 = vsub.f32 %v11647_v12, %v4325_v62  ;;  %v11663_v12 = vld [vmem:[#allocation153_spill] sm:$0xff] }
 0x552   :  { %v2276_v2 = vmul.f32 %v7015_v3, %v9287_v57  ;;  %6422 = vmatmul.mubr.bf16.vlgmr.msra.gmra.mrb[132].mxu1 %v2980_v36  ;;  %v2903_v32 = vmul.f32 %v9472_v60, %v2849_v17  ;;  %v2956_v0 = vadd.f32 %v9465_v14, %v2902_v22  ;;  %v4417_v36 = vmul.f32 %v9568_v25, %v9568_v25  ;;  %v4232_v11 = vpop.xlane.xlu0 %4231  ;;  %v11653_v22 = vld [vmem:[#allocation34_spill] sm:$0xff] }
 0x553   :  { %v7017_v18 = vpop.eup %7016  ;;  %6436 = vmatpush3.bf16.msra.mxu1 %v11643_v31  ;;  %4301 = vadd.xlane.f32.xlu1 %v11644_v41  ;;  %11648 = vst [vmem:[#allocation84_spill] sm:$0xff] %v9585_v21  ;;  %v4418_v3 = vmul.f32 %v9581_v35, %v9581_v35  ;;  %v11685_v41 = vld [vmem:[#allocation39_spill] sm:$0xff] }
 0x554   :  { %v2277_v30 = vmul.f32 %v7017_v18, %v9295_v28  ;;  %6437 = vmatprep.subr.bf16.mxu1 %v11518_v47  ;;  %v2957_v57 = vadd.f32 %v9465_v14, %v2903_v32  ;;  %v2298_v60 = vmul.f32 %v7280_v45, %v2276_v2  ;;  %6441 = vmatprep.mubr.msk.bf16.mxu1 %vm7441_vm0, %v11518_v47  ;;  %v11649_v28 = vld [vmem:[#allocation113_spill] sm:$0xff]  ;;  %v11652_v14 = vld [vmem:[#allocation92_spill] sm:$0xff]  ;;  %v4234_v58 = vpop.xlane.xlu1 %4233 }
 0x555   :  { %4307 = vadd.xlane.f32.xlu0 %v11646_v40  ;;  %v11651_v7 = vpack.c.bf16 %v11649_v28, %v11650_v61  ;;  %v11655_v32 = vld [vmem:[#allocation121_spill] sm:$0xff]  ;;  %v11664_v28 = vld [vmem:[#allocation151_spill] sm:$0xff] }
 0x556   :  { %v3005_v54 = vpack.c.bf16 %v2957_v57, %v2956_v0  ;;  %v2299_v44 = vmul.f32 %v7280_v45, %v2277_v30  ;;  %v2320_v52 = vadd.f32 %v7281_v5, %v2298_v60  ;;  %v9595_v45 = vsub.f32 %v11653_v22, %v4326_v37  ;;  %v11656_v18 = vld [vmem:[#allocation117_spill] sm:$0xff]  ;;  %v4240_v31 = vpop.xlane.xlu0 %4239  ;;  %v11659_v57 = vld [vmem:[#allocation147_spill] sm:$0xff]  ;;  %v11661_v37 = vld [vmem:[#allocation86_spill] sm:$0xff] }
 0x557   :  { %6438 = vmatpush3.bf16.msra.mxu1 %v11651_v7  ;;  %4309 = vadd.xlane.f32.xlu1 %v11652_v14  ;;  %v11657_v62 = vpack.c.bf16 %v11655_v32, %v11656_v18  ;;  %v11658_v30 = vld [vmem:[#allocation149_spill] sm:$0xff]  ;;  %v11665_v61 = vpack.c.bf16 %v11663_v12, %v11664_v28  ;;  %v4324_v7 = vmul.f32 0.0078125, %v4234_v58  ;;  %v11678_v12 = vld [vmem:[#allocation99_spill] sm:$0xff] }
 0x558   :  { %6430 = vmatpush3.bf16.xpose.msra.mxu0 %v3005_v54  ;;  %6439 = vmatprep.subr.bf16.mxu1 %v11518_v47  ;;  %v2321_v17 = vadd.f32 %v7281_v5, %v2299_v44  ;;  %11654 = vst [vmem:[#allocation87_spill] sm:$0xff] %v9595_v45  ;;  %v2972_v2 = vmul.f32 0.088388346, %v2320_v52  ;;  %v4421_v5 = vmul.f32 %v9585_v21, %v9585_v21  ;;  %v4242_v0 = vpop.xlane.xlu1 %4241  ;;  %v4323_v54 = vmul.f32 0.0078125, %v4232_v11  ;;  %v11662_v44 = vld [vmem:[#allocation89_spill] sm:$0xff] }
 0x559   :  { %4467 = vadd.xlane.f32.xlu0 %v4417_v36  ;;  %6455 = vmatprep.subr.bf16.mxu0 %v11518_v47  ;;  %v4422_v39 = vmul.f32 %v9595_v45, %v9595_v45  ;;  %v11660_v60 = vpack.c.bf16 %v11658_v30, %v11659_v57  ;;  %v11666_v36 = vld [vmem:[#allocation93_spill] sm:$0xff]  ;;  %v9629_v18 = vsub.f32 %v11575_v1, %v4324_v7 }
 0x55a   :  { %v2973_v10 = vmul.f32 0.088388346, %v2321_v17  ;;  %v4016_v52 = vpop.xlane.xlu0 %4015  ;;  %v9622_v22 = vsub.f32 %v11574_v13, %v4323_v54  ;;  %v11669_v11 = vld [vmem:[#allocation157_spill] sm:$0xff] }
 0x55b   :  { %6440 = vmatpush3.bf16.msra.mxu1 %v11657_v62  ;;  %4469 = vadd.xlane.f32.xlu1 %v4418_v3  ;;  %v4327_v3 = vmul.f32 0.0078125, %v4240_v31  ;;  %11672 = vst [vmem:[#allocation98_spill] sm:$0xff] %v9629_v18  ;;  %v4328_v62 = vmul.f32 0.0078125, %v4242_v0  ;;  %v11673_v58 = vld [vmem:[#allocation85_spill] sm:$0xff]  ;;  %v4420_v0 = vmul.f32 %v9629_v18, %v9629_v18 }
 0x55c   :  { %v2981_v56 = vpack.c.bf16 %v2973_v10, %v2972_v2  ;;  %6445 = vmatprep.subr.bf16.mxu1 %v11518_v47  ;;  %v4018_v17 = vpop.xlane.xlu1 %4017  ;;  %11667 = vst [vmem:[#allocation95_spill] sm:$0xff] %v9622_v22  ;;  %v11668_v2 = vld [vmem:[#allocation94_spill] sm:$0xff]  ;;  %v11670_v10 = vld [vmem:[#allocation155_spill] sm:$0xff]  ;;  %v11677_v54 = vld [vmem:[#allocation97_spill] sm:$0xff] }
 0x55d   :  { %4475 = vadd.xlane.f32.xlu0 %v4421_v5  ;;  %v11671_v32 = vpack.c.bf16 %v11669_v11, %v11670_v10  ;;  %v9636_v13 = vsub.f32 %v11576_v6, %v4327_v3  ;;  %v9644_v1 = vsub.f32 %v11577_v9, %v4328_v62  ;;  %v4048_v7 = vmul.f32 0.0078125, %v4018_v17 }
 0x55e   :  { %v9633_v5 = vpop.xlane.xlu0 %4243 }
 0x55f   :  { %4477 = vadd.xlane.f32.xlu1 %v4422_v39  ;;  %6432 = vmatmul.mubr.bf16.vlgmr.msra.gmra.mrb[116].mxu0 %v2981_v56  ;;  %11674 = vst [vmem:[#allocation20_spill] sm:$0xff] %v9636_v13  ;;  %v11675_v56 = vld [vmem:[#allocation90_spill] sm:$0xff]  ;;  %v4419_v39 = vmul.f32 %v9622_v22, %v9622_v22  ;;  %11676 = vst [vmem:[#allocation21_spill] sm:$0xff] %v9644_v1  ;;  %v4423_v30 = vmul.f32 %v9636_v13, %v9636_v13 }
 0x560   :  { %6456 = vmatpush3.bf16.msra.mxu0 %v11660_v60  ;;  %6461 = vmatprep.mubr.msk.bf16.mxu0 %vm7441_vm0, %v11518_v47  ;;  %v9641_v31 = vpop.xlane.xlu1 %4245  ;;  %v4424_v57 = vmul.f32 %v9644_v1, %v9644_v1  ;;  %v11683_v1 = vld [vmem:[#allocation100_spill] sm:$0xff] }
 0x561   :  { %4303 = vadd.xlane.f32.xlu0 %v11661_v37  ;;  %6457 = vmatprep.subr.bf16.mxu0 %v11518_v47  ;;  %v4330_v14 = vmul.f32 0.0078125, %v9641_v31 }
 0x562   :  { %v9650_v6 = vpop.xlane.xlu0 %4247 }
 0x563   :  { %4305 = vadd.xlane.f32.xlu1 %v11662_v44  ;;  %v4329_v44 = vmul.f32 0.0078125, %v9633_v5  ;;  %v9756_v42 = vsub.f32 %v11687_v34, %v4330_v14 }
 0x564   :  { %6458 = vmatpush3.bf16.msra.mxu0 %v11665_v61  ;;  %v9654_v60 = vpop.xlane.xlu1 %4249  ;;  %v4047_v61 = vmul.f32 0.0078125, %v4016_v52 }
 0x565   :  { %4311 = vadd.xlane.f32.xlu0 %v11666_v36  ;;  %6459 = vmatprep.subr.bf16.mxu0 %v11518_v47  ;;  %v9749_v8 = vsub.f32 %v11685_v41, %v4329_v44  ;;  %11688 = vst [vmem:[#allocation27_spill] sm:$0xff] %v9756_v42  ;;  %v4426_v34 = vmul.f32 %v9756_v42, %v9756_v42 }
 0x566   :  { %v9657_v9 = vpop.xlane.xlu0 %4019  ;;  %v9665_v11 = vsub.f32 %v11578_v20, %v4047_v61 }
 0x567   :  { %4313 = vadd.xlane.f32.xlu1 %v11668_v2  ;;  %11686 = vst [vmem:[#allocation24_spill] sm:$0xff] %v9749_v8 }
 0x568   :  { %6460 = vmatpush3.bf16.msra.mxu0 %v11671_v32  ;;  %v9660_v28 = vpop.xlane.xlu1 %4021  ;;  %11679 = vst [vmem:[#allocation40_spill] sm:$0xff] %v9665_v11  ;;  %v4079_v61 = vmul.f32 %v9665_v11, %v9665_v11 }
 0x569   :  { %4039 = vadd.xlane.f32.xlu0 %v11673_v58  ;;  %6475 = vmatprep.subr.bf16.mxu0 %v11518_v47 }
 0x56a   :  { %v9662_v3 = vpop.xlane.xlu0 %4251 }
 0x56b   :  { %4041 = vadd.xlane.f32.xlu1 %v11675_v56 }
 0x56c   :  { %v9667_v10 = vpop.xlane.xlu1 %4253 }
 0x56d   :  { %4471 = vadd.xlane.f32.xlu0 %v4419_v39 }
 0x56e   :  { %v9680_v20 = vpop.xlane.xlu0 %4259 }
 0x56f   :  { %4473 = vadd.xlane.f32.xlu1 %v4420_v0  ;;  %v11680_v0 = vld [vmem:[#allocation30_spill] sm:$0xff] }
 0x571   :  { %4479 = vadd.xlane.f32.xlu0 %v4423_v30  ;;  %v9674_v30 = vsub.f32 %v11680_v0, %v4048_v7 }
 0x572   :  { %v9688_v0 = vpop.xlane.xlu0 %4255 }
 0x573   :  { %4481 = vadd.xlane.f32.xlu1 %v4424_v57  ;;  %11681 = vst [vmem:[#allocation22_spill] sm:$0xff] %v9674_v30  ;;  %v4080_v7 = vmul.f32 %v9674_v30, %v9674_v30 }
 0x575   :  { %4315 = vadd.xlane.f32.xlu0 %v11677_v54 }
 0x576   :  { %v9694_v13 = vpop.xlane.xlu0 %4263 }
 0x577   :  { %4317 = vadd.xlane.f32.xlu1 %v11678_v12 }
 0x57a   :  { %v9698_v11 = vpop.xlane.xlu0 %4023 }
 0x57e   :  { %v9669_v32 = vpop.f32.mrb[116].mxu1 }
 0x57f   :  { %v6363_v62 = vpop.f32.mrb[117].mxu1  ;;  %v3335_v39 = vsel %vm3334_vm1, %v9669_v32, -inf }
 0x580   :  { %v9676_v57 = vpop.f32.mrb[118].mxu1  ;;  %3336 = vmax.xlane.f32.xlu0 %v3335_v39  ;;  %v9684_v62 = vpop.xlane.xlu1 %4261  ;;  %v11682_v39 = vld [vmem:[#allocation96_spill] sm:$0xff] }
 0x581   :  { %v6364_v52 = vpop.f32.mrb[119].mxu1  ;;  %v3338_v17 = vsel %vm3334_vm1, %v9676_v57, -inf }
 0x582   :  { %3339 = vmax.xlane.f32.xlu1 %v3338_v17 }
 0x584   :  { %4095 = vadd.xlane.f32.xlu0 %v4079_v61  ;;  %v9691_v52 = vpop.xlane.xlu1 %4257  ;;  %v9702_v61 = vpop.xlane.xlu0 %4267 }
 0x586   :  { %4097 = vadd.xlane.f32.xlu1 %v4080_v7 }
 0x588   :  { %4043 = vadd.xlane.f32.xlu0 %v11682_v39  ;;  %v9696_v17 = vpop.xlane.xlu1 %4265  ;;  %v9706_v7 = vpop.xlane.xlu0 %4271 }
 0x58a   :  { %4045 = vadd.xlane.f32.xlu1 %v11683_v1 }
 0x58c   :  { %v9700_v22 = vpop.xlane.xlu1 %4025  ;;  %v9718_v1 = vpop.xlane.xlu0 %4027 }
 0x590   :  { %v9704_v30 = vpop.xlane.xlu1 %4269  ;;  %v9722_v12 = vpop.xlane.xlu0 %4275 }
 0x594   :  { %v9708_v18 = vpop.xlane.xlu1 %4273 }
 0x598   :  { %v9720_v39 = vpop.xlane.xlu1 %4029 }
 0x59c   :  { %v9724_v54 = vpop.xlane.xlu1 %4277 }
 0x5a0   :  { %v9728_v56 = vpop.xlane.xlu1 %4285 }
 0x5a2   :  { %v9710_v45 = vpop.f32.mrb[120].mxu1 }
 0x5a3   :  { %v6373_v21 = vpop.f32.mrb[121].mxu1  ;;  %v3341_v35 = vsel %vm3334_vm1, %v9710_v45, -inf }
 0x5a4   :  { %v9714_v25 = vpop.f32.mrb[122].mxu1  ;;  %3342 = vmax.xlane.f32.xlu0 %v3341_v35  ;;  %v9726_v21 = vpop.xlane.xlu0 %4283 }
 0x5a5   :  { %v6374_v63 = vpop.f32.mrb[123].mxu1  ;;  %v3344_v26 = vsel %vm3334_vm1, %v9714_v25, -inf  ;;  %v9732_v35 = vpop.xlane.xlu1 %4281 }
 0x5a6   :  { %3345 = vmax.xlane.f32.xlu1 %v3344_v26 }
 0x5a8   :  { %v9730_v58 = vpop.xlane.xlu0 %4279 }
 0x5a9   :  { %v9736_v2 = vpop.xlane.xlu1 %4289 }
 0x5ac   :  { %v9734_v63 = vpop.xlane.xlu0 %4287 }
 0x5ad   :  { %v9740_v26 = vpop.xlane.xlu1 %4033 }
 0x5b0   :  { %v9738_v36 = vpop.xlane.xlu0 %4031 }
 0x5b1   :  { %v9746_v40 = vpop.xlane.xlu1 %4293 }
 0x5b2   :  { %11684 = vst [vmem:[#allocation37_spill] sm:$0xff] %v9746_v40 }
 0x5b4   :  { %v9743_v37 = vpop.xlane.xlu0 %4291 }
 0x5b5   :  { %v9764_v41 = vpop.xlane.xlu1 %4297 }
 0x5b6   :  { %11691 = vst [vmem:[#allocation36_spill] sm:$0xff] %v9764_v41 }
 0x5b8   :  { %v9758_v19 = vpop.xlane.xlu0 %4295 }
 0x5b9   :  { %11689 = vst [vmem:[#allocation29_spill] sm:$0xff] %v9758_v19  ;;  %v9772_v44 = vpop.xlane.xlu1 %4037 }
 0x5ba   :  { %11693 = vst [vmem:[#allocation50_spill] sm:$0xff] %v9772_v44 }
 0x5bc   :  { %v9770_v14 = vpop.xlane.xlu0 %4035 }
 0x5bd   :  { %11692 = vst [vmem:[#allocation26_spill] sm:$0xff] %v9770_v14 }
 0x5ce   :  { %v9751_v46 = vpop.f32.mrb[124].mxu1 }
 0x5cf   :  { %v6383_v27 = vpop.f32.mrb[125].mxu1  ;;  %v3347_v23 = vsel %vm3334_vm1, %v9751_v46, -inf }
 0x5d0   :  { %v9760_v5 = vpop.f32.mrb[126].mxu1  ;;  %3348 = vmax.xlane.f32.xlu0 %v3347_v23  ;;  %v4425_v27 = vmul.f32 %v9749_v8, %v9749_v8 }
 0x5d1   :  { %11690 = vst [vmem:[#allocation35_spill] sm:$0xff] %v9760_v5  ;;  %v6384_v31 = vpop.f32.mrb[127].mxu1  ;;  %v3350_v40 = vsel %vm3334_vm1, %v9760_v5, -inf }
 0x5d2   :  { %3351 = vmax.xlane.f32.xlu1 %v3350_v40 }
 0x5d4   :  { %4483 = vadd.xlane.f32.xlu0 %v4425_v27 }
 0x5d6   :  { %4485 = vadd.xlane.f32.xlu1 %v4426_v34 }
 0x5da   :  { %v9774_v23 = vpop.xlane.xlu0 %4463 }
 0x5db   :  { %11694 = vst [vmem:[#allocation49_spill] sm:$0xff] %v9774_v23 }
 0x5dc   :  { %v9776_v31 = vpop.xlane.xlu1 %4465 }
 0x5dd   :  { %11695 = vst [vmem:[#allocation52_spill] sm:$0xff] %v9776_v31 }
 0x5de   :  { %v9778_v19 = vpop.xlane.xlu0 %4299 }
 0x5df   :  { %11696 = vst [vmem:[#allocation47_spill] sm:$0xff] %v9778_v19 }
 0x5e0   :  { %v9780_v41 = vpop.xlane.xlu1 %4301 }
 0x5e1   :  { %11697 = vst [vmem:[#allocation55_spill] sm:$0xff] %v9780_v41 }
 0x5e2   :  { %v9782_v40 = vpop.f32.mrb[108].mxu0  ;;  %v9784_v8 = vpop.xlane.xlu0 %4307 }
 0x5e3   :  { %11698 = vst [vmem:[#allocation57_spill] sm:$0xff] %v9782_v40  ;;  %11699 = vst [vmem:[#allocation61_spill] sm:$0xff] %v9784_v8  ;;  %v6393_v27 = vpop.f32.mrb[109].mxu0  ;;  %v3353_v42 = vsel %vm3334_vm1, %v9782_v40, -inf  ;;  %v4331_v8 = vmul.f32 0.0078125, %v9650_v6  ;;  %v4332_v40 = vmul.f32 0.0078125, %v9654_v60 }
 0x5e4   :  { %v9788_v14 = vpop.xlane.xlu1 %4309  ;;  %v9790_v34 = vpop.f32.mrb[110].mxu0  ;;  %3354 = vmax.xlane.f32.xlu0 %v3353_v42 }
 0x5e5   :  { %11700 = vst [vmem:[#allocation56_spill] sm:$0xff] %v9788_v14  ;;  %11701 = vst [vmem:[#allocation162_spill] sm:$0xff] %v9790_v34  ;;  %v6394_v23 = vpop.f32.mrb[111].mxu0  ;;  %v3356_v31 = vsel %vm3334_vm1, %v9790_v34, -inf  ;;  %v11706_v14 = vld [vmem:[#allocation43_spill] sm:$0xff] }
 0x5e6   :  { %3357 = vmax.xlane.f32.xlu1 %v3356_v31  ;;  %v9794_v19 = vpop.xlane.xlu0 %4467  ;;  %v9805_v5 = vsub.f32 %v11706_v14, %v4331_v8 }
 0x5e7   :  { %11702 = vst [vmem:[#allocation160_spill] sm:$0xff] %v9794_v19 }
 0x5e8   :  { %v9796_v41 = vpop.xlane.xlu1 %4469  ;;  %11707 = vst [vmem:[#allocation69_spill] sm:$0xff] %v9805_v5 }
 0x5e9   :  { %11703 = vst [vmem:[#allocation59_spill] sm:$0xff] %v9796_v41  ;;  %v11709_v41 = vld [vmem:[#allocation44_spill] sm:$0xff] }
 0x5ea   :  { %v9799_v27 = vpop.xlane.xlu0 %4475  ;;  %v9814_v34 = vsub.f32 %v11709_v41, %v4332_v40  ;;  %v4049_v40 = vmul.f32 0.0078125, %v9657_v9 }
 0x5eb   :  { %11704 = vst [vmem:[#allocation62_spill] sm:$0xff] %v9799_v27 }
 0x5ec   :  { %v9802_v44 = vpop.xlane.xlu1 %4477  ;;  %11710 = vst [vmem:[#allocation66_spill] sm:$0xff] %v9814_v34  ;;  %v4428_v41 = vmul.f32 %v9814_v34, %v9814_v34 }
 0x5ed   :  { %11705 = vst [vmem:[#allocation63_spill] sm:$0xff] %v9802_v44 }
 0x5ee   :  { %v9807_v42 = vpop.f32.mrb[128].mxu1  ;;  %v9809_v23 = vpop.xlane.xlu0 %4303 }
 0x5ef   :  { %11708 = vst [vmem:[#allocation70_spill] sm:$0xff] %v9807_v42  ;;  %v6403_v31 = vpop.f32.mrb[129].mxu1  ;;  %v3359_v19 = vsel %vm3334_vm1, %v9807_v42, -inf }
 0x5f0   :  { %v9816_v6 = vpop.xlane.xlu1 %4305  ;;  %v9818_v27 = vpop.f32.mrb[130].mxu1  ;;  %3360 = vmax.xlane.f32.xlu0 %v3359_v19  ;;  %v4427_v31 = vmul.f32 %v9805_v5, %v9805_v5 }
 0x5f1   :  { %11711 = vst [vmem:[#allocation169_spill] sm:$0xff] %v9818_v27  ;;  %v6404_v60 = vpop.f32.mrb[131].mxu1  ;;  %v3362_v8 = vsel %vm3334_vm1, %v9818_v27, -inf }
 0x5f2   :  { %3363 = vmax.xlane.f32.xlu1 %v3362_v8  ;;  %v9822_v14 = vpop.xlane.xlu0 %4311  ;;  %v4050_v60 = vmul.f32 0.0078125, %v9660_v28  ;;  %v11715_v8 = vld [vmem:[#allocation38_spill] sm:$0xff] }
 0x5f3   :  { %11712 = vst [vmem:[#allocation71_spill] sm:$0xff] %v9822_v14  ;;  %v9837_v42 = vsub.f32 %v11715_v8, %v4049_v40 }
 0x5f4   :  { %v9826_v44 = vpop.xlane.xlu1 %4313  ;;  %4487 = vadd.xlane.f32.xlu0 %v4427_v31 }
 0x5f5   :  { %11713 = vst [vmem:[#allocation167_spill] sm:$0xff] %v9826_v44  ;;  %11716 = vst [vmem:[#allocation64_spill] sm:$0xff] %v9837_v42  ;;  %v11718_v44 = vld [vmem:[#allocation42_spill] sm:$0xff]  ;;  %v4081_v40 = vmul.f32 %v9837_v42, %v9837_v42 }
 0x5f6   :  { %4489 = vadd.xlane.f32.xlu1 %v4428_v41  ;;  %v9831_v19 = vpop.xlane.xlu0 %4039  ;;  %v9844_v34 = vsub.f32 %v11718_v44, %v4050_v60 }
 0x5f8   :  { %v9834_v27 = vpop.xlane.xlu1 %4041  ;;  %11719 = vst [vmem:[#allocation74_spill] sm:$0xff] %v9844_v34  ;;  %v4082_v44 = vmul.f32 %v9844_v34, %v9844_v34 }
 0x5f9   :  { %11714 = vst [vmem:[#allocation72_spill] sm:$0xff] %v9834_v27 }
 0x5fa   :  { %v9839_v14 = vpop.f32.mrb[112].mxu0  ;;  %v9848_v41 = vpop.xlane.xlu0 %4471 }
 0x5fb   :  { %11717 = vst [vmem:[#allocation77_spill] sm:$0xff] %v9839_v14  ;;  %v6413_v5 = vpop.f32.mrb[113].mxu0  ;;  %v3365_v31 = vsel %vm3334_vm1, %v9839_v14, -inf  ;;  %11721 = vst [vmem:[#allocation73_spill] sm:$0xff] %v9848_v41  ;;  %v11727_v14 = vld [vmem:[#allocation129_spill] sm:$0xff] }
 0x5fc   :  { %v9846_v9 = vpop.f32.mrb[114].mxu0  ;;  %3366 = vmax.xlane.f32.xlu0 %v3365_v31  ;;  %v9854_v5 = vpop.xlane.xlu1 %4473 }
 0x5fd   :  { %11720 = vst [vmem:[#allocation201_spill] sm:$0xff] %v9846_v9  ;;  %v6414_v28 = vpop.f32.mrb[115].mxu0  ;;  %v3368_v27 = vsel %vm3334_vm1, %v9846_v9, -inf  ;;  %11722 = vst [vmem:[#allocation202_spill] sm:$0xff] %v9854_v5 }
 0x5fe   :  { %3369 = vmax.xlane.f32.xlu1 %v3368_v27  ;;  %v9858_v60 = vpop.xlane.xlu0 %4479 }
 0x5ff   :  { %11723 = vst [vmem:[#allocation68_spill] sm:$0xff] %v9858_v60  ;;  %v4333_v60 = vmul.f32 0.0078125, %v9662_v3  ;;  %v11734_v3 = vld [vmem:[#allocation133_spill] sm:$0xff] }
 0x600   :  { %4099 = vadd.xlane.f32.xlu0 %v4081_v40  ;;  %v9860_v8 = vpop.xlane.xlu1 %4481 }
 0x601   :  { %11724 = vst [vmem:[#allocation203_spill] sm:$0xff] %v9860_v8 }
 0x602   :  { %4101 = vadd.xlane.f32.xlu1 %v4082_v44  ;;  %v9862_v31 = vpop.xlane.xlu0 %4315 }
 0x604   :  { %v9864_v28 = vpop.xlane.xlu1 %4317 }
 0x60d   :  { %v3337_v41 = vpop.xlane.xlu0 %3336 }
 0x60e   :  { %v3383_v27 = vsub.f32 %v9669_v32, %v3337_v41  ;;  %v11728_v32 = vld [vmem:[#allocation125_spill] sm:$0xff] }
 0x60f   :  { %v3340_v9 = vpop.xlane.xlu1 %3339  ;;  %v11729_v41 = vpack.c.bf16 %v11727_v14, %v11728_v32  ;;  %v11736_v32 = vld [vmem:[#allocation46_spill] sm:$0xff] }
 0x610   :  { %v3399_v42 = vmul.f32 1.442695, %v3383_v27  ;;  %v3384_v5 = vsub.f32 %v9676_v57, %v3340_v9  ;;  %v4334_v57 = vmul.f32 0.0078125, %v9667_v10  ;;  %v11733_v27 = vld [vmem:[#allocation137_spill] sm:$0xff] }
 0x612   :  { %v3401_v40 = vmul.f32 1.442695, %v3384_v5  ;;  %7018 = vpow2.f32 %v3399_v42  ;;  %v11730_v42 = vld [vmem:[#allocation45_spill] sm:$0xff] }
 0x613   :  { %v9884_v9 = vsub.f32 %v11730_v42, %v4333_v60 }
 0x614   :  { %7020 = vpow2.f32 %v3401_v40  ;;  %v11735_v40 = vpack.c.bf16 %v11733_v27, %v11734_v3  ;;  %v9903_v27 = vpop.xlane.xlu1 %4097 }
 0x615   :  { %11731 = vst [vmem:[#allocation23_spill] sm:$0xff] %v9884_v9  ;;  %11740 = vst [vmem:[#allocation101_spill] sm:$0xff] %v9903_v27  ;;  %v4429_v3 = vmul.f32 %v9884_v9, %v9884_v9 }
 0x61c   :  { %v9868_v34 = vpop.eup %7018 }
 0x61d   :  { %11725 = vst [vmem:[#allocation204_spill] sm:$0xff] %v9868_v34 }
 0x61e   :  { %v9870_v44 = vpop.eup %7020 }
 0x61f   :  { %11726 = vst [vmem:[#allocation205_spill] sm:$0xff] %v9870_v44  ;;  %v3543_v8 = vpack.c.bf16 %v9870_v44, %v9868_v34  ;;  %v9896_v44 = vpop.xlane.xlu0 %4095  ;;  %v9916_v34 = vpop.xlane.xlu1 %4045 }
 0x620   :  { %11738 = vst [vmem:[#allocation143_spill] sm:$0xff] %v9896_v44 }
 0x621   :  { %6442 = vmatmul.mubr.msk.bf16.vlgmr.msra.gmra.mrb[136].mxu1 %vm3334_vm1, %v3543_v8 }
 0x622   :  { %6446 = vmatpush3.bf16.msra.mxu1 %v11729_v41  ;;  %6451 = vmatprep.mubr.msk.bf16.mxu1 %vm7441_vm0, %v11518_v47  ;;  %v9894_v41 = vsub.f32 %v11736_v32, %v4334_v57  ;;  %v11742_v57 = vld [vmem:[#allocation142_spill] sm:$0xff] }
 0x623   :  { %6447 = vmatprep.subr.bf16.mxu1 %v11518_v47  ;;  %v9913_v32 = vpop.xlane.xlu0 %4043 }
 0x624   :  { %11737 = vst [vmem:[#allocation206_spill] sm:$0xff] %v9894_v41 }
 0x625   :  { %v9886_v5 = vpop.f32.mrb[132].mxu1 }
 0x626   :  { %11732 = vst [vmem:[#allocation207_spill] sm:$0xff] %v9886_v5  ;;  %6448 = vmatpush3.bf16.msra.mxu1 %v11735_v40  ;;  %v6423_v8 = vpop.f32.mrb[133].mxu1  ;;  %v3371_v14 = vsel %vm3334_vm1, %v9886_v5, -inf  ;;  %v11741_v40 = vld [vmem:[#allocation145_spill] sm:$0xff] }
 0x627   :  { %v9898_v10 = vpop.f32.mrb[134].mxu1  ;;  %3372 = vmax.xlane.f32.xlu0 %v3371_v14  ;;  %6449 = vmatprep.subr.bf16.mxu1 %v11518_v47  ;;  %v11743_v8 = vpack.c.bf16 %v11741_v40, %v11742_v57  ;;  %v4430_v14 = vmul.f32 %v9894_v41, %v9894_v41 }
 0x628   :  { %11739 = vst [vmem:[#allocation105_spill] sm:$0xff] %v9898_v10  ;;  %v6424_v60 = vpop.f32.mrb[135].mxu1  ;;  %v3374_v42 = vsel %vm3334_vm1, %v9898_v10, -inf  ;;  %v11744_v10 = vld [vmem:[#allocation53_spill] sm:$0xff] }
 0x629   :  { %3375 = vmax.xlane.f32.xlu1 %v3374_v42  ;;  %v4337_v60 = vmul.f32 0.0078125, %v9680_v20  ;;  %v4338_v42 = vmul.f32 0.0078125, %v9684_v62  ;;  %v11746_v20 = vld [vmem:[#allocation54_spill] sm:$0xff]  ;;  %v4336_v62 = vmul.f32 0.0078125, %v9691_v52 }
 0x62a   :  { %6450 = vmatpush3.bf16.msra.mxu1 %v11743_v8 }
 0x62b   :  { %4491 = vadd.xlane.f32.xlu0 %v4429_v3  ;;  %6465 = vmatprep.subr.bf16.mxu1 %v11518_v47  ;;  %v9920_v5 = vsub.f32 %v11744_v10, %v4337_v60  ;;  %v4335_v3 = vmul.f32 0.0078125, %v9688_v0  ;;  %v9929_v27 = vsub.f32 %v11746_v20, %v4338_v42  ;;  %v4340_v42 = vmul.f32 0.0078125, %v9696_v17 }
 0x62c   :  { %v4341_v20 = vmul.f32 0.0078125, %v9702_v61  ;;  %v4343_v61 = vmul.f32 0.0078125, %v9706_v7 }
 0x62d   :  { %4493 = vadd.xlane.f32.xlu1 %v4430_v14  ;;  %v4433_v52 = vmul.f32 %v9920_v5, %v9920_v5 }
 0x631   :  { %v3343_v9 = vpop.xlane.xlu0 %3342 }
 0x632   :  { %v3385_v40 = vsub.f32 %v9710_v45, %v3343_v9  ;;  %v9924_v57 = vpop.f32.mrb[116].mxu0  ;;  %v9938_v9 = vsub.f32 %v11591_v24, %v4335_v3  ;;  %v11747_v24 = vld [vmem:[#allocation19_spill] sm:$0xff] }
 0x633   :  { %11745 = vst [vmem:[#allocation32_spill] sm:$0xff] %v9924_v57  ;;  %v3346_v8 = vpop.xlane.xlu1 %3345  ;;  %v6433_v41 = vpop.f32.mrb[117].mxu0  ;;  %v3377_v14 = vsel %vm3334_vm1, %v9924_v57, -inf }
 0x634   :  { %v3403_v44 = vmul.f32 1.442695, %v3385_v40  ;;  %v3386_v10 = vsub.f32 %v9714_v25, %v3346_v8  ;;  %v9933_v60 = vpop.f32.mrb[118].mxu0  ;;  %3378 = vmax.xlane.f32.xlu0 %v3377_v14  ;;  %v4339_v41 = vmul.f32 0.0078125, %v9694_v13  ;;  %v9944_v25 = vsub.f32 %v11592_v53, %v4336_v62  ;;  %v11749_v62 = vld [vmem:[#allocation51_spill] sm:$0xff] }
 0x635   :  { %v6434_v0 = vpop.f32.mrb[119].mxu0  ;;  %v3380_v45 = vsel %vm3334_vm1, %v9933_v60, -inf  ;;  %v4434_v40 = vmul.f32 %v9929_v27, %v9929_v27  ;;  %v4051_v13 = vmul.f32 0.0078125, %v9698_v11  ;;  %v4431_v8 = vmul.f32 %v9938_v9, %v9938_v9 }
 0x636   :  { %v3405_v57 = vmul.f32 1.442695, %v3386_v10  ;;  %3381 = vmax.xlane.f32.xlu1 %v3380_v45  ;;  %7022 = vpow2.f32 %v3403_v44  ;;  %v9950_v3 = vsub.f32 %v11747_v24, %v4339_v41  ;;  %v9956_v44 = vsub.f32 %v11595_v16, %v4340_v42  ;;  %v11752_v42 = vld [vmem:[#allocation58_spill] sm:$0xff] }
 0x637   :  { %v4052_v53 = vmul.f32 0.0078125, %v9700_v22  ;;  %v4432_v17 = vmul.f32 %v9944_v25, %v9944_v25  ;;  %v4342_v16 = vmul.f32 0.0078125, %v9704_v30  ;;  %v9978_v41 = vsub.f32 %v11598_v29, %v4341_v20  ;;  %v11753_v29 = vld [vmem:[#allocation60_spill] sm:$0xff] }
 0x638   :  { %7024 = vpow2.f32 %v3405_v57  ;;  %4499 = vadd.xlane.f32.xlu0 %v4433_v52  ;;  %v11748_v57 = vld [vmem:[#allocation48_spill] sm:$0xff]  ;;  %v4435_v11 = vmul.f32 %v9950_v3, %v9950_v3  ;;  %v4436_v22 = vmul.f32 %v9956_v44, %v9956_v44  ;;  %v4344_v24 = vmul.f32 0.0078125, %v9708_v18 }
 0x639   :  { %v9962_v14 = vsub.f32 %v11748_v57, %v4051_v13  ;;  %v9968_v10 = vsub.f32 %v11749_v62, %v4052_v53  ;;  %v9993_v7 = vsub.f32 %v11753_v29, %v4343_v61  ;;  %v11754_v53 = vld [vmem:[#allocation159_spill] sm:$0xff]  ;;  %v4437_v20 = vmul.f32 %v9978_v41, %v9978_v41 }
 0x63a   :  { %4501 = vadd.xlane.f32.xlu1 %v4434_v40  ;;  %v9986_v40 = vsub.f32 %v11752_v42, %v4342_v16  ;;  %v10005_v18 = vsub.f32 %v11601_v33, %v4344_v24  ;;  %v4345_v16 = vmul.f32 0.0078125, %v9722_v12  ;;  %v11758_v61 = vld [vmem:[#allocation163_spill] sm:$0xff]  ;;  %v4349_v42 = vmul.f32 0.0078125, %v9726_v21 }
 0x63b   :  { %v4083_v52 = vmul.f32 %v9962_v14, %v9962_v14  ;;  %v4084_v13 = vmul.f32 %v9968_v10, %v9968_v10  ;;  %v4439_v33 = vmul.f32 %v9993_v7, %v9993_v7  ;;  %v11760_v24 = vld [vmem:[#allocation171_spill] sm:$0xff] }
 0x63c   :  { %4495 = vadd.xlane.f32.xlu0 %v4431_v8  ;;  %v4053_v8 = vmul.f32 0.0078125, %v9718_v1  ;;  %v4438_v1 = vmul.f32 %v9986_v40, %v9986_v40  ;;  %v10027_v12 = vsub.f32 %v11606_v48, %v4345_v16  ;;  %v10043_v21 = vsub.f32 %v11608_v38, %v4349_v42 }
 0x63d   :  { %v4351_v38 = vmul.f32 0.0078125, %v9734_v63 }
 0x63e   :  { %4497 = vadd.xlane.f32.xlu1 %v4432_v17  ;;  %v11755_v17 = vld [vmem:[#allocation31_spill] sm:$0xff]  ;;  %v10011_v62 = vsub.f32 %v11602_v43, %v4053_v8  ;;  %v4440_v43 = vmul.f32 %v10005_v18, %v10005_v18  ;;  %v4350_v8 = vmul.f32 0.0078125, %v9728_v56 }
 0x63f   :  { %v11756_v57 = vpack.c.bf16 %v11754_v53, %v11755_v17  ;;  %v4347_v53 = vmul.f32 0.0078125, %v9730_v58  ;;  %v4441_v17 = vmul.f32 %v10027_v12, %v10027_v12  ;;  %v4445_v58 = vmul.f32 %v10043_v21, %v10043_v21 }
 0x640   :  { %4503 = vadd.xlane.f32.xlu0 %v4435_v11  ;;  %v9973_v0 = vpop.eup %7022  ;;  %v4054_v11 = vmul.f32 0.0078125, %v9720_v39  ;;  %v10067_v16 = vsub.f32 %v11613_v59, %v4351_v38  ;;  %v4353_v59 = vmul.f32 0.0078125, %v9743_v37  ;;  %v11767_v37 = vld [vmem:[#allocation76_spill] sm:$0xff] }
 0x641   :  { %11750 = vst [vmem:[#allocation113_spill] sm:$0xff] %v9973_v0 }
 0x642   :  { %v9975_v45 = vpop.eup %7024  ;;  %4505 = vadd.xlane.f32.xlu1 %v4436_v22  ;;  %v11757_v22 = vld [vmem:[#allocation165_spill] sm:$0xff]  ;;  %v10021_v39 = vsub.f32 %v11605_v50, %v4054_v11  ;;  %v4085_v50 = vmul.f32 %v10011_v62, %v10011_v62 }
 0x643   :  { %11751 = vst [vmem:[#allocation109_spill] sm:$0xff] %v9975_v45  ;;  %v3544_v30 = vpack.c.bf16 %v9975_v45, %v9973_v0 }
 0x644   :  { %4103 = vadd.xlane.f32.xlu0 %v4083_v52  ;;  %v11759_v52 = vpack.c.bf16 %v11757_v22, %v11758_v61  ;;  %v4086_v48 = vmul.f32 %v10021_v39, %v10021_v39  ;;  %v4055_v22 = vmul.f32 0.0078125, %v9738_v36 }
 0x645   :  { %6452 = vmatmul.mubr.msk.bf16.vlgmr.msra.gmra.mrb[140].mxu1 %vm3334_vm1, %v3544_v30  ;;  %v4346_v30 = vmul.f32 0.0078125, %v9724_v54 }
 0x646   :  { %6466 = vmatpush3.bf16.msra.mxu1 %v11756_v57  ;;  %4105 = vadd.xlane.f32.xlu1 %v4084_v13  ;;  %v11761_v13 = vld [vmem:[#allocation168_spill] sm:$0xff]  ;;  %v10049_v57 = vsub.f32 %v11609_v49, %v4350_v8  ;;  %v10093_v8 = vsub.f32 %v11767_v37, %v4353_v59  ;;  %v11778_v59 = vld [vmem:[#allocation50_spill] sm:$0xff] }
 0x647   :  { %6467 = vmatprep.subr.bf16.mxu1 %v11518_v47  ;;  %6471 = vmatprep.mubr.msk.bf16.mxu1 %vm7441_vm0, %v11518_v47  ;;  %v11762_v29 = vpack.c.bf16 %v11760_v24, %v11761_v13  ;;  %v10037_v54 = vsub.f32 %v11607_v51, %v4346_v30  ;;  %v4348_v51 = vmul.f32 0.0078125, %v9732_v35  ;;  %v4447_v30 = vmul.f32 %v10067_v16, %v10067_v16  ;;  %v11765_v24 = vld [vmem:[#allocation37_spill] sm:$0xff] }
 0x648   :  { %4507 = vadd.xlane.f32.xlu0 %v4437_v20  ;;  %v11763_v20 = vld [vmem:[#allocation65_spill] sm:$0xff]  ;;  %v4446_v35 = vmul.f32 %v10049_v57, %v10049_v57  ;;  %v4354_v13 = vmul.f32 0.0078125, %v11765_v24  ;;  %11768 = vst [vmem:[#allocation34_spill] sm:$0xff] %v10093_v8 }
 0x649   :  { %v4442_v56 = vmul.f32 %v10037_v54, %v10037_v54  ;;  %v10055_v11 = vsub.f32 %v11763_v20, %v4347_v53  ;;  %v10062_v49 = vsub.f32 %v11611_v15, %v4348_v51  ;;  %v11770_v51 = vld [vmem:[#allocation78_spill] sm:$0xff]  ;;  %v11772_v20 = vld [vmem:[#allocation36_spill] sm:$0xff] }
 0x64a   :  { %6468 = vmatpush3.bf16.msra.mxu1 %v11759_v52  ;;  %4509 = vadd.xlane.f32.xlu1 %v4438_v1  ;;  %v4352_v1 = vmul.f32 0.0078125, %v9736_v2  ;;  %v4056_v2 = vmul.f32 0.0078125, %v9740_v26  ;;  %v4356_v38 = vmul.f32 0.0078125, %v11772_v20 }
 0x64b   :  { %6469 = vmatprep.subr.bf16.mxu1 %v11518_v47  ;;  %v4443_v63 = vmul.f32 %v10055_v11, %v10055_v11  ;;  %v4444_v15 = vmul.f32 %v10062_v49, %v10062_v49 }
 0x64c   :  { %4511 = vadd.xlane.f32.xlu0 %v4439_v33  ;;  %v10073_v61 = vsub.f32 %v11615_v4, %v4352_v1  ;;  %v10079_v33 = vsub.f32 %v11616_v55, %v4055_v22  ;;  %v11766_v55 = vld [vmem:[#allocation35_spill] sm:$0xff]  ;;  %v11773_v1 = vld [vmem:[#allocation80_spill] sm:$0xff]  ;;  %v11775_v22 = vld [vmem:[#allocation26_spill] sm:$0xff] }
 0x64e   :  { %6470 = vmatpush3.bf16.msra.mxu1 %v11762_v29  ;;  %4513 = vadd.xlane.f32.xlu1 %v4440_v43  ;;  %v4448_v26 = vmul.f32 %v10073_v61, %v10073_v61  ;;  %v11764_v43 = vld [vmem:[#allocation67_spill] sm:$0xff] }
 0x64f   :  { %6485 = vmatprep.subr.bf16.mxu1 %v11518_v47  ;;  %v10088_v42 = vsub.f32 %v11764_v43, %v4056_v2  ;;  %v4449_v2 = vmul.f32 %v10093_v8, %v10093_v8  ;;  %v11781_v43 = vld [vmem:[#allocation47_spill] sm:$0xff] }
 0x650   :  { %4107 = vadd.xlane.f32.xlu0 %v4085_v50  ;;  %v4357_v24 = vmul.f32 0.0078125, %v11781_v43  ;;  %v11793_v43 = vld [vmem:[#allocation91_spill] sm:$0xff] }
 0x652   :  { %4109 = vadd.xlane.f32.xlu1 %v4086_v48 }
 0x654   :  { %4515 = vadd.xlane.f32.xlu0 %v4441_v17  ;;  %v4087_v17 = vmul.f32 %v10079_v33, %v10079_v33 }
 0x656   :  { %4517 = vadd.xlane.f32.xlu1 %v4442_v56  ;;  %v10099_v56 = vsub.f32 %v11770_v51, %v4354_v13  ;;  %v11787_v51 = vld [vmem:[#allocation82_spill] sm:$0xff] }
 0x657   :  { %v10135_v20 = vsub.f32 %v11787_v51, %v4357_v24 }
 0x658   :  { %4523 = vadd.xlane.f32.xlu0 %v4445_v58  ;;  %11771 = vst [vmem:[#allocation121_spill] sm:$0xff] %v10099_v56  ;;  %v4088_v58 = vmul.f32 %v10088_v42, %v10088_v42 }
 0x659   :  { %11788 = vst [vmem:[#allocation155_spill] sm:$0xff] %v10135_v20 }
 0x65a   :  { %4525 = vadd.xlane.f32.xlu1 %v4446_v35 }
 0x65c   :  { %4519 = vadd.xlane.f32.xlu0 %v4443_v63  ;;  %v4057_v63 = vmul.f32 0.0078125, %v11775_v22  ;;  %v11790_v22 = vld [vmem:[#allocation83_spill] sm:$0xff] }
 0x65d   :  { %v3349_v52 = vpop.xlane.xlu0 %3348 }
 0x65e   :  { %v3387_v36 = vsub.f32 %v9751_v46, %v3349_v52  ;;  %4521 = vadd.xlane.f32.xlu1 %v4444_v15  ;;  %v11769_v46 = vld [vmem:[#allocation29_spill] sm:$0xff] }
 0x65f   :  { %v3352_v4 = vpop.xlane.xlu1 %3351  ;;  %v4355_v48 = vmul.f32 0.0078125, %v11769_v46  ;;  %v11776_v15 = vld [vmem:[#allocation81_spill] sm:$0xff] }
 0x660   :  { %v3407_v29 = vmul.f32 1.442695, %v3387_v36  ;;  %v3388_v50 = vsub.f32 %v11766_v55, %v3352_v4  ;;  %4527 = vadd.xlane.f32.xlu0 %v4447_v30  ;;  %v10111_v52 = vsub.f32 %v11776_v15, %v4356_v38  ;;  %v4058_v36 = vmul.f32 0.0078125, %v11778_v59  ;;  %v11779_v4 = vld [vmem:[#allocation75_spill] sm:$0xff]  ;;  %v11789_v38 = vld [vmem:[#allocation61_spill] sm:$0xff]  ;;  %v11792_v59 = vld [vmem:[#allocation56_spill] sm:$0xff] }
 0x661   :  { %v10105_v35 = vsub.f32 %v11773_v1, %v4355_v48  ;;  %v4450_v30 = vmul.f32 %v10099_v56, %v10099_v56 }
 0x662   :  { %v3409_v53 = vmul.f32 1.442695, %v3388_v50  ;;  %4529 = vadd.xlane.f32.xlu1 %v4448_v26  ;;  %7026 = vpow2.f32 %v3407_v29  ;;  %11777 = vst [vmem:[#allocation149_spill] sm:$0xff] %v10111_v52  ;;  %v10117_v26 = vsub.f32 %v11779_v4, %v4057_v63  ;;  %v11782_v29 = vld [vmem:[#allocation55_spill] sm:$0xff]  ;;  %v4452_v46 = vmul.f32 %v10111_v52, %v10111_v52 }
 0x663   :  { %11774 = vst [vmem:[#allocation117_spill] sm:$0xff] %v10105_v35  ;;  %v4451_v13 = vmul.f32 %v10105_v35, %v10105_v35  ;;  %v4358_v55 = vmul.f32 0.0078125, %v11782_v29  ;;  %v11783_v50 = vld [vmem:[#allocation79_spill] sm:$0xff] }
 0x664   :  { %7028 = vpow2.f32 %v3409_v53  ;;  %4111 = vadd.xlane.f32.xlu0 %v4087_v17  ;;  %11780 = vst [vmem:[#allocation147_spill] sm:$0xff] %v10117_v26  ;;  %v10124_v37 = vsub.f32 %v11783_v50, %v4058_v36  ;;  %v10130_v53 = vpop.xlane.xlu0 %4483  ;;  %v4089_v1 = vmul.f32 %v10117_v26, %v10117_v26  ;;  %v4362_v36 = vmul.f32 0.0078125, %v11792_v59  ;;  %v11795_v29 = vld [vmem:[#allocation175_spill] sm:$0xff] }
 0x665   :  { %v10141_v63 = vsub.f32 %v11790_v22, %v4358_v55  ;;  %v11796_v55 = vld [vmem:[#allocation173_spill] sm:$0xff] }
 0x666   :  { %4113 = vadd.xlane.f32.xlu1 %v4088_v58  ;;  %11784 = vst [vmem:[#allocation153_spill] sm:$0xff] %v10124_v37  ;;  %v4361_v58 = vmul.f32 0.0078125, %v11789_v38  ;;  %v11797_v50 = vpack.c.bf16 %v11795_v29, %v11796_v55  ;;  %v4453_v38 = vmul.f32 %v10135_v20, %v10135_v20  ;;  %v11804_v55 = vld [vmem:[#allocation71_spill] sm:$0xff] }
 0x667   :  { %11791 = vst [vmem:[#allocation30_spill] sm:$0xff] %v10141_v63  ;;  %v4454_v22 = vmul.f32 %v10141_v63, %v10141_v63  ;;  %v11887_v63 = vld [vmem:[#allocation84_spill] sm:$0xff] }
 0x668   :  { %4531 = vadd.xlane.f32.xlu0 %v4449_v2  ;;  %v10143_v2 = vpop.xlane.xlu1 %4485  ;;  %v10152_v24 = vsub.f32 %v11793_v43, %v4361_v58  ;;  %v11802_v43 = vld [vmem:[#allocation86_spill] sm:$0xff] }
 0x66a   :  { %4533 = vadd.xlane.f32.xlu1 %v4450_v30  ;;  %v4090_v30 = vmul.f32 %v10124_v37, %v10124_v37  ;;  %11794 = vst [vmem:[#allocation39_spill] sm:$0xff] %v10152_v24  ;;  %v11888_v37 = vld [vmem:[#allocation87_spill] sm:$0xff] }
 0x66c   :  { %4535 = vadd.xlane.f32.xlu0 %v4451_v13  ;;  %v10128_v48 = vpop.eup %7026  ;;  %v4359_v13 = vmul.f32 0.0078125, %v9809_v23  ;;  %v11799_v23 = vld [vmem:[#allocation92_spill] sm:$0xff] }
 0x66d   :  { %11785 = vst [vmem:[#allocation151_spill] sm:$0xff] %v10128_v48  ;;  %v10167_v58 = vsub.f32 %v11799_v23, %v4362_v36  ;;  %v4457_v36 = vmul.f32 %v10152_v24, %v10152_v24  ;;  %v11808_v23 = vld [vmem:[#allocation167_spill] sm:$0xff] }
 0x66e   :  { %v10132_v17 = vpop.eup %7028  ;;  %4537 = vadd.xlane.f32.xlu1 %v4452_v46  ;;  %v11798_v46 = vld [vmem:[#allocation57_spill] sm:$0xff]  ;;  %v10172_v29 = vsub.f32 %v11802_v43, %v4359_v13  ;;  %v11818_v43 = vld [vmem:[#allocation72_spill] sm:$0xff] }
 0x66f   :  { %11786 = vst [vmem:[#allocation157_spill] sm:$0xff] %v10132_v17  ;;  %v3545_v15 = vpack.c.bf16 %v10132_v17, %v10128_v48  ;;  %11800 = vst [vmem:[#allocation41_spill] sm:$0xff] %v10167_v58  ;;  %v11805_v17 = vld [vmem:[#allocation179_spill] sm:$0xff]  ;;  %v11806_v48 = vld [vmem:[#allocation177_spill] sm:$0xff]  ;;  %v4458_v13 = vmul.f32 %v10167_v58, %v10167_v58 }
 0x670   :  { %4115 = vadd.xlane.f32.xlu0 %v4089_v1  ;;  %11803 = vst [vmem:[#allocation43_spill] sm:$0xff] %v10172_v29  ;;  %v11807_v45 = vpack.c.bf16 %v11805_v17, %v11806_v48  ;;  %v11813_v17 = vld [vmem:[#allocation183_spill] sm:$0xff] }
 0x671   :  { %6462 = vmatmul.mubr.msk.bf16.vlgmr.msra.gmra.mrb[120].mxu0 %vm3334_vm1, %v3545_v15  ;;  %v3355_v4 = vpop.xlane.xlu0 %3354  ;;  %v4360_v15 = vmul.f32 0.0078125, %v9816_v6  ;;  %v4364_v6 = vmul.f32 0.0078125, %v11808_v23  ;;  %v4365_v23 = vmul.f32 0.0078125, %v9862_v31 }
 0x672   :  { %6476 = vmatpush3.bf16.msra.mxu0 %v11797_v50  ;;  %v3389_v51 = vsub.f32 %v11798_v46, %v3355_v4  ;;  %4117 = vadd.xlane.f32.xlu1 %v4090_v30  ;;  %v11801_v4 = vld [vmem:[#allocation162_spill] sm:$0xff]  ;;  %v4363_v50 = vmul.f32 0.0078125, %v11804_v55  ;;  %v4060_v55 = vmul.f32 0.0078125, %v11818_v43 }
 0x673   :  { %v3358_v1 = vpop.xlane.xlu1 %3357  ;;  %6477 = vmatprep.subr.bf16.mxu0 %v11518_v47  ;;  %6481 = vmatprep.mubr.msk.bf16.mxu0 %vm7441_vm0, %v11518_v47 }
 0x674   :  { %v3411_v59 = vmul.f32 1.442695, %v3389_v51  ;;  %v3390_v30 = vsub.f32 %v11801_v4, %v3358_v1  ;;  %4539 = vadd.xlane.f32.xlu0 %v4453_v38  ;;  %v11809_v51 = vld [vmem:[#allocation89_spill] sm:$0xff] }
 0x675   :  { %v10183_v38 = vsub.f32 %v11809_v51, %v4360_v15  ;;  %v11811_v1 = vld [vmem:[#allocation93_spill] sm:$0xff]  ;;  %v11816_v15 = vld [vmem:[#allocation94_spill] sm:$0xff] }
 0x676   :  { %v3413_v46 = vmul.f32 1.442695, %v3390_v30  ;;  %6478 = vmatpush3.bf16.msra.mxu0 %v11807_v45  ;;  %4541 = vadd.xlane.f32.xlu1 %v4454_v22  ;;  %7030 = vpow2.f32 %v3411_v59  ;;  %v10188_v48 = vsub.f32 %v11811_v1, %v4363_v50  ;;  %v4059_v45 = vmul.f32 0.0078125, %v9831_v19  ;;  %v11814_v22 = vld [vmem:[#allocation181_spill] sm:$0xff]  ;;  %v11821_v51 = vld [vmem:[#allocation70_spill] sm:$0xff] }
 0x677   :  { %6479 = vmatprep.subr.bf16.mxu0 %v11518_v47  ;;  %11810 = vst [vmem:[#allocation44_spill] sm:$0xff] %v10183_v38  ;;  %v11815_v4 = vpack.c.bf16 %v11813_v17, %v11814_v22  ;;  %v4455_v59 = vmul.f32 %v10172_v29, %v10172_v29  ;;  %v10197_v30 = vsub.f32 %v11816_v15, %v4364_v6  ;;  %v11822_v22 = vld [vmem:[#allocation90_spill] sm:$0xff]  ;;  %v11881_v29 = vld [vmem:[#allocation105_spill] sm:$0xff] }
 0x678   :  { %7032 = vpow2.f32 %v3413_v46  ;;  %4547 = vadd.xlane.f32.xlu0 %v4457_v36  ;;  %11812 = vst [vmem:[#allocation38_spill] sm:$0xff] %v10188_v48  ;;  %v4456_v50 = vmul.f32 %v10183_v38, %v10183_v38  ;;  %v11819_v46 = vld [vmem:[#allocation85_spill] sm:$0xff]  ;;  %v4459_v6 = vmul.f32 %v10188_v48, %v10188_v48 }
 0x679   :  { %11817 = vst [vmem:[#allocation42_spill] sm:$0xff] %v10197_v30  ;;  %v10204_v36 = vsub.f32 %v11819_v46, %v4059_v45  ;;  %v4460_v17 = vmul.f32 %v10197_v30, %v10197_v30  ;;  %v11824_v45 = vld [vmem:[#allocation169_spill] sm:$0xff] }
 0x67a   :  { %6480 = vmatpush3.bf16.msra.mxu0 %v11815_v4  ;;  %4549 = vadd.xlane.f32.xlu1 %v4458_v13  ;;  %v10213_v4 = vsub.f32 %v11822_v22, %v4060_v55 }
 0x67b   :  { %6495 = vmatprep.subr.bf16.mxu0 %v11518_v47  ;;  %11820 = vst [vmem:[#allocation129_spill] sm:$0xff] %v10204_v36  ;;  %v4091_v55 = vmul.f32 %v10204_v36, %v10204_v36 }
 0x67c   :  { %4543 = vadd.xlane.f32.xlu0 %v4455_v59  ;;  %11823 = vst [vmem:[#allocation125_spill] sm:$0xff] %v10213_v4  ;;  %v4366_v59 = vmul.f32 0.0078125, %v9864_v28 }
 0x67d   :  { %v3361_v19 = vpop.xlane.xlu0 %3360 }
 0x67e   :  { %v3391_v13 = vsub.f32 %v11821_v51, %v3361_v19  ;;  %4545 = vadd.xlane.f32.xlu1 %v4456_v50  ;;  %v11827_v50 = vld [vmem:[#allocation97_spill] sm:$0xff]  ;;  %v4061_v51 = vmul.f32 0.0078125, %v9913_v32 }
 0x67f   :  { %v3364_v1 = vpop.xlane.xlu1 %3363  ;;  %v10222_v46 = vsub.f32 %v11827_v50, %v4365_v23  ;;  %v4092_v23 = vmul.f32 %v10213_v4, %v10213_v4 }
 0x680   :  { %v3415_v15 = vmul.f32 1.442695, %v3391_v13  ;;  %v3392_v43 = vsub.f32 %v11824_v45, %v3364_v1  ;;  %4551 = vadd.xlane.f32.xlu0 %v4459_v6  ;;  %v10217_v31 = vpop.eup %7030  ;;  %v11829_v13 = vld [vmem:[#allocation99_spill] sm:$0xff]  ;;  %v4062_v1 = vmul.f32 0.0078125, %v9916_v34  ;;  %v11834_v45 = vld [vmem:[#allocation185_spill] sm:$0xff] }
 0x681   :  { %11825 = vst [vmem:[#allocation45_spill] sm:$0xff] %v10217_v31  ;;  %11828 = vst [vmem:[#allocation133_spill] sm:$0xff] %v10222_v46  ;;  %v10230_v6 = vsub.f32 %v11829_v13, %v4366_v59  ;;  %v10235_v32 = vpop.xlane.xlu0 %4487  ;;  %v4461_v34 = vmul.f32 %v10222_v46, %v10222_v46  ;;  %v11836_v59 = vld [vmem:[#allocation100_spill] sm:$0xff]  ;;  %v11839_v13 = vld [vmem:[#allocation189_spill] sm:$0xff] }
 0x682   :  { %v10219_v19 = vpop.eup %7032  ;;  %v3417_v0 = vmul.f32 1.442695, %v3392_v43  ;;  %4553 = vadd.xlane.f32.xlu1 %v4460_v17  ;;  %7034 = vpow2.f32 %v3415_v15  ;;  %v11831_v17 = vld [vmem:[#allocation96_spill] sm:$0xff]  ;;  %v11833_v15 = vld [vmem:[#allocation187_spill] sm:$0xff]  ;;  %v10252_v50 = vsub.f32 %v11836_v59, %v4062_v1  ;;  %v11842_v59 = vld [vmem:[#allocation201_spill] sm:$0xff] }
 0x683   :  { %11826 = vst [vmem:[#allocation137_spill] sm:$0xff] %v10219_v19  ;;  %v3546_v28 = vpack.c.bf16 %v10219_v19, %v10217_v31  ;;  %11830 = vst [vmem:[#allocation46_spill] sm:$0xff] %v10230_v6  ;;  %v10239_v22 = vsub.f32 %v11831_v17, %v4061_v51  ;;  %v11835_v43 = vpack.c.bf16 %v11833_v15, %v11834_v45  ;;  %v11841_v17 = vld [vmem:[#allocation77_spill] sm:$0xff] }
 0x684   :  { %7036 = vpow2.f32 %v3417_v0  ;;  %4119 = vadd.xlane.f32.xlu0 %v4091_v55  ;;  %v10246_v0 = vpop.xlane.xlu1 %4489  ;;  %11837 = vst [vmem:[#allocation142_spill] sm:$0xff] %v10252_v50  ;;  %v4462_v51 = vmul.f32 %v10230_v6, %v10230_v6  ;;  %v4094_v19 = vmul.f32 %v10252_v50, %v10252_v50  ;;  %v11871_v50 = vld [vmem:[#allocation59_spill] sm:$0xff] }
 0x685   :  { %6472 = vmatmul.mubr.msk.bf16.vlgmr.msra.gmra.mrb[144].mxu1 %vm3334_vm1, %v3546_v28  ;;  %11832 = vst [vmem:[#allocation145_spill] sm:$0xff] %v10239_v22  ;;  %v11838_v28 = vld [vmem:[#allocation191_spill] sm:$0xff]  ;;  %v4093_v45 = vmul.f32 %v10239_v22, %v10239_v22 }
 0x686   :  { %6486 = vmatpush3.bf16.msra.mxu1 %v11835_v43  ;;  %4121 = vadd.xlane.f32.xlu1 %v4092_v23  ;;  %v11840_v23 = vpack.c.bf16 %v11838_v28, %v11839_v13 }
 0x687   :  { %6487 = vmatprep.subr.bf16.mxu1 %v11518_v47  ;;  %6491 = vmatprep.mubr.msk.bf16.mxu1 %vm7441_vm0, %v11518_v47 }
 0x688   :  { %4555 = vadd.xlane.f32.xlu0 %v4461_v34 }
 0x689   :  { %v3367_v55 = vpop.xlane.xlu0 %3366 }
 0x68a   :  { %6488 = vmatpush3.bf16.msra.mxu1 %v11840_v23  ;;  %v3393_v15 = vsub.f32 %v11841_v17, %v3367_v55  ;;  %4557 = vadd.xlane.f32.xlu1 %v4462_v51  ;;  %v11845_v55 = vld [vmem:[#allocation195_spill] sm:$0xff]  ;;  %v11846_v51 = vld [vmem:[#allocation193_spill] sm:$0xff] }
 0x68b   :  { %v3370_v43 = vpop.xlane.xlu1 %3369  ;;  %6489 = vmatprep.subr.bf16.mxu1 %v11518_v47  ;;  %v11847_v23 = vpack.c.bf16 %v11845_v55, %v11846_v51  ;;  %v11856_v55 = vld [vmem:[#allocation114_spill] sm:$0xff] }
 0x68c   :  { %v3419_v1 = vmul.f32 1.442695, %v3393_v15  ;;  %v3394_v34 = vsub.f32 %v11842_v59, %v3370_v43  ;;  %4123 = vadd.xlane.f32.xlu0 %v4093_v45  ;;  %v10266_v31 = vpop.eup %7034  ;;  %v11848_v15 = vld [vmem:[#allocation199_spill] sm:$0xff]  ;;  %v11849_v45 = vld [vmem:[#allocation197_spill] sm:$0xff]  ;;  %v11851_v59 = vld [vmem:[#allocation106_spill] sm:$0xff] }
 0x68d   :  { %11843 = vst [vmem:[#allocation53_spill] sm:$0xff] %v10266_v31  ;;  %v11850_v43 = vpack.c.bf16 %v11848_v15, %v11849_v45  ;;  %v11857_v51 = vld [vmem:[#allocation110_spill] sm:$0xff] }
 0x68e   :  { %v10268_v28 = vpop.eup %7036  ;;  %v3421_v13 = vmul.f32 1.442695, %v3394_v34  ;;  %6490 = vmatpush3.bf16.msra.mxu1 %v11847_v23  ;;  %4125 = vadd.xlane.f32.xlu1 %v4094_v19  ;;  %7038 = vpow2.f32 %v3419_v1  ;;  %v11852_v19 = vld [vmem:[#allocation102_spill] sm:$0xff]  ;;  %v11858_v23 = vpack.c.bf16 %v11856_v55, %v11857_v51  ;;  %v11865_v55 = vld [vmem:[#allocation49_spill] sm:$0xff] }
 0x68f   :  { %11844 = vst [vmem:[#allocation54_spill] sm:$0xff] %v10268_v28  ;;  %v3547_v17 = vpack.c.bf16 %v10268_v28, %v10266_v31  ;;  %6505 = vmatprep.subr.bf16.mxu1 %v11518_v47  ;;  %v11853_v1 = vpack.c.bf16 %v11851_v59, %v11852_v19  ;;  %v11859_v15 = vld [vmem:[#allocation122_spill] sm:$0xff]  ;;  %v4559_v51 = vmul.f32 0.0078125, %v11865_v55  ;;  %v11873_v55 = vld [vmem:[#allocation63_spill] sm:$0xff] }
 0x690   :  { %7040 = vpow2.f32 %v3421_v13  ;;  %v11860_v45 = vld [vmem:[#allocation118_spill] sm:$0xff]  ;;  %v4566_v22 = vmul.f32 0.0078125, %v11873_v55 }
 0x691   :  { %6482 = vmatmul.mubr.msk.bf16.vlgmr.msra.gmra.mrb[124].mxu0 %vm3334_vm1, %v3547_v17  ;;  %v11862_v59 = vld [vmem:[#allocation130_spill] sm:$0xff] }
 0x692   :  { %6496 = vmatpush3.bf16.msra.mxu0 %v11850_v43  ;;  %6501 = vmatprep.mubr.msk.bf16.mxu0 %vm7441_vm0, %v11518_v47  ;;  %v11861_v43 = vpack.c.bf16 %v11859_v15, %v11860_v45  ;;  %v11863_v19 = vld [vmem:[#allocation126_spill] sm:$0xff]  ;;  %v4607_v15 = vadd.f32 1e-05, %v4559_v51  ;;  %v4614_v30 = vadd.f32 1e-05, %v4566_v22 }
 0x693   :  { %6497 = vmatprep.subr.bf16.mxu0 %v11518_v47 }
 0x694   :  { %7042 = vrsqrt.f32 %v4607_v15 }
 0x696   :  { %6498 = vmatpush3.bf16.msra.mxu0 %v11853_v1  ;;  %v11864_v1 = vpack.c.bf16 %v11862_v59, %v11863_v19  ;;  %v4562_v59 = vmul.f32 0.0078125, %v11871_v50  ;;  %v11872_v19 = vld [vmem:[#allocation62_spill] sm:$0xff] }
 0x697   :  { %6499 = vmatprep.subr.bf16.mxu0 %v11518_v47 }
 0x698   :  { %v10287_v34 = vpop.eup %7038  ;;  %v4610_v4 = vadd.f32 1e-05, %v4562_v59 }
 0x699   :  { %11854 = vst [vmem:[#allocation19_spill] sm:$0xff] %v10287_v34 }
 0x69a   :  { %v10289_v13 = vpop.eup %7040  ;;  %6500 = vmatpush3.bf16.msra.mxu0 %v11858_v23  ;;  %v11866_v23 = vld [vmem:[#allocation52_spill] sm:$0xff] }
 0x69b   :  { %11855 = vst [vmem:[#allocation48_spill] sm:$0xff] %v10289_v13  ;;  %v3548_v17 = vpack.c.bf16 %v10289_v13, %v10287_v34  ;;  %6515 = vmatprep.subr.bf16.mxu0 %v11518_v47  ;;  %v4560_v13 = vmul.f32 0.0078125, %v11866_v23  ;;  %v11868_v34 = vld [vmem:[#allocation134_spill] sm:$0xff]  ;;  %v11874_v23 = vld [vmem:[#allocation73_spill] sm:$0xff] }
 0x69c   :  { %v4563_v46 = vmul.f32 0.0078125, %v11874_v23 }
 0x69d   :  { %6492 = vmatmul.mubr.msk.bf16.vlgmr.msra.gmra.mrb[148].mxu1 %vm3334_vm1, %v3548_v17  ;;  %v11867_v17 = vld [vmem:[#allocation138_spill] sm:$0xff]  ;;  %v4608_v45 = vadd.f32 1e-05, %v4560_v13  ;;  %v4100_v13 = vpop.xlane.xlu0 %4099 }
 0x69e   :  { %6506 = vmatpush3.bf16.msra.mxu1 %v11861_v43  ;;  %6511 = vmatprep.mubr.msk.bf16.mxu1 %vm7441_vm0, %v11518_v47  ;;  %v11869_v28 = vpack.c.bf16 %v11867_v17, %v11868_v34  ;;  %v11870_v43 = vld [vmem:[#allocation160_spill] sm:$0xff]  ;;  %v11875_v34 = vld [vmem:[#allocation202_spill] sm:$0xff]  ;;  %v4611_v50 = vadd.f32 1e-05, %v4563_v46  ;;  %v7043_v59 = vpop.eup %7042 }
 0x69f   :  { %6507 = vmatprep.subr.bf16.mxu1 %v11518_v47  ;;  %v4561_v31 = vmul.f32 0.0078125, %v11870_v43  ;;  %7044 = vrsqrt.f32 %v4608_v45  ;;  %v11876_v17 = vld [vmem:[#allocation68_spill] sm:$0xff]  ;;  %v11877_v43 = vld [vmem:[#allocation143_spill] sm:$0xff]  ;;  %v4102_v45 = vpop.xlane.xlu1 %4101 }
 0x6a0   :  { %v4567_v36 = vmul.f32 0.0078125, %v11876_v17  ;;  %v4127_v15 = vmul.f32 0.0078125, %v11877_v43  ;;  %v11880_v43 = vld [vmem:[#allocation203_spill] sm:$0xff] }
 0x6a1   :  { %v4609_v6 = vadd.f32 1e-05, %v4561_v31  ;;  %v11878_v31 = vld [vmem:[#allocation101_spill] sm:$0xff] }
 0x6a2   :  { %6508 = vmatpush3.bf16.msra.mxu1 %v11864_v1  ;;  %v4565_v1 = vmul.f32 0.0078125, %v11872_v19  ;;  %v4615_v55 = vadd.f32 1e-05, %v4567_v36  ;;  %v4128_v48 = vmul.f32 0.0078125, %v11878_v31  ;;  %v11882_v36 = vld [vmem:[#allocation88_spill] sm:$0xff]  ;;  %v4569_v31 = vmul.f32 0.0078125, %v10130_v53 }
 0x6a3   :  { %6509 = vmatprep.subr.bf16.mxu1 %v11518_v47  ;;  %7046 = vrsqrt.f32 %v4609_v6  ;;  %v4568_v6 = vmul.f32 0.0078125, %v11880_v43  ;;  %v10335_v53 = vld [vmem:[%s11057_s11] ss:$0 sm:$0xff] }
 0x6a4   :  { %v4613_v51 = vadd.f32 1e-05, %v4565_v1  ;;  %7048 = vrsqrt.f32 %v4610_v4  ;;  %v11879_v1 = vld [vmem:[#allocation207_spill] sm:$0xff] }
 0x6a6   :  { %6510 = vmatpush3.bf16.msra.mxu1 %v11869_v28  ;;  %v4564_v28 = vmul.f32 0.0078125, %v11875_v34  ;;  %7050 = vrsqrt.f32 %v4613_v51  ;;  %v4143_v34 = vadd.f32 1e-05, %v4127_v15  ;;  %v4703_v51 = vmul.f32 %v7043_v59, %v11882_v36  ;;  %v11883_v15 = vld [vmem:[#allocation25_spill] sm:$0xff] }
 0x6a7   :  { %6525 = vmatprep.subr.bf16.mxu1 %v11518_v47  ;;  %7052 = vrsqrt.f32 %v4614_v30  ;;  %v4129_v59 = vmul.f32 0.0078125, %v4100_v13 }
 0x6a8   :  { %v4612_v19 = vadd.f32 1e-05, %v4564_v28  ;;  %7054 = vrsqrt.f32 %v4611_v50  ;;  %v4144_v28 = vadd.f32 1e-05, %v4128_v48  ;;  %v4616_v50 = vadd.f32 1e-05, %v4568_v6 }
 0x6a9   :  { %v7045_v17 = vpop.eup %7044 }
 0x6aa   :  { %7056 = vrsqrt.f32 %v4612_v19  ;;  %v4704_v58 = vmul.f32 %v7045_v17, %v11883_v15  ;;  %v4571_v19 = vmul.f32 0.0078125, %v10235_v32  ;;  %v11884_v15 = vld [vmem:[#allocation32_spill] sm:$0xff] }
 0x6ab   :  { %7058 = vrsqrt.f32 %v4615_v55  ;;  %v4617_v55 = vadd.f32 1e-05, %v4569_v31  ;;  %v10342_v31 = vld [vmem:[%s11058_s12] ss:$0 sm:$0xff] }
 0x6ac   :  { %7060 = vrsqrt.f32 %v4143_v34  ;;  %v4619_v6 = vadd.f32 1e-05, %v4571_v19 }
 0x6b4   :  { %v3373_v23 = vpop.xlane.xlu0 %3372 }
 0x6b5   :  { %v3395_v38 = vsub.f32 %v11879_v1, %v3373_v23  ;;  %v4570_v23 = vmul.f32 0.0078125, %v10143_v2  ;;  %v4751_v2 = vmul.f32 %v10335_v53, %v4703_v51  ;;  %v4752_v1 = vmul.f32 %v10335_v53, %v4704_v58 }
 0x6b6   :  { %v3376_v22 = vpop.xlane.xlu1 %3375 }
 0x6b7   :  { %v3423_v46 = vmul.f32 1.442695, %v3395_v38  ;;  %v3396_v4 = vsub.f32 %v11881_v29, %v3376_v22  ;;  %v7047_v38 = vpop.eup %7046  ;;  %v4572_v29 = vmul.f32 0.0078125, %v10246_v0  ;;  %v4618_v32 = vadd.f32 1e-05, %v4570_v23 }
 0x6b8   :  { %v7049_v48 = vpop.eup %7048  ;;  %v4492_v34 = vpop.xlane.xlu0 %4491  ;;  %v4130_v22 = vmul.f32 0.0078125, %v4102_v45  ;;  %v4799_v58 = vadd.f32 %v10342_v31, %v4751_v2  ;;  %v4800_v51 = vadd.f32 %v10342_v31, %v4752_v1 }
 0x6b9   :  { %v3425_v30 = vmul.f32 1.442695, %v3396_v4  ;;  %7062 = vpow2.f32 %v3423_v46  ;;  %v7051_v17 = vpop.eup %7050  ;;  %v4620_v4 = vadd.f32 1e-05, %v4572_v29 }
 0x6ba   :  { %v7053_v43 = vpop.eup %7052  ;;  %v4494_v0 = vpop.xlane.xlu1 %4493  ;;  %v4709_v20 = vmul.f32 %v7051_v17, %v11887_v63 }
 0x6bb   :  { %7064 = vpow2.f32 %v3425_v30  ;;  %v7055_v46 = vpop.eup %7054  ;;  %v4146_v30 = vadd.f32 1e-05, %v4130_v22  ;;  %v4710_v26 = vmul.f32 %v7053_v43, %v11888_v37  ;;  %v4574_v63 = vmul.f32 0.0078125, %v4494_v0 }
 0x6bc   :  { %7066 = vrsqrt.f32 %v4144_v28  ;;  %v7057_v13 = vpop.eup %7056  ;;  %v4145_v28 = vadd.f32 1e-05, %v4129_v59  ;;  %v11886_v59 = vld [vmem:[#allocation28_spill] sm:$0xff] }
 0x6bd   :  { %7068 = vrsqrt.f32 %v4616_v50  ;;  %v7059_v45 = vpop.eup %7058  ;;  %v11885_v50 = vld [vmem:[#allocation141_spill] sm:$0xff]  ;;  %v4706_v24 = vmul.f32 %v7049_v48, %v11886_v59 }
 0x6be   :  { %7070 = vrsqrt.f32 %v4617_v55  ;;  %v4705_v19 = vmul.f32 %v7047_v38, %v11885_v50  ;;  %v7061_v29 = vpop.eup %7060  ;;  %v4573_v38 = vmul.f32 0.0078125, %v4492_v34  ;;  %v11892_v50 = vld [vmem:[#allocation95_spill] sm:$0xff]  ;;  %v4757_v34 = vmul.f32 %v10335_v53, %v4709_v20 }
 0x6bf   :  { %7072 = vrsqrt.f32 %v4618_v32  ;;  %v11890_v32 = vld [vmem:[#allocation98_spill] sm:$0xff]  ;;  %v4707_v48 = vmul.f32 %v7055_v46, %v11892_v50 }
 0x6c0   :  { %7074 = vrsqrt.f32 %v4619_v6  ;;  %v4708_v22 = vmul.f32 %v7057_v13, %v11890_v32  ;;  %v4758_v13 = vmul.f32 %v10335_v53, %v4710_v26  ;;  %v4622_v26 = vadd.f32 1e-05, %v4574_v63 }
 0x6c1   :  { %v3379_v36 = vpop.xlane.xlu0 %3378  ;;  %7076 = vrsqrt.f32 %v4620_v4  ;;  %v4754_v4 = vmul.f32 %v10335_v53, %v4706_v24  ;;  %v4755_v20 = vmul.f32 %v10335_v53, %v4707_v48 }
 0x6c2   :  { %v3397_v23 = vsub.f32 %v11884_v15, %v3379_v36  ;;  %7078 = vrsqrt.f32 %v4145_v28  ;;  %v4871_v15 = vpack.c.bf16 %v4800_v51, %v4799_v58  ;;  %v4756_v46 = vmul.f32 %v10335_v53, %v4708_v22  ;;  %v11893_v28 = vld [vmem:[#allocation40_spill] sm:$0xff]  ;;  %v11894_v51 = vld [vmem:[#allocation22_spill] sm:$0xff] }
 0x6c3   :  { %v3382_v55 = vpop.xlane.xlu1 %3381  ;;  %v10351_v52 = vpop.eup %7062  ;;  %7080 = vrsqrt.f32 %v4146_v30  ;;  %v4175_v58 = vmul.f32 %v7061_v29, %v11893_v28 }
 0x6c4   :  { %11889 = vst [vmem:[#allocation51_spill] sm:$0xff] %v10351_v52  ;;  %v3427_v2 = vmul.f32 1.442695, %v3397_v23  ;;  %v3398_v1 = vsub.f32 %v9933_v60, %v3382_v55  ;;  %v4753_v60 = vmul.f32 %v10335_v53, %v4705_v19  ;;  %v4621_v23 = vadd.f32 1e-05, %v4573_v38  ;;  %v11895_v19 = vld [vmem:[#allocation20_spill] sm:$0xff] }
 0x6c5   :  { %v10355_v36 = vpop.eup %7064  ;;  %v4500_v6 = vpop.xlane.xlu0 %4499  ;;  %v4802_v38 = vadd.f32 %v10342_v31, %v4754_v4  ;;  %v10378_v63 = vadd.f32 %v10342_v31, %v4756_v46 }
 0x6c6   :  { %11891 = vst [vmem:[#allocation58_spill] sm:$0xff] %v10355_v36  ;;  %v7067_v59 = vpop.eup %7066  ;;  %v3429_v37 = vmul.f32 1.442695, %v3398_v1  ;;  %v3549_v17 = vpack.c.bf16 %v10355_v36, %v10351_v52  ;;  %7082 = vpow2.f32 %v3427_v2  ;;  %v4711_v2 = vmul.f32 %v7059_v45, %v11895_v19 }
 0x6c7   :  { %v4502_v43 = vpop.xlane.xlu1 %4501  ;;  %v7069_v0 = vpop.eup %7068  ;;  %v4176_v30 = vmul.f32 %v7067_v59, %v11894_v51  ;;  %v4577_v32 = vmul.f32 0.0078125, %v4500_v6  ;;  %v4801_v29 = vadd.f32 %v10342_v31, %v4753_v60  ;;  %v4805_v59 = vadd.f32 %v10342_v31, %v4757_v34  ;;  %v10385_v60 = vld [vmem:[%s11055_s9] ss:$0 sm:$0xff] }
 0x6c8   :  { %7084 = vpow2.f32 %v3429_v37  ;;  %6502 = vmatmul.mubr.msk.bf16.vlgmr.msra.gmra.mrb[128].mxu0 %vm3334_vm1, %v3549_v17  ;;  %v4578_v24 = vmul.f32 0.0078125, %v4502_v43  ;;  %v7071_v1 = vpop.eup %7070  ;;  %v11896_v37 = vld [vmem:[#allocation21_spill] sm:$0xff]  ;;  %v4759_v6 = vmul.f32 %v10335_v53, %v4711_v2  ;;  %v4191_v4 = vmul.f32 %v10385_v60, %v4175_v58 }
 0x6c9   :  { %6516 = vmatpush3.bf16.xpose.msra.mxu0 %v4871_v15  ;;  %v4496_v55 = vpop.xlane.xlu0 %4495  ;;  %6521 = vmatprep.mubr.msk.bf16.mxu0 %vm7441_vm0, %v11518_v47  ;;  %v4806_v15 = vadd.f32 %v10342_v31, %v4758_v13  ;;  %v7073_v50 = vpop.eup %7072  ;;  %v4712_v17 = vmul.f32 %v7069_v0, %v11896_v37  ;;  %7086 = vrsqrt.f32 %v4621_v23  ;;  %v4192_v13 = vmul.f32 %v10385_v60, %v4176_v30 }
 0x6ca   :  { %6517 = vmatprep.subr.bf16.mxu0 %v11518_v47  ;;  %v7075_v43 = vpop.eup %7074  ;;  %7088 = vrsqrt.f32 %v4622_v26  ;;  %v4626_v46 = vadd.f32 1e-05, %v4578_v24  ;;  %v4575_v28 = vmul.f32 0.0078125, %v4496_v55  ;;  %v4803_v0 = vadd.f32 %v10342_v31, %v4755_v20  ;;  %v10400_v26 = vld [vmem:[%s11056_s10] ss:$0 sm:$0xff] }
 0x6cb   :  { %v4498_v22 = vpop.xlane.xlu1 %4497  ;;  %v7077_v34 = vpop.eup %7076  ;;  %v4625_v23 = vadd.f32 1e-05, %v4577_v32  ;;  %v4874_v2 = vpack.c.bf16 %v4806_v15, %v4805_v59  ;;  %v4760_v58 = vmul.f32 %v10335_v53, %v4712_v17  ;;  %v10395_v55 = vadd.f32 %v10342_v31, %v4759_v6  ;;  %v11898_v32 = vld [vmem:[#allocation66_spill] sm:$0xff] }
 0x6cc   :  { %v4576_v45 = vmul.f32 0.0078125, %v4498_v22  ;;  %v7079_v51 = vpop.eup %7078  ;;  %v4872_v22 = vpack.c.bf16 %v4802_v38, %v4801_v29  ;;  %v4873_v35 = vpack.c.bf16 %v10378_v63, %v4803_v0  ;;  %v4207_v24 = vadd.f32 %v10400_v26, %v4191_v4  ;;  %v11900_v0 = vld [vmem:[#allocation69_spill] sm:$0xff] }
 0x6cd   :  { %v4504_v48 = vpop.xlane.xlu0 %4503  ;;  %v7081_v37 = vpop.eup %7080  ;;  %v4208_v20 = vadd.f32 %v10400_v26, %v4192_v13  ;;  %v4716_v29 = vmul.f32 %v7077_v34, %v11898_v32  ;;  %7090 = vrsqrt.f32 %v4626_v46  ;;  %v4623_v15 = vadd.f32 1e-05, %v4575_v28  ;;  %v11903_v46 = vld [vmem:[#allocation64_spill] sm:$0xff] }
 0x6ce   :  { %v4624_v36 = vadd.f32 1e-05, %v4576_v45  ;;  %v4579_v45 = vmul.f32 0.0078125, %v4504_v48  ;;  %7092 = vrsqrt.f32 %v4625_v23  ;;  %v4715_v4 = vmul.f32 %v7075_v43, %v11900_v0  ;;  %v11904_v48 = vld [vmem:[#allocation74_spill] sm:$0xff] }
 0x6cf   :  { %v4506_v19 = vpop.xlane.xlu1 %4505  ;;  %v4177_v28 = vmul.f32 %v7079_v51, %v11903_v46  ;;  %v4764_v23 = vmul.f32 %v10335_v53, %v4716_v29  ;;  %v4847_v43 = vmul.f32 0.088388346, %v4207_v24  ;;  %v4848_v51 = vmul.f32 0.088388346, %v4208_v20 }
 0x6d0   :  { %v4580_v52 = vmul.f32 0.0078125, %v4506_v19  ;;  %v10392_v8 = vpop.eup %7082  ;;  %7094 = vrsqrt.f32 %v4624_v36  ;;  %v11901_v19 = vld [vmem:[#allocation24_spill] sm:$0xff]  ;;  %v4808_v36 = vadd.f32 %v10342_v31, %v4760_v58 }
 0x6d1   :  { %11897 = vst [vmem:[#allocation60_spill] sm:$0xff] %v10392_v8  ;;  %6518 = vmatpush3.bf16.xpose.msra.mxu0 %v4872_v22  ;;  %v4104_v30 = vpop.xlane.xlu0 %4103  ;;  %v4713_v34 = vmul.f32 %v7071_v1, %v11901_v19  ;;  %v11902_v22 = vld [vmem:[#allocation27_spill] sm:$0xff]  ;;  %7096 = vrsqrt.f32 %v4623_v15  ;;  %v4863_v46 = vpack.c.bf16 %v4848_v51, %v4847_v43 }
 0x6d2   :  { %v10405_v38 = vpop.eup %7084  ;;  %v4131_v59 = vmul.f32 0.0078125, %v4104_v30  ;;  %6519 = vmatprep.subr.bf16.mxu0 %v11518_v47  ;;  %v4628_v63 = vadd.f32 1e-05, %v4580_v52  ;;  %v4714_v32 = vmul.f32 %v7073_v50, %v11902_v22  ;;  %v4178_v30 = vmul.f32 %v7081_v37, %v11904_v48 }
 0x6d3   :  { %11899 = vst [vmem:[#allocation159_spill] sm:$0xff] %v10405_v38  ;;  %v4106_v17 = vpop.xlane.xlu1 %4105  ;;  %v3550_v6 = vpack.c.bf16 %v10405_v38, %v10392_v8  ;;  %v4627_v38 = vadd.f32 1e-05, %v4579_v45  ;;  %v7087_v1 = vpop.eup %7086  ;;  %v4763_v37 = vmul.f32 %v10335_v53, %v4715_v4  ;;  %v4761_v15 = vmul.f32 %v10335_v53, %v4713_v34  ;;  %v11906_v4 = vld [vmem:[#allocation206_spill] sm:$0xff] }
 0x6d4   :  { %v4132_v13 = vmul.f32 0.0078125, %v4106_v17  ;;  %v4147_v56 = vadd.f32 1e-05, %v4131_v59  ;;  %7098 = vrsqrt.f32 %v4628_v63  ;;  %v7089_v59 = vpop.eup %7088  ;;  %v4812_v45 = vadd.f32 %v10342_v31, %v4764_v23 }
 0x6d5   :  { %6512 = vmatmul.mubr.msk.bf16.vlgmr.msra.gmra.mrb[152].mxu1 %vm3334_vm1, %v3550_v6  ;;  %v4508_v52 = vpop.xlane.xlu0 %4507  ;;  %v4193_v63 = vmul.f32 %v10385_v60, %v4177_v28  ;;  %v4194_v17 = vmul.f32 %v10385_v60, %v4178_v30 }
 0x6d6   :  { %v4148_v8 = vadd.f32 1e-05, %v4132_v13  ;;  %6526 = vmatpush3.bf16.xpose.msra.mxu1 %v4874_v2  ;;  %6531 = vmatprep.mubr.msk.bf16.mxu1 %vm7441_vm0, %v11518_v47  ;;  %v4762_v2 = vmul.f32 %v10335_v53, %v4714_v32  ;;  %v4581_v24 = vmul.f32 0.0078125, %v4508_v52  ;;  %v4718_v13 = vmul.f32 %v7089_v59, %v11906_v4 }
 0x6d7   :  { %v4510_v50 = vpop.xlane.xlu1 %4509  ;;  %6527 = vmatprep.subr.bf16.mxu1 %v11518_v47  ;;  %v7091_v34 = vpop.eup %7090  ;;  %v4209_v23 = vadd.f32 %v10400_v26, %v4193_v63 }
 0x6d8   :  { %7100 = vrsqrt.f32 %v4148_v8  ;;  %v4582_v29 = vmul.f32 0.0078125, %v4510_v50  ;;  %v11905_v8 = vld [vmem:[#allocation23_spill] sm:$0xff]  ;;  %v7093_v28 = vpop.eup %7092  ;;  %v4810_v52 = vadd.f32 %v10342_v31, %v4762_v2  ;;  %v4629_v59 = vadd.f32 1e-05, %v4581_v24 }
 0x6d9   :  { %7102 = vrsqrt.f32 %v4147_v56  ;;  %6520 = vmatpush3.bf16.xpose.msra.mxu0 %v4873_v35  ;;  %v4512_v58 = vpop.xlane.xlu0 %4511  ;;  %v4717_v0 = vmul.f32 %v7087_v1, %v11905_v8  ;;  %v4875_v56 = vpack.c.bf16 %v4808_v36, %v10395_v55  ;;  %v4811_v35 = vadd.f32 %v10342_v31, %v4763_v37 }
 0x6da   :  { %7104 = vrsqrt.f32 %v4627_v38  ;;  %v4630_v20 = vadd.f32 1e-05, %v4582_v29  ;;  %v4583_v6 = vmul.f32 0.0078125, %v4512_v58  ;;  %6535 = vmatprep.subr.bf16.mxu0 %v11518_v47  ;;  %v4809_v38 = vadd.f32 %v10342_v31, %v4761_v15  ;;  %v7095_v50 = vpop.eup %7094 }
 0x6db   :  { %v4514_v19 = vpop.xlane.xlu1 %4513  ;;  %v4877_v30 = vpack.c.bf16 %v4812_v45, %v4811_v35  ;;  %v4210_v1 = vadd.f32 %v10400_v26, %v4194_v17  ;;  %v4722_v37 = vmul.f32 %v7091_v34, %v9929_v27  ;;  %v4765_v51 = vmul.f32 %v10335_v53, %v4717_v0  ;;  %v7097_v15 = vpop.eup %7096 }
 0x6dc   :  { %v4631_v22 = vadd.f32 1e-05, %v4583_v6  ;;  %v4584_v32 = vmul.f32 0.0078125, %v4514_v19  ;;  %7106 = vrsqrt.f32 %v4630_v20  ;;  %v4766_v29 = vmul.f32 %v10335_v53, %v4718_v13 }
 0x6dd   :  { %v4108_v48 = vpop.xlane.xlu0 %4107  ;;  %v4721_v2 = vmul.f32 %v7093_v28, %v9920_v5  ;;  %v4720_v63 = vmul.f32 %v7095_v50, %v9944_v25  ;;  %v4876_v27 = vpack.c.bf16 %v4810_v52, %v4809_v38  ;;  %v10442_v24 = vmul.f32 0.088388346, %v4209_v23 }
 0x6de   :  { %v4632_v55 = vadd.f32 1e-05, %v4584_v32  ;;  %6528 = vmatpush3.bf16.xpose.msra.mxu1 %v4875_v56  ;;  %v4133_v36 = vmul.f32 0.0078125, %v4108_v48  ;;  %7108 = vrsqrt.f32 %v4631_v22  ;;  %v7099_v45 = vpop.eup %7098  ;;  %v4813_v13 = vadd.f32 %v10342_v31, %v4765_v51 }
 0x6df   :  { %v4110_v43 = vpop.xlane.xlu1 %4109  ;;  %6529 = vmatprep.subr.bf16.mxu1 %v11518_v47  ;;  %v4814_v25 = vadd.f32 %v10342_v31, %v4766_v29  ;;  %v4850_v19 = vmul.f32 0.088388346, %v4210_v1  ;;  %v4770_v56 = vmul.f32 %v10335_v53, %v4722_v37  ;;  %v4719_v34 = vmul.f32 %v7097_v15, %v9938_v9 }
 0x6e0   :  { %7110 = vrsqrt.f32 %v4632_v55  ;;  %v4134_v58 = vmul.f32 0.0078125, %v4110_v43  ;;  %6522 = vmatmul.mubr.bf16.vlgmr.msra.gmra.mrb[132].mxu0 %v4863_v46  ;;  %v4149_v6 = vadd.f32 1e-05, %v4133_v36  ;;  %v4769_v46 = vmul.f32 %v10335_v53, %v4721_v2 }
 0x6e1   :  { %6536 = vmatpush3.bf16.xpose.msra.mxu0 %v4877_v30  ;;  %v4516_v17 = vpop.xlane.xlu0 %4515  ;;  %7112 = vrsqrt.f32 %v4629_v59  ;;  %6541 = vmatprep.mubr.msk.bf16.mxu0 %vm7441_vm0, %v11518_v47  ;;  %v4724_v38 = vmul.f32 %v7099_v45, %v9956_v44  ;;  %v4768_v30 = vmul.f32 %v10335_v53, %v4720_v63  ;;  %v4878_v59 = vpack.c.bf16 %v4814_v25, %v4813_v13 }
 0x6e2   :  { %v7101_v20 = vpop.eup %7100  ;;  %v4150_v8 = vadd.f32 1e-05, %v4134_v58  ;;  %v4585_v0 = vmul.f32 0.0078125, %v4516_v17  ;;  %6537 = vmatprep.subr.bf16.mxu0 %v11518_v47  ;;  %v4818_v44 = vadd.f32 %v10342_v31, %v4770_v56  ;;  %v4767_v37 = vmul.f32 %v10335_v53, %v4719_v34 }
 0x6e3   :  { %v7103_v5 = vpop.eup %7102  ;;  %v4518_v4 = vpop.xlane.xlu1 %4517  ;;  %v4180_v28 = vmul.f32 %v7101_v20, %v9968_v10  ;;  %v4864_v51 = vpack.c.bf16 %v4850_v19, %v10442_v24  ;;  %v4772_v29 = vmul.f32 %v10335_v53, %v4724_v38  ;;  %v4816_v63 = vadd.f32 %v10342_v31, %v4768_v30 }
 0x6e4   :  { %v7105_v35 = vpop.eup %7104  ;;  %v4633_v22 = vadd.f32 1e-05, %v4585_v0  ;;  %v4586_v32 = vmul.f32 0.0078125, %v4518_v4  ;;  %7114 = vrsqrt.f32 %v4150_v8  ;;  %v4179_v52 = vmul.f32 %v7103_v5, %v9962_v14 }
 0x6e5   :  { %v4524_v48 = vpop.xlane.xlu0 %4523  ;;  %7116 = vrsqrt.f32 %v4149_v6  ;;  %v4723_v9 = vmul.f32 %v7105_v35, %v9950_v3  ;;  %v4817_v3 = vadd.f32 %v10342_v31, %v4769_v46  ;;  %v4196_v15 = vmul.f32 %v10385_v60, %v4180_v28 }
 0x6e6   :  { %v4634_v23 = vadd.f32 1e-05, %v4586_v32  ;;  %6530 = vmatpush3.bf16.xpose.msra.mxu1 %v4876_v27  ;;  %v4589_v1 = vmul.f32 0.0078125, %v4524_v48  ;;  %7118 = vrsqrt.f32 %v4633_v22  ;;  %v7107_v10 = vpop.eup %7106  ;;  %v4195_v17 = vmul.f32 %v10385_v60, %v4179_v52 }
 0x6e7   :  { %v4526_v50 = vpop.xlane.xlu1 %4525  ;;  %6545 = vmatprep.subr.bf16.mxu1 %v11518_v47  ;;  %v4880_v24 = vpack.c.bf16 %v4818_v44, %v4817_v3  ;;  %v4771_v6 = vmul.f32 %v10335_v53, %v4723_v9  ;;  %v4815_v4 = vadd.f32 %v10342_v31, %v4767_v37  ;;  %v4726_v13 = vmul.f32 %v7107_v10, %v9986_v40 }
 0x6e8   :  { %7120 = vrsqrt.f32 %v4634_v23  ;;  %v4637_v55 = vadd.f32 1e-05, %v4589_v1  ;;  %v4590_v36 = vmul.f32 0.0078125, %v4526_v50  ;;  %v7109_v14 = vpop.eup %7108  ;;  %v4820_v56 = vadd.f32 %v10342_v31, %v4772_v29 }
 0x6e9   :  { %6538 = vmatpush3.bf16.xpose.msra.mxu0 %v4878_v59  ;;  %v4520_v43 = vpop.xlane.xlu0 %4519  ;;  %v4727_v25 = vmul.f32 %v7109_v14, %v9993_v7  ;;  %v4879_v22 = vpack.c.bf16 %v4816_v63, %v4815_v4  ;;  %v4211_v32 = vadd.f32 %v10400_v26, %v4195_v17  ;;  %v4819_v38 = vadd.f32 %v10342_v31, %v4771_v6 }
 0x6ea   :  { %v7111_v2 = vpop.eup %7110  ;;  %v4638_v58 = vadd.f32 1e-05, %v4590_v36  ;;  %v4587_v45 = vmul.f32 0.0078125, %v4520_v43  ;;  %6539 = vmatprep.subr.bf16.mxu0 %v11518_v47  ;;  %7122 = vrsqrt.f32 %v4637_v55 }
 0x6eb   :  { %v4728_v27 = vmul.f32 %v7111_v2, %v10005_v18  ;;  %v4522_v20 = vpop.xlane.xlu1 %4521  ;;  %v7113_v8 = vpop.eup %7112  ;;  %v4212_v18 = vadd.f32 %v10400_v26, %v4196_v15  ;;  %v4881_v9 = vpack.c.bf16 %v4820_v56, %v4819_v38  ;;  %v4775_v59 = vmul.f32 %v10335_v53, %v4727_v25 }
 0x6ec   :  { %7124 = vrsqrt.f32 %v4638_v58  ;;  %v4635_v0 = vadd.f32 1e-05, %v4587_v45  ;;  %v4588_v5 = vmul.f32 0.0078125, %v4522_v20  ;;  %v4725_v40 = vmul.f32 %v7113_v8, %v9978_v41 }
 0x6ed   :  { %6532 = vmatmul.mubr.bf16.vlgmr.msra.gmra.mrb[156].mxu1 %v4864_v51  ;;  %v4528_v19 = vpop.xlane.xlu0 %4527  ;;  %v4776_v28 = vmul.f32 %v10335_v53, %v4728_v27  ;;  %v4852_v50 = vmul.f32 0.088388346, %v4212_v18  ;;  %v4774_v41 = vmul.f32 %v10335_v53, %v4726_v13  ;;  %v4851_v37 = vmul.f32 0.088388346, %v4211_v32 }
 0x6ee   :  { %v4636_v35 = vadd.f32 1e-05, %v4588_v5  ;;  %6546 = vmatpush3.bf16.xpose.msra.mxu1 %v4880_v24  ;;  %v4591_v34 = vmul.f32 0.0078125, %v4528_v19  ;;  %6551 = vmatprep.mubr.msk.bf16.mxu1 %vm7441_vm0, %v11518_v47  ;;  %v7115_v46 = vpop.eup %7114  ;;  %7126 = vrsqrt.f32 %v4635_v0  ;;  %v4773_v3 = vmul.f32 %v10335_v53, %v4725_v40 }
 0x6ef   :  { %v4530_v7 = vpop.xlane.xlu1 %4529  ;;  %6547 = vmatprep.subr.bf16.mxu1 %v11518_v47  ;;  %v7117_v48 = vpop.eup %7116  ;;  %v4182_v10 = vmul.f32 %v7115_v46, %v10021_v39  ;;  %v4824_v51 = vadd.f32 %v10342_v31, %v4776_v28  ;;  %v4865_v27 = vpack.c.bf16 %v4852_v50, %v4851_v37  ;;  %v4822_v20 = vadd.f32 %v10342_v31, %v4774_v41 }
 0x6f0   :  { %7128 = vrsqrt.f32 %v4636_v35  ;;  %v4639_v30 = vadd.f32 1e-05, %v4591_v34  ;;  %v4592_v52 = vmul.f32 0.0078125, %v4530_v7  ;;  %v7119_v23 = vpop.eup %7118  ;;  %v4181_v29 = vmul.f32 %v7117_v48, %v10011_v62 }
 0x6f1   :  { %6540 = vmatpush3.bf16.xpose.msra.mxu0 %v4879_v22  ;;  %v4112_v1 = vpop.xlane.xlu0 %4111  ;;  %v4729_v45 = vmul.f32 %v7119_v23, %v10027_v12  ;;  %v4198_v0 = vmul.f32 %v10385_v60, %v4182_v10  ;;  %v4821_v25 = vadd.f32 %v10342_v31, %v4773_v3 }
 0x6f2   :  { %v7121_v44 = vpop.eup %7120  ;;  %v4640_v55 = vadd.f32 1e-05, %v4592_v52  ;;  %v4135_v36 = vmul.f32 0.0078125, %v4112_v1  ;;  %6555 = vmatprep.subr.bf16.mxu0 %v11518_v47  ;;  %7130 = vrsqrt.f32 %v4639_v30  ;;  %v4197_v35 = vmul.f32 %v10385_v60, %v4181_v29 }
 0x6f3   :  { %v4730_v14 = vmul.f32 %v7121_v44, %v10037_v54  ;;  %v4114_v43 = vpop.xlane.xlu1 %4113  ;;  %v4823_v54 = vadd.f32 %v10342_v31, %v4775_v59  ;;  %v4777_v32 = vmul.f32 %v10335_v53, %v4729_v45  ;;  %v4882_v38 = vpack.c.bf16 %v4822_v20, %v4821_v25 }
 0x6f4   :  { %7132 = vrsqrt.f32 %v4640_v55  ;;  %v4151_v15 = vadd.f32 1e-05, %v4135_v36  ;;  %v4136_v2 = vmul.f32 0.0078125, %v4114_v43  ;;  %v10489_v58 = vpop.f32.mrb[136].mxu1  ;;  %v7123_v39 = vpop.eup %7122  ;;  %v4214_v28 = vadd.f32 %v10400_v26, %v4198_v0 }
 0x6f5   :  { %v6443_v63 = vpop.f32.mrb[137].mxu1  ;;  %v4532_v17 = vpop.xlane.xlu0 %4531  ;;  %v4883_v13 = vpack.c.bf16 %v4824_v51, %v4823_v54  ;;  %v4778_v19 = vmul.f32 %v10335_v53, %v4730_v14  ;;  %v4733_v22 = vmul.f32 %v7123_v39, %v10043_v21  ;;  %v4825_v44 = vadd.f32 %v10342_v31, %v4777_v32 }
 0x6f6   :  { %v7125_v24 = vpop.eup %7124  ;;  %7134 = vrsqrt.f32 %v4151_v15  ;;  %v4152_v6 = vadd.f32 1e-05, %v4136_v2  ;;  %6548 = vmatpush3.bf16.xpose.msra.mxu1 %v4881_v9  ;;  %v4593_v62 = vmul.f32 0.0078125, %v4532_v17  ;;  %v10494_v8 = vpop.f32.mrb[138].mxu1  ;;  %v4213_v9 = vadd.f32 %v10400_v26, %v4197_v35 }
 0x6f7   :  { %v4734_v5 = vmul.f32 %v7125_v24, %v10049_v57  ;;  %v4534_v4 = vpop.xlane.xlu1 %4533  ;;  %v6444_v12 = vpop.f32.mrb[139].mxu1  ;;  %6549 = vmatprep.subr.bf16.mxu1 %v11518_v47  ;;  %v4826_v21 = vadd.f32 %v10342_v31, %v4778_v19  ;;  %v4781_v10 = vmul.f32 %v10335_v53, %v4733_v22  ;;  %v4854_v37 = vmul.f32 0.088388346, %v4214_v28 }
 0x6f8   :  { %7136 = vrsqrt.f32 %v4152_v6  ;;  %v4641_v56 = vadd.f32 1e-05, %v4593_v62  ;;  %v4594_v18 = vmul.f32 0.0078125, %v4534_v4  ;;  %6542 = vmatmul.mubr.bf16.vlgmr.msra.gmra.mrb[136].mxu0 %v4865_v27  ;;  %v7127_v34 = vpop.eup %7126  ;;  %v4853_v39 = vmul.f32 0.088388346, %v4213_v9 }
 0x6f9   :  { %6556 = vmatpush3.bf16.xpose.msra.mxu0 %v4883_v13  ;;  %v4536_v57 = vpop.xlane.xlu0 %4535  ;;  %6561 = vmatprep.mubr.msk.bf16.mxu0 %vm7441_vm0, %v11518_v47  ;;  %v4782_v52 = vmul.f32 %v10335_v53, %v4734_v5  ;;  %v4731_v59 = vmul.f32 %v7127_v34, %v10055_v11  ;;  %v4884_v51 = vpack.c.bf16 %v4826_v21, %v4825_v44 }
 0x6fa   :  { %v7129_v46 = vpop.eup %7128  ;;  %v4642_v40 = vadd.f32 1e-05, %v4594_v18  ;;  %v4595_v7 = vmul.f32 0.0078125, %v4536_v57  ;;  %6557 = vmatprep.subr.bf16.mxu0 %v11518_v47  ;;  %7138 = vrsqrt.f32 %v4641_v56  ;;  %v4866_v6 = vpack.c.bf16 %v4854_v37, %v4853_v39  ;;  %v11907_v57 = vld [vmem:[#allocation121_spill] sm:$0xff] }
 0x6fb   :  { %v4732_v48 = vmul.f32 %v7129_v46, %v10062_v49  ;;  %v4538_v30 = vpop.xlane.xlu1 %4537  ;;  %v4830_v3 = vadd.f32 %v10342_v31, %v4782_v52  ;;  %v4779_v27 = vmul.f32 %v10335_v53, %v4731_v59  ;;  %v11908_v52 = vld [vmem:[#allocation34_spill] sm:$0xff] }
 0x6fc   :  { %7140 = vrsqrt.f32 %v4642_v40  ;;  %v4643_v23 = vadd.f32 1e-05, %v4595_v7  ;;  %v4596_v1 = vmul.f32 0.0078125, %v4538_v30  ;;  %v7131_v50 = vpop.eup %7130 }
 0x6fd   :  { %v4116_v41 = vpop.xlane.xlu0 %4115  ;;  %v4780_v11 = vmul.f32 %v10335_v53, %v4732_v48  ;;  %v4735_v45 = vmul.f32 %v7131_v50, %v10067_v16  ;;  %v4827_v56 = vadd.f32 %v10342_v31, %v4779_v27 }
 0x6fe   :  { %v7133_v49 = vpop.eup %7132  ;;  %7142 = vrsqrt.f32 %v4643_v23  ;;  %v4644_v55 = vadd.f32 1e-05, %v4596_v1  ;;  %6550 = vmatpush3.bf16.xpose.msra.mxu1 %v4882_v38  ;;  %v4137_v36 = vmul.f32 0.0078125, %v4116_v41  ;;  %v11909_v1 = vld [vmem:[#allocation117_spill] sm:$0xff] }
 0x6ff   :  { %v4736_v14 = vmul.f32 %v7133_v49, %v10073_v61  ;;  %v4118_v43 = vpop.xlane.xlu1 %4117  ;;  %6565 = vmatprep.subr.bf16.mxu1 %v11518_v47  ;;  %v4829_v61 = vadd.f32 %v10342_v31, %v4781_v10  ;;  %v4828_v16 = vadd.f32 %v10342_v31, %v4780_v11  ;;  %v4783_v18 = vmul.f32 %v10335_v53, %v4735_v45 }
 0x700   :  { %v7135_v29 = vpop.eup %7134  ;;  %7144 = vrsqrt.f32 %v4644_v55  ;;  %v4153_v15 = vadd.f32 1e-05, %v4137_v36  ;;  %v4138_v2 = vmul.f32 0.0078125, %v4118_v43  ;;  %v11910_v55 = vld [vmem:[#allocation149_spill] sm:$0xff] }
 0x701   :  { %v4183_v63 = vmul.f32 %v7135_v29, %v10079_v33  ;;  %6558 = vmatpush3.bf16.xpose.msra.mxu0 %v4884_v51  ;;  %v4540_v17 = vpop.xlane.xlu0 %4539  ;;  %v4886_v5 = vpack.c.bf16 %v4830_v3, %v4829_v61  ;;  %v4784_v33 = vmul.f32 %v10335_v53, %v4736_v14  ;;  %v4885_v40 = vpack.c.bf16 %v4828_v16, %v4827_v56 }
 0x702   :  { %v7137_v54 = vpop.eup %7136  ;;  %7146 = vrsqrt.f32 %v4153_v15  ;;  %v4154_v20 = vadd.f32 1e-05, %v4138_v2  ;;  %v4597_v24 = vmul.f32 0.0078125, %v4540_v17  ;;  %6559 = vmatprep.subr.bf16.mxu0 %v11518_v47  ;;  %v4831_v59 = vadd.f32 %v10342_v31, %v4783_v18  ;;  %v11911_v2 = vld [vmem:[#allocation147_spill] sm:$0xff] }
 0x703   :  { %v4184_v62 = vmul.f32 %v7137_v54, %v10088_v42  ;;  %v4542_v0 = vpop.xlane.xlu1 %4541  ;;  %v4199_v13 = vmul.f32 %v10385_v60, %v4183_v63  ;;  %v4832_v7 = vadd.f32 %v10342_v31, %v4784_v33 }
 0x704   :  { %7148 = vrsqrt.f32 %v4154_v20  ;;  %v4645_v4 = vadd.f32 1e-05, %v4597_v24  ;;  %v4598_v12 = vmul.f32 0.0078125, %v4542_v0  ;;  %v7139_v25 = vpop.eup %7138  ;;  %v11912_v24 = vld [vmem:[#allocation153_spill] sm:$0xff] }
 0x705   :  { %6552 = vmatmul.mubr.bf16.vlgmr.msra.gmra.mrb[160].mxu1 %v4866_v6  ;;  %v4548_v19 = vpop.xlane.xlu0 %4547  ;;  %v4200_v42 = vmul.f32 %v10385_v60, %v4184_v62  ;;  %v4215_v21 = vadd.f32 %v10400_v26, %v4199_v13  ;;  %v4737_v23 = vmul.f32 %v7139_v25, %v11908_v52  ;;  %v4887_v14 = vpack.c.bf16 %v4832_v7, %v4831_v59  ;;  %v11913_v25 = vld [vmem:[#allocation155_spill] sm:$0xff] }
 0x706   :  { %v7141_v35 = vpop.eup %7140  ;;  %7150 = vrsqrt.f32 %v4645_v4  ;;  %v4646_v34 = vadd.f32 1e-05, %v4598_v12  ;;  %6566 = vmatpush3.bf16.xpose.msra.mxu1 %v4886_v5  ;;  %v4601_v22 = vmul.f32 0.0078125, %v4548_v19  ;;  %6571 = vmatprep.mubr.msk.bf16.mxu1 %vm7441_vm0, %v11518_v47 }
 0x707   :  { %v4738_v32 = vmul.f32 %v7141_v35, %v11907_v57  ;;  %v4550_v46 = vpop.xlane.xlu1 %4549  ;;  %6567 = vmatprep.subr.bf16.mxu1 %v11518_v47  ;;  %v4216_v38 = vadd.f32 %v10400_v26, %v4200_v42  ;;  %v4855_v15 = vmul.f32 0.088388346, %v4215_v21  ;;  %v4785_v17 = vmul.f32 %v10335_v53, %v4737_v23  ;;  %v11915_v23 = vld [vmem:[#allocation39_spill] sm:$0xff] }
 0x708   :  { %v7143_v28 = vpop.eup %7142  ;;  %7152 = vrsqrt.f32 %v4646_v34  ;;  %v4649_v48 = vadd.f32 1e-05, %v4601_v22  ;;  %v4602_v30 = vmul.f32 0.0078125, %v4550_v46 }
 0x709   :  { %v4739_v9 = vmul.f32 %v7143_v28, %v11909_v1  ;;  %6560 = vmatpush3.bf16.xpose.msra.mxu0 %v4885_v40  ;;  %v4544_v50 = vpop.xlane.xlu0 %4543  ;;  %v4856_v49 = vmul.f32 0.088388346, %v4216_v38  ;;  %v4786_v51 = vmul.f32 %v10335_v53, %v4738_v32  ;;  %v4833_v42 = vadd.f32 %v10342_v31, %v4785_v17  ;;  %v11914_v32 = vld [vmem:[#allocation30_spill] sm:$0xff] }
 0x70a   :  { %v7145_v41 = vpop.eup %7144  ;;  %7154 = vrsqrt.f32 %v4649_v48  ;;  %v4650_v44 = vadd.f32 1e-05, %v4602_v30  ;;  %v4599_v10 = vmul.f32 0.0078125, %v4544_v50  ;;  %6575 = vmatprep.subr.bf16.mxu0 %v11518_v47 }
 0x70b   :  { %v4740_v36 = vmul.f32 %v7145_v41, %v11910_v55  ;;  %v4546_v37 = vpop.xlane.xlu1 %4545  ;;  %v4787_v43 = vmul.f32 %v10335_v53, %v4739_v9  ;;  %v4867_v20 = vpack.c.bf16 %v4856_v49, %v4855_v15  ;;  %v4834_v16 = vadd.f32 %v10342_v31, %v4786_v51  ;;  %v11916_v49 = vld [vmem:[#allocation41_spill] sm:$0xff] }
 0x70c   :  { %v7147_v3 = vpop.eup %7146  ;;  %7156 = vrsqrt.f32 %v4650_v44  ;;  %v4647_v11 = vadd.f32 1e-05, %v4599_v10  ;;  %v4600_v29 = vmul.f32 0.0078125, %v4546_v37 }
 0x70d   :  { %v4185_v39 = vmul.f32 %v7147_v3, %v11911_v2  ;;  %v4552_v45 = vpop.xlane.xlu0 %4551  ;;  %v4788_v63 = vmul.f32 %v10335_v53, %v4740_v36  ;;  %v4835_v0 = vadd.f32 %v10342_v31, %v4787_v43  ;;  %v4888_v7 = vpack.c.bf16 %v4834_v16, %v4833_v42  ;;  %v11917_v2 = vld [vmem:[#allocation43_spill] sm:$0xff] }
 0x70e   :  { %v7149_v61 = vpop.eup %7148  ;;  %7158 = vrsqrt.f32 %v4647_v11  ;;  %v4648_v27 = vadd.f32 1e-05, %v4600_v29  ;;  %6568 = vmatpush3.bf16.xpose.msra.mxu1 %v4887_v14  ;;  %v4603_v54 = vmul.f32 0.0078125, %v4552_v45 }
 0x70f   :  { %v4186_v6 = vmul.f32 %v7149_v61, %v11912_v24  ;;  %v4554_v62 = vpop.xlane.xlu1 %4553  ;;  %v4836_v5 = vadd.f32 %v10342_v31, %v4788_v63  ;;  %6569 = vmatprep.subr.bf16.mxu1 %v11518_v47  ;;  %v4201_v13 = vmul.f32 %v10385_v60, %v4185_v39 }
 0x710   :  { %v7151_v33 = vpop.eup %7150  ;;  %7160 = vrsqrt.f32 %v4648_v27  ;;  %v4651_v4 = vadd.f32 1e-05, %v4603_v54  ;;  %v4604_v12 = vmul.f32 0.0078125, %v4554_v62  ;;  %6562 = vmatmul.mubr.bf16.vlgmr.msra.gmra.mrb[140].mxu0 %v4867_v20  ;;  %v11918_v62 = vld [vmem:[#allocation44_spill] sm:$0xff] }
 0x711   :  { %v4741_v19 = vmul.f32 %v7151_v33, %v11913_v25  ;;  %v4120_v56 = vpop.xlane.xlu0 %4119  ;;  %v4889_v18 = vpack.c.bf16 %v4836_v5, %v4835_v0  ;;  %v4202_v35 = vmul.f32 %v10385_v60, %v4186_v6  ;;  %6581 = vmatprep.mubr.msk.bf16.mxu0 %vm7441_vm0, %v11518_v47  ;;  %v4217_v52 = vadd.f32 %v10400_v26, %v4201_v13 }
 0x712   :  { %v7153_v34 = vpop.eup %7152  ;;  %7162 = vrsqrt.f32 %v4651_v4  ;;  %v4652_v22 = vadd.f32 1e-05, %v4604_v12  ;;  %v4139_v57 = vmul.f32 0.0078125, %v4120_v56  ;;  %v11919_v56 = vld [vmem:[#allocation38_spill] sm:$0xff] }
 0x713   :  { %v4742_v46 = vmul.f32 %v7153_v34, %v11914_v32  ;;  %v4122_v40 = vpop.xlane.xlu1 %4121  ;;  %6576 = vmatpush3.bf16.xpose.msra.mxu0 %v4889_v18  ;;  %v4789_v38 = vmul.f32 %v10335_v53, %v4741_v19  ;;  %v4218_v28 = vadd.f32 %v10400_v26, %v4202_v35  ;;  %v4857_v15 = vmul.f32 0.088388346, %v4217_v52  ;;  %v7287_v32 = vld [vmem:[%s11058_s12] ss:$0 sm:$0xff]  ;;  %s7442_s12 = smov [#allocation14]  }
 0x714   :  { %v7155_v48 = vpop.eup %7154  ;;  %7164 = vrsqrt.f32 %v4652_v22  ;;  %v4155_v30 = vadd.f32 1e-05, %v4139_v57  ;;  %v4140_v21 = vmul.f32 0.0078125, %v4122_v40  ;;  %6577 = vmatprep.subr.bf16.mxu0 %v11518_v47  ;;  %s6061_s5 = sshll.u32 %s7442_s12, 4  ;;  %s6062_s5 = int_to_ptr.vmem [resolvable:$true] %s6061_s5 }
 0x715   :  { %v4745_v1 = vmul.f32 %v7155_v48, %v11915_v23  ;;  %v4556_v9 = vpop.xlane.xlu0 %4555  ;;  %v4790_v50 = vmul.f32 %v10335_v53, %v4742_v46  ;;  %v4858_v10 = vmul.f32 0.088388346, %v4218_v28  ;;  %v4837_v37 = vadd.f32 %v10342_v31, %v4789_v38  ;;  %v11921_v28 = vld [vmem:[#allocation129_spill] sm:$0xff]  ;;  %s7398_s17 = scalar_lea.vmem %s6062_s5, 2048  ;;  %p7403_p13 = scmp.lt.s32.totalorder %s6062_s5, %s6062_s5 }
 0x716   :  { %v7157_v59 = vpop.eup %7156  ;;  %7166 = vrsqrt.f32 %v4155_v30  ;;  %v4156_v41 = vadd.f32 1e-05, %v4140_v21  ;;  %6570 = vmatpush3.bf16.xpose.msra.mxu1 %v4888_v7  ;;  %v4605_v44 = vmul.f32 0.0078125, %v4556_v9  ;;  %v11922_v23 = vld [vmem:[#allocation125_spill] sm:$0xff]  ;;  %p7399_p12 = scmp.ne.s32.totalorder %s6062_s5, %s7398_s17  ;;  %p7404_p0 = scmp.lt.s32.totalorder %s7398_s17, %s7398_s17 }
 0x717   :  { %v4746_v55 = vmul.f32 %v7157_v59, %v11916_v49  ;;  %v4558_v36 = vpop.xlane.xlu1 %4557  ;;  %v4838_v14 = vadd.f32 %v10342_v31, %v4790_v50  ;;  %6585 = vmatprep.subr.bf16.mxu1 %v11518_v47  ;;  %v4793_v43 = vmul.f32 %v10335_v53, %v4745_v1  ;;  %v4868_v6 = vpack.c.bf16 %v4858_v10, %v4857_v15  ;;  %v11925_v15 = vld [vmem:[#allocation145_spill] sm:$0xff] }
 0x718   :  { %v7159_v51 = vpop.eup %7158  ;;  %7168 = vrsqrt.f32 %v4156_v41  ;;  %v4653_v3 = vadd.f32 1e-05, %v4605_v44  ;;  %v4606_v11 = vmul.f32 0.0078125, %v4558_v36  ;;  %v10571_v29 = vpop.f32.mrb[140].mxu1  ;;  %v11923_v44 = vld [vmem:[#allocation133_spill] sm:$0xff]  ;;  %p7405_p1 = por %p7404_p0, %p7403_p13 }
 0x719   :  { %v4743_v39 = vmul.f32 %v7159_v51, %v11917_v2  ;;  %v6453_v45 = vpop.f32.mrb[141].mxu1  ;;  %v4124_v63 = vpop.xlane.xlu0 %4123  ;;  %v4890_v17 = vpack.c.bf16 %v4838_v14, %v4837_v37  ;;  %v4794_v61 = vmul.f32 %v10335_v53, %v4746_v55  ;;  %v4841_v33 = vadd.f32 %v10342_v31, %v4793_v43  ;;  %v7286_v53 = vld [vmem:[%s11057_s11] ss:$0 sm:$0xff]  ;;  %v11924_v14 = vld [vmem:[#allocation46_spill] sm:$0xff] }
 0x71a   :  { %v7161_v27 = vpop.eup %7160  ;;  %7170 = vrsqrt.f32 %v4653_v3  ;;  %v4654_v54 = vadd.f32 1e-05, %v4606_v11  ;;  %v4141_v20 = vmul.f32 0.0078125, %v4124_v63  ;;  %v10575_v24 = vpop.f32.mrb[142].mxu1  ;;  %p7406_p2 = pnand %p7405_p1, %p7399_p12 }
 0x71b   :  { %v4744_v0 = vmul.f32 %v7161_v27, %v11918_v62  ;;  %v4126_v5 = vpop.xlane.xlu1 %4125  ;;  %v6454_v16 = vpop.f32.mrb[143].mxu1  ;;  %6578 = vmatpush3.bf16.xpose.msra.mxu0 %v4890_v17  ;;  %v4842_v4 = vadd.f32 %v10342_v31, %v4794_v61  ;;  %v4791_v12 = vmul.f32 %v7286_v53, %v4743_v39  ;;  %v11920_v31 = vld [vmem:[#allocation42_spill] sm:$0xff] }
 0x71c   :  { %v7163_v13 = vpop.eup %7162  ;;  %7172 = vrsqrt.f32 %v4654_v54  ;;  %v4157_v25 = vadd.f32 1e-05, %v4141_v20  ;;  %v4142_v19 = vmul.f32 0.0078125, %v4126_v5  ;;  %6579 = vmatprep.subr.bf16.mxu0 %v11518_v47  ;;  %v11926_v27 = vld [vmem:[#allocation142_spill] sm:$0xff] }
 0x71d   :  { %v4747_v18 = vmul.f32 %v7163_v13, %v11919_v56  ;;  %6572 = vmatmul.mubr.bf16.vlgmr.msra.gmra.mrb[164].mxu1 %v4868_v6  ;;  %v4892_v42 = vpack.c.bf16 %v4842_v4, %v4841_v33  ;;  %v4792_v35 = vmul.f32 %v7286_v53, %v4744_v0  ;;  %v4839_v46 = vadd.f32 %v7287_v32, %v4791_v12  ;;  %v11927_v33 = vld [vmem:[#allocation108_spill] sm:$0xff] }
 0x71e   :  { %v7165_v34 = vpop.eup %7164  ;;  %7174 = vrsqrt.f32 %v4157_v25  ;;  %v4158_v22 = vadd.f32 1e-05, %v4142_v19  ;;  %6591 = vmatprep.mubr.msk.bf16.mxu1 %vm7441_vm0, %v11518_v47  ;;  %v11928_v4 = vld [vmem:[#allocation104_spill] sm:$0xff] }
 0x71f   :  { %v4748_v57 = vmul.f32 %v7165_v34, %v11920_v31  ;;  %6586 = vmatpush3.bf16.xpose.msra.mxu1 %v4892_v42  ;;  %v4840_v40 = vadd.f32 %v7287_v32, %v4792_v35  ;;  %v4795_v7 = vmul.f32 %v7286_v53, %v4747_v18  ;;  %v11929_v12 = vpack.c.bf16 %v11927_v33, %v11928_v4  ;;  %v11930_v19 = vld [vmem:[#allocation116_spill] sm:$0xff]  ;;  %v11934_v35 = vld [vmem:[#allocation119_spill] sm:$0xff] }
 0x720   :  { %v7167_v38 = vpop.eup %7166  ;;  %7176 = vrsqrt.f32 %v4158_v22  ;;  %6587 = vmatprep.subr.bf16.mxu1 %v11518_v47  ;;  %v11933_v42 = vld [vmem:[#allocation124_spill] sm:$0xff] }
 0x721   :  { %v4187_v48 = vmul.f32 %v7167_v38, %v11921_v28  ;;  %v4891_v30 = vpack.c.bf16 %v4840_v40, %v4839_v46  ;;  %v4796_v21 = vmul.f32 %v7286_v53, %v4748_v57  ;;  %v4843_v9 = vadd.f32 %v7287_v32, %v4795_v7  ;;  %v11936_v22 = vld [vmem:[#allocation132_spill] sm:$0xff]  ;;  %v11942_v40 = vld [vmem:[#allocation146_spill] sm:$0xff] }
 0x722   :  { %v7169_v52 = vpop.eup %7168  ;;  %v11935_v34 = vpack.c.bf16 %v11933_v42, %v11934_v35  ;;  %v11937_v31 = vld [vmem:[#allocation128_spill] sm:$0xff] }
 0x723   :  { %v4188_v1 = vmul.f32 %v7169_v52, %v11922_v23  ;;  %6580 = vmatpush3.bf16.xpose.msra.mxu0 %v4891_v30  ;;  %v4844_v50 = vadd.f32 %v7287_v32, %v4796_v21  ;;  %v4203_v59 = vmul.f32 %v10385_v60, %v4187_v48  ;;  %v11938_v57 = vpack.c.bf16 %v11936_v22, %v11937_v31  ;;  %v11943_v7 = vld [vmem:[#allocation144_spill] sm:$0xff] }
 0x724   :  { %v7171_v41 = vpop.eup %7170  ;;  %6595 = vmatprep.subr.bf16.mxu0 %v11518_v47  ;;  %v11944_v38 = vpack.c.bf16 %v11942_v40, %v11943_v7 }
 0x725   :  { %v4749_v10 = vmul.f32 %v7171_v41, %v11923_v44  ;;  %v4893_v49 = vpack.c.bf16 %v4844_v50, %v4843_v9  ;;  %v4204_v55 = vmul.f32 %v10385_v60, %v4188_v1  ;;  %v4219_v36 = vadd.f32 %v10400_v26, %v4203_v59 }
 0x726   :  { %v7173_v37 = vpop.eup %7172 }
 0x727   :  { %v4750_v43 = vmul.f32 %v7173_v37, %v11924_v14  ;;  %6588 = vmatpush3.bf16.xpose.msra.mxu1 %v4893_v49  ;;  %v4220_v51 = vadd.f32 %v10400_v26, %v4204_v55  ;;  %v4797_v3 = vmul.f32 %v7286_v53, %v4749_v10  ;;  %v4859_v39 = vmul.f32 0.088388346, %v4219_v36 }
 0x728   :  { %v7175_v11 = vpop.eup %7174  ;;  %6589 = vmatprep.subr.bf16.mxu1 %v11518_v47 }
 0x729   :  { %v4189_v2 = vmul.f32 %v7175_v11, %v11925_v15  ;;  %v4860_v45 = vmul.f32 0.088388346, %v4220_v51  ;;  %v4798_v63 = vmul.f32 %v7286_v53, %v4750_v43  ;;  %v4845_v61 = vadd.f32 %v7287_v32, %v4797_v3 }
 0x72a   :  { %v7177_v17 = vpop.eup %7176 }
 0x72b   :  { %v4190_v54 = vmul.f32 %v7177_v17, %v11926_v27  ;;  %v4869_v20 = vpack.c.bf16 %v4860_v45, %v4859_v39  ;;  %v4846_v6 = vadd.f32 %v7287_v32, %v4798_v63  ;;  %v4205_v62 = vmul.f32 %v10385_v60, %v4189_v2  ;;  %v11940_v32 = vld [vmem:[#allocation136_spill] sm:$0xff] }
 0x72d   :  { %6582 = vmatmul.mubr.bf16.vlgmr.msra.gmra.mrb[144].mxu0 %v4869_v20  ;;  %v4894_v0 = vpack.c.bf16 %v4846_v6, %v4845_v61  ;;  %v4206_v5 = vmul.f32 %v10385_v60, %v4190_v54  ;;  %v4221_v16 = vadd.f32 %v10400_v26, %v4205_v62  ;;  %v11931_v60 = vld [vmem:[#allocation112_spill] sm:$0xff] }
 0x72e   :  { %6596 = vmatpush3.bf16.msra.mxu0 %v11929_v12  ;;  %6601 = vmatprep.mubr.msk.bf16.mxu0 %vm7441_vm0, %v11518_v47  ;;  %v11932_v56 = vpack.c.bf16 %v11930_v19, %v11931_v60 }
 0x72f   :  { %6590 = vmatpush3.bf16.xpose.msra.mxu1 %v4894_v0  ;;  %6597 = vmatprep.subr.bf16.mxu0 %v11518_v47  ;;  %v4222_v53 = vadd.f32 %v10400_v26, %v4206_v5  ;;  %v4861_v13 = vmul.f32 0.088388346, %v4221_v16  ;;  %v11939_v26 = vld [vmem:[#allocation140_spill] sm:$0xff] }
 0x730   :  { %6605 = vmatprep.subr.bf16.mxu1 %v11518_v47  ;;  %v11941_v46 = vpack.c.bf16 %v11939_v26, %v11940_v32 }
 0x731   :  { %v4862_v25 = vmul.f32 0.088388346, %v4222_v53 }
 0x732   :  { %6598 = vmatpush3.bf16.msra.mxu0 %v11932_v56 }
 0x733   :  { %6599 = vmatprep.subr.bf16.mxu0 %v11518_v47  ;;  %v4870_v18 = vpack.c.bf16 %v4862_v25, %v4861_v13 }
 0x736   :  { %6600 = vmatpush3.bf16.msra.mxu0 %v11935_v34  ;;  %6592 = vmatmul.mubr.bf16.vlgmr.msra.gmra.mrb[168].mxu1 %v4870_v18 }
 0x737   :  { %6606 = vmatpush3.bf16.msra.mxu1 %v11938_v57  ;;  %6615 = vmatprep.subr.bf16.mxu0 %v11518_v47 }
 0x738   :  { %6607 = vmatprep.subr.bf16.mxu1 %v11518_v47  ;;  %6611 = vmatprep.mubr.msk.bf16.mxu1 %vm7441_vm0, %v11518_v47 }
 0x73b   :  { %6608 = vmatpush3.bf16.msra.mxu1 %v11941_v46 }
 0x73c   :  { %6609 = vmatprep.subr.bf16.mxu1 %v11518_v47 }
 0x73f   :  { %6610 = vmatpush3.bf16.msra.mxu1 %v11944_v38 }
 0x740   :  { %6625 = vmatprep.subr.bf16.mxu1 %v11518_v47 }
 0x744   :  { %v10637_v28 = vpop.f32.mrb[120].mxu0 }
 0x745   :  { %v6463_v48 = vpop.f32.mrb[121].mxu0 }
 0x746   :  { %v10639_v30 = vpop.f32.mrb[122].mxu0 }
 0x747   :  { %v6464_v21 = vpop.f32.mrb[123].mxu0 }
 0x758   :  { %v10641_v52 = vpop.f32.mrb[144].mxu1 }
 0x759   :  { %v6473_v23 = vpop.f32.mrb[145].mxu1 }
 0x75a   :  { %v10643_v1 = vpop.f32.mrb[146].mxu1 }
 0x75b   :  { %v6474_v9 = vpop.f32.mrb[147].mxu1 }
 0x764   :  { %v10645_v50 = vpop.f32.mrb[124].mxu0 }
 0x765   :  { %v6483_v59 = vpop.f32.mrb[125].mxu0 }
 0x766   :  { %v10647_v41 = vpop.f32.mrb[126].mxu0 }
 0x767   :  { %v6484_v44 = vpop.f32.mrb[127].mxu0 }
 0x770   :  { %v10649_v10 = vpop.f32.mrb[148].mxu1 }
 0x771   :  { %v6493_v49 = vpop.f32.mrb[149].mxu1 }
 0x772   :  { %v10651_v55 = vpop.f32.mrb[150].mxu1 }
 0x773   :  { %v6494_v36 = vpop.f32.mrb[151].mxu1 }
 0x79b   :  { %v10653_v37 = vpop.f32.mrb[128].mxu0 }
 0x79c   :  { %v6503_v14 = vpop.f32.mrb[129].mxu0 }
 0x79d   :  { %v10655_v43 = vpop.f32.mrb[130].mxu0 }
 0x79e   :  { %v6504_v51 = vpop.f32.mrb[131].mxu0 }
 0x7a8   :  { %v10657_v3 = vpop.f32.mrb[152].mxu1 }
 0x7a9   :  { %v6513_v11 = vpop.f32.mrb[153].mxu1 }
 0x7aa   :  { %v10659_v15 = vpop.f32.mrb[154].mxu1 }
 0x7ab   :  { %v6514_v2 = vpop.f32.mrb[155].mxu1 }
 0x7b3   :  { %v10661_v39 = vpop.f32.mrb[132].mxu0 }
 0x7b4   :  { %v6523_v45 = vpop.f32.mrb[133].mxu0  ;;  %v5223_v63 = vsel %vm3334_vm1, %v10661_v39, -inf }
 0x7b5   :  { %5224 = vmax.xlane.f32.xlu0 %v5223_v63  ;;  %v10665_v17 = vpop.f32.mrb[134].mxu0 }
 0x7b6   :  { %v6524_v61 = vpop.f32.mrb[135].mxu0  ;;  %v5226_v27 = vsel %vm3334_vm1, %v10665_v17, -inf }
 0x7b7   :  { %5227 = vmax.xlane.f32.xlu1 %v5226_v27 }
 0x7c0   :  { %v10669_v54 = vpop.f32.mrb[156].mxu1 }
 0x7c1   :  { %v6533_v20 = vpop.f32.mrb[157].mxu1  ;;  %v5229_v6 = vsel %vm3334_vm1, %v10669_v54, -inf }
 0x7c2   :  { %5230 = vmax.xlane.f32.xlu0 %v5229_v6  ;;  %v10673_v62 = vpop.f32.mrb[158].mxu1 }
 0x7c3   :  { %v6534_v0 = vpop.f32.mrb[159].mxu1  ;;  %v5232_v5 = vsel %vm3334_vm1, %v10673_v62, -inf }
 0x7c4   :  { %5233 = vmax.xlane.f32.xlu1 %v5232_v5 }
 0x7cb   :  { %v10677_v16 = vpop.f32.mrb[136].mxu0 }
 0x7cc   :  { %v6543_v33 = vpop.f32.mrb[137].mxu0  ;;  %v5235_v4 = vsel %vm3334_vm1, %v10677_v16, -inf }
 0x7cd   :  { %5236 = vmax.xlane.f32.xlu0 %v5235_v4  ;;  %v10681_v12 = vpop.f32.mrb[138].mxu0 }
 0x7ce   :  { %v6544_v53 = vpop.f32.mrb[139].mxu0  ;;  %v5238_v13 = vsel %vm3334_vm1, %v10681_v12, -inf }
 0x7cf   :  { %5239 = vmax.xlane.f32.xlu1 %v5238_v13 }
 0x7d8   :  { %v10685_v25 = vpop.f32.mrb[160].mxu1 }
 0x7d9   :  { %v6553_v19 = vpop.f32.mrb[161].mxu1  ;;  %v5241_v60 = vsel %vm3334_vm1, %v10685_v25, -inf }
 0x7da   :  { %5242 = vmax.xlane.f32.xlu0 %v5241_v60  ;;  %v10689_v56 = vpop.f32.mrb[162].mxu1 }
 0x7db   :  { %v6554_v18 = vpop.f32.mrb[163].mxu1  ;;  %v5244_v42 = vsel %vm3334_vm1, %v10689_v56, -inf }
 0x7dc   :  { %5245 = vmax.xlane.f32.xlu1 %v5244_v42 }
 0x7e3   :  { %v10693_v35 = vpop.f32.mrb[140].mxu0 }
 0x7e4   :  { %v6563_v34 = vpop.f32.mrb[141].mxu0  ;;  %v5247_v22 = vsel %vm3334_vm1, %v10693_v35, -inf }
 0x7e5   :  { %5248 = vmax.xlane.f32.xlu0 %v5247_v22  ;;  %v10697_v31 = vpop.f32.mrb[142].mxu0  ;;  %v11945_v34 = vld [vmem:[#allocation204_spill] sm:$0xff]  ;;  %v11946_v22 = vld [vmem:[#allocation150_spill] sm:$0xff] }
 0x7e6   :  { %v6564_v57 = vpop.f32.mrb[143].mxu0  ;;  %v5250_v26 = vsel %vm3334_vm1, %v10697_v31, -inf }
 0x7e7   :  { %5251 = vmax.xlane.f32.xlu1 %v5250_v26  ;;  %v11947_v57 = vld [vmem:[#allocation148_spill] sm:$0xff] }
 0x7e8   :  { %v11948_v26 = vpack.c.bf16 %v11946_v22, %v11947_v57 }
 0x7f0   :  { %v10701_v32 = vpop.f32.mrb[164].mxu1 }
 0x7f1   :  { %v6573_v46 = vpop.f32.mrb[165].mxu1  ;;  %v5253_v40 = vsel %vm3334_vm1, %v10701_v32, -inf }
 0x7f2   :  { %5254 = vmax.xlane.f32.xlu0 %v5253_v40  ;;  %v10705_v7 = vpop.f32.mrb[166].mxu1 }
 0x7f3   :  { %v6574_v38 = vpop.f32.mrb[167].mxu1  ;;  %v5256_v48 = vsel %vm3334_vm1, %v10705_v7, -inf }
 0x7f4   :  { %5257 = vmax.xlane.f32.xlu1 %v5256_v48  ;;  %v11950_v38 = vld [vmem:[#allocation154_spill] sm:$0xff]  ;;  %v11951_v48 = vld [vmem:[#allocation152_spill] sm:$0xff] }
 0x800   :  { %v10709_v21 = vpop.f32.mrb[144].mxu0 }
 0x801   :  { %v6583_v23 = vpop.f32.mrb[145].mxu0  ;;  %v5259_v9 = vsel %vm3334_vm1, %v10709_v21, -inf }
 0x802   :  { %5260 = vmax.xlane.f32.xlu0 %v5259_v9  ;;  %v10713_v59 = vpop.f32.mrb[146].mxu0  ;;  %v11952_v23 = vpack.c.bf16 %v11950_v38, %v11951_v48 }
 0x803   :  { %v6584_v44 = vpop.f32.mrb[147].mxu0  ;;  %v5262_v49 = vsel %vm3334_vm1, %v10713_v59, -inf }
 0x804   :  { %5263 = vmax.xlane.f32.xlu1 %v5262_v49 }
 0x809   :  { %v10717_v36 = vpop.f32.mrb[168].mxu1 }
 0x80a   :  { %v6593_v14 = vpop.f32.mrb[169].mxu1  ;;  %v5265_v51 = vsel %vm3334_vm1, %v10717_v36, -inf }
 0x80b   :  { %5266 = vmax.xlane.f32.xlu0 %v5265_v51  ;;  %v10721_v11 = vpop.f32.mrb[170].mxu1 }
 0x80c   :  { %v6594_v2 = vpop.f32.mrb[171].mxu1  ;;  %v5268_v45 = vsel %vm3334_vm1, %v10721_v11, -inf }
 0x80d   :  { %5269 = vmax.xlane.f32.xlu1 %v5268_v45  ;;  %v11953_v45 = vld [vmem:[#allocation158_spill] sm:$0xff] }
 0x842   :  { %v5225_v63 = vpop.xlane.xlu0 %5224 }
 0x843   :  { %v5271_v61 = vsub.f32 %v10661_v39, %v5225_v63  ;;  %v11954_v63 = vld [vmem:[#allocation156_spill] sm:$0xff] }
 0x844   :  { %v5228_v27 = vpop.xlane.xlu1 %5227 }
 0x845   :  { %v5287_v20 = vmul.f32 1.442695, %v5271_v61  ;;  %v5272_v6 = vsub.f32 %v10665_v17, %v5228_v27  ;;  %v11955_v61 = vpack.c.bf16 %v11953_v45, %v11954_v63  ;;  %v11972_v45 = vld [vmem:[#allocation180_spill] sm:$0xff]  ;;  %v11973_v63 = vld [vmem:[#allocation178_spill] sm:$0xff] }
 0x847   :  { %7178 = vpow2.f32 %v5287_v20  ;;  %v5289_v0 = vmul.f32 1.442695, %v5272_v6 }
 0x849   :  { %7180 = vpow2.f32 %v5289_v0 }
 0x84f   :  { %v5231_v5 = vpop.xlane.xlu0 %5230 }
 0x850   :  { %v5273_v33 = vsub.f32 %v10669_v54, %v5231_v5  ;;  %v3431_v54 = vsel %vm3334_vm1, %v11945_v34, 0.0  ;;  %v11957_v5 = vld [vmem:[#allocation161_spill] sm:$0xff] }
 0x851   :  { %v7179_v4 = vpop.eup %7178  ;;  %v5234_v53 = vpop.xlane.xlu1 %5233 }
 0x852   :  { %v5291_v13 = vmul.f32 1.442695, %v5273_v33  ;;  %v5274_v19 = vsub.f32 %v10673_v62, %v5234_v53  ;;  %v5319_v60 = vsel %vm3334_vm1, %v7179_v4, 0.0  ;;  %v11949_v62 = vld [vmem:[#allocation205_spill] sm:$0xff] }
 0x853   :  { %v7181_v18 = vpop.eup %7180  ;;  %5320 = vadd.xlane.f32.xlu0 %v5319_v60  ;;  %v3434_v46 = vsel %vm3334_vm1, %v11949_v62, 0.0  ;;  %v11958_v33 = vld [vmem:[#allocation33_spill] sm:$0xff]  ;;  %v11961_v60 = vld [vmem:[#allocation166_spill] sm:$0xff] }
 0x854   :  { %7182 = vpow2.f32 %v5291_v13  ;;  %v5293_v39 = vmul.f32 1.442695, %v5274_v19  ;;  %v5322_v42 = vsel %vm3334_vm1, %v7181_v18, 0.0  ;;  %v5431_v17 = vpack.c.bf16 %v7181_v18, %v7179_v4  ;;  %v11960_v53 = vld [vmem:[#allocation109_spill] sm:$0xff]  ;;  %v11962_v18 = vld [vmem:[#allocation164_spill] sm:$0xff] }
 0x855   :  { %5323 = vadd.xlane.f32.xlu1 %v5322_v42  ;;  %v11959_v4 = vpack.c.bf16 %v11957_v5, %v11958_v33  ;;  %v3440_v13 = vsel %vm3334_vm1, %v11960_v53, 0.0  ;;  %v11975_v5 = vld [vmem:[#allocation184_spill] sm:$0xff]  ;;  %v11976_v33 = vld [vmem:[#allocation182_spill] sm:$0xff] }
 0x856   :  { %7184 = vpow2.f32 %v5293_v39  ;;  %6602 = vmatmul.mubr.msk.bf16.vlgmr.msra.gmra.mrb[148].mxu0 %vm3334_vm1, %v5431_v17  ;;  %v11963_v39 = vpack.c.bf16 %v11961_v60, %v11962_v18  ;;  %v11979_v18 = vld [vmem:[#allocation188_spill] sm:$0xff] }
 0x857   :  { %6616 = vmatpush3.bf16.msra.mxu0 %v11948_v26  ;;  %3432 = vadd.xlane.f32.xlu0 %v3431_v54 }
 0x858   :  { %6617 = vmatprep.subr.bf16.mxu0 %v11518_v47  ;;  %6621 = vmatprep.mubr.msk.bf16.mxu0 %vm7441_vm0, %v11518_v47 }
 0x859   :  { %3435 = vadd.xlane.f32.xlu1 %v3434_v46  ;;  %v11964_v46 = vld [vmem:[#allocation172_spill] sm:$0xff] }
 0x85a   :  { %v5237_v40 = vpop.xlane.xlu0 %5236 }
 0x85b   :  { %6618 = vmatpush3.bf16.msra.mxu0 %v11952_v23  ;;  %v5275_v9 = vsub.f32 %v10677_v16, %v5237_v40  ;;  %v11965_v40 = vld [vmem:[#allocation170_spill] sm:$0xff] }
 0x85c   :  { %v5240_v44 = vpop.xlane.xlu1 %5239  ;;  %6619 = vmatprep.subr.bf16.mxu0 %v11518_v47  ;;  %v11966_v38 = vpack.c.bf16 %v11964_v46, %v11965_v40 }
 0x85d   :  { %v5295_v49 = vmul.f32 1.442695, %v5275_v9  ;;  %v5276_v14 = vsub.f32 %v10681_v12, %v5240_v44  ;;  %v11956_v12 = vld [vmem:[#allocation113_spill] sm:$0xff]  ;;  %v11968_v9 = vld [vmem:[#allocation176_spill] sm:$0xff]  ;;  %v11969_v44 = vld [vmem:[#allocation174_spill] sm:$0xff] }
 0x85e   :  { %v7183_v51 = vpop.eup %7182  ;;  %v3437_v0 = vsel %vm3334_vm1, %v11956_v12, 0.0 }
 0x85f   :  { %7186 = vpow2.f32 %v5295_v49  ;;  %v5297_v2 = vmul.f32 1.442695, %v5276_v14  ;;  %6620 = vmatpush3.bf16.msra.mxu0 %v11955_v61  ;;  %v5325_v27 = vsel %vm3334_vm1, %v7183_v51, 0.0  ;;  %v11970_v49 = vpack.c.bf16 %v11968_v9, %v11969_v44  ;;  %v11971_v14 = vld [vmem:[#allocation157_spill] sm:$0xff]  ;;  %v11986_v9 = vld [vmem:[#allocation196_spill] sm:$0xff]  ;;  %v11987_v44 = vld [vmem:[#allocation194_spill] sm:$0xff] }
 0x860   :  { %v7185_v20 = vpop.eup %7184  ;;  %5326 = vadd.xlane.f32.xlu0 %v5325_v27  ;;  %6635 = vmatprep.subr.bf16.mxu0 %v11518_v47  ;;  %v11974_v61 = vpack.c.bf16 %v11972_v45, %v11973_v63  ;;  %v11991_v45 = vld [vmem:[#allocation198_spill] sm:$0xff] }
 0x861   :  { %7188 = vpow2.f32 %v5297_v2  ;;  %v5328_v16 = vsel %vm3334_vm1, %v7185_v20, 0.0  ;;  %v5432_v6 = vpack.c.bf16 %v7185_v20, %v7183_v51  ;;  %v3446_v51 = vsel %vm3334_vm1, %v11971_v14, 0.0 }
 0x862   :  { %5329 = vadd.xlane.f32.xlu1 %v5328_v16 }
 0x863   :  { %6612 = vmatmul.mubr.msk.bf16.vlgmr.msra.gmra.mrb[172].mxu1 %vm3334_vm1, %v5432_v6 }
 0x864   :  { %6626 = vmatpush3.bf16.msra.mxu1 %v11959_v4  ;;  %3438 = vadd.xlane.f32.xlu0 %v3437_v0  ;;  %v11977_v4 = vpack.c.bf16 %v11975_v5, %v11976_v33  ;;  %v11998_v5 = vld [vmem:[#allocation111_spill] sm:$0xff] }
 0x865   :  { %6627 = vmatprep.subr.bf16.mxu1 %v11518_v47  ;;  %6631 = vmatprep.mubr.msk.bf16.mxu1 %vm7441_vm0, %v11518_v47 }
 0x866   :  { %3441 = vadd.xlane.f32.xlu1 %v3440_v13 }
 0x867   :  { %v5243_v19 = vpop.xlane.xlu0 %5242 }
 0x868   :  { %6628 = vmatpush3.bf16.msra.mxu1 %v11963_v39  ;;  %v5277_v42 = vsub.f32 %v10685_v25, %v5243_v19  ;;  %v11980_v39 = vld [vmem:[#allocation186_spill] sm:$0xff] }
 0x869   :  { %v7187_v17 = vpop.eup %7186  ;;  %v5246_v34 = vpop.xlane.xlu1 %5245  ;;  %6629 = vmatprep.subr.bf16.mxu1 %v11518_v47 }
 0x86a   :  { %v5299_v54 = vmul.f32 1.442695, %v5277_v42  ;;  %v5278_v22 = vsub.f32 %v10689_v56, %v5246_v34  ;;  %v5331_v57 = vsel %vm3334_vm1, %v7187_v17, 0.0  ;;  %v11967_v56 = vld [vmem:[#allocation151_spill] sm:$0xff]  ;;  %v11981_v42 = vpack.c.bf16 %v11979_v18, %v11980_v39 }
 0x86b   :  { %v7189_v26 = vpop.eup %7188  ;;  %5332 = vadd.xlane.f32.xlu0 %v5331_v57  ;;  %v3443_v23 = vsel %vm3334_vm1, %v11967_v56, 0.0  ;;  %v11984_v57 = vld [vmem:[#allocation190_spill] sm:$0xff] }
 0x86c   :  { %7190 = vpow2.f32 %v5299_v54  ;;  %v5301_v62 = vmul.f32 1.442695, %v5278_v22  ;;  %6630 = vmatpush3.bf16.msra.mxu1 %v11966_v38  ;;  %v5334_v48 = vsel %vm3334_vm1, %v7189_v26, 0.0  ;;  %v5433_v25 = vpack.c.bf16 %v7189_v26, %v7187_v17  ;;  %v11982_v17 = vld [vmem:[#allocation137_spill] sm:$0xff]  ;;  %v11983_v22 = vld [vmem:[#allocation192_spill] sm:$0xff] }
 0x86d   :  { %5335 = vadd.xlane.f32.xlu1 %v5334_v48  ;;  %6645 = vmatprep.subr.bf16.mxu1 %v11518_v47  ;;  %v3452_v34 = vsel %vm3334_vm1, %v11982_v17, 0.0  ;;  %v11985_v26 = vpack.c.bf16 %v11983_v22, %v11984_v57  ;;  %v12000_v17 = vld [vmem:[#allocation19_spill] sm:$0xff]  ;;  %v12002_v57 = vld [vmem:[#allocation120_spill] sm:$0xff] }
 0x86e   :  { %7192 = vpow2.f32 %v5301_v62  ;;  %6622 = vmatmul.mubr.msk.bf16.vlgmr.msra.gmra.mrb[152].mxu0 %vm3334_vm1, %v5433_v25  ;;  %v12001_v22 = vld [vmem:[#allocation123_spill] sm:$0xff] }
 0x86f   :  { %6636 = vmatpush3.bf16.msra.mxu0 %v11970_v49  ;;  %3444 = vadd.xlane.f32.xlu0 %v3443_v23  ;;  %v11988_v49 = vpack.c.bf16 %v11986_v9, %v11987_v44  ;;  %v12008_v9 = vld [vmem:[#allocation139_spill] sm:$0xff] }
 0x870   :  { %6637 = vmatprep.subr.bf16.mxu0 %v11518_v47  ;;  %6641 = vmatprep.mubr.msk.bf16.mxu0 %vm7441_vm0, %v11518_v47  ;;  %v12009_v44 = vld [vmem:[#allocation135_spill] sm:$0xff] }
 0x871   :  { %3447 = vadd.xlane.f32.xlu1 %v3446_v51 }
 0x872   :  { %v5249_v2 = vpop.xlane.xlu0 %5248 }
 0x873   :  { %6638 = vmatpush3.bf16.msra.mxu0 %v11974_v61  ;;  %v5279_v27 = vsub.f32 %v10693_v35, %v5249_v2  ;;  %v11990_v2 = vld [vmem:[#allocation200_spill] sm:$0xff]  ;;  %v11993_v61 = vld [vmem:[#allocation54_spill] sm:$0xff] }
 0x874   :  { %v5252_v20 = vpop.xlane.xlu1 %5251  ;;  %6639 = vmatprep.subr.bf16.mxu0 %v11518_v47  ;;  %v11992_v63 = vpack.c.bf16 %v11990_v2, %v11991_v45  ;;  %v6779_v2 = vld [vmem:[#allocation13] sm:$0xff]   ;;  %v6780_v45 = vld [vmem:[#allocation13 + $0x48] sm:$0xff]  }
 0x875   :  { %v5303_v16 = vmul.f32 1.442695, %v5279_v27  ;;  %v5280_v6 = vsub.f32 %v10697_v31, %v5252_v20  ;;  %v11978_v31 = vld [vmem:[#allocation45_spill] sm:$0xff]  ;;  %v3458_v27 = vsel %vm3334_vm1, %v11993_v61, 0.0  ;;  %v11994_v20 = vld [vmem:[#allocation107_spill] sm:$0xff]  ;;  %v6781_v61 = vld [vmem:[#allocation13 + $0x8] sm:$0xff]  }
 0x876   :  { %v7191_v12 = vpop.eup %7190  ;;  %v3449_v60 = vsel %vm3334_vm1, %v11978_v31, 0.0 }
 0x877   :  { %7194 = vpow2.f32 %v5303_v16  ;;  %v5305_v0 = vmul.f32 1.442695, %v5280_v6  ;;  %6640 = vmatpush3.bf16.msra.mxu0 %v11977_v4  ;;  %v5337_v53 = vsel %vm3334_vm1, %v7191_v12, 0.0  ;;  %v11995_v16 = vld [vmem:[#allocation103_spill] sm:$0xff] }
 0x878   :  { %v7193_v13 = vpop.eup %7192  ;;  %5338 = vadd.xlane.f32.xlu0 %v5337_v53  ;;  %6655 = vmatprep.subr.bf16.mxu0 %v11518_v47  ;;  %v11996_v6 = vpack.c.bf16 %v11994_v20, %v11995_v16  ;;  %v6782_v16 = vld [vmem:[#allocation13 + $0x50] sm:$0xff]  }
 0x879   :  { %7196 = vpow2.f32 %v5305_v0  ;;  %v5340_v35 = vsel %vm3334_vm1, %v7193_v13, 0.0  ;;  %v5434_v19 = vpack.c.bf16 %v7193_v13, %v7191_v12  ;;  %v11997_v0 = vld [vmem:[#allocation115_spill] sm:$0xff] }
 0x87a   :  { %5341 = vadd.xlane.f32.xlu1 %v5340_v35  ;;  %v11999_v33 = vpack.c.bf16 %v11997_v0, %v11998_v5  ;;  %v6783_v0 = vld [vmem:[#allocation13 + $0x10] sm:$0xff]  }
 0x87b   :  { %6632 = vmatmul.mubr.msk.bf16.vlgmr.msra.gmra.mrb[176].mxu1 %vm3334_vm1, %v5434_v19  ;;  %v6778_v19 = vld [vmem:[#allocation13 + $0x40] sm:$0xff]  }
 0x87c   :  { %6646 = vmatpush3.bf16.msra.mxu1 %v11981_v42  ;;  %3450 = vadd.xlane.f32.xlu0 %v3449_v60 }
 0x87d   :  { %6647 = vmatprep.subr.bf16.mxu1 %v11518_v47  ;;  %6651 = vmatprep.mubr.msk.bf16.mxu1 %vm7441_vm0, %v11518_v47 }
 0x87e   :  { %3453 = vadd.xlane.f32.xlu1 %v3452_v34  ;;  %v3461_v34 = vsel %vm3334_vm1, %v12000_v17, 0.0  ;;  %v6789_v17 = vld [vmem:[#allocation13 + $0x28] sm:$0xff]  }
 0x87f   :  { %v5255_v54 = vpop.xlane.xlu0 %5254 }
 0x880   :  { %6648 = vmatpush3.bf16.msra.mxu1 %v11985_v26  ;;  %v5281_v62 = vsub.f32 %v10701_v32, %v5255_v54  ;;  %v12004_v26 = vld [vmem:[#allocation48_spill] sm:$0xff] }
 0x881   :  { %v7195_v46 = vpop.eup %7194  ;;  %v5258_v40 = vpop.xlane.xlu1 %5257  ;;  %6649 = vmatprep.subr.bf16.mxu1 %v11518_v47 }
 0x882   :  { %v5307_v38 = vmul.f32 1.442695, %v5281_v62  ;;  %v5282_v48 = vsub.f32 %v10705_v7, %v5258_v40  ;;  %v5343_v25 = vsel %vm3334_vm1, %v7195_v46, 0.0  ;;  %v11989_v7 = vld [vmem:[#allocation53_spill] sm:$0xff]  ;;  %v3464_v62 = vsel %vm3334_vm1, %v12004_v26, 0.0 }
 0x883   :  { %v7197_v56 = vpop.eup %7196  ;;  %5344 = vadd.xlane.f32.xlu0 %v5343_v25  ;;  %v3455_v51 = vsel %vm3334_vm1, %v11989_v7, 0.0 }
 0x884   :  { %7198 = vpow2.f32 %v5307_v38  ;;  %v5309_v23 = vmul.f32 1.442695, %v5282_v48  ;;  %6650 = vmatpush3.bf16.msra.mxu1 %v11988_v49  ;;  %v5346_v14 = vsel %vm3334_vm1, %v7197_v56, 0.0  ;;  %v5435_v32 = vpack.c.bf16 %v7197_v56, %v7195_v46  ;;  %v12006_v46 = vld [vmem:[#allocation127_spill] sm:$0xff] }
 0x885   :  { %5347 = vadd.xlane.f32.xlu1 %v5346_v14  ;;  %6665 = vmatprep.subr.bf16.mxu1 %v11518_v47  ;;  %v12010_v49 = vpack.c.bf16 %v12008_v9, %v12009_v44 }
 0x886   :  { %7200 = vpow2.f32 %v5309_v23  ;;  %6642 = vmatmul.mubr.msk.bf16.vlgmr.msra.gmra.mrb[156].mxu0 %vm3334_vm1, %v5435_v32 }
 0x887   :  { %6656 = vmatpush3.bf16.msra.mxu0 %v11992_v63  ;;  %3456 = vadd.xlane.f32.xlu0 %v3455_v51 }
 0x888   :  { %6657 = vmatprep.subr.bf16.mxu0 %v11518_v47  ;;  %6661 = vmatprep.mubr.msk.bf16.mxu0 %vm7441_vm0, %v11518_v47 }
 0x889   :  { %3459 = vadd.xlane.f32.xlu1 %v3458_v27  ;;  %v12012_v27 = vld [vmem:[#allocation58_spill] sm:$0xff] }
 0x88a   :  { %v3470_v20 = vsel %vm3334_vm1, %v12012_v27, 0.0 }
 0x88b   :  { %6658 = vmatpush3.bf16.msra.mxu0 %v11996_v6 }
 0x88c   :  { %6659 = vmatprep.subr.bf16.mxu0 %v11518_v47 }
 0x88e   :  { %v7199_v12 = vpop.eup %7198 }
 0x88f   :  { %6660 = vmatpush3.bf16.msra.mxu0 %v11999_v33  ;;  %v5349_v4 = vsel %vm3334_vm1, %v7199_v12, 0.0  ;;  %v5261_v53 = vpop.xlane.xlu0 %5260  ;;  %v6784_v33 = vld [vmem:[#allocation13 + $0x58] sm:$0xff]  }
 0x890   :  { %v7201_v13 = vpop.eup %7200  ;;  %5350 = vadd.xlane.f32.xlu0 %v5349_v4  ;;  %v5283_v35 = vsub.f32 %v10709_v21, %v5261_v53  ;;  %6291 = vmatprep.subr.bf16.mxu0 %v6778_v19  ;;  %v12003_v21 = vpack.c.bf16 %v12001_v22, %v12002_v57  ;;  %v6785_v19 = vld [vmem:[#allocation13 + $0x18] sm:$0xff]  }
 0x891   :  { %v5264_v31 = vpop.xlane.xlu1 %5263  ;;  %v5352_v60 = vsel %vm3334_vm1, %v7201_v13, 0.0  ;;  %v5436_v18 = vpack.c.bf16 %v7201_v13, %v7199_v12  ;;  %v12013_v13 = vld [vmem:[#allocation60_spill] sm:$0xff]  ;;  %v6792_v22 = vld [vmem:[#allocation13 + $0x78] sm:$0xff]  }
 0x892   :  { %v5311_v39 = vmul.f32 1.442695, %v5283_v35  ;;  %v5284_v42 = vsub.f32 %v10713_v59, %v5264_v31  ;;  %5353 = vadd.xlane.f32.xlu1 %v5352_v60  ;;  %v12005_v59 = vld [vmem:[#allocation131_spill] sm:$0xff]  ;;  %v3473_v35 = vsel %vm3334_vm1, %v12013_v13, 0.0  ;;  %v6793_v57 = vld [vmem:[#allocation13 + $0x38] sm:$0xff]  }
 0x893   :  { %6652 = vmatmul.mubr.msk.bf16.vlgmr.msra.gmra.mrb[180].mxu1 %vm3334_vm1, %v5436_v18  ;;  %v12007_v40 = vpack.c.bf16 %v12005_v59, %v12006_v46  ;;  %v6786_v31 = vld [vmem:[#allocation13 + $0x60] sm:$0xff]  }
 0x894   :  { %7202 = vpow2.f32 %v5311_v39  ;;  %v5313_v54 = vmul.f32 1.442695, %v5284_v42  ;;  %6666 = vmatpush3.bf16.msra.mxu1 %v12003_v21  ;;  %3462 = vadd.xlane.f32.xlu0 %v3461_v34  ;;  %v12014_v60 = vld [vmem:[#allocation159_spill] sm:$0xff]  ;;  %v6788_v42 = vld [vmem:[#allocation13 + $0x68] sm:$0xff]   ;;  %v6790_v34 = vld [vmem:[#allocation13 + $0x70] sm:$0xff]  }
 0x895   :  { %6667 = vmatprep.subr.bf16.mxu1 %v11518_v47  ;;  %6671 = vmatprep.mubr.msk.bf16.mxu1 %vm7441_vm0, %v11518_v47  ;;  %v3476_v18 = vsel %vm3334_vm1, %v12014_v60, 0.0  ;;  %v6787_v39 = vld [vmem:[#allocation13 + $0x20] sm:$0xff]  }
 0x896   :  { %7204 = vpow2.f32 %v5313_v54  ;;  %3465 = vadd.xlane.f32.xlu1 %v3464_v62  ;;  %v6791_v54 = vld [vmem:[#allocation13 + $0x30] sm:$0xff]  }
 0x898   :  { %6668 = vmatpush3.bf16.msra.mxu1 %v12007_v40  ;;  %v5267_v38 = vpop.xlane.xlu0 %5266 }
 0x899   :  { %v5285_v48 = vsub.f32 %v10717_v36, %v5267_v38  ;;  %6669 = vmatprep.subr.bf16.mxu1 %v11518_v47 }
 0x89a   :  { %v5270_v25 = vpop.xlane.xlu1 %5269 }
 0x89b   :  { %v5315_v56 = vmul.f32 1.442695, %v5285_v48  ;;  %v5286_v23 = vsub.f32 %v10721_v11, %v5270_v25  ;;  %v12011_v11 = vld [vmem:[#allocation51_spill] sm:$0xff] }
 0x89c   :  { %6670 = vmatpush3.bf16.msra.mxu1 %v12010_v49  ;;  %v3467_v63 = vsel %vm3334_vm1, %v12011_v11, 0.0 }
 0x89d   :  { %7206 = vpow2.f32 %v5315_v56  ;;  %v5317_v14 = vmul.f32 1.442695, %v5286_v23 }
 0x89e   :  { %v7203_v32 = vpop.eup %7202 }
 0x89f   :  { %7208 = vpow2.f32 %v5317_v14  ;;  %v5355_v7 = vsel %vm3334_vm1, %v7203_v32, 0.0 }
 0x8a0   :  { %v7205_v51 = vpop.eup %7204  ;;  %5356 = vadd.xlane.f32.xlu0 %v5355_v7 }
 0x8a1   :  { %v5358_v36 = vsel %vm3334_vm1, %v7205_v51, 0.0  ;;  %v5437_v47 = vpack.c.bf16 %v7205_v51, %v7203_v32 }
 0x8a2   :  { %5359 = vadd.xlane.f32.xlu1 %v5358_v36 }
 0x8a3   :  { %6662 = vmatmul.mubr.msk.bf16.vlgmr.msra.gmra.mrb[160].mxu0 %vm3334_vm1, %v5437_v47 }
 0x8a4   :  { %3468 = vadd.xlane.f32.xlu0 %v3467_v63  ;;  %6292 = vmatpush3.bf16.msra.mxu0 %v6779_v2 }
 0x8a5   :  { %6293 = vmatprep.subr.bf16.mxu0 %v6780_v45 }
 0x8a6   :  { %3471 = vadd.xlane.f32.xlu1 %v3470_v20 }
 0x8a7   :  { %v7207_v6 = vpop.eup %7206 }
 0x8a8   :  { %v5361_v12 = vsel %vm3334_vm1, %v7207_v6, 0.0  ;;  %6294 = vmatpush3.bf16.msra.mxu0 %v6781_v61 }
 0x8a9   :  { %v7209_v5 = vpop.eup %7208  ;;  %5362 = vadd.xlane.f32.xlu0 %v5361_v12  ;;  %6295 = vmatprep.subr.bf16.mxu0 %v6782_v16 }
 0x8aa   :  { %v5364_v4 = vsel %vm3334_vm1, %v7209_v5, 0.0  ;;  %v5438_v53 = vpack.c.bf16 %v7209_v5, %v7207_v6 }
 0x8ab   :  { %5365 = vadd.xlane.f32.xlu1 %v5364_v4 }
 0x8ac   :  { %6672 = vmatmul.mubr.msk.bf16.vlgmr.msra.gmra.mrb[184].mxu1 %vm3334_vm1, %v5438_v53  ;;  %6296 = vmatpush3.bf16.msra.mxu0 %v6783_v0 }
 0x8ad   :  { %3474 = vadd.xlane.f32.xlu0 %v3473_v35  ;;  %6297 = vmatprep.subr.bf16.mxu0 %v6784_v33 }
 0x8af   :  { %3477 = vadd.xlane.f32.xlu1 %v3476_v18 }
 0x8b0   :  { %6298 = vmatpush3.bf16.msra.mxu0 %v6785_v19 }
 0x8b1   :  { %6299 = vmatprep.subr.bf16.mxu0 %v6786_v31 }
 0x8b4   :  { %6300 = vmatpush3.bf16.msra.mxu0 %v6787_v39 }
 0x8b5   :  { %6301 = vmatprep.subr.bf16.mxu0 %v6788_v42 }
 0x8b8   :  { %6302 = vmatpush3.bf16.msra.mxu0 %v6789_v17 }
 0x8b9   :  { %6303 = vmatprep.subr.bf16.mxu0 %v6790_v34 }
 0x8bc   :  { %6304 = vmatpush3.bf16.msra.mxu0 %v6791_v54 }
 0x8bd   :  { %6305 = vmatprep.subr.bf16.mxu0 %v6792_v22 }
 0x8c0   :  { %6306 = vmatpush3.bf16.msra.mxu0 %v6793_v57 }
 0x8e0   :  { %v10879_v21 = vpop.xlane.xlu0 %5320 }
 0x8e2   :  { %v10881_v26 = vpop.xlane.xlu1 %5323 }
 0x8e4   :  { %v3433_v62 = vpop.xlane.xlu0 %3432 }
 0x8e5   :  { %7210 = vrcp.f32 %v3433_v62 }
 0x8e6   :  { %v3436_v59 = vpop.xlane.xlu1 %3435 }
 0x8e7   :  { %7212 = vrcp.f32 %v3436_v59 }
 0x8ed   :  { %v10883_v46 = vpop.xlane.xlu0 %5326 }
 0x8ef   :  { %v7211_v40 = vpop.eup %7210  ;;  %v10885_v38 = vpop.xlane.xlu1 %5329 }
 0x8f0   :  { %v3495_v48 = vmul.f32 %v7211_v40, %v3433_v62 }
 0x8f1   :  { %v7213_v25 = vpop.eup %7212  ;;  %v3439_v56 = vpop.xlane.xlu0 %3438 }
 0x8f2   :  { %v3511_v23 = vsub.f32 2.0, %v3495_v48  ;;  %v3496_v9 = vmul.f32 %v7213_v25, %v3436_v59  ;;  %7214 = vrcp.f32 %v3439_v56 }
 0x8f3   :  { %v3442_v44 = vpop.xlane.xlu1 %3441 }
 0x8f4   :  { %v3527_v49 = vmul.f32 %v7211_v40, %v3511_v23  ;;  %v3512_v14 = vsub.f32 2.0, %v3496_v9  ;;  %7216 = vrcp.f32 %v3442_v44 }
 0x8f6   :  { %v3528_v32 = vmul.f32 %v7213_v25, %v3512_v14  ;;  %v10888_v7 = vmul.f32 %v10489_v58, %v3527_v49 }
 0x8f8   :  { %v10891_v51 = vmul.f32 %v10494_v8, %v3528_v32  ;;  %v10893_v2 = vpop.xlane.xlu0 %5332 }
 0x8fa   :  { %v10895_v36 = vpop.xlane.xlu1 %5335  ;;  %v3919_v47 = vpack.c.bf16 %v10891_v51, %v10888_v7 }
 0x8fc   :  { %v7215_v45 = vpop.eup %7214  ;;  %v3445_v11 = vpop.xlane.xlu0 %3444 }
 0x8fd   :  { %v3497_v63 = vmul.f32 %v7215_v45, %v3439_v56  ;;  %7218 = vrcp.f32 %v3445_v11 }
 0x8fe   :  { %v7217_v61 = vpop.eup %7216  ;;  %v3448_v27 = vpop.xlane.xlu1 %3447 }
 0x8ff   :  { %v3513_v20 = vsub.f32 2.0, %v3497_v63  ;;  %v3498_v16 = vmul.f32 %v7217_v61, %v3442_v44  ;;  %7220 = vrcp.f32 %v3448_v27 }
 0x901   :  { %v3529_v58 = vmul.f32 %v7215_v45, %v3513_v20  ;;  %v3514_v6 = vsub.f32 2.0, %v3498_v16 }
 0x903   :  { %v3530_v8 = vmul.f32 %v7217_v61, %v3514_v6  ;;  %v10902_v0 = vmul.f32 %v10571_v29, %v3529_v58 }
 0x905   :  { %v10899_v12 = vpop.xlane.xlu0 %5338  ;;  %v10905_v5 = vmul.f32 %v10575_v24, %v3530_v8 }
 0x907   :  { %v7219_v33 = vpop.eup %7218  ;;  %v10907_v4 = vpop.xlane.xlu1 %5341  ;;  %v3920_v53 = vpack.c.bf16 %v10905_v5, %v10902_v0 }
 0x908   :  { %v3499_v13 = vmul.f32 %v7219_v33, %v3445_v11 }
 0x909   :  { %v7221_v35 = vpop.eup %7220  ;;  %v3451_v19 = vpop.xlane.xlu0 %3450 }
 0x90a   :  { %v3515_v31 = vsub.f32 2.0, %v3499_v13  ;;  %v3500_v60 = vmul.f32 %v7221_v35, %v3448_v27  ;;  %7222 = vrcp.f32 %v3451_v19 }
 0x90b   :  { %v3454_v18 = vpop.xlane.xlu1 %3453 }
 0x90c   :  { %v3531_v39 = vmul.f32 %v7219_v33, %v3515_v31  ;;  %v3516_v42 = vsub.f32 2.0, %v3500_v60  ;;  %7224 = vrcp.f32 %v3454_v18 }
 0x90d   :  { %7226 = vrcp.f32 %v10879_v21 }
 0x90e   :  { %v3532_v29 = vmul.f32 %v7221_v35, %v3516_v42  ;;  %v10914_v24 = vmul.f32 %v10637_v28, %v3531_v39  ;;  %7228 = vrcp.f32 %v10881_v26 }
 0x910   :  { %v10911_v17 = vpop.xlane.xlu0 %5344  ;;  %v10917_v34 = vmul.f32 %v10639_v30, %v3532_v29 }
 0x912   :  { %v10919_v54 = vpop.xlane.xlu1 %5347  ;;  %v3921_v22 = vpack.c.bf16 %v10917_v34, %v10914_v24 }
 0x914   :  { %v7223_v57 = vpop.eup %7222  ;;  %v3457_v62 = vpop.xlane.xlu0 %3456 }
 0x915   :  { %v3501_v59 = vmul.f32 %v7223_v57, %v3451_v19  ;;  %7230 = vrcp.f32 %v3457_v62 }
 0x916   :  { %v7225_v40 = vpop.eup %7224  ;;  %v3460_v48 = vpop.xlane.xlu1 %3459 }
 0x917   :  { %v3517_v28 = vsub.f32 2.0, %v3501_v59  ;;  %v3502_v25 = vmul.f32 %v7225_v40, %v3454_v18  ;;  %7232 = vrcp.f32 %v3460_v48  ;;  %v7227_v9 = vpop.eup %7226 }
 0x918   :  { %v7229_v32 = vpop.eup %7228  ;;  %7234 = vrcp.f32 %v10883_v46  ;;  %v5383_v20 = vmul.f32 %v7227_v9, %v10879_v21 }
 0x919   :  { %v3533_v30 = vmul.f32 %v7223_v57, %v3517_v28  ;;  %v3518_v56 = vsub.f32 2.0, %v3502_v25  ;;  %7236 = vrcp.f32 %v10885_v38  ;;  %v5384_v16 = vmul.f32 %v7229_v32, %v10881_v26 }
 0x91a   :  { %v5399_v13 = vsub.f32 2.0, %v5383_v20 }
 0x91b   :  { %v3534_v23 = vmul.f32 %v7225_v40, %v3518_v56  ;;  %v10928_v49 = vmul.f32 %v10641_v52, %v3533_v30  ;;  %v5400_v35 = vsub.f32 2.0, %v5384_v16 }
 0x91c   :  { %v5415_v39 = vmul.f32 %v7227_v9, %v5399_v13 }
 0x91d   :  { %v10925_v44 = vpop.xlane.xlu0 %5350  ;;  %v10931_v14 = vmul.f32 %v10643_v1, %v3534_v23  ;;  %v5416_v42 = vmul.f32 %v7229_v32, %v5400_v35 }
 0x91f   :  { %v7231_v45 = vpop.eup %7230  ;;  %v10933_v11 = vpop.xlane.xlu1 %5353  ;;  %v3922_v63 = vpack.c.bf16 %v10931_v14, %v10928_v49 }
 0x920   :  { %v3503_v61 = vmul.f32 %v7231_v45, %v3457_v62 }
 0x921   :  { %v7233_v27 = vpop.eup %7232  ;;  %v3463_v52 = vpop.xlane.xlu0 %3462 }
 0x922   :  { %v3519_v1 = vsub.f32 2.0, %v3503_v61  ;;  %v3504_v58 = vmul.f32 %v7233_v27, %v3460_v48  ;;  %7238 = vrcp.f32 %v3463_v52  ;;  %v7235_v18 = vpop.eup %7234 }
 0x923   :  { %v3466_v6 = vpop.xlane.xlu1 %3465  ;;  %v7237_v57 = vpop.eup %7236  ;;  %v5385_v56 = vmul.f32 %v7235_v18, %v10883_v46 }
 0x924   :  { %v3535_v8 = vmul.f32 %v7231_v45, %v3519_v1  ;;  %v3520_v33 = vsub.f32 2.0, %v3504_v58  ;;  %7240 = vrcp.f32 %v3466_v6  ;;  %v5386_v23 = vmul.f32 %v7237_v57, %v10885_v38 }
 0x925   :  { %7242 = vrcp.f32 %v10893_v2 }
 0x926   :  { %v3536_v19 = vmul.f32 %v7233_v27, %v3520_v33  ;;  %v10942_v31 = vmul.f32 %v10645_v50, %v3535_v8  ;;  %7244 = vrcp.f32 %v10895_v36  ;;  %v5402_v16 = vsub.f32 2.0, %v5386_v23 }
 0x928   :  { %v10945_v21 = vmul.f32 %v10647_v41, %v3536_v19 }
 0x929   :  { %v5476_v60 = vpop.f32.mrb[148].mxu0 }
 0x92a   :  { %v6603_v26 = vpop.f32.mrb[149].mxu0  ;;  %v3923_v29 = vpack.c.bf16 %v10945_v21, %v10942_v31  ;;  %v5791_v40 = vmul.f32 %v5476_v60, %v5415_v39 }
 0x92b   :  { %v5479_v62 = vpop.f32.mrb[150].mxu0 }
 0x92c   :  { %v7239_v59 = vpop.eup %7238  ;;  %v5792_v48 = vmul.f32 %v5479_v62, %v5416_v42  ;;  %v6604_v50 = vpop.f32.mrb[151].mxu0 }
 0x92d   :  { %v3505_v41 = vmul.f32 %v7239_v59, %v3463_v52  ;;  %v10951_v28 = vpop.xlane.xlu0 %5356  ;;  %v5401_v52 = vsub.f32 2.0, %v5385_v56 }
 0x92e   :  { %v7241_v25 = vpop.eup %7240  ;;  %v5807_v30 = vpack.c.bf16 %v5792_v48, %v5791_v40 }
 0x92f   :  { %v3521_v9 = vsub.f32 2.0, %v3505_v41  ;;  %v3506_v32 = vmul.f32 %v7241_v25, %v3466_v6  ;;  %v10955_v45 = vpop.xlane.xlu1 %5359  ;;  %v7243_v6 = vpop.eup %7242  ;;  %v5417_v7 = vmul.f32 %v7235_v18, %v5401_v52 }
 0x930   :  { %5975 = vmatprep.mubr.bf16.mxu0 %v5807_v30  ;;  %v7245_v13 = vpop.eup %7244  ;;  %v5387_v26 = vmul.f32 %v7243_v6, %v10893_v2 }
 0x931   :  { %v3537_v61 = vmul.f32 %v7239_v59, %v3521_v9  ;;  %v3522_v27 = vsub.f32 2.0, %v3506_v32  ;;  %5976 = vmatmul.mubr.bf16.vlgmr.msra.gmra.mrb[164].mxu0 %v3919_v47  ;;  %v3469_v20 = vpop.xlane.xlu0 %3468  ;;  %v5418_v47 = vmul.f32 %v7237_v57, %v5402_v16  ;;  %v5388_v42 = vmul.f32 %v7245_v13, %v10895_v36 }
 0x932   :  { %7246 = vrcp.f32 %v3469_v20  ;;  %v5403_v50 = vsub.f32 2.0, %v5387_v26 }
 0x933   :  { %v3538_v1 = vmul.f32 %v7241_v25, %v3522_v27  ;;  %v3472_v58 = vpop.xlane.xlu1 %3471  ;;  %v10961_v46 = vmul.f32 %v10649_v10, %v3537_v61  ;;  %v5404_v41 = vsub.f32 2.0, %v5388_v42 }
 0x934   :  { %7248 = vrcp.f32 %v3472_v58  ;;  %v5419_v23 = vmul.f32 %v7243_v6, %v5403_v50 }
 0x935   :  { %v10964_v38 = vmul.f32 %v10651_v55, %v3538_v1  ;;  %7250 = vrcp.f32 %v10899_v12  ;;  %v5420_v32 = vmul.f32 %v7245_v13, %v5404_v41 }
 0x936   :  { %v5520_v8 = vpop.f32.mrb[172].mxu1  ;;  %v10966_v33 = vpop.xlane.xlu0 %5362  ;;  %7252 = vrcp.f32 %v10907_v4 }
 0x937   :  { %v6613_v51 = vpop.f32.mrb[173].mxu1  ;;  %v3924_v35 = vpack.c.bf16 %v10964_v38, %v10961_v46  ;;  %v5793_v10 = vmul.f32 %v5520_v8, %v5417_v7 }
 0x938   :  { %v5523_v19 = vpop.f32.mrb[174].mxu1  ;;  %v10970_v60 = vpop.xlane.xlu1 %5365 }
 0x939   :  { %v5794_v39 = vmul.f32 %v5523_v19, %v5418_v47  ;;  %v6614_v55 = vpop.f32.mrb[175].mxu1 }
 0x93a   :  { %v3475_v18 = vpop.xlane.xlu0 %3474 }
 0x93b   :  { %v5808_v62 = vpack.c.bf16 %v5794_v39, %v5793_v10  ;;  %7254 = vrcp.f32 %v3475_v18 }
 0x93c   :  { %v7247_v57 = vpop.eup %7246  ;;  %v3478_v59 = vpop.xlane.xlu1 %3477 }
 0x93d   :  { %v3507_v40 = vmul.f32 %v7247_v57, %v3469_v20  ;;  %7256 = vrcp.f32 %v3478_v59  ;;  %5983 = vmatprep.mubr.bf16.mxu0 %v5808_v62 }
 0x93e   :  { %v7249_v48 = vpop.eup %7248  ;;  %5984 = vmatmul.mubr.bf16.gmra.mrb[168].mxu0 %v3920_v53  ;;  %7258 = vrcp.f32 %v10911_v17 }
 0x93f   :  { %v3523_v2 = vsub.f32 2.0, %v3507_v40  ;;  %v3508_v25 = vmul.f32 %v7249_v48, %v3472_v58  ;;  %v7251_v61 = vpop.eup %7250  ;;  %7260 = vrcp.f32 %v10919_v54 }
 0x940   :  { %v7253_v52 = vpop.eup %7252  ;;  %v5389_v13 = vmul.f32 %v7251_v61, %v10899_v12  ;;  %7262 = vrcp.f32 %v10925_v44 }
 0x941   :  { %v3539_v36 = vmul.f32 %v7247_v57, %v3523_v2  ;;  %v3524_v30 = vsub.f32 2.0, %v3508_v25  ;;  %v5564_v56 = vpop.f32.mrb[152].mxu0  ;;  %v5390_v51 = vmul.f32 %v7253_v52, %v10907_v4  ;;  %7264 = vrcp.f32 %v10933_v11 }
 0x942   :  { %v6623_v9 = vpop.f32.mrb[153].mxu0  ;;  %v5795_v16 = vmul.f32 %v5564_v56, %v5419_v23  ;;  %v5405_v39 = vsub.f32 2.0, %v5389_v13  ;;  %7266 = vrcp.f32 %v10951_v28 }
 0x943   :  { %v3540_v27 = vmul.f32 %v7249_v48, %v3524_v30  ;;  %v5567_v20 = vpop.f32.mrb[154].mxu0  ;;  %v10982_v0 = vmul.f32 %v10653_v37, %v3539_v36  ;;  %v5406_v55 = vsub.f32 2.0, %v5390_v51  ;;  %7268 = vrcp.f32 %v10955_v45 }
 0x944   :  { %v5796_v1 = vmul.f32 %v5567_v20, %v5420_v32  ;;  %v6624_v8 = vpop.f32.mrb[155].mxu0  ;;  %v5421_v57 = vmul.f32 %v7251_v61, %v5405_v39  ;;  %7270 = vrcp.f32 %v10966_v33 }
 0x945   :  { %v7255_v7 = vpop.eup %7254  ;;  %v10985_v5 = vmul.f32 %v10655_v43, %v3540_v27  ;;  %v5422_v40 = vmul.f32 %v7253_v52, %v5406_v55  ;;  %7272 = vrcp.f32 %v10970_v60 }
 0x946   :  { %v3509_v53 = vmul.f32 %v7255_v7, %v3475_v18  ;;  %v5809_v58 = vpack.c.bf16 %v5796_v1, %v5795_v16 }
 0x947   :  { %v7257_v6 = vpop.eup %7256  ;;  %v3925_v47 = vpack.c.bf16 %v10985_v5, %v10982_v0 }
 0x948   :  { %v3525_v19 = vsub.f32 2.0, %v3509_v53  ;;  %v3510_v10 = vmul.f32 %v7257_v6, %v3478_v59  ;;  %5991 = vmatprep.mubr.bf16.mxu0 %v5809_v58  ;;  %v7259_v42 = vpop.eup %7258 }
 0x949   :  { %5992 = vmatmul.mubr.bf16.gmra.mrb[172].mxu0 %v3921_v22  ;;  %v7261_v62 = vpop.eup %7260 }
 0x94a   :  { %v3541_v37 = vmul.f32 %v7255_v7, %v3525_v19  ;;  %v3526_v43 = vsub.f32 2.0, %v3510_v10  ;;  %v5392_v41 = vmul.f32 %v7261_v62, %v10919_v54  ;;  %v7263_v9 = vpop.eup %7262 }
 0x94b   :  { %v7265_v61 = vpop.eup %7264  ;;  %v5393_v52 = vmul.f32 %v7263_v9, %v10925_v44 }
 0x94c   :  { %v3542_v26 = vmul.f32 %v7257_v6, %v3526_v43  ;;  %v10995_v12 = vmul.f32 %v10657_v3, %v3541_v37  ;;  %v5391_v3 = vmul.f32 %v7259_v42, %v10911_v17  ;;  %v5408_v25 = vsub.f32 2.0, %v5392_v41 }
 0x94d   :  { %v5394_v16 = vmul.f32 %v7265_v61, %v10933_v11  ;;  %v5409_v49 = vsub.f32 2.0, %v5393_v52  ;;  %v7267_v11 = vpop.eup %7266 }
 0x94e   :  { %v10998_v4 = vmul.f32 %v10659_v15, %v3542_v26  ;;  %v5608_v18 = vpop.f32.mrb[176].mxu1  ;;  %v5407_v2 = vsub.f32 2.0, %v5391_v3  ;;  %v5424_v23 = vmul.f32 %v7261_v62, %v5408_v25  ;;  %v7269_v31 = vpop.eup %7268  ;;  %v5395_v21 = vmul.f32 %v7267_v11, %v10951_v28 }
 0x94f   :  { %v6633_v59 = vpop.f32.mrb[177].mxu1  ;;  %v5797_v34 = vmul.f32 %v5608_v18, %v5421_v57  ;;  %v5410_v14 = vsub.f32 2.0, %v5394_v16  ;;  %v5425_v1 = vmul.f32 %v7263_v9, %v5409_v49  ;;  %v7271_v10 = vpop.eup %7270 }
 0x950   :  { %v5611_v48 = vpop.f32.mrb[178].mxu1  ;;  %v3926_v24 = vpack.c.bf16 %v10998_v4, %v10995_v12  ;;  %v5423_v30 = vmul.f32 %v7259_v42, %v5407_v2  ;;  %v5411_v51 = vsub.f32 2.0, %v5395_v21  ;;  %v7273_v37 = vpop.eup %7272  ;;  %v5397_v42 = vmul.f32 %v7271_v10, %v10966_v33 }
 0x951   :  { %v5798_v22 = vmul.f32 %v5611_v48, %v5422_v40  ;;  %v6634_v50 = vpop.f32.mrb[179].mxu1  ;;  %v5426_v7 = vmul.f32 %v7265_v61, %v5410_v14  ;;  %v5398_v18 = vmul.f32 %v7273_v37, %v10970_v60 }
 0x952   :  { %v5427_v39 = vmul.f32 %v7267_v11, %v5411_v51  ;;  %v5413_v28 = vsub.f32 2.0, %v5397_v42 }
 0x953   :  { %v5810_v15 = vpack.c.bf16 %v5798_v22, %v5797_v34  ;;  %v5414_v59 = vsub.f32 2.0, %v5398_v18 }
 0x954   :  { %v5429_v40 = vmul.f32 %v7271_v10, %v5413_v28 }
 0x955   :  { %5999 = vmatprep.mubr.bf16.mxu0 %v5810_v15  ;;  %v5430_v34 = vmul.f32 %v7273_v37, %v5414_v59 }
 0x956   :  { %6000 = vmatmul.mubr.bf16.gmra.mrb[176].mxu0 %v3922_v63 }
 0x959   :  { %v5652_v36 = vpop.f32.mrb[156].mxu0 }
 0x95a   :  { %v6643_v56 = vpop.f32.mrb[157].mxu0  ;;  %v5799_v17 = vmul.f32 %v5652_v36, %v5423_v30 }
 0x95b   :  { %v5655_v32 = vpop.f32.mrb[158].mxu0 }
 0x95c   :  { %v5800_v27 = vmul.f32 %v5655_v32, %v5424_v23  ;;  %v6644_v54 = vpop.f32.mrb[159].mxu0 }
 0x95e   :  { %v5811_v20 = vpack.c.bf16 %v5800_v27, %v5799_v17 }
 0x960   :  { %6007 = vmatprep.mubr.bf16.mxu0 %v5811_v20 }
 0x961   :  { %6008 = vmatmul.mubr.bf16.gmra.mrb[180].mxu0 %v3923_v29  ;;  %v5396_v29 = vmul.f32 %v7269_v31, %v10955_v45 }
 0x963   :  { %v5412_v19 = vsub.f32 2.0, %v5396_v29 }
 0x965   :  { %v5428_v26 = vmul.f32 %v7269_v31, %v5412_v19 }
 0x966   :  { %v5696_v63 = vpop.f32.mrb[180].mxu1 }
 0x967   :  { %v6653_v8 = vpop.f32.mrb[181].mxu1  ;;  %v5801_v58 = vmul.f32 %v5696_v63, %v5425_v1 }
 0x968   :  { %v5699_v53 = vpop.f32.mrb[182].mxu1 }
 0x969   :  { %v5802_v44 = vmul.f32 %v5699_v53, %v5426_v7  ;;  %v6654_v6 = vpop.f32.mrb[183].mxu1 }
 0x96b   :  { %v5812_v13 = vpack.c.bf16 %v5802_v44, %v5801_v58 }
 0x96d   :  { %6015 = vmatprep.mubr.bf16.mxu0 %v5812_v13 }
 0x96e   :  { %6016 = vmatmul.mubr.bf16.gmra.mrb[184].mxu0 %v3924_v35 }
 0x976   :  { %v5740_v43 = vpop.f32.mrb[160].mxu0 }
 0x977   :  { %v6663_v55 = vpop.f32.mrb[161].mxu0  ;;  %v5803_v57 = vmul.f32 %v5740_v43, %v5427_v39 }
 0x978   :  { %v5743_v62 = vpop.f32.mrb[162].mxu0 }
 0x979   :  { %v5804_v46 = vmul.f32 %v5743_v62, %v5428_v26  ;;  %v6664_v38 = vpop.f32.mrb[163].mxu0 }
 0x97b   :  { %v5813_v35 = vpack.c.bf16 %v5804_v46, %v5803_v57 }
 0x97d   :  { %6023 = vmatprep.mubr.bf16.mxu0 %v5813_v35 }
 0x97e   :  { %6024 = vmatmul.mubr.bf16.gmra.mrb[188].mxu0 %v3925_v47 }
 0x97f   :  { %v5784_v45 = vpop.f32.mrb[184].mxu1 }
 0x980   :  { %v6673_v48 = vpop.f32.mrb[185].mxu1  ;;  %v5805_v33 = vmul.f32 %v5784_v45, %v5429_v40 }
 0x981   :  { %v5787_v22 = vpop.f32.mrb[186].mxu1 }
 0x982   :  { %v5806_v50 = vmul.f32 %v5787_v22, %v5430_v34  ;;  %v6674_v60 = vpop.f32.mrb[187].mxu1 }
 0x984   :  { %v5814_v3 = vpack.c.bf16 %v5806_v50, %v5805_v33 }
 0x986   :  { %6031 = vmatprep.mubr.bf16.mxu0 %v5814_v3 }
 0x987   :  { %6032 = vmatmul.mubr.bf16.gmra.mrb[192].mxu0 %v3926_v24 }
 0xa04   :  { %v6307_v41 = vpop.f32.mrb[164].mxu0 }
 0xa05   :  { %v6308_v15 = vpop.f32.mrb[165].mxu0 }
 0xa06   :  { %v6309_v2 = vadd.f32 %v6308_v15, %v6307_v41  ;;  %v6310_v25 = vpop.f32.mrb[166].mxu0 }
 0xa07   :  { %v6311_v0 = vpop.f32.mrb[167].mxu0 }
 0xa08   :  { %6040 = vst [vmem:[#allocation14] sm:$0xff] %v6309_v2  ;;  %v6312_v5 = vadd.f32 %v6311_v0, %v6310_v25 }
 0xa0a   :  { %6041 = vst [vmem:[#allocation14 + $0x8] sm:$0xff] %v6312_v5 }
 0xa11   :  { %v6313_v47 = vpop.f32.mrb[168].mxu0 }
 0xa12   :  { %v6314_v36 = vpop.f32.mrb[169].mxu0 }
 0xa13   :  { %v6315_v30 = vadd.f32 %v6314_v36, %v6313_v47  ;;  %v6316_v56 = vpop.f32.mrb[170].mxu0 }
 0xa14   :  { %v6317_v23 = vpop.f32.mrb[171].mxu0 }
 0xa15   :  { %6042 = vst [vmem:[#allocation14 + $0x10] sm:$0xff] %v6315_v30  ;;  %v6318_v9 = vadd.f32 %v6317_v23, %v6316_v56 }
 0xa17   :  { %6043 = vst [vmem:[#allocation14 + $0x18] sm:$0xff] %v6318_v9 }
 0xa1c   :  { %v6319_v32 = vpop.f32.mrb[172].mxu0 }
 0xa1d   :  { %v6320_v61 = vpop.f32.mrb[173].mxu0 }
 0xa1e   :  { %v6321_v12 = vadd.f32 %v6320_v61, %v6319_v32  ;;  %v6322_v4 = vpop.f32.mrb[174].mxu0 }
 0xa1f   :  { %v6323_v24 = vpop.f32.mrb[175].mxu0 }
 0xa20   :  { %6044 = vst [vmem:[#allocation14 + $0x20] sm:$0xff] %v6321_v12  ;;  %v6324_v17 = vadd.f32 %v6323_v24, %v6322_v4 }
 0xa22   :  { %6045 = vst [vmem:[#allocation14 + $0x28] sm:$0xff] %v6324_v17 }
 0xa29   :  { %v6325_v27 = vpop.f32.mrb[176].mxu0 }
 0xa2a   :  { %v6326_v54 = vpop.f32.mrb[177].mxu0 }
 0xa2b   :  { %v6327_v20 = vadd.f32 %v6326_v54, %v6325_v27  ;;  %v6328_v52 = vpop.f32.mrb[178].mxu0 }
 0xa2c   :  { %v6329_v16 = vpop.f32.mrb[179].mxu0 }
 0xa2d   :  { %6046 = vst [vmem:[#allocation14 + $0x30] sm:$0xff] %v6327_v20  ;;  %v6330_v49 = vadd.f32 %v6329_v16, %v6328_v52 }
 0xa2f   :  { %6047 = vst [vmem:[#allocation14 + $0x38] sm:$0xff] %v6330_v49 }
 0xa34   :  { %v6331_v14 = vpop.f32.mrb[180].mxu0 }
 0xa35   :  { %v6332_v63 = vpop.f32.mrb[181].mxu0 }
 0xa36   :  { %v6333_v1 = vadd.f32 %v6332_v63, %v6331_v14  ;;  %v6334_v8 = vpop.f32.mrb[182].mxu0 }
 0xa37   :  { %v6335_v7 = vpop.f32.mrb[183].mxu0 }
 0xa38   :  { %6048 = vst [vmem:[#allocation14 + $0x40] sm:$0xff] %v6333_v1  ;;  %v6336_v53 = vadd.f32 %v6335_v7, %v6334_v8 }
 0xa3a   :  { %6049 = vst [vmem:[#allocation14 + $0x48] sm:$0xff] %v6336_v53 }
 0xa41   :  { %v6337_v58 = vpop.f32.mrb[184].mxu0 }
 0xa42   :  { %v6338_v44 = vpop.f32.mrb[185].mxu0 }
 0xa43   :  { %v6339_v6 = vadd.f32 %v6338_v44, %v6337_v58  ;;  %v6340_v11 = vpop.f32.mrb[186].mxu0 }
 0xa44   :  { %v6341_v13 = vpop.f32.mrb[187].mxu0 }
 0xa45   :  { %6050 = vst [vmem:[#allocation14 + $0x50] sm:$0xff] %v6339_v6  ;;  %v6342_v31 = vadd.f32 %v6341_v13, %v6340_v11 }
 0xa47   :  { %6051 = vst [vmem:[#allocation14 + $0x58] sm:$0xff] %v6342_v31 }
 0xa51   :  { %v6343_v21 = vpop.f32.mrb[188].mxu0 }
 0xa52   :  { %v6344_v29 = vpop.f32.mrb[189].mxu0 }
 0xa53   :  { %v6345_v51 = vadd.f32 %v6344_v29, %v6343_v21  ;;  %v6346_v19 = vpop.f32.mrb[190].mxu0 }
 0xa54   :  { %v6347_v10 = vpop.f32.mrb[191].mxu0 }
 0xa55   :  { %6052 = vst [vmem:[#allocation14 + $0x60] sm:$0xff] %v6345_v51  ;;  %v6348_v37 = vadd.f32 %v6347_v10, %v6346_v19 }
 0xa57   :  { %6053 = vst [vmem:[#allocation14 + $0x68] sm:$0xff] %v6348_v37 }
 0xa5a   :  { %v6349_v43 = vpop.f32.mrb[192].mxu0 }
 0xa5b   :  { %v6350_v39 = vpop.f32.mrb[193].mxu0 }
 0xa5c   :  { %v6351_v55 = vadd.f32 %v6350_v39, %v6349_v43  ;;  %v6352_v26 = vpop.f32.mrb[194].mxu0 }
 0xa5d   :  { %v6353_v42 = vpop.f32.mrb[195].mxu0 }
 0xa5e   :  { %6054 = vst [vmem:[#allocation14 + $0x70] sm:$0xff] %v6351_v55  ;;  %v6354_v18 = vadd.f32 %v6353_v42, %v6352_v26 }
 0xa60   :  { %6055 = vst [vmem:[#allocation14 + $0x78] sm:$0xff] %v6354_v18 }
 0xa61   :  { %7409 = shalt.err (!%p7406_p2)
}
 0xa62   :  { %s7410_s24 = scalar_lea.hbm %s11059_s13, 2048 }
 0xa63   :  { %p7411_p3 = scmp.ne.s32.totalorder %s11059_s13, %s7410_s24  ;;  %p7414_p4 = scmp.lt.u32.totalorder %s7410_s24, %s11059_s13 }
 0xa65   :  { %p7416_p5 = pnand %p7414_p4, %p7411_p3 }
 0xa67   :  { %7419 = shalt.err (!%p7416_p5)
}
 0xa68   :  { %6067 = dma.vmem_to_hbm [thread:$0]  %s6062_s5, 2048, %s11059_s13, [#allocation7], %s7430_s20, %s7430_s20, %s7431_s21  }
 0xa69   :  { %7426 = dma.done.wait [#allocation7], 2048  }
 0xa6a   :  { %7427 = vsyncadd [#allocation7], 4294965248 }
 0xa6b   :  { %6071 = vsyncpa [#allocation6], 1 }
 0xa6c   :  { %6072 = vsyncpa [#allocation9], 1 }
 0xa6d   :  { %6073 = vsyncpa [#allocation12], 1 }
 0xa6e   :  { %6074 = vsyncpa [#allocation7], 1 }

</bundles_post_ra>
